<compile_context>
chip_gen: v7x
topology: tpu7x:2x2x1
jax: 0.10.0
libtpu: 0.0.40
codegen_flags: <defaults>
</compile_context>

<pallas_src>
import functools

import jax
import jax.numpy as jnp
from jax.experimental import pallas as pl
from jax.experimental.pallas import tpu as pltpu

_HIGHEST = jax.lax.Precision.HIGHEST


# ----------------------------------------------------------------------------
# One AGUNet layer on lane-dense (C, M) column tiles (pure value-level helper,
# called three times inside the fused kernel).
# ----------------------------------------------------------------------------
def _agu_block(xs, wdu, wk, w1, *, height, C):
    # xs : list of `height` arrays, each (C, M) f32   (per-height branches)
    # wdu: (d, C)         conv_du weight
    # wk : (height*C, d)  all per-height attention conv weights, fused
    # w1 : (C, height*C)  conv_1 weight (height-major input channels)
    u = xs[0]
    for k in range(1, height):
        u = u + xs[k]                                    # feats_U

    z = jnp.dot(wdu, u, preferred_element_type=jnp.float32, precision=_HIGHEST)
    z = jnp.where(z >= 0.0, z, 0.2 * z)                  # LeakyReLU(0.2)

    a = jnp.dot(wk, z, preferred_element_type=jnp.float32, precision=_HIGHEST)
    logits = [a[k * C:(k + 1) * C, :] for k in range(height)]

    # softmax over the height axis (independent per (channel, column))
    m = logits[0]
    for k in range(1, height):
        m = jnp.maximum(m, logits[k])
    exps = [jnp.exp(l - m) for l in logits]
    s = exps[0]
    for k in range(1, height):
        s = s + exps[k]
    inv_s = 1.0 / s                                      # (C, M); exact divide
    # inv_s depends on the channel axis which conv_1 contracts over, so it
    # cannot be hoisted outside the matmul below.

    # conv_1 accumulated per branch: avoids materializing a (height*C, M)
    # concatenation in VMEM.
    acc = None
    for k in range(height):
        vk = xs[k] * (exps[k] * inv_s)                   # modulated branch
        pk = jnp.dot(w1[:, k * C:(k + 1) * C], vk,
                     preferred_element_type=jnp.float32, precision=_HIGHEST)
        acc = pk if acc is None else acc + pk
    return acc


# ----------------------------------------------------------------------------
# Fused kernel: all three AGUNet layers, activations resident in VMEM scratch.
# ----------------------------------------------------------------------------
def _agf_fused_kernel(x_ref,
                      wdu1_ref, wk1_ref, w11_ref,
                      wdu2_ref, wk2_ref, w12_ref,
                      wdu3_ref, wk3_ref, w13_ref,
                      o_ref,
                      out1_s, out2_s, *, height):
    C = o_ref.shape[0]
    M1 = x_ref.shape[-1]
    M2 = M1 // height
    M3 = M2 // height

    # ---- layer 1: height axis is the leading axis of the input block.
    xs1 = [x_ref[k] for k in range(height)]
    out1_s[...] = _agu_block(xs1, wdu1_ref[...], wk1_ref[...], w11_ref[...],
                             height=height, C=C)

    # ---- layer 2: PyTorch height re-split = contiguous lane slices, because
    # the layer-1 column ordering put the layer-2 height digit outermost.
    xs2 = [out1_s[:, k * M2:(k + 1) * M2] for k in range(height)]
    out2_s[...] = _agu_block(xs2, wdu2_ref[...], wk2_ref[...], w12_ref[...],
                             height=height, C=C)

    # ---- layer 3: same trick on the layer-2 output.
    xs3 = [out2_s[:, k * M3:(k + 1) * M3] for k in range(height)]
    o_ref[...] = _agu_block(xs3, wdu3_ref[...], wk3_ref[...], w13_ref[...],
                            height=height, C=C)


# ----------------------------------------------------------------------------
# Wrapper: one input re-layout, one pallas_call, one output re-layout.
# ----------------------------------------------------------------------------
def agf_net_pallas(x, kernel_params, *, height):
    # x: (b, f1, C, h, w)  PyTorch NCHW-style layout
    b, f1, C, h, w = x.shape
    P = h * w
    hh = height
    assert len(kernel_params) == 3, "AGFNet has exactly three AGUNet layers"
    assert f1 % (hh ** 3) == 0, "f1 must be divisible by height**3"
    n3 = f1 // hh ** 3
    M1 = (f1 // hh) * b * P
    M2 = M1 // hh
    M3 = M2 // hh
    # For free (128-aligned) in-kernel slices, M3 should be a multiple of 128
    # (true for the shapes below); unaligned static slices still lower.

    # One-time layout glue.  f1 digits are (n3, k3, k2, k1) outer->inner; put
    # the layer-1 height digit k1 in front and order columns (k2, k3, b, n3, p).
    xk = (x.reshape(b, n3, hh, hh, hh, C, P)
            .transpose(4, 5, 3, 2, 0, 1, 6)
            .reshape(hh, C, M1))

    flat_w = []
    for p in kernel_params:
        flat_w += [p["w_du"], p["w_k"], p["w_1"]]

    out3 = pl.pallas_call(
        functools.partial(_agf_fused_kernel, height=hh),
        out_shape=jax.ShapeDtypeStruct((C, M3), jnp.float32),
        in_specs=[pl.BlockSpec(memory_space=pltpu.MemorySpace.VMEM)]
        * (1 + len(flat_w)),
        out_specs=pl.BlockSpec(memory_space=pltpu.MemorySpace.VMEM),
        scratch_shapes=[
            pltpu.VMEM((C, M1), jnp.float32),   # layer-1 output, stays in VMEM
            pltpu.VMEM((C, M2), jnp.float32),   # layer-2 output, stays in VMEM
        ],
    )(xk, *flat_w)

    # out3 columns are ordered (b, n3, p) -> PyTorch (b, n3, C, h, w).
    return out3.reshape(C, b, n3, h, w).transpose(1, 2, 0, 3, 4)


# ----------------------------------------------------------------------------
# Pure-JAX reference mirroring the PyTorch forward exactly (for validation).
# ----------------------------------------------------------------------------
def agu_net_ref(x6, params, height):
    b, n, hh, C, H, W = x6.shape
    xf = x6.reshape(b * n, hh, C, H, W)
    U = xf.sum(axis=1)                                            # (BN, C, H, W)
    Z = jnp.einsum("dc,bchw->bdhw", params["w_du"], U, precision=_HIGHEST)
    Z = jnp.where(Z >= 0.0, Z, 0.2 * Z)
    att = jnp.stack(
        [jnp.einsum("cd,bdhw->bchw", wk, Z, precision=_HIGHEST)
         for wk in params["w_convs"]],
        axis=1,
    )                                                             # (BN, h, C, H, W)
    att = jax.nn.softmax(att, axis=1)
    V = (xf * att).reshape(b * n, hh * C, H, W)
    out = jnp.einsum("ok,bkhw->bohw", params["w_1"], V, precision=_HIGHEST)
    return out.reshape(b, n, C, H, W)


def agf_net_ref(x, all_params, height):
    for p in all_params:
        b, f1, f2, h, w = x.shape
        x6 = x.reshape(b, f1 // height, height, f2, h, w)
        x = agu_net_ref(x6, p, height)
    return x


# ----------------------------------------------------------------------------
# Deterministic parameters (PyTorch __init__ shapes, bias=False, 1x1 convs as
# 2-D matrices) and the one-time kernel weight re-layout.
# ----------------------------------------------------------------------------
def make_agu_params(key, in_channels, height, reduction=8):
    d = max(in_channels // reduction, 4)
    keys = jax.random.split(key, 2 + height)
    scale_du = 1.0 / jnp.sqrt(in_channels)
    scale_k = 1.0 / jnp.sqrt(d)
    scale_1 = 1.0 / jnp.sqrt(in_channels * height)
    return {
        "w_du": scale_du * jax.random.normal(keys[0], (d, in_channels), jnp.float32),
        "w_convs": [
            scale_k * jax.random.normal(keys[2 + k], (in_channels, d), jnp.float32)
            for k in range(height)
        ],
        "w_1": scale_1
        * jax.random.normal(keys[1], (in_channels, in_channels * height), jnp.float32),
    }


def make_agf_params(key, in_channels, height, reduction=8):
    ks = jax.random.split(key, 3)
    return [make_agu_params(k, in_channels, height, reduction) for k in ks]


def prepare_kernel_params(all_params):
    # One-time fuse of the per-height attention convs (height-major rows).
    return [
        {
            "w_du": p["w_du"],                               # (d, C)
            "w_k": jnp.concatenate(p["w_convs"], axis=0),    # (height*C, d)
            "w_1": p["w_1"],                                 # (C, height*C)
        }
        for p in all_params
    ]


# ----------------------------------------------------------------------------
if __name__ == "__main__":
    height = 4            # AGUNet's conv_1 (in_channels*4) requires height == 4
    b, f1, f2, h, w = 2, 64, 8, 8, 8   # f1 divisible by height**3 = 64
    in_channels = f2

    x = jax.random.normal(jax.random.PRNGKey(0), (b, f1, f2, h, w), jnp.float32)
    raw_params = make_agf_params(jax.random.PRNGKey(42), in_channels, height)
    kparams = prepare_kernel_params(raw_params)

    fwd = jax.jit(agf_net_pallas, static_argnames=("height",))
    out = jax.block_until_ready(fwd(x, kparams, height=height))

    ref = agf_net_ref(x, raw_params, height)
    assert out.shape == ref.shape == (b, f1 // height ** 3, f2, h, w)
    assert jnp.allclose(out, ref, atol=2e-4, rtol=2e-4), "mismatch vs reference"

    print("KERNEL_OK")
</pallas_src>

<mosaic_0001>
module attributes {stable_mosaic.version = 11 : i64} {
  func.func @_agf_fused_kernel(%arg0: memref<4x8x2048xf32, #tpu.memory_space<vmem>>, %arg1: memref<4x8xf32, #tpu.memory_space<vmem>>, %arg2: memref<32x4xf32, #tpu.memory_space<vmem>>, %arg3: memref<8x32xf32, #tpu.memory_space<vmem>>, %arg4: memref<4x8xf32, #tpu.memory_space<vmem>>, %arg5: memref<32x4xf32, #tpu.memory_space<vmem>>, %arg6: memref<8x32xf32, #tpu.memory_space<vmem>>, %arg7: memref<4x8xf32, #tpu.memory_space<vmem>>, %arg8: memref<32x4xf32, #tpu.memory_space<vmem>>, %arg9: memref<8x32xf32, #tpu.memory_space<vmem>>, %arg10: memref<8x128xf32, #tpu.memory_space<vmem>>, %arg11: memref<8x2048xf32, #tpu.memory_space<vmem>>, %arg12: memref<8x512xf32, #tpu.memory_space<vmem>>) attributes {dimension_semantics = [], scalar_prefetch = 0 : i64, scratch_operands = 2 : i64, tpu.core_type = #tpu.core_type<tc>} {
    %c0 = arith.constant 0 : index
    %c0_0 = arith.constant 0 : index
    %c0_1 = arith.constant 0 : index
    %0 = vector.load %arg0[%c0, %c0_0, %c0_1] : memref<4x8x2048xf32, #tpu.memory_space<vmem>>, vector<1x8x2048xf32>
    %1 = vector.shape_cast %0 : vector<1x8x2048xf32> to vector<8x2048xf32>
    %c1 = arith.constant 1 : index
    %c0_2 = arith.constant 0 : index
    %c0_3 = arith.constant 0 : index
    %2 = vector.load %arg0[%c1, %c0_2, %c0_3] : memref<4x8x2048xf32, #tpu.memory_space<vmem>>, vector<1x8x2048xf32>
    %3 = vector.shape_cast %2 : vector<1x8x2048xf32> to vector<8x2048xf32>
    %c2 = arith.constant 2 : index
    %c0_4 = arith.constant 0 : index
    %c0_5 = arith.constant 0 : index
    %4 = vector.load %arg0[%c2, %c0_4, %c0_5] : memref<4x8x2048xf32, #tpu.memory_space<vmem>>, vector<1x8x2048xf32>
    %5 = vector.shape_cast %4 : vector<1x8x2048xf32> to vector<8x2048xf32>
    %c3 = arith.constant 3 : index
    %c0_6 = arith.constant 0 : index
    %c0_7 = arith.constant 0 : index
    %6 = vector.load %arg0[%c3, %c0_6, %c0_7] : memref<4x8x2048xf32, #tpu.memory_space<vmem>>, vector<1x8x2048xf32>
    %7 = vector.shape_cast %6 : vector<1x8x2048xf32> to vector<8x2048xf32>
    %c0_8 = arith.constant 0 : index
    %c0_9 = arith.constant 0 : index
    %8 = vector.load %arg1[%c0_8, %c0_9] : memref<4x8xf32, #tpu.memory_space<vmem>>, vector<4x8xf32>
    %c0_10 = arith.constant 0 : index
    %c0_11 = arith.constant 0 : index
    %9 = vector.load %arg2[%c0_10, %c0_11] : memref<32x4xf32, #tpu.memory_space<vmem>>, vector<32x4xf32>
    %c0_12 = arith.constant 0 : index
    %c0_13 = arith.constant 0 : index
    %10 = vector.load %arg3[%c0_12, %c0_13] : memref<8x32xf32, #tpu.memory_space<vmem>>, vector<8x32xf32>
    %11 = arith.addf %1, %3 : vector<8x2048xf32>
    %12 = arith.addf %11, %5 : vector<8x2048xf32>
    %13 = arith.addf %12, %7 : vector<8x2048xf32>
    %cst = arith.constant dense<0.000000e+00> : vector<4x2048xf32>
    %14 = tpu.matmul %8, %13, %cst {dimension_numbers = #tpu.dot_dimension_numbers<[1], [0], [0], [1], [0, 0, 1, 1], [], []>, precision = #tpu.contract_precision<fp32>} : vector<4x8xf32>, vector<8x2048xf32>, vector<4x2048xf32> -> vector<4x2048xf32>
    %cst_14 = arith.constant 0.000000e+00 : f32
    %15 = vector.broadcast %cst_14 : f32 to vector<4x2048xf32>
    %16 = arith.cmpf oge, %14, %15 : vector<4x2048xf32>
    %cst_15 = arith.constant 2.000000e-01 : f32
    %17 = vector.broadcast %cst_15 : f32 to vector<4x2048xf32>
    %18 = arith.mulf %17, %14 : vector<4x2048xf32>
    %19 = arith.select %16, %14, %18 : vector<4x2048xi1>, vector<4x2048xf32>
    %cst_16 = arith.constant dense<0.000000e+00> : vector<32x2048xf32>
    %20 = tpu.matmul %9, %19, %cst_16 {dimension_numbers = #tpu.dot_dimension_numbers<[1], [0], [0], [1], [0, 0, 1, 1], [], []>, precision = #tpu.contract_precision<fp32>} : vector<32x4xf32>, vector<4x2048xf32>, vector<32x2048xf32> -> vector<32x2048xf32>
    %21 = vector.extract_strided_slice %20 {offsets = [0, 0], sizes = [8, 2048], strides = [1, 1]} : vector<32x2048xf32> to vector<8x2048xf32>
    %22 = vector.extract_strided_slice %20 {offsets = [8, 0], sizes = [8, 2048], strides = [1, 1]} : vector<32x2048xf32> to vector<8x2048xf32>
    %23 = vector.extract_strided_slice %20 {offsets = [16, 0], sizes = [8, 2048], strides = [1, 1]} : vector<32x2048xf32> to vector<8x2048xf32>
    %24 = vector.extract_strided_slice %20 {offsets = [24, 0], sizes = [8, 2048], strides = [1, 1]} : vector<32x2048xf32> to vector<8x2048xf32>
    %25 = arith.maximumf %21, %22 : vector<8x2048xf32>
    %26 = arith.maximumf %25, %23 : vector<8x2048xf32>
    %27 = arith.maximumf %26, %24 : vector<8x2048xf32>
    %28 = arith.subf %21, %27 : vector<8x2048xf32>
    %29 = math.exp %28 : vector<8x2048xf32>
    %30 = arith.subf %22, %27 : vector<8x2048xf32>
    %31 = math.exp %30 : vector<8x2048xf32>
    %32 = arith.subf %23, %27 : vector<8x2048xf32>
    %33 = math.exp %32 : vector<8x2048xf32>
    %34 = arith.subf %24, %27 : vector<8x2048xf32>
    %35 = math.exp %34 : vector<8x2048xf32>
    %36 = arith.addf %29, %31 : vector<8x2048xf32>
    %37 = arith.addf %36, %33 : vector<8x2048xf32>
    %38 = arith.addf %37, %35 : vector<8x2048xf32>
    %cst_17 = arith.constant 1.000000e+00 : f32
    %39 = vector.broadcast %cst_17 : f32 to vector<8x2048xf32>
    %40 = arith.divf %39, %38 : vector<8x2048xf32>
    %41 = arith.mulf %29, %40 : vector<8x2048xf32>
    %42 = arith.mulf %1, %41 : vector<8x2048xf32>
    %43 = vector.extract_strided_slice %10 {offsets = [0, 0], sizes = [8, 8], strides = [1, 1]} : vector<8x32xf32> to vector<8x8xf32>
    %cst_18 = arith.constant dense<0.000000e+00> : vector<8x2048xf32>
    %44 = tpu.matmul %43, %42, %cst_18 {dimension_numbers = #tpu.dot_dimension_numbers<[1], [0], [0], [1], [0, 0, 1, 1], [], []>, precision = #tpu.contract_precision<fp32>} : vector<8x8xf32>, vector<8x2048xf32>, vector<8x2048xf32> -> vector<8x2048xf32>
    %45 = arith.mulf %31, %40 : vector<8x2048xf32>
    %46 = arith.mulf %3, %45 : vector<8x2048xf32>
    %47 = vector.extract_strided_slice %10 {offsets = [0, 8], sizes = [8, 8], strides = [1, 1]} : vector<8x32xf32> to vector<8x8xf32>
    %cst_19 = arith.constant dense<0.000000e+00> : vector<8x2048xf32>
    %48 = tpu.matmul %47, %46, %cst_19 {dimension_numbers = #tpu.dot_dimension_numbers<[1], [0], [0], [1], [0, 0, 1, 1], [], []>, precision = #tpu.contract_precision<fp32>} : vector<8x8xf32>, vector<8x2048xf32>, vector<8x2048xf32> -> vector<8x2048xf32>
    %49 = arith.addf %44, %48 : vector<8x2048xf32>
    %50 = arith.mulf %33, %40 : vector<8x2048xf32>
    %51 = arith.mulf %5, %50 : vector<8x2048xf32>
    %52 = vector.extract_strided_slice %10 {offsets = [0, 16], sizes = [8, 8], strides = [1, 1]} : vector<8x32xf32> to vector<8x8xf32>
    %cst_20 = arith.constant dense<0.000000e+00> : vector<8x2048xf32>
    %53 = tpu.matmul %52, %51, %cst_20 {dimension_numbers = #tpu.dot_dimension_numbers<[1], [0], [0], [1], [0, 0, 1, 1], [], []>, precision = #tpu.contract_precision<fp32>} : vector<8x8xf32>, vector<8x2048xf32>, vector<8x2048xf32> -> vector<8x2048xf32>
    %54 = arith.addf %49, %53 : vector<8x2048xf32>
    %55 = arith.mulf %35, %40 : vector<8x2048xf32>
    %56 = arith.mulf %7, %55 : vector<8x2048xf32>
    %57 = vector.extract_strided_slice %10 {offsets = [0, 24], sizes = [8, 8], strides = [1, 1]} : vector<8x32xf32> to vector<8x8xf32>
    %cst_21 = arith.constant dense<0.000000e+00> : vector<8x2048xf32>
    %58 = tpu.matmul %57, %56, %cst_21 {dimension_numbers = #tpu.dot_dimension_numbers<[1], [0], [0], [1], [0, 0, 1, 1], [], []>, precision = #tpu.contract_precision<fp32>} : vector<8x8xf32>, vector<8x2048xf32>, vector<8x2048xf32> -> vector<8x2048xf32>
    %59 = arith.addf %54, %58 : vector<8x2048xf32>
    %c0_22 = arith.constant 0 : index
    %c0_23 = arith.constant 0 : index
    %60 = vector.load %arg11[%c0_22, %c0_23] : memref<8x2048xf32, #tpu.memory_space<vmem>>, vector<8x2048xf32>
    tpu.vector_store %arg11[%c0_22, %c0_23], %59 {strides = array<i32>} : memref<8x2048xf32, #tpu.memory_space<vmem>>, vector<8x2048xf32>,
    %c0_24 = arith.constant 0 : index
    %c0_25 = arith.constant 0 : index
    %61 = vector.load %arg11[%c0_24, %c0_25] : memref<8x2048xf32, #tpu.memory_space<vmem>>, vector<8x512xf32>
    %c0_26 = arith.constant 0 : index
    %c512 = arith.constant 512 : index
    %62 = vector.load %arg11[%c0_26, %c512] : memref<8x2048xf32, #tpu.memory_space<vmem>>, vector<8x512xf32>
    %c0_27 = arith.constant 0 : index
    %c1024 = arith.constant 1024 : index
    %63 = vector.load %arg11[%c0_27, %c1024] : memref<8x2048xf32, #tpu.memory_space<vmem>>, vector<8x512xf32>
    %c0_28 = arith.constant 0 : index
    %c1536 = arith.constant 1536 : index
    %64 = vector.load %arg11[%c0_28, %c1536] : memref<8x2048xf32, #tpu.memory_space<vmem>>, vector<8x512xf32>
    %c0_29 = arith.constant 0 : index
    %c0_30 = arith.constant 0 : index
    %65 = vector.load %arg4[%c0_29, %c0_30] : memref<4x8xf32, #tpu.memory_space<vmem>>, vector<4x8xf32>
    %c0_31 = arith.constant 0 : index
    %c0_32 = arith.constant 0 : index
    %66 = vector.load %arg5[%c0_31, %c0_32] : memref<32x4xf32, #tpu.memory_space<vmem>>, vector<32x4xf32>
    %c0_33 = arith.constant 0 : index
    %c0_34 = arith.constant 0 : index
    %67 = vector.load %arg6[%c0_33, %c0_34] : memref<8x32xf32, #tpu.memory_space<vmem>>, vector<8x32xf32>
    %68 = arith.addf %61, %62 : vector<8x512xf32>
    %69 = arith.addf %68, %63 : vector<8x512xf32>
    %70 = arith.addf %69, %64 : vector<8x512xf32>
    %cst_35 = arith.constant dense<0.000000e+00> : vector<4x512xf32>
    %71 = tpu.matmul %65, %70, %cst_35 {dimension_numbers = #tpu.dot_dimension_numbers<[1], [0], [0], [1], [0, 0, 1, 1], [], []>, precision = #tpu.contract_precision<fp32>} : vector<4x8xf32>, vector<8x512xf32>, vector<4x512xf32> -> vector<4x512xf32>
    %cst_36 = arith.constant 0.000000e+00 : f32
    %72 = vector.broadcast %cst_36 : f32 to vector<4x512xf32>
    %73 = arith.cmpf oge, %71, %72 : vector<4x512xf32>
    %cst_37 = arith.constant 2.000000e-01 : f32
    %74 = vector.broadcast %cst_37 : f32 to vector<4x512xf32>
    %75 = arith.mulf %74, %71 : vector<4x512xf32>
    %76 = arith.select %73, %71, %75 : vector<4x512xi1>, vector<4x512xf32>
    %cst_38 = arith.constant dense<0.000000e+00> : vector<32x512xf32>
    %77 = tpu.matmul %66, %76, %cst_38 {dimension_numbers = #tpu.dot_dimension_numbers<[1], [0], [0], [1], [0, 0, 1, 1], [], []>, precision = #tpu.contract_precision<fp32>} : vector<32x4xf32>, vector<4x512xf32>, vector<32x512xf32> -> vector<32x512xf32>
    %78 = vector.extract_strided_slice %77 {offsets = [0, 0], sizes = [8, 512], strides = [1, 1]} : vector<32x512xf32> to vector<8x512xf32>
    %79 = vector.extract_strided_slice %77 {offsets = [8, 0], sizes = [8, 512], strides = [1, 1]} : vector<32x512xf32> to vector<8x512xf32>
    %80 = vector.extract_strided_slice %77 {offsets = [16, 0], sizes = [8, 512], strides = [1, 1]} : vector<32x512xf32> to vector<8x512xf32>
    %81 = vector.extract_strided_slice %77 {offsets = [24, 0], sizes = [8, 512], strides = [1, 1]} : vector<32x512xf32> to vector<8x512xf32>
    %82 = arith.maximumf %78, %79 : vector<8x512xf32>
    %83 = arith.maximumf %82, %80 : vector<8x512xf32>
    %84 = arith.maximumf %83, %81 : vector<8x512xf32>
    %85 = arith.subf %78, %84 : vector<8x512xf32>
    %86 = math.exp %85 : vector<8x512xf32>
    %87 = arith.subf %79, %84 : vector<8x512xf32>
    %88 = math.exp %87 : vector<8x512xf32>
    %89 = arith.subf %80, %84 : vector<8x512xf32>
    %90 = math.exp %89 : vector<8x512xf32>
    %91 = arith.subf %81, %84 : vector<8x512xf32>
    %92 = math.exp %91 : vector<8x512xf32>
    %93 = arith.addf %86, %88 : vector<8x512xf32>
    %94 = arith.addf %93, %90 : vector<8x512xf32>
    %95 = arith.addf %94, %92 : vector<8x512xf32>
    %cst_39 = arith.constant 1.000000e+00 : f32
    %96 = vector.broadcast %cst_39 : f32 to vector<8x512xf32>
    %97 = arith.divf %96, %95 : vector<8x512xf32>
    %98 = arith.mulf %86, %97 : vector<8x512xf32>
    %99 = arith.mulf %61, %98 : vector<8x512xf32>
    %100 = vector.extract_strided_slice %67 {offsets = [0, 0], sizes = [8, 8], strides = [1, 1]} : vector<8x32xf32> to vector<8x8xf32>
    %cst_40 = arith.constant dense<0.000000e+00> : vector<8x512xf32>
    %101 = tpu.matmul %100, %99, %cst_40 {dimension_numbers = #tpu.dot_dimension_numbers<[1], [0], [0], [1], [0, 0, 1, 1], [], []>, precision = #tpu.contract_precision<fp32>} : vector<8x8xf32>, vector<8x512xf32>, vector<8x512xf32> -> vector<8x512xf32>
    %102 = arith.mulf %88, %97 : vector<8x512xf32>
    %103 = arith.mulf %62, %102 : vector<8x512xf32>
    %104 = vector.extract_strided_slice %67 {offsets = [0, 8], sizes = [8, 8], strides = [1, 1]} : vector<8x32xf32> to vector<8x8xf32>
    %cst_41 = arith.constant dense<0.000000e+00> : vector<8x512xf32>
    %105 = tpu.matmul %104, %103, %cst_41 {dimension_numbers = #tpu.dot_dimension_numbers<[1], [0], [0], [1], [0, 0, 1, 1], [], []>, precision = #tpu.contract_precision<fp32>} : vector<8x8xf32>, vector<8x512xf32>, vector<8x512xf32> -> vector<8x512xf32>
    %106 = arith.addf %101, %105 : vector<8x512xf32>
    %107 = arith.mulf %90, %97 : vector<8x512xf32>
    %108 = arith.mulf %63, %107 : vector<8x512xf32>
    %109 = vector.extract_strided_slice %67 {offsets = [0, 16], sizes = [8, 8], strides = [1, 1]} : vector<8x32xf32> to vector<8x8xf32>
    %cst_42 = arith.constant dense<0.000000e+00> : vector<8x512xf32>
    %110 = tpu.matmul %109, %108, %cst_42 {dimension_numbers = #tpu.dot_dimension_numbers<[1], [0], [0], [1], [0, 0, 1, 1], [], []>, precision = #tpu.contract_precision<fp32>} : vector<8x8xf32>, vector<8x512xf32>, vector<8x512xf32> -> vector<8x512xf32>
    %111 = arith.addf %106, %110 : vector<8x512xf32>
    %112 = arith.mulf %92, %97 : vector<8x512xf32>
    %113 = arith.mulf %64, %112 : vector<8x512xf32>
    %114 = vector.extract_strided_slice %67 {offsets = [0, 24], sizes = [8, 8], strides = [1, 1]} : vector<8x32xf32> to vector<8x8xf32>
    %cst_43 = arith.constant dense<0.000000e+00> : vector<8x512xf32>
    %115 = tpu.matmul %114, %113, %cst_43 {dimension_numbers = #tpu.dot_dimension_numbers<[1], [0], [0], [1], [0, 0, 1, 1], [], []>, precision = #tpu.contract_precision<fp32>} : vector<8x8xf32>, vector<8x512xf32>, vector<8x512xf32> -> vector<8x512xf32>
    %116 = arith.addf %111, %115 : vector<8x512xf32>
    %c0_44 = arith.constant 0 : index
    %c0_45 = arith.constant 0 : index
    %117 = vector.load %arg12[%c0_44, %c0_45] : memref<8x512xf32, #tpu.memory_space<vmem>>, vector<8x512xf32>
    tpu.vector_store %arg12[%c0_44, %c0_45], %116 {strides = array<i32>} : memref<8x512xf32, #tpu.memory_space<vmem>>, vector<8x512xf32>,
    %c0_46 = arith.constant 0 : index
    %c0_47 = arith.constant 0 : index
    %118 = vector.load %arg12[%c0_46, %c0_47] : memref<8x512xf32, #tpu.memory_space<vmem>>, vector<8x128xf32>
    %c0_48 = arith.constant 0 : index
    %c128 = arith.constant 128 : index
    %119 = vector.load %arg12[%c0_48, %c128] : memref<8x512xf32, #tpu.memory_space<vmem>>, vector<8x128xf32>
    %c0_49 = arith.constant 0 : index
    %c256 = arith.constant 256 : index
    %120 = vector.load %arg12[%c0_49, %c256] : memref<8x512xf32, #tpu.memory_space<vmem>>, vector<8x128xf32>
    %c0_50 = arith.constant 0 : index
    %c384 = arith.constant 384 : index
    %121 = vector.load %arg12[%c0_50, %c384] : memref<8x512xf32, #tpu.memory_space<vmem>>, vector<8x128xf32>
    %c0_51 = arith.constant 0 : index
    %c0_52 = arith.constant 0 : index
    %122 = vector.load %arg7[%c0_51, %c0_52] : memref<4x8xf32, #tpu.memory_space<vmem>>, vector<4x8xf32>
    %c0_53 = arith.constant 0 : index
    %c0_54 = arith.constant 0 : index
    %123 = vector.load %arg8[%c0_53, %c0_54] : memref<32x4xf32, #tpu.memory_space<vmem>>, vector<32x4xf32>
    %c0_55 = arith.constant 0 : index
    %c0_56 = arith.constant 0 : index
    %124 = vector.load %arg9[%c0_55, %c0_56] : memref<8x32xf32, #tpu.memory_space<vmem>>, vector<8x32xf32>
    %125 = arith.addf %118, %119 : vector<8x128xf32>
    %126 = arith.addf %125, %120 : vector<8x128xf32>
    %127 = arith.addf %126, %121 : vector<8x128xf32>
    %cst_57 = arith.constant dense<0.000000e+00> : vector<4x128xf32>
    %128 = tpu.matmul %122, %127, %cst_57 {dimension_numbers = #tpu.dot_dimension_numbers<[1], [0], [0], [1], [0, 0, 1, 1], [], []>, precision = #tpu.contract_precision<fp32>} : vector<4x8xf32>, vector<8x128xf32>, vector<4x128xf32> -> vector<4x128xf32>
    %cst_58 = arith.constant 0.000000e+00 : f32
    %129 = vector.broadcast %cst_58 : f32 to vector<4x128xf32>
    %130 = arith.cmpf oge, %128, %129 : vector<4x128xf32>
    %cst_59 = arith.constant 2.000000e-01 : f32
    %131 = vector.broadcast %cst_59 : f32 to vector<4x128xf32>
    %132 = arith.mulf %131, %128 : vector<4x128xf32>
    %133 = arith.select %130, %128, %132 : vector<4x128xi1>, vector<4x128xf32>
    %cst_60 = arith.constant dense<0.000000e+00> : vector<32x128xf32>
    %134 = tpu.matmul %123, %133, %cst_60 {dimension_numbers = #tpu.dot_dimension_numbers<[1], [0], [0], [1], [0, 0, 1, 1], [], []>, precision = #tpu.contract_precision<fp32>} : vector<32x4xf32>, vector<4x128xf32>, vector<32x128xf32> -> vector<32x128xf32>
    %135 = vector.extract_strided_slice %134 {offsets = [0, 0], sizes = [8, 128], strides = [1, 1]} : vector<32x128xf32> to vector<8x128xf32>
    %136 = vector.extract_strided_slice %134 {offsets = [8, 0], sizes = [8, 128], strides = [1, 1]} : vector<32x128xf32> to vector<8x128xf32>
    %137 = vector.extract_strided_slice %134 {offsets = [16, 0], sizes = [8, 128], strides = [1, 1]} : vector<32x128xf32> to vector<8x128xf32>
    %138 = vector.extract_strided_slice %134 {offsets = [24, 0], sizes = [8, 128], strides = [1, 1]} : vector<32x128xf32> to vector<8x128xf32>
    %139 = arith.maximumf %135, %136 : vector<8x128xf32>
    %140 = arith.maximumf %139, %137 : vector<8x128xf32>
    %141 = arith.maximumf %140, %138 : vector<8x128xf32>
    %142 = arith.subf %135, %141 : vector<8x128xf32>
    %143 = math.exp %142 : vector<8x128xf32>
    %144 = arith.subf %136, %141 : vector<8x128xf32>
    %145 = math.exp %144 : vector<8x128xf32>
    %146 = arith.subf %137, %141 : vector<8x128xf32>
    %147 = math.exp %146 : vector<8x128xf32>
    %148 = arith.subf %138, %141 : vector<8x128xf32>
    %149 = math.exp %148 : vector<8x128xf32>
    %150 = arith.addf %143, %145 : vector<8x128xf32>
    %151 = arith.addf %150, %147 : vector<8x128xf32>
    %152 = arith.addf %151, %149 : vector<8x128xf32>
    %cst_61 = arith.constant 1.000000e+00 : f32
    %153 = vector.broadcast %cst_61 : f32 to vector<8x128xf32>
    %154 = arith.divf %153, %152 : vector<8x128xf32>
    %155 = arith.mulf %143, %154 : vector<8x128xf32>
    %156 = arith.mulf %118, %155 : vector<8x128xf32>
    %157 = vector.extract_strided_slice %124 {offsets = [0, 0], sizes = [8, 8], strides = [1, 1]} : vector<8x32xf32> to vector<8x8xf32>
    %cst_62 = arith.constant dense<0.000000e+00> : vector<8x128xf32>
    %158 = tpu.matmul %157, %156, %cst_62 {dimension_numbers = #tpu.dot_dimension_numbers<[1], [0], [0], [1], [0, 0, 1, 1], [], []>, precision = #tpu.contract_precision<fp32>} : vector<8x8xf32>, vector<8x128xf32>, vector<8x128xf32> -> vector<8x128xf32>
    %159 = arith.mulf %145, %154 : vector<8x128xf32>
    %160 = arith.mulf %119, %159 : vector<8x128xf32>
    %161 = vector.extract_strided_slice %124 {offsets = [0, 8], sizes = [8, 8], strides = [1, 1]} : vector<8x32xf32> to vector<8x8xf32>
    %cst_63 = arith.constant dense<0.000000e+00> : vector<8x128xf32>
    %162 = tpu.matmul %161, %160, %cst_63 {dimension_numbers = #tpu.dot_dimension_numbers<[1], [0], [0], [1], [0, 0, 1, 1], [], []>, precision = #tpu.contract_precision<fp32>} : vector<8x8xf32>, vector<8x128xf32>, vector<8x128xf32> -> vector<8x128xf32>
    %163 = arith.addf %158, %162 : vector<8x128xf32>
    %164 = arith.mulf %147, %154 : vector<8x128xf32>
    %165 = arith.mulf %120, %164 : vector<8x128xf32>
    %166 = vector.extract_strided_slice %124 {offsets = [0, 16], sizes = [8, 8], strides = [1, 1]} : vector<8x32xf32> to vector<8x8xf32>
    %cst_64 = arith.constant dense<0.000000e+00> : vector<8x128xf32>
    %167 = tpu.matmul %166, %165, %cst_64 {dimension_numbers = #tpu.dot_dimension_numbers<[1], [0], [0], [1], [0, 0, 1, 1], [], []>, precision = #tpu.contract_precision<fp32>} : vector<8x8xf32>, vector<8x128xf32>, vector<8x128xf32> -> vector<8x128xf32>
    %168 = arith.addf %163, %167 : vector<8x128xf32>
    %169 = arith.mulf %149, %154 : vector<8x128xf32>
    %170 = arith.mulf %121, %169 : vector<8x128xf32>
    %171 = vector.extract_strided_slice %124 {offsets = [0, 24], sizes = [8, 8], strides = [1, 1]} : vector<8x32xf32> to vector<8x8xf32>
    %cst_65 = arith.constant dense<0.000000e+00> : vector<8x128xf32>
    %172 = tpu.matmul %171, %170, %cst_65 {dimension_numbers = #tpu.dot_dimension_numbers<[1], [0], [0], [1], [0, 0, 1, 1], [], []>, precision = #tpu.contract_precision<fp32>} : vector<8x8xf32>, vector<8x128xf32>, vector<8x128xf32> -> vector<8x128xf32>
    %173 = arith.addf %168, %172 : vector<8x128xf32>
    %c0_66 = arith.constant 0 : index
    %c0_67 = arith.constant 0 : index
    %174 = vector.load %arg10[%c0_66, %c0_67] : memref<8x128xf32, #tpu.memory_space<vmem>>, vector<8x128xf32>
    tpu.vector_store %arg10[%c0_66, %c0_67], %173 {strides = array<i32>} : memref<8x128xf32, #tpu.memory_space<vmem>>, vector<8x128xf32>,
    return
  }
}

</mosaic_0001>

<bundles_post_ra>
// kernel: agf_net_pallas.1
= control target key start
LH: loop header
LB: loop body
LE: loop exit
PB: predicated region body
PF: predicated region fallthrough
CT: control target
= control target key end

     0   :  { %v38316_v3 = vmov 0.0   ;;  %vm156_vm0 = vcmask 64512   ;;  %vm3928_vm1 = vcmask 31744   ;;  %vm3941_vm2 = vcmask 1043456   ;;  %s34905_s26 = smov 120   ;;  %s34906_s12 = smov 112   ;;  %s38305_s0 = inlined_call_operand.vmem [shape: f32[4,8,2048], index: 0, kind: input, shape index: {}]   ;;  %s38306_s1 = inlined_call_operand.vmem [shape: f32[4,8], index: 1, kind: input, shape index: {}]   ;;  %s38307_s2 = inlined_call_operand.vmem [shape: f32[32,4], index: 2, kind: input, shape index: {}]   ;;  %s38308_s3 = inlined_call_operand.vmem [shape: f32[8,32], index: 3, kind: input, shape index: {}]   ;;  %s38309_s4 = inlined_call_operand.vmem [shape: f32[4,8], index: 4, kind: input, shape index: {}]   ;;  %s38310_s5 = inlined_call_operand.vmem [shape: f32[32,4], index: 5, kind: input, shape index: {}]   ;;  %s38311_s6 = inlined_call_operand.vmem [shape: f32[8,32], index: 6, kind: input, shape index: {}]   ;;  %s38312_s7 = inlined_call_operand.vmem [shape: f32[4,8], index: 7, kind: input, shape index: {}]   ;;  %s38313_s8 = inlined_call_operand.vmem [shape: f32[32,4], index: 8, kind: input, shape index: {}]   ;;  %s38314_s9 = inlined_call_operand.vmem [shape: f32[8,32], index: 9, kind: input, shape index: {}]   ;;  %s38315_s10 = inlined_call_operand.vmem [shape: f32[8,128], index: 10, kind: output, shape index: {}]  }
   0x1   :  { %v36_v0 = vld [vmem:[%s38305_s0 + $0x8] sm:$0xff]  ;;  %226 = vmatprep.mubr.f32.mxu1 %v38316_v3  ;;  %312 = vmatprep.mubr.f32.mxu0 %v38316_v3  ;;  %v35_v6 = vld [vmem:[%s38305_s0] sm:$0xff]  ;;  %v38_v14 = vld [vmem:[%s38305_s0 + $0x18] sm:$0xff]  ;;  %s34907_s18 = smov 104  }
   0x2   :  { %v33253_v1 = vld [vmem:[%s38305_s0 + $0x88] sm:$0xff]  ;;  %v33252_v7 = vld [vmem:[%s38305_s0 + $0x80] sm:$0xff]  ;;  %v33255_v15 = vld [vmem:[%s38305_s0 + $0x98] sm:$0xff] }
   0x3   :  { %v33269_v2 = vld [vmem:[%s38305_s0 + $0x108] sm:$0xff]  ;;  %v109_v5 = vadd.f32 %v33253_v1, %v36_v0  ;;  %v33268_v8 = vld [vmem:[%s38305_s0 + $0x100] sm:$0xff]  ;;  %v108_v10 = vadd.f32 %v33252_v7, %v35_v6  ;;  %v33271_v16 = vld [vmem:[%s38305_s0 + $0x118] sm:$0xff]  ;;  %v111_v19 = vadd.f32 %v33255_v15, %v38_v14 }
   0x4   :  { %v33285_v4 = vld [vmem:[%s38305_s0 + $0x188] sm:$0xff]  ;;  %v33284_v9 = vld [vmem:[%s38305_s0 + $0x180] sm:$0xff]  ;;  %v37_v20 = vld [vmem:[%s38305_s0 + $0x10] sm:$0xff] }
   0x5   :  { %v102_v11 = vld [vmem:[%s38306_s1] sm:$0xf]  ;;  %v125_v12 = vadd.f32 %v33269_v2, %v109_v5  ;;  %v124_v17 = vadd.f32 %v33268_v8, %v108_v10  ;;  %v33254_v21 = vld [vmem:[%s38305_s0 + $0x90] sm:$0xff]  ;;  %v33287_v23 = vld [vmem:[%s38305_s0 + $0x198] sm:$0xff]  ;;  %v127_v28 = vadd.f32 %v33271_v16, %v111_v19 }
   0x6   :  { %v158_v13 = vsel %vm156_vm0, %v102_v11, 0  ;;  %v33270_v24 = vld [vmem:[%s38305_s0 + $0x110] sm:$0xff]  ;;  %v110_v25 = vadd.f32 %v33254_v21, %v37_v20  ;;  %v40_v55 = vld [vmem:[%s38305_s0 + $0x28] sm:$0xff]  ;;  %v39_v59 = vld [vmem:[%s38305_s0 + $0x20] sm:$0xff] }
   0x7   :  { %v35003_v18 = vand.u32 4294901760, %v158_v13  ;;  %v141_v22 = vadd.f32 %v33285_v4, %v125_v12  ;;  %v140_v26 = vadd.f32 %v33284_v9, %v124_v17  ;;  %v33286_v29 = vld [vmem:[%s38305_s0 + $0x190] sm:$0xff]  ;;  %v143_v34 = vadd.f32 %v33287_v23, %v127_v28  ;;  %v33257_v56 = vld [vmem:[%s38305_s0 + $0xa8] sm:$0xff]  ;;  %v33256_v60 = vld [vmem:[%s38305_s0 + $0xa0] sm:$0xff] }
   0x8   :  { %v126_v31 = vadd.f32 %v33270_v24, %v110_v25  ;;  %v113_v58 = vadd.f32 %v33257_v56, %v40_v55  ;;  %v33273_v61 = vld [vmem:[%s38305_s0 + $0x128] sm:$0xff]  ;;  %v112_v62 = vadd.f32 %v33256_v60, %v39_v59  ;;  %v33272_v0 = vld [vmem:[%s38305_s0 + $0x120] sm:$0xff]  ;;  %v42_v1 = vld [vmem:[%s38305_s0 + $0x38] sm:$0xff] }
   0x9   :  { %v35018_v27 = vsub.f32 %v158_v13, %v35003_v18  ;;  %v35023_v30 = vand.u32 4294901760, %v141_v22  ;;  %v35025_v32 = vand.u32 4294901760, %v140_v26  ;;  %v35037_v38 = vand.u32 4294901760, %v143_v34  ;;  %v33259_v2 = vld [vmem:[%s38305_s0 + $0xb8] sm:$0xff]  ;;  %v33289_v4 = vld [vmem:[%s38305_s0 + $0x1a8] sm:$0xff]  ;;  %v41_v7 = vld [vmem:[%s38305_s0 + $0x30] sm:$0xff] }
   0xa   :  { %v142_v35 = vadd.f32 %v33286_v29, %v126_v31  ;;  %v129_v63 = vadd.f32 %v33273_v61, %v113_v58  ;;  %v128_v5 = vadd.f32 %v33272_v0, %v112_v62  ;;  %v115_v6 = vadd.f32 %v33259_v2, %v42_v1  ;;  %v33258_v8 = vld [vmem:[%s38305_s0 + $0xb0] sm:$0xff]  ;;  %v33288_v10 = vld [vmem:[%s38305_s0 + $0x1a0] sm:$0xff]  ;;  %v33275_v11 = vld [vmem:[%s38305_s0 + $0x138] sm:$0xff] }
   0xb   :  { %v35028_v33 = vand.u32 4294901760, %v35018_v27  ;;  %161 = vmatprep.subr.mxu1 %v35023_v30  ;;  %v35032_v36 = vsub.f32 %v141_v22, %v35023_v30  ;;  %v35040_v39 = vsub.f32 %v140_v26, %v35025_v32  ;;  %v35050_v44 = vsub.f32 %v143_v34, %v35037_v38  ;;  %v33274_v15 = vld [vmem:[%s38305_s0 + $0x130] sm:$0xff]  ;;  %v33291_v17 = vld [vmem:[%s38305_s0 + $0x1b8] sm:$0xff]  ;;  %v33293_v56 = vld [vmem:[%s38305_s0 + $0x1c8] sm:$0xff] }
   0xc   :  { %163 = vmatpush1.msra.mxu1 %v35025_v32  ;;  %v35042_v40 = vand.u32 4294901760, %v142_v35  ;;  %v145_v9 = vadd.f32 %v33289_v4, %v129_v63  ;;  %v114_v12 = vadd.f32 %v33258_v8, %v41_v7  ;;  %v144_v13 = vadd.f32 %v33288_v10, %v128_v5  ;;  %v33290_v22 = vld [vmem:[%s38305_s0 + $0x1b0] sm:$0xff]  ;;  %v33279_v61 = vld [vmem:[%s38305_s0 + $0x158] sm:$0xff]  ;;  %v33292_v62 = vld [vmem:[%s38305_s0 + $0x1c0] sm:$0xff] }
   0xd   :  { %v230_v37 = vsub.f32 %v35018_v27, %v35028_v33  ;;  %v240_v41 = vand.u32 4294901760, %v35032_v36  ;;  %626 = vmatprep.subr.mxu1 %v35037_v38  ;;  %v246_v43 = vand.u32 4294901760, %v35040_v39  ;;  %v705_v48 = vand.u32 4294901760, %v35050_v44  ;;  %v45_v58 = vld [vmem:[%s38305_s0 + $0x50] sm:$0xff]  ;;  %v33295_v5 = vld [vmem:[%s38305_s0 + $0x1d8] sm:$0xff] }
   0xe   :  { %v35053_v45 = vsub.f32 %v142_v35, %v35042_v40  ;;  %v131_v14 = vadd.f32 %v33275_v11, %v115_v6  ;;  %v35127_v16 = vand.u32 4294901760, %v145_v9  ;;  %v130_v19 = vadd.f32 %v33274_v15, %v114_v12  ;;  %v33262_v59 = vld [vmem:[%s38305_s0 + $0xd0] sm:$0xff] }
   0xf   :  { %v35045_v42 = vand.u32 4294901760, %v230_v37  ;;  %v241_v46 = vsub.f32 %v35032_v36, %v240_v41  ;;  %v247_v47 = vsub.f32 %v35040_v39, %v246_v43  ;;  %v706_v52 = vsub.f32 %v35050_v44, %v705_v48  ;;  %v33278_v2 = vld [vmem:[%s38305_s0 + $0x150] sm:$0xff] }
  0x10   :  { %v711_v50 = vand.u32 4294901760, %v35053_v45  ;;  %v35138_v20 = vand.u32 4294901760, %v144_v13  ;;  %v147_v21 = vadd.f32 %v33291_v17, %v131_v14  ;;  %v35147_v23 = vsub.f32 %v145_v9, %v35127_v16  ;;  %v33294_v9 = vld [vmem:[%s38305_s0 + $0x1d0] sm:$0xff] }
  0x11   :  { %232 = vmatmul.mubr.f32.vlgmr.msra.gmra.mrb[0].mxu1 %v35045_v42  ;;  %v242_v49 = vand.u32 4294901760, %v241_v46  ;;  %v248_v51 = vand.u32 4294901760, %v247_v47  ;;  %v707_v54 = vand.u32 4294901760, %v706_v52  ;;  %v146_v24 = vadd.f32 %v33290_v22, %v130_v19  ;;  %v33261_v46 = vld [vmem:[%s38305_s0 + $0xc8] sm:$0xff]  ;;  %v43_v47 = vld [vmem:[%s38305_s0 + $0x40] sm:$0xff]  ;;  %v46_v52 = vld [vmem:[%s38305_s0 + $0x58] sm:$0xff] }
  0x12   :  { %628 = vmatpush1.msra.mxu1 %v35042_v40  ;;  %691 = vmatprep.mubr.f32.mxu1 %v38316_v3  ;;  %v712_v53 = vsub.f32 %v35053_v45, %v711_v50  ;;  %v35151_v25 = vsub.f32 %v144_v13, %v35138_v20  ;;  %v35153_v26 = vand.u32 4294901760, %v147_v21  ;;  %v1170_v28 = vand.u32 4294901760, %v35147_v23 }
  0x13   :  { %243 = vmatprep.subr.mxu0 %v242_v49  ;;  %708 = vmatprep.subr.mxu1 %v707_v54  ;;  %v35160_v29 = vand.u32 4294901760, %v146_v24  ;;  %v33276_v54 = vld [vmem:[%s38305_s0 + $0x140] sm:$0xff]  ;;  %v118_v0 = vadd.f32 %v33262_v59, %v45_v58 }
  0x14   :  { %249 = vmatpush1.msra.mxu0 %v248_v51  ;;  %v713_v57 = vand.u32 4294901760, %v712_v53  ;;  %v35166_v31 = vsub.f32 %v147_v21, %v35153_v26  ;;  %v1171_v34 = vsub.f32 %v35147_v23, %v1170_v28  ;;  %v33263_v53 = vld [vmem:[%s38305_s0 + $0xd8] sm:$0xff] }
  0x15   :  { %697 = vmatmul.mubr.f32.vlgmr.msra.gmra.mrb[2].mxu1 %v35045_v42  ;;  %314 = vmatmul.mubr.f32.vlgmr.msra.gmra.mrb[0].mxu0 %v35003_v18  ;;  %v35175_v35 = vsub.f32 %v146_v24, %v35160_v29  ;;  %v134_v7 = vadd.f32 %v33278_v2, %v118_v0 }
  0x16   :  { %777 = vmatprep.mubr.f32.mxu1 %v38316_v3  ;;  %322 = vmatprep.subr.mxu0 %v35032_v36  ;;  %v1635_v36 = vand.u32 4294901760, %v35166_v31  ;;  %v1172_v37 = vand.u32 4294901760, %v1171_v34  ;;  %v48_v34 = vld [vmem:[%s38305_s0 + $0x68] sm:$0xff] }
  0x17   :  { %714 = vmatpush1.msra.mxu1 %v713_v57  ;;  %325 = vmatpush1.msra.mxu0 %v35040_v39  ;;  %v119_v57 = vadd.f32 %v33263_v53, %v46_v52  ;;  %v150_v12 = vadd.f32 %v33294_v9, %v134_v7  ;;  %v33296_v52 = vld [vmem:[%s38305_s0 + $0x1e0] sm:$0xff] }
  0x18   :  { %388 = vmatprep.mubr.f32.mxu0 %v38316_v3  ;;  %787 = vmatprep.subr.mxu1 %v35050_v44 }
  0x19   :  { %398 = vmatprep.subr.mxu0 %v35023_v30  ;;  %v135_v1 = vadd.f32 %v33279_v61, %v119_v57  ;;  %v33298_v61 = vld [vmem:[%s38305_s0 + $0x1f0] sm:$0xff] }
  0x1b   :  { %v151_v8 = vadd.f32 %v33295_v5, %v135_v1 }
  0x1d   :  { %779 = vmatmul.mubr.f32.vlgmr.msra.gmra.mrb[2].mxu1 %v35003_v18  ;;  %391 = vmatmul.mubr.f32.vlgmr.msra.gmra.mrb[0].mxu0 %v35018_v27  ;;  %v35282_v13 = vand.u32 4294901760, %v151_v8 }
  0x1e   :  { %790 = vmatpush1.msra.mxu1 %v35053_v45  ;;  %853 = vmatprep.mubr.f32.mxu1 %v38316_v3  ;;  %v44_v45 = vld [vmem:[%s38305_s0 + $0x48] sm:$0xff] }
  0x1f   :  { %400 = vmatpush1.msra.mxu0 %v35025_v32  ;;  %463 = vmatprep.mubr.f32.mxu0 %v38316_v3  ;;  %v117_v49 = vadd.f32 %v33261_v46, %v44_v45  ;;  %v35297_v17 = vsub.f32 %v151_v8, %v35282_v13  ;;  %v33297_v45 = vld [vmem:[%s38305_s0 + $0x1e8] sm:$0xff] }
  0x20   :  { %863 = vmatprep.subr.mxu1 %v35037_v38  ;;  %476 = vmatprep.subr.mxu0 %v240_v41  ;;  %v1636_v41 = vsub.f32 %v35166_v31, %v1635_v36 }
  0x25   :  { %856 = vmatmul.mubr.f32.vlgmr.msra.gmra.mrb[2].mxu1 %v35018_v27  ;;  %467 = vmatmul.mubr.f32.vlgmr.msra.gmra.mrb[0].mxu0 %v35028_v33 }
  0x26   :  { %865 = vmatpush1.msra.mxu1 %v35042_v40  ;;  %928 = vmatprep.mubr.f32.mxu1 %v38316_v3 }
  0x27   :  { %480 = vmatpush1.msra.mxu0 %v246_v43  ;;  %543 = vmatprep.mubr.f32.mxu0 %v38316_v3  ;;  %v1637_v43 = vand.u32 4294901760, %v1636_v41  ;;  %v33267_v41 = vld [vmem:[%s38305_s0 + $0xf8] sm:$0xff] }
  0x28   :  { %941 = vmatprep.subr.mxu1 %v705_v48  ;;  %552 = vmatprep.subr.mxu0 %v35023_v30  ;;  %v1176_v30 = vand.u32 4294901760, %v35151_v25  ;;  %v33260_v48 = vld [vmem:[%s38305_s0 + $0xc0] sm:$0xff] }
  0x29   :  { %v116_v51 = vadd.f32 %v33260_v48, %v43_v47  ;;  %v49_v47 = vld [vmem:[%s38305_s0 + $0x70] sm:$0xff] }
  0x2a   :  { %v33266_v48 = vld [vmem:[%s38305_s0 + $0xf0] sm:$0xff] }
  0x2b   :  { %v132_v60 = vadd.f32 %v33276_v54, %v116_v51  ;;  %v122_v53 = vadd.f32 %v33266_v48, %v49_v47 }
  0x2d   :  { %932 = vmatmul.mubr.f32.vlgmr.msra.gmra.mrb[2].mxu1 %v35028_v33  ;;  %545 = vmatmul.mubr.f32.vlgmr.msra.gmra.mrb[0].mxu0 %v35003_v18  ;;  %v148_v4 = vadd.f32 %v33292_v62, %v132_v60 }
  0x2e   :  { %945 = vmatpush1.msra.mxu1 %v711_v50  ;;  %1008 = vmatprep.mubr.f32.mxu1 %v38316_v3  ;;  %v33277_v50 = vld [vmem:[%s38305_s0 + $0x148] sm:$0xff] }
  0x2f   :  { %554 = vmatpush1.msra.mxu0 %v35025_v32  ;;  %617 = vmatprep.mubr.f32.mxu0 %v38316_v3  ;;  %v1177_v32 = vsub.f32 %v35151_v25, %v1176_v30  ;;  %v133_v55 = vadd.f32 %v33277_v50, %v117_v49  ;;  %v35273_v10 = vand.u32 4294901760, %v148_v4  ;;  %v33283_v49 = vld [vmem:[%s38305_s0 + $0x178] sm:$0xff] }
  0x30   :  { %1017 = vmatprep.subr.mxu1 %v35037_v38  ;;  %1091 = vmatprep.subr.mxu0 %v35127_v16  ;;  %v1641_v38 = vand.u32 4294901760, %v35175_v35 }
  0x31   :  { %v1178_v39 = vand.u32 4294901760, %v1177_v32  ;;  %v149_v63 = vadd.f32 %v33293_v56, %v133_v55  ;;  %v35285_v14 = vsub.f32 %v148_v4, %v35273_v10  ;;  %v33282_v55 = vld [vmem:[%s38305_s0 + $0x170] sm:$0xff]  ;;  %v33299_v56 = vld [vmem:[%s38305_s0 + $0x1f8] sm:$0xff] }
  0x32   :  { %v138_v59 = vadd.f32 %v33282_v55, %v122_v53 }
  0x33   :  { %v35263_v6 = vand.u32 4294901760, %v149_v63  ;;  %v2106_v19 = vand.u32 4294901760, %v35285_v14 }
  0x34   :  { %v154_v0 = vadd.f32 %v33298_v61, %v138_v59 }
  0x35   :  { %1010 = vmatmul.mubr.f32.vlgmr.msra.gmra.mrb[2].mxu1 %v35003_v18  ;;  %619 = vmatmul.mubr.f32.vlgmr.msra.gmra.mrb[0].mxu0 %v35003_v18  ;;  %v35280_v11 = vsub.f32 %v149_v63, %v35263_v6 }
  0x36   :  { %1019 = vmatpush1.msra.mxu1 %v35042_v40  ;;  %1082 = vmatprep.mubr.f32.mxu1 %v38316_v3  ;;  %v1642_v40 = vsub.f32 %v35175_v35, %v1641_v38  ;;  %v35419_v5 = vand.u32 4294901760, %v154_v0 }
  0x37   :  { %1093 = vmatpush1.msra.mxu0 %v35138_v20  ;;  %1156 = vmatprep.mubr.f32.mxu0 %v38316_v3  ;;  %v2100_v15 = vand.u32 4294901760, %v35280_v11 }
  0x38   :  { %1173 = vmatprep.subr.mxu0 %v1172_v37  ;;  %1556 = vmatprep.subr.mxu1 %v35153_v26  ;;  %v1643_v44 = vand.u32 4294901760, %v1642_v40  ;;  %v33264_v37 = vld [vmem:[%s38305_s0 + $0xe0] sm:$0xff]  ;;  %v3500_v9 = vsub.f32 %v154_v0, %v35419_v5 }
  0x39   :  { %1162 = vmatmul.mubr.f32.vlgmr.msra.gmra.mrb[2].mxu0 %v35045_v42  ;;  %v2101_v21 = vsub.f32 %v35280_v11, %v2100_v15 }
  0x3a   :  { %1179 = vmatpush1.msra.mxu0 %v1178_v39  ;;  %1242 = vmatprep.mubr.f32.mxu0 %v38316_v3  ;;  %v50_v39 = vld [vmem:[%s38305_s0 + $0x78] sm:$0xff] }
  0x3b   :  { %1252 = vmatprep.subr.mxu0 %v35147_v23  ;;  %v2107_v23 = vsub.f32 %v35285_v14, %v2106_v19  ;;  %v2102_v24 = vand.u32 4294901760, %v2101_v21  ;;  %v123_v46 = vadd.f32 %v33267_v41, %v50_v39 }
  0x3d   :  { %1084 = vmatmul.mubr.f32.vlgmr.msra.gmra.mrb[2].mxu1 %v35003_v18  ;;  %v139_v54 = vadd.f32 %v33283_v49, %v123_v46 }
  0x3e   :  { %1558 = vmatpush1.msra.mxu1 %v35160_v29  ;;  %1621 = vmatprep.mubr.f32.mxu1 %v38316_v3 }
  0x3f   :  { %1638 = vmatprep.subr.mxu1 %v1637_v43  ;;  %v155_v60 = vadd.f32 %v33299_v56, %v139_v54 }
  0x41   :  { %1627 = vmatmul.mubr.f32.vlgmr.msra.gmra.mrb[4].mxu1 %v35045_v42  ;;  %1244 = vmatmul.mubr.f32.vlgmr.msra.gmra.mrb[2].mxu0 %v35003_v18  ;;  %v35412_v1 = vand.u32 4294901760, %v155_v60 }
  0x42   :  { %1644 = vmatpush1.msra.mxu1 %v1643_v44  ;;  %1255 = vmatpush1.msra.mxu0 %v35151_v25  ;;  %v33280_v44 = vld [vmem:[%s38305_s0 + $0x160] sm:$0xff] }
  0x43   :  { %1318 = vmatprep.mubr.f32.mxu0 %v38316_v3  ;;  %1328 = vmatprep.subr.mxu0 %v35127_v16 }
  0x44   :  { %1707 = vmatprep.mubr.f32.mxu1 %v38316_v3  ;;  %1717 = vmatprep.subr.mxu1 %v35166_v31 }
  0x49   :  { %1709 = vmatmul.mubr.f32.vlgmr.msra.gmra.mrb[4].mxu1 %v35003_v18  ;;  %1321 = vmatmul.mubr.f32.vlgmr.msra.gmra.mrb[2].mxu0 %v35018_v27 }
  0x4a   :  { %1720 = vmatpush1.msra.mxu1 %v35175_v35  ;;  %1330 = vmatpush1.msra.mxu0 %v35138_v20  ;;  %v33265_v35 = vld [vmem:[%s38305_s0 + $0xe8] sm:$0xff] }
  0x4b   :  { %1393 = vmatprep.mubr.f32.mxu0 %v38316_v3  ;;  %1406 = vmatprep.subr.mxu0 %v1170_v28  ;;  %v2108_v28 = vand.u32 4294901760, %v2107_v23  ;;  %v121_v32 = vadd.f32 %v33265_v35, %v48_v34 }
  0x4c   :  { %1783 = vmatprep.mubr.f32.mxu1 %v38316_v3  ;;  %1793 = vmatprep.subr.mxu1 %v35153_v26 }
  0x51   :  { %1786 = vmatmul.mubr.f32.vlgmr.msra.gmra.mrb[4].mxu1 %v35018_v27  ;;  %1397 = vmatmul.mubr.f32.vlgmr.msra.gmra.mrb[2].mxu0 %v35028_v33 }
  0x52   :  { %1795 = vmatpush1.msra.mxu1 %v35160_v29  ;;  %1410 = vmatpush1.msra.mxu0 %v1176_v30 }
  0x53   :  { %1473 = vmatprep.mubr.f32.mxu0 %v38316_v3  ;;  %1482 = vmatprep.subr.mxu0 %v35127_v16  ;;  %v35292_v16 = vand.u32 4294901760, %v150_v12 }
  0x54   :  { %1858 = vmatprep.mubr.f32.mxu1 %v38316_v3  ;;  %1871 = vmatprep.subr.mxu1 %v1635_v36  ;;  %v47_v36 = vld [vmem:[%s38305_s0 + $0x60] sm:$0xff] }
  0x55   :  { %v35307_v22 = vsub.f32 %v150_v12, %v35292_v16  ;;  %v120_v40 = vadd.f32 %v33264_v37, %v47_v36 }
  0x57   :  { %v2571_v25 = vand.u32 4294901760, %v35307_v22  ;;  %v136_v50 = vadd.f32 %v33280_v44, %v120_v40 }
  0x59   :  { %1862 = vmatmul.mubr.f32.vlgmr.msra.gmra.mrb[4].mxu1 %v35028_v33  ;;  %1475 = vmatmul.mubr.f32.vlgmr.msra.gmra.mrb[2].mxu0 %v35003_v18  ;;  %v152_v57 = vadd.f32 %v33296_v52, %v136_v50 }
  0x5a   :  { %1875 = vmatpush1.msra.mxu1 %v1641_v38  ;;  %1484 = vmatpush1.msra.mxu0 %v35138_v20  ;;  %v2565_v20 = vand.u32 4294901760, %v35297_v17  ;;  %v33281_v38 = vld [vmem:[%s38305_s0 + $0x168] sm:$0xff] }
  0x5b   :  { %1547 = vmatprep.mubr.f32.mxu0 %v38316_v3  ;;  %1938 = vmatprep.mubr.f32.mxu1 %v38316_v3  ;;  %v137_v43 = vadd.f32 %v33281_v38, %v121_v32  ;;  %v35408_v62 = vand.u32 4294901760, %v152_v57 }
  0x5c   :  { %1947 = vmatprep.subr.mxu1 %v35153_v26  ;;  %2021 = vmatprep.subr.mxu0 %v35263_v6  ;;  %v2566_v26 = vsub.f32 %v35297_v17, %v2565_v20 }
  0x5d   :  { %v153_v51 = vadd.f32 %v33297_v45, %v137_v43  ;;  %v3035_v2 = vsub.f32 %v152_v57, %v35408_v62 }
  0x5e   :  { %v2567_v30 = vand.u32 4294901760, %v2566_v26 }
  0x5f   :  { %v35395_v58 = vand.u32 4294901760, %v153_v51  ;;  %v3036_v7 = vand.u32 4294901760, %v3035_v2 }
  0x61   :  { %1940 = vmatmul.mubr.f32.vlgmr.msra.gmra.mrb[4].mxu1 %v35003_v18  ;;  %1549 = vmatmul.mubr.f32.vlgmr.msra.gmra.mrb[2].mxu0 %v35003_v18  ;;  %v3029_v63 = vsub.f32 %v153_v51, %v35395_v58  ;;  %v3037_v12 = vsub.f32 %v3035_v2, %v3036_v7 }
  0x62   :  { %1949 = vmatpush1.msra.mxu1 %v35160_v29  ;;  %2012 = vmatprep.mubr.f32.mxu1 %v38316_v3  ;;  %v2572_v29 = vsub.f32 %v35307_v22, %v2571_v25 }
  0x63   :  { %2486 = vmatprep.subr.mxu1 %v35282_v13  ;;  %2023 = vmatpush1.msra.mxu0 %v35273_v10  ;;  %v3030_v4 = vand.u32 4294901760, %v3029_v63 }
  0x64   :  { %2086 = vmatprep.mubr.f32.mxu0 %v38316_v3  ;;  %2103 = vmatprep.subr.mxu0 %v2102_v24  ;;  %v2573_v31 = vand.u32 4294901760, %v2572_v29 }
  0x65   :  { %2092 = vmatmul.mubr.f32.vlgmr.msra.gmra.mrb[4].mxu0 %v35045_v42  ;;  %v3031_v8 = vsub.f32 %v3029_v63, %v3030_v4 }
  0x66   :  { %2109 = vmatpush1.msra.mxu0 %v2108_v28  ;;  %2172 = vmatprep.mubr.f32.mxu0 %v38316_v3  ;;  %v106_v28 = vld [vmem:[%s38307_s2 + $0x18] sm:$0xff] }
  0x67   :  { %2182 = vmatprep.subr.mxu0 %v35280_v11  ;;  %v3939_v36 = vsel %vm3928_vm1, %v106_v28, 0 }
  0x68   :  { %v35509_v44 = vand.u32 4294901760, %v3939_v36 }
  0x69   :  { %2014 = vmatmul.mubr.f32.vlgmr.msra.gmra.mrb[4].mxu1 %v35003_v18 }
  0x6a   :  { %2488 = vmatpush1.msra.mxu1 %v35292_v16  ;;  %2551 = vmatprep.mubr.f32.mxu1 %v38316_v3  ;;  %v35525_v56 = vsub.f32 %v3939_v36, %v35509_v44 }
  0x6b   :  { %2568 = vmatprep.subr.mxu1 %v2567_v30 }
  0x6d   :  { %2557 = vmatmul.mubr.f32.vlgmr.msra.gmra.mrb[6].mxu1 %v35045_v42  ;;  %2174 = vmatmul.mubr.f32.vlgmr.msra.gmra.mrb[4].mxu0 %v35003_v18 }
  0x6e   :  { %2574 = vmatpush1.msra.mxu1 %v2573_v31  ;;  %2637 = vmatprep.mubr.f32.mxu1 %v38316_v3 }
  0x6f   :  { %2647 = vmatprep.subr.mxu1 %v35297_v17  ;;  %2185 = vmatpush1.msra.mxu0 %v35285_v14  ;;  %v3032_v14 = vand.u32 4294901760, %v3031_v8 }
  0x70   :  { %2248 = vmatprep.mubr.f32.mxu0 %v38316_v3  ;;  %2258 = vmatprep.subr.mxu0 %v35263_v6 }
  0x75   :  { %2639 = vmatmul.mubr.f32.vlgmr.msra.gmra.mrb[6].mxu1 %v35003_v18  ;;  %2251 = vmatmul.mubr.f32.vlgmr.msra.gmra.mrb[4].mxu0 %v35018_v27 }
  0x76   :  { %2650 = vmatpush1.msra.mxu1 %v35307_v22  ;;  %2713 = vmatprep.mubr.f32.mxu1 %v38316_v3  ;;  %v104_v22 = vld [vmem:[%s38307_s2 + $0x8] sm:$0xff] }
  0x77   :  { %2723 = vmatprep.subr.mxu1 %v35282_v13  ;;  %2260 = vmatpush1.msra.mxu0 %v35273_v10  ;;  %v3933_v23 = vsel %vm3928_vm1, %v104_v22, 0 }
  0x78   :  { %2323 = vmatprep.mubr.f32.mxu0 %v38316_v3  ;;  %2336 = vmatprep.subr.mxu0 %v2100_v15  ;;  %v3038_v15 = vand.u32 4294901760, %v3037_v12 }
  0x7d   :  { %2716 = vmatmul.mubr.f32.vlgmr.msra.gmra.mrb[6].mxu1 %v35018_v27  ;;  %2327 = vmatmul.mubr.f32.vlgmr.msra.gmra.mrb[4].mxu0 %v35028_v33 }
  0x7e   :  { %2725 = vmatpush1.msra.mxu1 %v35292_v16  ;;  %2788 = vmatprep.mubr.f32.mxu1 %v38316_v3 }
  0x7f   :  { %2801 = vmatprep.subr.mxu1 %v2565_v20  ;;  %2340 = vmatpush1.msra.mxu0 %v2106_v19 }
  0x80   :  { %2403 = vmatprep.mubr.f32.mxu0 %v38316_v3  ;;  %2412 = vmatprep.subr.mxu0 %v35263_v6  ;;  %v3494_v6 = vsub.f32 %v155_v60, %v35412_v1 }
  0x82   :  { %v3495_v11 = vand.u32 4294901760, %v3494_v6 }
  0x85   :  { %2792 = vmatmul.mubr.f32.vlgmr.msra.gmra.mrb[6].mxu1 %v35028_v33  ;;  %2405 = vmatmul.mubr.f32.vlgmr.msra.gmra.mrb[4].mxu0 %v35003_v18 }
  0x86   :  { %2805 = vmatpush1.msra.mxu1 %v2571_v25  ;;  %2868 = vmatprep.mubr.f32.mxu1 %v38316_v3  ;;  %v35486_v25 = vand.u32 4294901760, %v3933_v23 }
  0x87   :  { %2877 = vmatprep.subr.mxu1 %v35282_v13  ;;  %2414 = vmatpush1.msra.mxu0 %v35273_v10  ;;  %v3501_v13 = vand.u32 4294901760, %v3500_v9  ;;  %v3496_v10 = vsub.f32 %v3494_v6, %v3495_v11 }
  0x88   :  { %2477 = vmatprep.mubr.f32.mxu0 %v38316_v3  ;;  %2951 = vmatprep.subr.mxu0 %v35395_v58  ;;  %v35496_v30 = vsub.f32 %v3933_v23, %v35486_v25 }
  0x89   :  { %v3502_v17 = vsub.f32 %v3500_v9, %v3501_v13  ;;  %v3497_v19 = vand.u32 4294901760, %v3496_v10 }
  0x8a   :  { %v35504_v41 = vand.u32 4294901760, %v35496_v30 }
  0x8c   :  { %v4071_v51 = vsub.f32 %v35496_v30, %v35504_v41 }
  0x8d   :  { %2870 = vmatmul.mubr.f32.vlgmr.msra.gmra.mrb[6].mxu1 %v35003_v18  ;;  %2479 = vmatmul.mubr.f32.vlgmr.msra.gmra.mrb[4].mxu0 %v35003_v18 }
  0x8e   :  { %2879 = vmatpush1.msra.mxu1 %v35292_v16  ;;  %2942 = vmatprep.mubr.f32.mxu1 %v38316_v3  ;;  %v3503_v16 = vand.u32 4294901760, %v3502_v17  ;;  %v35531_v61 = vand.u32 4294901760, %v4071_v51 }
  0x8f   :  { %3416 = vmatprep.subr.mxu1 %v35412_v1  ;;  %2953 = vmatpush1.msra.mxu0 %v35408_v62 }
  0x90   :  { %3016 = vmatprep.mubr.f32.mxu0 %v38316_v3  ;;  %3033 = vmatprep.subr.mxu0 %v3032_v14 }
  0x91   :  { %3022 = vmatmul.mubr.f32.vlgmr.msra.gmra.mrb[6].mxu0 %v35045_v42 }
  0x92   :  { %3039 = vmatpush1.msra.mxu0 %v3038_v15  ;;  %3102 = vmatprep.mubr.f32.mxu0 %v38316_v3 }
  0x93   :  { %3112 = vmatprep.subr.mxu0 %v3029_v63 }
  0x95   :  { %2944 = vmatmul.mubr.f32.vlgmr.msra.gmra.mrb[6].mxu1 %v35003_v18 }
  0x96   :  { %3418 = vmatpush1.msra.mxu1 %v35419_v5  ;;  %3481 = vmatprep.mubr.f32.mxu1 %v38316_v3 }
  0x97   :  { %3498 = vmatprep.subr.mxu1 %v3497_v19 }
  0x99   :  { %3487 = vmatmul.mubr.f32.vlgmr.msra.gmra.mrb[8].mxu1 %v35045_v42  ;;  %3104 = vmatmul.mubr.f32.vlgmr.msra.gmra.mrb[6].mxu0 %v35003_v18  ;;  %v103_v42 = vld [vmem:[%s38307_s2] sm:$0xff] }
  0x9a   :  { %3504 = vmatpush1.msra.mxu1 %v3503_v16  ;;  %3567 = vmatprep.mubr.f32.mxu1 %v38316_v3  ;;  %v3930_v21 = vsel %vm3928_vm1, %v103_v42, 0 }
  0x9b   :  { %3577 = vmatprep.subr.mxu1 %v3494_v6  ;;  %3115 = vmatpush1.msra.mxu0 %v3035_v2  ;;  %v35477_v20 = vand.u32 4294901760, %v3930_v21  ;;  %v35538_v2 = vand.u32 4294901760, %v35525_v56 }
  0x9c   :  { %3178 = vmatprep.mubr.f32.mxu0 %v38316_v3  ;;  %3188 = vmatprep.subr.mxu0 %v35395_v58 }
  0x9d   :  { %v35484_v24 = vsub.f32 %v3930_v21, %v35477_v20 }
  0x9f   :  { %v35493_v29 = vand.u32 4294901760, %v35484_v24 }
  0xa1   :  { %3569 = vmatmul.mubr.f32.vlgmr.msra.gmra.mrb[8].mxu1 %v35003_v18  ;;  %3181 = vmatmul.mubr.f32.vlgmr.msra.gmra.mrb[6].mxu0 %v35018_v27  ;;  %v4060_v39 = vsub.f32 %v35484_v24, %v35493_v29 }
  0xa2   :  { %3580 = vmatpush1.msra.mxu1 %v3500_v9  ;;  %3643 = vmatprep.mubr.f32.mxu1 %v38316_v3 }
  0xa3   :  { %3653 = vmatprep.subr.mxu1 %v35412_v1  ;;  %3190 = vmatpush1.msra.mxu0 %v35408_v62  ;;  %v35519_v54 = vand.u32 4294901760, %v4060_v39 }
  0xa4   :  { %3253 = vmatprep.mubr.f32.mxu0 %v38316_v3  ;;  %3266 = vmatprep.subr.mxu0 %v3030_v4 }
  0xa9   :  { %3646 = vmatmul.mubr.f32.vlgmr.msra.gmra.mrb[8].mxu1 %v35018_v27  ;;  %3257 = vmatmul.mubr.f32.vlgmr.msra.gmra.mrb[6].mxu0 %v35028_v33 }
  0xaa   :  { %3655 = vmatpush1.msra.mxu1 %v35419_v5  ;;  %3718 = vmatprep.mubr.f32.mxu1 %v38316_v3 }
  0xab   :  { %3731 = vmatprep.subr.mxu1 %v3495_v11  ;;  %3270 = vmatpush1.msra.mxu0 %v3036_v7  ;;  %v4093_v11 = vsub.f32 %v35525_v56, %v35538_v2 }
  0xac   :  { %3333 = vmatprep.mubr.f32.mxu0 %v38316_v3  ;;  %3342 = vmatprep.subr.mxu0 %v35395_v58 }
  0xb1   :  { %3722 = vmatmul.mubr.f32.vlgmr.msra.gmra.mrb[8].mxu1 %v35028_v33  ;;  %3335 = vmatmul.mubr.f32.vlgmr.msra.gmra.mrb[6].mxu0 %v35003_v18 }
  0xb2   :  { %3735 = vmatpush1.msra.mxu1 %v3501_v13  ;;  %3798 = vmatprep.mubr.f32.mxu1 %v38316_v3  ;;  %v35560_v13 = vand.u32 4294901760, %v4093_v11 }
  0xb3   :  { %3807 = vmatprep.subr.mxu1 %v35412_v1  ;;  %3344 = vmatpush1.msra.mxu0 %v35408_v62 }
  0xb4   :  { %3407 = vmatprep.mubr.f32.mxu0 %v38316_v3 }
  0xb9   :  { %3800 = vmatmul.mubr.f32.vlgmr.msra.gmra.mrb[8].mxu1 %v35003_v18  ;;  %3409 = vmatmul.mubr.f32.vlgmr.msra.gmra.mrb[6].mxu0 %v35003_v18 }
  0xba   :  { %3809 = vmatpush1.msra.mxu1 %v35419_v5  ;;  %3872 = vmatprep.mubr.f32.mxu1 %v38316_v3 }
  0xbb   :  { %4272 = vmatprep.mubr.f32.mxu0 %v38316_v3 }
  0xc1   :  { %3874 = vmatmul.mubr.f32.vlgmr.msra.gmra.mrb[8].mxu1 %v35003_v18  ;;  %v105_v18 = vld [vmem:[%s38307_s2 + $0x10] sm:$0xff] }
  0xc2   :  { %4056 = vmatprep.mubr.f32.mxu1 %v38316_v3  ;;  %v3936_v26 = vsel %vm3928_vm1, %v105_v18, 0 }
  0xc3   :  { %v35498_v34 = vand.u32 4294901760, %v3936_v26 }
  0xc5   :  { %v35507_v43 = vsub.f32 %v3936_v26, %v35498_v34 }
  0xc7   :  { %v35522_v55 = vand.u32 4294901760, %v35507_v43 }
  0xc9   :  { %v4082_v1 = vsub.f32 %v35507_v43, %v35522_v55 }
  0xcb   :  { %v35551_v9 = vand.u32 4294901760, %v4082_v1 }
  0xe4   :  { %v233_v27 = vpop.f32.mrb[0].mxu1 }
  0xe5   :  { %v235_v33 = vpop.f32.mrb[1].mxu1 }
 0x108   :  { %v620_v31 = vpop.f32.mrb[0].mxu0 }
 0x109   :  { %v33588_v35 = vadd.f32 %v620_v31, %v233_v27  ;;  %v622_v32 = vpop.f32.mrb[1].mxu0 }
 0x10a   :  { %v33589_v37 = vadd.f32 %v622_v32, %v235_v33 }
 0x10b   :  { %vm3880_vm3 = vcmp.ge.f32.partialorder %v33588_v35, 0.0  ;;  %v3896_v38 = vmul.f32 0.2, %v33588_v35 }
 0x10c   :  { %vm3881_vm4 = vcmp.ge.f32.partialorder %v33589_v37, 0.0  ;;  %v3897_v40 = vmul.f32 0.2, %v33589_v37 }
 0x10d   :  { %v3912_v45 = vsel %vm3880_vm3, %v33588_v35, %v3896_v38 }
 0x10e   :  { %v3943_v46 = vsel %vm3941_vm2, %v3912_v45, 0  ;;  %v3913_v47 = vsel %vm3881_vm4, %v33589_v37, %v3897_v40 }
 0x10f   :  { %v35512_v48 = vand.u32 4294901760, %v3943_v46  ;;  %v3946_v49 = vsel %vm3941_vm2, %v3913_v47, 0 }
 0x110   :  { %v1085_v50 = vpop.f32.mrb[2].mxu1  ;;  %v35517_v52 = vand.u32 4294901760, %v3946_v49 }
 0x111   :  { %v1087_v53 = vpop.f32.mrb[3].mxu1  ;;  %v4108_v57 = vsub.f32 %v3943_v46, %v35512_v48  ;;  %v3898_v12 = vmul.f32 0.2, %v1085_v50  ;;  %vm3882_vm6 = vcmp.ge.f32.partialorder %v1085_v50, 0.0 }
 0x112   :  { %vm3883_vm5 = vcmp.ge.f32.partialorder %v1087_v53, 0.0  ;;  %v3899_v58 = vmul.f32 0.2, %v1087_v53  ;;  %3991 = vmatprep.subr.mxu1 %v35517_v52  ;;  %v4102_v59 = vsub.f32 %v3946_v49, %v35517_v52 }
 0x113   :  { %3993 = vmatpush1.msra.mxu1 %v35512_v48  ;;  %v4109_v62 = vand.u32 4294901760, %v4108_v57  ;;  %v3914_v15 = vsel %vm3882_vm6, %v1085_v50, %v3898_v12 }
 0x114   :  { %v3915_v60 = vsel %vm3883_vm5, %v1087_v53, %v3899_v58  ;;  %4062 = vmatmul.mubr.f32.vlgmr.msra.gmra.mrb[10].mxu1 %v35519_v54  ;;  %4206 = vmatprep.subr.mxu0 %v4102_v59  ;;  %v4103_v0 = vand.u32 4294901760, %v4102_v59  ;;  %v3949_v17 = vsel %vm3941_vm2, %v3914_v15, 0 }
 0x115   :  { %v3952_v63 = vsel %vm3941_vm2, %v3915_v60, 0  ;;  %4209 = vmatpush1.msra.mxu0 %v4108_v57  ;;  %4067 = vmatprep.mubr.f32.mxu1 %v38316_v3  ;;  %v4110_v5 = vsub.f32 %v4108_v57, %v4109_v62  ;;  %v35573_v16 = vand.u32 4294901760, %v3949_v17 }
 0x116   :  { %v35540_v4 = vand.u32 4294901760, %v3952_v63  ;;  %4275 = vmatmul.mubr.f32.vlgmr.msra.gmra.mrb[8].mxu0 %v35484_v24  ;;  %4306 = vmatprep.subr.mxu0 %v35517_v52  ;;  %v4104_v6 = vsub.f32 %v4102_v59, %v4103_v0 }
 0x117   :  { %4308 = vmatpush1.msra.mxu0 %v35512_v48  ;;  %4280 = vmatprep.mubr.f32.mxu0 %v38316_v3  ;;  %v4111_v14 = vand.u32 4294901760, %v4110_v5  ;;  %v35581_v33 = vsub.f32 %v3949_v17, %v35573_v16 }
 0x118   :  { %v35548_v7 = vsub.f32 %v3952_v63, %v35540_v4  ;;  %4073 = vmatmul.mubr.f32.gmra.mrb[12].mxu1 %v35531_v61  ;;  %4411 = vmatprep.subr.mxu0 %v4103_v0  ;;  %v4105_v8 = vand.u32 4294901760, %v4104_v6 }
 0x119   :  { %4078 = vmatprep.mubr.f32.mxu1 %v38316_v3  ;;  %v4721_v42 = vand.u32 4294901760, %v35581_v33 }
 0x11a   :  { %4106 = vmatprep.subr.mxu1 %v4105_v8  ;;  %4283 = vmatmul.mubr.f32.gmra.mrb[10].mxu0 %v35496_v30  ;;  %v4715_v10 = vand.u32 4294901760, %v35548_v7 }
 0x11b   :  { %4112 = vmatpush1.msra.mxu1 %v4111_v14  ;;  %4288 = vmatprep.mubr.f32.mxu0 %v38316_v3  ;;  %v4722_v21 = vsub.f32 %v35581_v33, %v4721_v42 }
 0x11c   :  { %4084 = vmatmul.mubr.f32.gmra.mrb[14].mxu1 %v35551_v9  ;;  %4603 = vmatprep.subr.mxu1 %v35540_v4  ;;  %v4716_v19 = vsub.f32 %v35548_v7, %v4715_v10 }
 0x11d   :  { %4089 = vmatprep.mubr.f32.mxu1 %v38316_v3  ;;  %v4723_v22 = vand.u32 4294901760, %v4722_v21 }
 0x11e   :  { %4291 = vmatmul.mubr.f32.gmra.mrb[12].mxu0 %v35507_v43  ;;  %v4717_v27 = vand.u32 4294901760, %v4716_v19 }
 0x11f   :  { %4296 = vmatprep.mubr.f32.mxu0 %v38316_v3 }
 0x120   :  { %4095 = vmatmul.mubr.f32.gmra.mrb[16].mxu1 %v35560_v13 }
 0x121   :  { %4175 = vmatprep.mubr.f32.mxu1 %v38316_v3 }
 0x122   :  { %4299 = vmatmul.mubr.f32.gmra.mrb[14].mxu0 %v35525_v56 }
 0x123   :  { %4371 = vmatprep.mubr.f32.mxu0 %v38316_v3 }
 0x124   :  { %4177 = vmatmul.mubr.f32.vlgmr.msra.gmra.mrb[10].mxu1 %v35477_v20 }
 0x125   :  { %4605 = vmatpush1.msra.mxu1 %v35573_v16  ;;  %4182 = vmatprep.mubr.f32.mxu1 %v38316_v3 }
 0x126   :  { %4718 = vmatprep.subr.mxu1 %v4717_v27  ;;  %4375 = vmatmul.mubr.f32.vlgmr.msra.gmra.mrb[8].mxu0 %v35493_v29 }
 0x127   :  { %4415 = vmatpush1.msra.mxu0 %v4109_v62  ;;  %4380 = vmatprep.mubr.f32.mxu0 %v38316_v3 }
 0x128   :  { %4508 = vmatprep.subr.mxu0 %v35517_v52  ;;  %4184 = vmatmul.mubr.f32.gmra.mrb[12].mxu1 %v35486_v25 }
 0x129   :  { %4189 = vmatprep.mubr.f32.mxu1 %v38316_v3 }
 0x12a   :  { %4384 = vmatmul.mubr.f32.gmra.mrb[10].mxu0 %v35504_v41 }
 0x12b   :  { %4389 = vmatprep.mubr.f32.mxu0 %v38316_v3 }
 0x12c   :  { %4191 = vmatmul.mubr.f32.gmra.mrb[14].mxu1 %v35498_v34 }
 0x12d   :  { %4196 = vmatprep.mubr.f32.mxu1 %v38316_v3 }
 0x12e   :  { %4393 = vmatmul.mubr.f32.gmra.mrb[12].mxu0 %v35522_v55 }
 0x12f   :  { %4398 = vmatprep.mubr.f32.mxu0 %v38316_v3 }
 0x130   :  { %4198 = vmatmul.mubr.f32.gmra.mrb[16].mxu1 %v35509_v44 }
 0x131   :  { %4668 = vmatprep.mubr.f32.mxu1 %v38316_v3 }
 0x132   :  { %4402 = vmatmul.mubr.f32.gmra.mrb[14].mxu0 %v35538_v2 }
 0x133   :  { %4478 = vmatprep.mubr.f32.mxu0 %v38316_v3 }
 0x134   :  { %4674 = vmatmul.mubr.f32.vlgmr.msra.gmra.mrb[18].mxu1 %v35519_v54  ;;  %v1550_v23 = vpop.f32.mrb[2].mxu0 }
 0x135   :  { %4724 = vmatpush1.msra.mxu1 %v4723_v22  ;;  %4679 = vmatprep.mubr.f32.mxu1 %v38316_v3  ;;  %v1552_v18 = vpop.f32.mrb[3].mxu0  ;;  %v3900_v31 = vmul.f32 0.2, %v1550_v23  ;;  %vm3884_vm8 = vcmp.ge.f32.partialorder %v1550_v23, 0.0 }
 0x136   :  { %4818 = vmatprep.subr.mxu1 %v35548_v7  ;;  %4480 = vmatmul.mubr.f32.vlgmr.msra.gmra.mrb[8].mxu0 %v35477_v20  ;;  %vm3885_vm7 = vcmp.ge.f32.partialorder %v1552_v18, 0.0  ;;  %v3901_v26 = vmul.f32 0.2, %v1552_v18 }
 0x137   :  { %4510 = vmatpush1.msra.mxu0 %v35512_v48  ;;  %4485 = vmatprep.mubr.f32.mxu0 %v38316_v3  ;;  %v3916_v39 = vsel %vm3884_vm8, %v1550_v23, %v3900_v31 }
 0x138   :  { %4685 = vmatmul.mubr.f32.gmra.mrb[20].mxu1 %v35531_v61  ;;  %v3917_v28 = vsel %vm3885_vm7, %v1552_v18, %v3901_v26  ;;  %v3955_v45 = vsel %vm3941_vm2, %v3916_v39, 0 }
 0x139   :  { %4690 = vmatprep.mubr.f32.mxu1 %v38316_v3  ;;  %v3958_v35 = vsel %vm3941_vm2, %v3917_v28, 0  ;;  %v35635_v47 = vand.u32 4294901760, %v3955_v45 }
 0x13a   :  { %4487 = vmatmul.mubr.f32.gmra.mrb[10].mxu0 %v35486_v25  ;;  %v35611_v32 = vand.u32 4294901760, %v3958_v35 }
 0x13b   :  { %4492 = vmatprep.mubr.f32.mxu0 %v38316_v3  ;;  %v35644_v49 = vsub.f32 %v3955_v45, %v35635_v47 }
 0x13c   :  { %v35614_v36 = vpop.f32.mrb[4].mxu1  ;;  %4696 = vmatmul.mubr.f32.gmra.mrb[22].mxu1 %v35551_v9  ;;  %v35618_v37 = vsub.f32 %v3958_v35, %v35611_v32  ;;  %5215 = vmatprep.subr.mxu0 %v35611_v32 }
 0x13d   :  { %v35621_v38 = vpop.f32.mrb[5].mxu1  ;;  %4701 = vmatprep.mubr.f32.mxu1 %v38316_v3  ;;  %v5333_v50 = vand.u32 4294901760, %v35644_v49  ;;  %v3902_v5 = vmul.f32 0.2, %v35614_v36  ;;  %vm3886_vm10 = vcmp.ge.f32.partialorder %v35614_v36, 0.0 }
 0x13e   :  { %4494 = vmatmul.mubr.f32.gmra.mrb[12].mxu0 %v35498_v34  ;;  %v5327_v40 = vand.u32 4294901760, %v35618_v37  ;;  %v3903_v60 = vmul.f32 0.2, %v35621_v38  ;;  %vm3887_vm9 = vcmp.ge.f32.partialorder %v35621_v38, 0.0 }
 0x13f   :  { %4499 = vmatprep.mubr.f32.mxu0 %v38316_v3  ;;  %v5334_v51 = vsub.f32 %v35644_v49, %v5333_v50  ;;  %v3918_v7 = vsel %vm3886_vm10, %v35614_v36, %v3902_v5  ;;  %vm34908_vm10 = vmmov 0  }
 0x140   :  { %4707 = vmatmul.mubr.f32.gmra.mrb[24].mxu1 %v35560_v13  ;;  %v5328_v46 = vsub.f32 %v35618_v37, %v5327_v40  ;;  %v3919_v62 = vsel %vm3887_vm9, %v35621_v38, %v3903_v60  ;;  %v3961_v8 = vsel %vm3941_vm2, %v3918_v7, 0 }
 0x141   :  { %4787 = vmatprep.mubr.f32.mxu1 %v38316_v3  ;;  %v5335_v52 = vand.u32 4294901760, %v5334_v51  ;;  %v3964_v63 = vsel %vm3941_vm2, %v3919_v62, 0  ;;  %v35753_v12 = vand.u32 4294901760, %v3961_v8 }
 0x142   :  { %4501 = vmatmul.mubr.f32.gmra.mrb[14].mxu0 %v35509_v44  ;;  %v5329_v48 = vand.u32 4294901760, %v5328_v46  ;;  %v35716_v0 = vand.u32 4294901760, %v3964_v63 }
 0x143   :  { %4573 = vmatprep.mubr.f32.mxu0 %v38316_v3 }
 0x144   :  { %4789 = vmatmul.mubr.f32.vlgmr.msra.gmra.mrb[18].mxu1 %v35477_v20  ;;  %v35726_v1 = vsub.f32 %v3964_v63, %v35716_v0 }
 0x145   :  { %4821 = vmatpush1.msra.mxu1 %v35581_v33  ;;  %4794 = vmatprep.mubr.f32.mxu1 %v38316_v3 }
 0x146   :  { %4918 = vmatprep.subr.mxu1 %v35540_v4  ;;  %4575 = vmatmul.mubr.f32.vlgmr.msra.gmra.mrb[8].mxu0 %v35477_v20  ;;  %v5939_v6 = vand.u32 4294901760, %v35726_v1 }
 0x147   :  { %4580 = vmatprep.mubr.f32.mxu0 %v38316_v3  ;;  %5217 = vmatpush1.msra.mxu0 %v35635_v47 }
 0x148   :  { %4796 = vmatmul.mubr.f32.gmra.mrb[20].mxu1 %v35486_v25  ;;  %5330 = vmatprep.subr.mxu0 %v5329_v48  ;;  %v5940_v11 = vsub.f32 %v35726_v1, %v5939_v6 }
 0x149   :  { %4801 = vmatprep.mubr.f32.mxu1 %v38316_v3 }
 0x14a   :  { %4582 = vmatmul.mubr.f32.gmra.mrb[10].mxu0 %v35486_v25  ;;  %v5941_v14 = vand.u32 4294901760, %v5940_v11 }
 0x14b   :  { %4587 = vmatprep.mubr.f32.mxu0 %v38316_v3 }
 0x14c   :  { %4803 = vmatmul.mubr.f32.gmra.mrb[22].mxu1 %v35498_v34 }
 0x14d   :  { %4808 = vmatprep.mubr.f32.mxu1 %v38316_v3 }
 0x14e   :  { %4589 = vmatmul.mubr.f32.gmra.mrb[12].mxu0 %v35498_v34 }
 0x14f   :  { %4594 = vmatprep.mubr.f32.mxu0 %v38316_v3 }
 0x150   :  { %4810 = vmatmul.mubr.f32.gmra.mrb[24].mxu1 %v35509_v44 }
 0x151   :  { %4884 = vmatprep.mubr.f32.mxu1 %v38316_v3 }
 0x152   :  { %4596 = vmatmul.mubr.f32.gmra.mrb[14].mxu0 %v35509_v44 }
 0x153   :  { %5280 = vmatprep.mubr.f32.mxu0 %v38316_v3 }
 0x154   :  { %4887 = vmatmul.mubr.f32.vlgmr.msra.gmra.mrb[18].mxu1 %v35484_v24 }
 0x155   :  { %4920 = vmatpush1.msra.mxu1 %v35573_v16  ;;  %4892 = vmatprep.mubr.f32.mxu1 %v38316_v3 }
 0x156   :  { %5023 = vmatprep.subr.mxu1 %v4715_v10  ;;  %5286 = vmatmul.mubr.f32.vlgmr.msra.gmra.mrb[16].mxu0 %v35519_v54  ;;  %v35761_v10 = vsub.f32 %v3961_v8, %v35753_v12 }
 0x157   :  { %5291 = vmatprep.mubr.f32.mxu0 %v38316_v3  ;;  %5336 = vmatpush1.msra.mxu0 %v5335_v52 }
 0x158   :  { %4895 = vmatmul.mubr.f32.gmra.mrb[20].mxu1 %v35496_v30  ;;  %5430 = vmatprep.subr.mxu0 %v35618_v37  ;;  %v5945_v17 = vand.u32 4294901760, %v35761_v10 }
 0x159   :  { %4900 = vmatprep.mubr.f32.mxu1 %v38316_v3 }
 0x15a   :  { %5297 = vmatmul.mubr.f32.gmra.mrb[18].mxu0 %v35531_v61  ;;  %v5946_v33 = vsub.f32 %v35761_v10, %v5945_v17 }
 0x15b   :  { %5302 = vmatprep.mubr.f32.mxu0 %v38316_v3 }
 0x15c   :  { %4903 = vmatmul.mubr.f32.gmra.mrb[22].mxu1 %v35507_v43  ;;  %v5947_v21 = vand.u32 4294901760, %v5946_v33 }
 0x15d   :  { %4908 = vmatprep.mubr.f32.mxu1 %v38316_v3 }
 0x15e   :  { %5308 = vmatmul.mubr.f32.gmra.mrb[20].mxu0 %v35551_v9 }
 0x15f   :  { %5313 = vmatprep.mubr.f32.mxu0 %v38316_v3 }
 0x160   :  { %4911 = vmatmul.mubr.f32.gmra.mrb[24].mxu1 %v35525_v56  ;;  %v35681_v53 = vpop.f32.mrb[4].mxu0 }
 0x161   :  { %4983 = vmatprep.mubr.f32.mxu1 %v38316_v3  ;;  %v35684_v57 = vpop.f32.mrb[5].mxu0  ;;  %v3904_v28 = vmul.f32 0.2, %v35681_v53  ;;  %vm3888_vm12 = vcmp.ge.f32.partialorder %v35681_v53, 0.0 }
 0x162   :  { %5319 = vmatmul.mubr.f32.gmra.mrb[22].mxu0 %v35560_v13  ;;  %v3905_v15 = vmul.f32 0.2, %v35684_v57  ;;  %vm3889_vm11 = vcmp.ge.f32.partialorder %v35684_v57, 0.0 }
 0x163   :  { %5399 = vmatprep.mubr.f32.mxu0 %v38316_v3  ;;  %v3920_v35 = vsel %vm3888_vm12, %v35681_v53, %v3904_v28 }
 0x164   :  { %4987 = vmatmul.mubr.f32.vlgmr.msra.gmra.mrb[18].mxu1 %v35493_v29 }
 0x165   :  { %5027 = vmatpush1.msra.mxu1 %v4721_v42  ;;  %4992 = vmatprep.mubr.f32.mxu1 %v38316_v3 }
 0x166   :  { %5120 = vmatprep.subr.mxu1 %v35540_v4  ;;  %5401 = vmatmul.mubr.f32.vlgmr.msra.gmra.mrb[16].mxu0 %v35477_v20  ;;  %v107_v4 = vld [vmem:[%s38308_s3] sm:$0xff] }
 0x167   :  { %5433 = vmatpush1.msra.mxu0 %v35644_v49  ;;  %5406 = vmatprep.mubr.f32.mxu0 %v38316_v3 }
 0x168   :  { %v35695_v58 = vpop.f32.mrb[6].mxu1  ;;  %5530 = vmatprep.subr.mxu0 %v35611_v32  ;;  %4996 = vmatmul.mubr.f32.gmra.mrb[20].mxu1 %v35504_v41 }
 0x169   :  { %v35699_v59 = vpop.f32.mrb[7].mxu1  ;;  %5001 = vmatprep.mubr.f32.mxu1 %v38316_v3  ;;  %9271 = vrot.lane.b32.xlu0 %v107_v4, %s34905_s26  ;;  %v3906_v52 = vmul.f32 0.2, %v35695_v58  ;;  %vm3890_vm14 = vcmp.ge.f32.partialorder %v35695_v58, 0.0 }
 0x16a   :  { %5408 = vmatmul.mubr.f32.gmra.mrb[18].mxu0 %v35486_v25  ;;  %vm3891_vm13 = vcmp.ge.f32.partialorder %v35699_v59, 0.0 }
 0x16b   :  { %5413 = vmatprep.mubr.f32.mxu0 %v38316_v3 }
 0x16c   :  { %5005 = vmatmul.mubr.f32.gmra.mrb[22].mxu1 %v35522_v55 }
 0x16d   :  { %5010 = vmatprep.mubr.f32.mxu1 %v38316_v3 }
 0x16e   :  { %5415 = vmatmul.mubr.f32.gmra.mrb[20].mxu0 %v35498_v34 }
 0x16f   :  { %5420 = vmatprep.mubr.f32.mxu0 %v38316_v3 }
 0x170   :  { %5014 = vmatmul.mubr.f32.gmra.mrb[24].mxu1 %v35538_v2 }
 0x171   :  { %5090 = vmatprep.mubr.f32.mxu1 %v38316_v3 }
 0x172   :  { %5422 = vmatmul.mubr.f32.gmra.mrb[22].mxu0 %v35509_v44 }
 0x173   :  { %5496 = vmatprep.mubr.f32.mxu0 %v38316_v3 }
 0x174   :  { %5092 = vmatmul.mubr.f32.vlgmr.msra.gmra.mrb[18].mxu1 %v35477_v20 }
 0x175   :  { %5122 = vmatpush1.msra.mxu1 %v35573_v16  ;;  %5097 = vmatprep.mubr.f32.mxu1 %v38316_v3  ;;  %v3921_v16 = vsel %vm3889_vm11, %v35684_v57, %v3905_v15  ;;  %v3922_v57 = vsel %vm3890_vm14, %v35695_v58, %v3906_v52 }
 0x176   :  { %5827 = vmatprep.subr.mxu1 %v35716_v0  ;;  %5499 = vmatmul.mubr.f32.vlgmr.msra.gmra.mrb[16].mxu0 %v35484_v24  ;;  %v3970_v42 = vsel %vm3941_vm2, %v3921_v16, 0 }
 0x177   :  { %5532 = vmatpush1.msra.mxu0 %v35635_v47  ;;  %5504 = vmatprep.mubr.f32.mxu0 %v38316_v3  ;;  %v35794_v23 = vand.u32 4294901760, %v3970_v42 }
 0x178   :  { %5635 = vmatprep.subr.mxu0 %v5327_v40  ;;  %5099 = vmatmul.mubr.f32.gmra.mrb[20].mxu1 %v35486_v25 }
 0x179   :  { %5104 = vmatprep.mubr.f32.mxu1 %v38316_v3  ;;  %v35805_v26 = vsub.f32 %v3970_v42, %v35794_v23 }
 0x17a   :  { %5507 = vmatmul.mubr.f32.gmra.mrb[18].mxu0 %v35496_v30 }
 0x17b   :  { %5512 = vmatprep.mubr.f32.mxu0 %v38316_v3  ;;  %v6551_v31 = vand.u32 4294901760, %v35805_v26 }
 0x17c   :  { %5106 = vmatmul.mubr.f32.gmra.mrb[22].mxu1 %v35498_v34 }
 0x17d   :  { %5111 = vmatprep.mubr.f32.mxu1 %v38316_v3  ;;  %v6552_v36 = vsub.f32 %v35805_v26, %v6551_v31 }
 0x17e   :  { %5515 = vmatmul.mubr.f32.gmra.mrb[20].mxu0 %v35507_v43 }
 0x17f   :  { %5520 = vmatprep.mubr.f32.mxu0 %v38316_v3  ;;  %v6553_v38 = vand.u32 4294901760, %v6552_v36 }
 0x180   :  { %5113 = vmatmul.mubr.f32.gmra.mrb[24].mxu1 %v35509_v44 }
 0x181   :  { %5185 = vmatprep.mubr.f32.mxu1 %v38316_v3 }
 0x182   :  { %5523 = vmatmul.mubr.f32.gmra.mrb[22].mxu0 %v35525_v56 }
 0x183   :  { %5595 = vmatprep.mubr.f32.mxu0 %v38316_v3 }
 0x184   :  { %5187 = vmatmul.mubr.f32.vlgmr.msra.gmra.mrb[18].mxu1 %v35477_v20 }
 0x185   :  { %5829 = vmatpush1.msra.mxu1 %v35753_v12  ;;  %5192 = vmatprep.mubr.f32.mxu1 %v38316_v3 }
 0x186   :  { %5942 = vmatprep.subr.mxu1 %v5941_v14  ;;  %5599 = vmatmul.mubr.f32.vlgmr.msra.gmra.mrb[16].mxu0 %v35493_v29 }
 0x187   :  { %5639 = vmatpush1.msra.mxu0 %v5333_v50  ;;  %5604 = vmatprep.mubr.f32.mxu0 %v38316_v3 }
 0x188   :  { %5732 = vmatprep.subr.mxu0 %v35611_v32  ;;  %5194 = vmatmul.mubr.f32.gmra.mrb[20].mxu1 %v35486_v25  ;;  %v3967_v32 = vsel %vm3941_vm2, %v3920_v35, 0 }
 0x189   :  { %5199 = vmatprep.mubr.f32.mxu1 %v38316_v3  ;;  %v35827_v37 = vand.u32 4294901760, %v3967_v32 }
 0x18a   :  { %5608 = vmatmul.mubr.f32.gmra.mrb[18].mxu0 %v35504_v41 }
 0x18b   :  { %5613 = vmatprep.mubr.f32.mxu0 %v38316_v3  ;;  %v35836_v39 = vsub.f32 %v3967_v32, %v35827_v37 }
 0x18c   :  { %5201 = vmatmul.mubr.f32.gmra.mrb[22].mxu1 %v35498_v34  ;;  %v35776_v19 = vpop.f32.mrb[6].mxu0 }
 0x18d   :  { %5206 = vmatprep.mubr.f32.mxu1 %v38316_v3  ;;  %v35780_v27 = vpop.f32.mrb[7].mxu0  ;;  %v6557_v40 = vand.u32 4294901760, %v35836_v39  ;;  %vm3892_vm3 = vcmp.ge.f32.partialorder %v35776_v19, 0.0 }
 0x18e   :  { %5617 = vmatmul.mubr.f32.gmra.mrb[20].mxu0 %v35522_v55  ;;  %vm3893_vm15 = vcmp.ge.f32.partialorder %v35780_v27, 0.0 }
 0x18f   :  { %5622 = vmatprep.mubr.f32.mxu0 %v38316_v3  ;;  %v6558_v45 = vsub.f32 %v35836_v39, %v6557_v40 }
 0x190   :  { %5208 = vmatmul.mubr.f32.gmra.mrb[24].mxu1 %v35509_v44 }
 0x191   :  { %5892 = vmatprep.mubr.f32.mxu1 %v38316_v3  ;;  %v6559_v46 = vand.u32 4294901760, %v6558_v45 }
 0x192   :  { %5626 = vmatmul.mubr.f32.gmra.mrb[22].mxu0 %v35538_v2 }
 0x193   :  { %5702 = vmatprep.mubr.f32.mxu0 %v38316_v3 }
 0x194   :  { %v35791_v22 = vpop.f32.mrb[8].mxu1  ;;  %5898 = vmatmul.mubr.f32.vlgmr.msra.gmra.mrb[26].mxu1 %v35519_v54 }
 0x195   :  { %v35796_v18 = vpop.f32.mrb[9].mxu1  ;;  %5948 = vmatpush1.msra.mxu1 %v5947_v21  ;;  %5903 = vmatprep.mubr.f32.mxu1 %v38316_v3  ;;  %vm3894_vm5 = vcmp.ge.f32.partialorder %v35791_v22, 0.0 }
 0x196   :  { %6042 = vmatprep.subr.mxu1 %v35726_v1  ;;  %5704 = vmatmul.mubr.f32.vlgmr.msra.gmra.mrb[16].mxu0 %v35477_v20  ;;  %v3909_v1 = vmul.f32 0.2, %v35780_v27  ;;  %vm3895_vm4 = vcmp.ge.f32.partialorder %v35796_v18, 0.0 }
 0x197   :  { %5734 = vmatpush1.msra.mxu0 %v35635_v47  ;;  %5709 = vmatprep.mubr.f32.mxu0 %v38316_v3  ;;  %v3907_v47 = vmul.f32 0.2, %v35699_v59 }
 0x198   :  { %5909 = vmatmul.mubr.f32.gmra.mrb[28].mxu1 %v35531_v61  ;;  %6439 = vmatprep.subr.mxu0 %v35794_v23  ;;  %v3925_v5 = vsel %vm3893_vm15, %v35780_v27, %v3909_v1 }
 0x199   :  { %5914 = vmatprep.mubr.f32.mxu1 %v38316_v3  ;;  %v3923_v48 = vsel %vm3891_vm13, %v35699_v59, %v3907_v47  ;;  %v3973_v59 = vsel %vm3941_vm2, %v3922_v57, 0 }
 0x19a   :  { %5711 = vmatmul.mubr.f32.gmra.mrb[18].mxu0 %v35486_v25  ;;  %v3976_v49 = vsel %vm3941_vm2, %v3923_v48, 0  ;;  %v35933_v62 = vand.u32 4294901760, %v3973_v59 }
 0x19b   :  { %5716 = vmatprep.mubr.f32.mxu0 %v38316_v3  ;;  %v35900_v50 = vand.u32 4294901760, %v3976_v49 }
 0x19c   :  { %5920 = vmatmul.mubr.f32.gmra.mrb[30].mxu1 %v35551_v9  ;;  %v35941_v63 = vsub.f32 %v3973_v59, %v35933_v62 }
 0x19d   :  { %5925 = vmatprep.mubr.f32.mxu1 %v38316_v3  ;;  %v35910_v51 = vsub.f32 %v3976_v49, %v35900_v50 }
 0x19e   :  { %5718 = vmatmul.mubr.f32.gmra.mrb[20].mxu0 %v35498_v34 }
 0x19f   :  { %5723 = vmatprep.mubr.f32.mxu0 %v38316_v3  ;;  %v7163_v53 = vand.u32 4294901760, %v35910_v51 }
 0x1a0   :  { %5931 = vmatmul.mubr.f32.gmra.mrb[32].mxu1 %v35560_v13 }
 0x1a1   :  { %6011 = vmatprep.mubr.f32.mxu1 %v38316_v3  ;;  %v7164_v60 = vsub.f32 %v35910_v51, %v7163_v53 }
 0x1a2   :  { %5725 = vmatmul.mubr.f32.gmra.mrb[22].mxu0 %v35509_v44 }
 0x1a3   :  { %5797 = vmatprep.mubr.f32.mxu0 %v38316_v3  ;;  %v7165_v58 = vand.u32 4294901760, %v7164_v60 }
 0x1a4   :  { %6013 = vmatmul.mubr.f32.vlgmr.msra.gmra.mrb[26].mxu1 %v35477_v20 }
 0x1a5   :  { %6045 = vmatpush1.msra.mxu1 %v35761_v10  ;;  %6018 = vmatprep.mubr.f32.mxu1 %v38316_v3  ;;  %v3908_v10 = vmul.f32 0.2, %v35776_v19 }
 0x1a6   :  { %6142 = vmatprep.subr.mxu1 %v35716_v0  ;;  %5799 = vmatmul.mubr.f32.vlgmr.msra.gmra.mrb[16].mxu0 %v35477_v20 }
 0x1a7   :  { %5804 = vmatprep.mubr.f32.mxu0 %v38316_v3  ;;  %6441 = vmatpush1.msra.mxu0 %v35827_v37  ;;  %v3924_v27 = vsel %vm3892_vm3, %v35776_v19, %v3908_v10 }
 0x1a8   :  { %6020 = vmatmul.mubr.f32.gmra.mrb[28].mxu1 %v35486_v25  ;;  %6554 = vmatprep.subr.mxu0 %v6553_v38  ;;  %v3979_v21 = vsel %vm3941_vm2, %v3924_v27, 0 }
 0x1a9   :  { %6025 = vmatprep.mubr.f32.mxu1 %v38316_v3  ;;  %v36016_v28 = vand.u32 4294901760, %v3979_v21 }
 0x1aa   :  { %5806 = vmatmul.mubr.f32.gmra.mrb[18].mxu0 %v35486_v25 }
 0x1ab   :  { %5811 = vmatprep.mubr.f32.mxu0 %v38316_v3  ;;  %v36026_v35 = vsub.f32 %v3979_v21, %v36016_v28 }
 0x1ac   :  { %6027 = vmatmul.mubr.f32.gmra.mrb[30].mxu1 %v35498_v34 }
 0x1ad   :  { %6032 = vmatprep.mubr.f32.mxu1 %v38316_v3  ;;  %v7781_v32 = vand.u32 4294901760, %v36026_v35 }
 0x1ae   :  { %5813 = vmatmul.mubr.f32.gmra.mrb[20].mxu0 %v35498_v34 }
 0x1af   :  { %5818 = vmatprep.mubr.f32.mxu0 %v38316_v3  ;;  %v7782_v36 = vsub.f32 %v36026_v35, %v7781_v32 }
 0x1b0   :  { %6034 = vmatmul.mubr.f32.gmra.mrb[32].mxu1 %v35509_v44 }
 0x1b1   :  { %6108 = vmatprep.mubr.f32.mxu1 %v38316_v3 }
 0x1b2   :  { %5820 = vmatmul.mubr.f32.gmra.mrb[22].mxu0 %v35509_v44 }
 0x1b3   :  { %6504 = vmatprep.mubr.f32.mxu0 %v38316_v3 }
 0x1b4   :  { %6111 = vmatmul.mubr.f32.vlgmr.msra.gmra.mrb[26].mxu1 %v35484_v24 }
 0x1b5   :  { %6144 = vmatpush1.msra.mxu1 %v35753_v12  ;;  %6116 = vmatprep.mubr.f32.mxu1 %v38316_v3 }
 0x1b6   :  { %6247 = vmatprep.subr.mxu1 %v5939_v6  ;;  %6510 = vmatmul.mubr.f32.vlgmr.msra.gmra.mrb[24].mxu0 %v35519_v54  ;;  %v3982_v6 = vsel %vm3941_vm2, %v3925_v5, 0 }
 0x1b7   :  { %6515 = vmatprep.mubr.f32.mxu0 %v38316_v3  ;;  %6560 = vmatpush1.msra.mxu0 %v6559_v46  ;;  %v35969_v8 = vand.u32 4294901760, %v3982_v6 }
 0x1b8   :  { %6119 = vmatmul.mubr.f32.gmra.mrb[28].mxu1 %v35496_v30  ;;  %6654 = vmatprep.subr.mxu0 %v35805_v26 }
 0x1b9   :  { %6124 = vmatprep.mubr.f32.mxu1 %v38316_v3  ;;  %v35983_v14 = vsub.f32 %v3982_v6, %v35969_v8 }
 0x1ba   :  { %6521 = vmatmul.mubr.f32.gmra.mrb[26].mxu0 %v35531_v61 }
 0x1bb   :  { %6526 = vmatprep.mubr.f32.mxu0 %v38316_v3  ;;  %v7775_v16 = vand.u32 4294901760, %v35983_v14 }
 0x1bc   :  { %6127 = vmatmul.mubr.f32.gmra.mrb[30].mxu1 %v35507_v43 }
 0x1bd   :  { %6132 = vmatprep.mubr.f32.mxu1 %v38316_v3 }
 0x1be   :  { %6532 = vmatmul.mubr.f32.gmra.mrb[28].mxu0 %v35551_v9 }
 0x1bf   :  { %6537 = vmatprep.mubr.f32.mxu0 %v38316_v3 }
 0x1c0   :  { %6135 = vmatmul.mubr.f32.gmra.mrb[32].mxu1 %v35525_v56 }
 0x1c1   :  { %6207 = vmatprep.mubr.f32.mxu1 %v38316_v3 }
 0x1c2   :  { %6543 = vmatmul.mubr.f32.gmra.mrb[30].mxu0 %v35560_v13 }
 0x1c3   :  { %6623 = vmatprep.mubr.f32.mxu0 %v38316_v3 }
 0x1c4   :  { %6211 = vmatmul.mubr.f32.vlgmr.msra.gmra.mrb[26].mxu1 %v35493_v29 }
 0x1c5   :  { %6251 = vmatpush1.msra.mxu1 %v5945_v17  ;;  %6216 = vmatprep.mubr.f32.mxu1 %v38316_v3 }
 0x1c6   :  { %6344 = vmatprep.subr.mxu1 %v35716_v0  ;;  %6625 = vmatmul.mubr.f32.vlgmr.msra.gmra.mrb[24].mxu0 %v35477_v20  ;;  %v7169_v0 = vand.u32 4294901760, %v35941_v63 }
 0x1c7   :  { %6657 = vmatpush1.msra.mxu0 %v35836_v39  ;;  %6630 = vmatprep.mubr.f32.mxu0 %v38316_v3 }
 0x1c8   :  { %6754 = vmatprep.subr.mxu0 %v35794_v23  ;;  %6220 = vmatmul.mubr.f32.gmra.mrb[28].mxu1 %v35504_v41  ;;  %v7170_v4 = vsub.f32 %v35941_v63, %v7169_v0 }
 0x1c9   :  { %6225 = vmatprep.mubr.f32.mxu1 %v38316_v3 }
 0x1ca   :  { %6632 = vmatmul.mubr.f32.gmra.mrb[26].mxu0 %v35486_v25  ;;  %v7171_v7 = vand.u32 4294901760, %v7170_v4 }
 0x1cb   :  { %6637 = vmatprep.mubr.f32.mxu0 %v38316_v3 }
 0x1cc   :  { %6229 = vmatmul.mubr.f32.gmra.mrb[30].mxu1 %v35522_v55 }
 0x1cd   :  { %6234 = vmatprep.mubr.f32.mxu1 %v38316_v3 }
 0x1ce   :  { %6639 = vmatmul.mubr.f32.gmra.mrb[28].mxu0 %v35498_v34 }
 0x1cf   :  { %6644 = vmatprep.mubr.f32.mxu0 %v38316_v3 }
 0x1d0   :  { %6238 = vmatmul.mubr.f32.gmra.mrb[32].mxu1 %v35538_v2 }
 0x1d1   :  { %6314 = vmatprep.mubr.f32.mxu1 %v38316_v3 }
 0x1d2   :  { %6646 = vmatmul.mubr.f32.gmra.mrb[30].mxu0 %v35509_v44 }
 0x1d3   :  { %6720 = vmatprep.mubr.f32.mxu0 %v38316_v3 }
 0x1d4   :  { %6316 = vmatmul.mubr.f32.vlgmr.msra.gmra.mrb[26].mxu1 %v35477_v20 }
 0x1d5   :  { %6346 = vmatpush1.msra.mxu1 %v35753_v12  ;;  %6321 = vmatprep.mubr.f32.mxu1 %v38316_v3 }
 0x1d6   :  { %7051 = vmatprep.subr.mxu1 %v35900_v50  ;;  %6723 = vmatmul.mubr.f32.vlgmr.msra.gmra.mrb[24].mxu0 %v35484_v24 }
 0x1d7   :  { %6756 = vmatpush1.msra.mxu0 %v35827_v37  ;;  %6728 = vmatprep.mubr.f32.mxu0 %v38316_v3 }
 0x1d8   :  { %6859 = vmatprep.subr.mxu0 %v6551_v31  ;;  %6323 = vmatmul.mubr.f32.gmra.mrb[28].mxu1 %v35486_v25 }
 0x1d9   :  { %6328 = vmatprep.mubr.f32.mxu1 %v38316_v3 }
 0x1da   :  { %6731 = vmatmul.mubr.f32.gmra.mrb[26].mxu0 %v35496_v30 }
 0x1db   :  { %6736 = vmatprep.mubr.f32.mxu0 %v38316_v3 }
 0x1dc   :  { %6330 = vmatmul.mubr.f32.gmra.mrb[30].mxu1 %v35498_v34 }
 0x1dd   :  { %6335 = vmatprep.mubr.f32.mxu1 %v38316_v3 }
 0x1de   :  { %6739 = vmatmul.mubr.f32.gmra.mrb[28].mxu0 %v35507_v43 }
 0x1df   :  { %6744 = vmatprep.mubr.f32.mxu0 %v38316_v3 }
 0x1e0   :  { %6337 = vmatmul.mubr.f32.gmra.mrb[32].mxu1 %v35509_v44 }
 0x1e1   :  { %6409 = vmatprep.mubr.f32.mxu1 %v38316_v3 }
 0x1e2   :  { %6747 = vmatmul.mubr.f32.gmra.mrb[30].mxu0 %v35525_v56 }
 0x1e3   :  { %6819 = vmatprep.mubr.f32.mxu0 %v38316_v3 }
 0x1e4   :  { %6411 = vmatmul.mubr.f32.vlgmr.msra.gmra.mrb[26].mxu1 %v35477_v20 }
 0x1e5   :  { %7053 = vmatpush1.msra.mxu1 %v35933_v62  ;;  %6416 = vmatprep.mubr.f32.mxu1 %v38316_v3 }
 0x1e6   :  { %7166 = vmatprep.subr.mxu1 %v7165_v58  ;;  %6823 = vmatmul.mubr.f32.vlgmr.msra.gmra.mrb[24].mxu0 %v35493_v29 }
 0x1e7   :  { %6863 = vmatpush1.msra.mxu0 %v6557_v40  ;;  %6828 = vmatprep.mubr.f32.mxu0 %v38316_v3 }
 0x1e8   :  { %6956 = vmatprep.subr.mxu0 %v35794_v23  ;;  %6418 = vmatmul.mubr.f32.gmra.mrb[28].mxu1 %v35486_v25  ;;  %v7776_v23 = vsub.f32 %v35983_v14, %v7775_v16 }
 0x1e9   :  { %6423 = vmatprep.mubr.f32.mxu1 %v38316_v3 }
 0x1ea   :  { %6832 = vmatmul.mubr.f32.gmra.mrb[26].mxu0 %v35504_v41  ;;  %v7777_v31 = vand.u32 4294901760, %v7776_v23 }
 0x1eb   :  { %6837 = vmatprep.mubr.f32.mxu0 %v38316_v3 }
 0x1ec   :  { %6425 = vmatmul.mubr.f32.gmra.mrb[30].mxu1 %v35498_v34 }
 0x1ed   :  { %6430 = vmatprep.mubr.f32.mxu1 %v38316_v3 }
 0x1ee   :  { %6841 = vmatmul.mubr.f32.gmra.mrb[28].mxu0 %v35522_v55 }
 0x1ef   :  { %6846 = vmatprep.mubr.f32.mxu0 %v38316_v3 }
 0x1f0   :  { %6432 = vmatmul.mubr.f32.gmra.mrb[32].mxu1 %v35509_v44 }
 0x1f1   :  { %7116 = vmatprep.mubr.f32.mxu1 %v38316_v3 }
 0x1f2   :  { %6850 = vmatmul.mubr.f32.gmra.mrb[30].mxu0 %v35538_v2 }
 0x1f3   :  { %6926 = vmatprep.mubr.f32.mxu0 %v38316_v3 }
 0x1f4   :  { %7122 = vmatmul.mubr.f32.vlgmr.msra.gmra.mrb[34].mxu1 %v35519_v54 }
 0x1f5   :  { %7172 = vmatpush1.msra.mxu1 %v7171_v7  ;;  %7127 = vmatprep.mubr.f32.mxu1 %v38316_v3 }
 0x1f6   :  { %7266 = vmatprep.subr.mxu1 %v35910_v51  ;;  %6928 = vmatmul.mubr.f32.vlgmr.msra.gmra.mrb[24].mxu0 %v35477_v20 }
 0x1f7   :  { %6958 = vmatpush1.msra.mxu0 %v35827_v37  ;;  %v35974_v11 = vpop.f32.mrb[10].mxu1  ;;  %6933 = vmatprep.mubr.f32.mxu0 %v38316_v3  ;;  %v7783_v37 = vand.u32 4294901760, %v7782_v36 }
 0x1f8   :  { %v35977_v12 = vpop.f32.mrb[11].mxu1  ;;  %7133 = vmatmul.mubr.f32.gmra.mrb[36].mxu1 %v35531_v61  ;;  %7663 = vmatprep.subr.mxu0 %v35969_v8 }
 0x1f9   :  { %7138 = vmatprep.mubr.f32.mxu1 %v38316_v3 }
 0x1fa   :  { %6935 = vmatmul.mubr.f32.gmra.mrb[26].mxu0 %v35486_v25 }
 0x1fb   :  { %v35987_v15 = vpop.f32.mrb[12].mxu1  ;;  %6940 = vmatprep.mubr.f32.mxu0 %v38316_v3 }
 0x1fc   :  { %v35991_v17 = vpop.f32.mrb[13].mxu1  ;;  %7144 = vmatmul.mubr.f32.gmra.mrb[38].mxu1 %v35551_v9 }
 0x1fd   :  { %7149 = vmatprep.mubr.f32.mxu1 %v38316_v3 }
 0x1fe   :  { %6942 = vmatmul.mubr.f32.gmra.mrb[28].mxu0 %v35498_v34 }
 0x1ff   :  { %v35998_v33 = vpop.f32.mrb[14].mxu1  ;;  %6947 = vmatprep.mubr.f32.mxu0 %v38316_v3 }
 0x200   :  { %v36001_v42 = vpop.f32.mrb[15].mxu1  ;;  %7155 = vmatmul.mubr.f32.gmra.mrb[40].mxu1 %v35560_v13 }
 0x201   :  { %7235 = vmatprep.mubr.f32.mxu1 %v38316_v3 }
 0x202   :  { %6949 = vmatmul.mubr.f32.gmra.mrb[30].mxu0 %v35509_v44 }
 0x203   :  { %v36010_v26 = vpop.f32.mrb[16].mxu1  ;;  %7021 = vmatprep.mubr.f32.mxu0 %v38316_v3 }
 0x204   :  { %v36013_v19 = vpop.f32.mrb[17].mxu1  ;;  %7237 = vmatmul.mubr.f32.vlgmr.msra.gmra.mrb[34].mxu1 %v35477_v20 }
 0x205   :  { %7269 = vmatpush1.msra.mxu1 %v35941_v63  ;;  %7242 = vmatprep.mubr.f32.mxu1 %v38316_v3  ;;  %v3911_v63 = vmul.f32 0.2, %v35796_v18 }
 0x206   :  { %7366 = vmatprep.subr.mxu1 %v35900_v50  ;;  %7023 = vmatmul.mubr.f32.vlgmr.msra.gmra.mrb[24].mxu0 %v35477_v20 }
 0x207   :  { %7665 = vmatpush1.msra.mxu0 %v36016_v28  ;;  %7028 = vmatprep.mubr.f32.mxu0 %v38316_v3 }
 0x208   :  { %7778 = vmatprep.subr.mxu0 %v7777_v31  ;;  %7244 = vmatmul.mubr.f32.gmra.mrb[36].mxu1 %v35486_v25  ;;  %v3927_v31 = vsel %vm3895_vm4, %v35796_v18, %v3911_v63 }
 0x209   :  { %7249 = vmatprep.mubr.f32.mxu1 %v38316_v3 }
 0x20a   :  { %7030 = vmatmul.mubr.f32.gmra.mrb[26].mxu0 %v35486_v25 }
 0x20b   :  { %7035 = vmatprep.mubr.f32.mxu0 %v38316_v3 }
 0x20c   :  { %7251 = vmatmul.mubr.f32.gmra.mrb[38].mxu1 %v35498_v34 }
 0x20d   :  { %7256 = vmatprep.mubr.f32.mxu1 %v38316_v3 }
 0x20e   :  { %7037 = vmatmul.mubr.f32.gmra.mrb[28].mxu0 %v35498_v34 }
 0x20f   :  { %7042 = vmatprep.mubr.f32.mxu0 %v38316_v3 }
 0x210   :  { %7258 = vmatmul.mubr.f32.gmra.mrb[40].mxu1 %v35509_v44 }
 0x211   :  { %7332 = vmatprep.mubr.f32.mxu1 %v38316_v3 }
 0x212   :  { %7044 = vmatmul.mubr.f32.gmra.mrb[30].mxu0 %v35509_v44 }
 0x213   :  { %7728 = vmatprep.mubr.f32.mxu0 %v38316_v3 }
 0x214   :  { %7335 = vmatmul.mubr.f32.vlgmr.msra.gmra.mrb[34].mxu1 %v35484_v24 }
 0x215   :  { %7368 = vmatpush1.msra.mxu1 %v35933_v62  ;;  %7340 = vmatprep.mubr.f32.mxu1 %v38316_v3 }
 0x216   :  { %7471 = vmatprep.subr.mxu1 %v7163_v53  ;;  %7734 = vmatmul.mubr.f32.vlgmr.msra.gmra.mrb[32].mxu0 %v35519_v54 }
 0x217   :  { %7784 = vmatpush1.msra.mxu0 %v7783_v37  ;;  %7739 = vmatprep.mubr.f32.mxu0 %v38316_v3 }
 0x218   :  { %7878 = vmatprep.subr.mxu0 %v35983_v14  ;;  %7343 = vmatmul.mubr.f32.gmra.mrb[36].mxu1 %v35496_v30 }
 0x219   :  { %v4576_v38 = vpop.f32.mrb[8].mxu0  ;;  %7348 = vmatprep.mubr.f32.mxu1 %v38316_v3 }
 0x21a   :  { %v33590_v39 = vadd.f32 %v4576_v38, %v35974_v11  ;;  %v4578_v40 = vpop.f32.mrb[9].mxu0  ;;  %7745 = vmatmul.mubr.f32.gmra.mrb[34].mxu0 %v35531_v61  ;;  %v3988_v38 = vsel %vm3941_vm2, %v3927_v31, 0 }
 0x21b   :  { %v33591_v45 = vadd.f32 %v4578_v40, %v35977_v12  ;;  %7750 = vmatprep.mubr.f32.mxu0 %v38316_v3  ;;  %v36098_v40 = vand.u32 4294901760, %v3988_v38 }
 0x21c   :  { %7351 = vmatmul.mubr.f32.gmra.mrb[38].mxu1 %v35507_v43 }
 0x21d   :  { %v4583_v46 = vpop.f32.mrb[10].mxu0  ;;  %7356 = vmatprep.mubr.f32.mxu1 %v38316_v3 }
 0x21e   :  { %v33592_v47 = vadd.f32 %v4583_v46, %v35987_v15  ;;  %v4585_v48 = vpop.f32.mrb[11].mxu0  ;;  %7756 = vmatmul.mubr.f32.gmra.mrb[36].mxu0 %v35551_v9  ;;  %v3910_v46 = vmul.f32 0.2, %v35791_v22 }
 0x21f   :  { %v33593_v49 = vadd.f32 %v4585_v48, %v35991_v17  ;;  %7761 = vmatprep.mubr.f32.mxu0 %v38316_v3 }
 0x220   :  { %v8886_v51 = vmax.f32 %v33590_v39, %v33592_v47  ;;  %7359 = vmatmul.mubr.f32.gmra.mrb[40].mxu1 %v35525_v56 }
 0x221   :  { %v8887_v52 = vmax.f32 %v33591_v45, %v33593_v49  ;;  %v4590_v53 = vpop.f32.mrb[12].mxu0  ;;  %7431 = vmatprep.mubr.f32.mxu1 %v38316_v3 }
 0x222   :  { %v33594_v57 = vadd.f32 %v4590_v53, %v35998_v33  ;;  %v4592_v59 = vpop.f32.mrb[13].mxu0  ;;  %7767 = vmatmul.mubr.f32.gmra.mrb[38].mxu0 %v35560_v13  ;;  %v3926_v53 = vsel %vm3894_vm5, %v35791_v22, %v3910_v46 }
 0x223   :  { %v33595_v60 = vadd.f32 %v4592_v59, %v36001_v42  ;;  %7847 = vmatprep.mubr.f32.mxu0 %v38316_v3 }
 0x224   :  { %v8902_v58 = vmax.f32 %v8886_v51, %v33594_v57  ;;  %7435 = vmatmul.mubr.f32.vlgmr.msra.gmra.mrb[34].mxu1 %v35493_v29 }
 0x225   :  { %v8903_v1 = vmax.f32 %v8887_v52, %v33595_v60  ;;  %7475 = vmatpush1.msra.mxu1 %v7169_v0  ;;  %v4597_v4 = vpop.f32.mrb[14].mxu0  ;;  %7440 = vmatprep.mubr.f32.mxu1 %v38316_v3 }
 0x226   :  { %v33596_v5 = vadd.f32 %v4597_v4, %v36010_v26  ;;  %7568 = vmatprep.subr.mxu1 %v35900_v50  ;;  %v4599_v6 = vpop.f32.mrb[15].mxu0  ;;  %7849 = vmatmul.mubr.f32.vlgmr.msra.gmra.mrb[32].mxu0 %v35477_v20 }
 0x227   :  { %v33597_v7 = vadd.f32 %v4599_v6, %v36013_v19  ;;  %7881 = vmatpush1.msra.mxu0 %v36026_v35  ;;  %7854 = vmatprep.mubr.f32.mxu0 %v38316_v3 }
 0x228   :  { %v8918_v11 = vmax.f32 %v8902_v58, %v33596_v5  ;;  %7978 = vmatprep.subr.mxu0 %v35969_v8  ;;  %7444 = vmatmul.mubr.f32.gmra.mrb[36].mxu1 %v35504_v41 }
 0x229   :  { %v8919_v0 = vmax.f32 %v8903_v1, %v33597_v7  ;;  %7449 = vmatprep.mubr.f32.mxu1 %v38316_v3  ;;  %v3985_v1 = vsel %vm3941_vm2, %v3926_v53, 0 }
 0x22a   :  { %v8934_v50 = vsub.f32 %v33590_v39, %v8918_v11  ;;  %v8982_v12 = vsub.f32 %v33592_v47, %v8918_v11  ;;  %v9030_v10 = vsub.f32 %v33594_v57, %v8918_v11  ;;  %v9078_v15 = vsub.f32 %v33596_v5, %v8918_v11  ;;  %7856 = vmatmul.mubr.f32.gmra.mrb[34].mxu0 %v35486_v25 }
 0x22b   :  { %v8935_v17 = vsub.f32 %v33591_v45, %v8919_v0  ;;  %v8983_v27 = vsub.f32 %v33593_v49, %v8919_v0  ;;  %v9031_v33 = vsub.f32 %v33595_v60, %v8919_v0  ;;  %v9079_v42 = vsub.f32 %v33597_v7, %v8919_v0  ;;  %7861 = vmatprep.mubr.f32.mxu0 %v38316_v3 }
 0x22c   :  { %v8950_v21 = vmul.f32 1.442695, %v8934_v50  ;;  %v8998_v23 = vmul.f32 1.442695, %v8982_v12  ;;  %v9046_v26 = vmul.f32 1.442695, %v9030_v10  ;;  %7453 = vmatmul.mubr.f32.gmra.mrb[38].mxu1 %v35522_v55  ;;  %v36109_v47 = vsub.f32 %v3988_v38, %v36098_v40  ;;  %v9272_v38 = vpop.permute.xlu0 %9271 }
 0x22d   :  { %v9094_v19 = vmul.f32 1.442695, %v9078_v15  ;;  %7458 = vmatprep.mubr.f32.mxu1 %v38316_v3  ;;  %v8952_v36 = vmul.f32 1.442695, %v8935_v17  ;;  %v9000_v37 = vmul.f32 1.442695, %v8983_v27 }
 0x22e   :  { %34629 = vpow2.f32 %v8950_v21  ;;  %7863 = vmatmul.mubr.f32.gmra.mrb[36].mxu0 %v35498_v34  ;;  %v9048_v39 = vmul.f32 1.442695, %v9031_v33  ;;  %v9096_v18 = vmul.f32 1.442695, %v9079_v42  ;;  %v8387_v14 = vand.u32 4294901760, %v36109_v47  ;;  %v34839_v21 = vld [vmem:[%s38305_s0 + $0x88] sm:$0xff] }
 0x22f   :  { %34631 = vpow2.f32 %v8998_v23  ;;  %7868 = vmatprep.mubr.f32.mxu0 %v38316_v3  ;;  %v36130_v6 = vand.u32 4294901760, %v3985_v1 }
 0x230   :  { %34633 = vpow2.f32 %v9046_v26  ;;  %7462 = vmatmul.mubr.f32.gmra.mrb[40].mxu1 %v35538_v2  ;;  %v8388_v22 = vsub.f32 %v36109_v47, %v8387_v14 }
 0x231   :  { %34635 = vpow2.f32 %v9094_v19  ;;  %7538 = vmatprep.mubr.f32.mxu1 %v38316_v3  ;;  %v36138_v63 = vsub.f32 %v3985_v1, %v36130_v6 }
 0x232   :  { %34637 = vpow2.f32 %v8952_v36  ;;  %7870 = vmatmul.mubr.f32.gmra.mrb[38].mxu0 %v35509_v44  ;;  %v8389_v11 = vand.u32 4294901760, %v8388_v22 }
 0x233   :  { %34639 = vpow2.f32 %v9000_v37  ;;  %7944 = vmatprep.mubr.f32.mxu0 %v38316_v3  ;;  %v8393_v50 = vand.u32 4294901760, %v36138_v63 }
 0x234   :  { %7540 = vmatmul.mubr.f32.vlgmr.msra.gmra.mrb[34].mxu1 %v35477_v20  ;;  %34641 = vpow2.f32 %v9048_v39 }
 0x235   :  { %7570 = vmatpush1.msra.mxu1 %v35933_v62  ;;  %7545 = vmatprep.mubr.f32.mxu1 %v38316_v3  ;;  %34643 = vpow2.f32 %v9096_v18  ;;  %v8394_v15 = vsub.f32 %v36138_v63, %v8393_v50 }
 0x236   :  { %8275 = vmatprep.subr.mxu1 %v36098_v40  ;;  %7947 = vmatmul.mubr.f32.vlgmr.msra.gmra.mrb[32].mxu0 %v35484_v24 }
 0x237   :  { %7980 = vmatpush1.msra.mxu0 %v36016_v28  ;;  %7952 = vmatprep.mubr.f32.mxu0 %v38316_v3  ;;  %v8395_v26 = vand.u32 4294901760, %v8394_v15 }
 0x238   :  { %v34630_v45 = vpop.eup %34629  ;;  %8083 = vmatprep.subr.mxu0 %v7775_v16  ;;  %7547 = vmatmul.mubr.f32.gmra.mrb[36].mxu1 %v35486_v25 }
 0x239   :  { %v34632_v62 = vpop.eup %34631  ;;  %7552 = vmatprep.mubr.f32.mxu1 %v38316_v3 }
 0x23a   :  { %v34634_v48 = vpop.eup %34633  ;;  %v9126_v49 = vadd.f32 %v34632_v62, %v34630_v45  ;;  %7955 = vmatmul.mubr.f32.gmra.mrb[34].mxu0 %v35496_v30 }
 0x23b   :  { %v34636_v51 = vpop.eup %34635  ;;  %7960 = vmatprep.mubr.f32.mxu0 %v38316_v3 }
 0x23c   :  { %v34638_v52 = vpop.eup %34637  ;;  %v9142_v57 = vadd.f32 %v34634_v48, %v9126_v49  ;;  %7554 = vmatmul.mubr.f32.gmra.mrb[38].mxu1 %v35498_v34 }
 0x23d   :  { %v34640_v16 = vpop.eup %34639  ;;  %7559 = vmatprep.mubr.f32.mxu1 %v38316_v3 }
 0x23e   :  { %v9158_v59 = vadd.f32 %v34636_v51, %v9142_v57  ;;  %v9127_v60 = vadd.f32 %v34640_v16, %v34638_v52  ;;  %7963 = vmatmul.mubr.f32.gmra.mrb[36].mxu0 %v35507_v43  ;;  %v34642_v58 = vpop.eup %34641 }
 0x23f   :  { %7968 = vmatprep.mubr.f32.mxu0 %v38316_v3  ;;  %v34644_v5 = vpop.eup %34643 }
 0x240   :  { %34645 = vrcp.f32 %v9158_v59  ;;  %v9143_v4 = vadd.f32 %v34642_v58, %v9127_v60  ;;  %7561 = vmatmul.mubr.f32.gmra.mrb[40].mxu1 %v35509_v44 }
 0x241   :  { %7633 = vmatprep.mubr.f32.mxu1 %v38316_v3 }
 0x242   :  { %v9159_v7 = vadd.f32 %v34644_v5, %v9143_v4  ;;  %7971 = vmatmul.mubr.f32.gmra.mrb[38].mxu0 %v35525_v56 }
 0x243   :  { %8043 = vmatprep.mubr.f32.mxu0 %v38316_v3 }
 0x244   :  { %34647 = vrcp.f32 %v9159_v7  ;;  %7635 = vmatmul.mubr.f32.vlgmr.msra.gmra.mrb[34].mxu1 %v35477_v20 }
 0x245   :  { %8277 = vmatpush1.msra.mxu1 %v36130_v6  ;;  %7640 = vmatprep.mubr.f32.mxu1 %v38316_v3 }
 0x246   :  { %8390 = vmatprep.subr.mxu1 %v8389_v11  ;;  %8047 = vmatmul.mubr.f32.vlgmr.msra.gmra.mrb[32].mxu0 %v35493_v29 }
 0x247   :  { %8087 = vmatpush1.msra.mxu0 %v7781_v32  ;;  %8052 = vmatprep.mubr.f32.mxu0 %v38316_v3 }
 0x248   :  { %8180 = vmatprep.subr.mxu0 %v35969_v8  ;;  %7642 = vmatmul.mubr.f32.gmra.mrb[36].mxu1 %v35486_v25 }
 0x249   :  { %7647 = vmatprep.mubr.f32.mxu1 %v38316_v3 }
 0x24a   :  { %v34646_v0 = vpop.eup %34645  ;;  %8056 = vmatmul.mubr.f32.gmra.mrb[34].mxu0 %v35504_v41 }
 0x24b   :  { %8061 = vmatprep.mubr.f32.mxu0 %v38316_v3  ;;  %v9238_v12 = vmul.f32 %v34646_v0, %v34632_v62  ;;  %v36150_v10 = vmul.f32 %v34646_v0, %v34630_v45  ;;  %v36152_v35 = vmul.f32 %v34646_v0, %v34634_v48  ;;  %v36154_v32 = vmul.f32 %v34646_v0, %v34636_v51 }
 0x24c   :  { %7649 = vmatmul.mubr.f32.gmra.mrb[38].mxu1 %v35498_v34  ;;  %v9273_v45 = vsel %vm156_vm0, %v9272_v38, 0 }
 0x24d   :  { %7654 = vmatprep.mubr.f32.mxu1 %v38316_v3  ;;  %v36206_v53 = vand.u32 4294901760, %v9273_v45 }
 0x24e   :  { %v34648_v8 = vpop.eup %34647  ;;  %8065 = vmatmul.mubr.f32.gmra.mrb[36].mxu0 %v35522_v55 }
 0x24f   :  { %8070 = vmatprep.mubr.f32.mxu0 %v38316_v3  ;;  %v9239_v17 = vmul.f32 %v34648_v8, %v34640_v16  ;;  %v36163_v27 = vmul.f32 %v34648_v8, %v34638_v52  ;;  %v36166_v33 = vmul.f32 %v34648_v8, %v34642_v58  ;;  %v36168_v42 = vmul.f32 %v34648_v8, %v34644_v5 }
 0x250   :  { %7656 = vmatmul.mubr.f32.gmra.mrb[40].mxu1 %v35509_v44  ;;  %v36216_v1 = vsub.f32 %v9273_v45, %v36206_v53 }
 0x251   :  { %8340 = vmatprep.mubr.f32.mxu1 %v38316_v3  ;;  %v9255_v23 = vmul.f32 %v34839_v21, %v9239_v17 }
 0x252   :  { %8074 = vmatmul.mubr.f32.gmra.mrb[38].mxu0 %v35538_v2 }
 0x253   :  { %8150 = vmatprep.mubr.f32.mxu0 %v38316_v3  ;;  %v36178_v19 = vand.u32 4294901760, %v9255_v23 }
 0x254   :  { %8346 = vmatmul.mubr.f32.vlgmr.msra.gmra.mrb[42].mxu1 %v35519_v54 }
 0x255   :  { %8396 = vmatpush1.msra.mxu1 %v8395_v26  ;;  %8351 = vmatprep.mubr.f32.mxu1 %v38316_v3  ;;  %v36188_v54 = vsub.f32 %v9255_v23, %v36178_v19 }
 0x256   :  { %8490 = vmatprep.subr.mxu1 %v36109_v47  ;;  %8152 = vmatmul.mubr.f32.vlgmr.msra.gmra.mrb[32].mxu0 %v35477_v20 }
 0x257   :  { %8182 = vmatpush1.msra.mxu0 %v36016_v28  ;;  %v5188_v31 = vpop.f32.mrb[18].mxu1  ;;  %8157 = vmatprep.mubr.f32.mxu0 %v38316_v3 }
 0x258   :  { %9276 = vmatprep.subr.mxu0 %v36178_v19  ;;  %v5190_v36 = vpop.f32.mrb[19].mxu1  ;;  %8357 = vmatmul.mubr.f32.gmra.mrb[44].mxu1 %v35531_v61  ;;  %v9355_v61 = vand.u32 4294901760, %v36188_v54 }
 0x259   :  { %8362 = vmatprep.mubr.f32.mxu1 %v38316_v3 }
 0x25a   :  { %8159 = vmatmul.mubr.f32.gmra.mrb[34].mxu0 %v35486_v25  ;;  %v9356_v52 = vsub.f32 %v36188_v54, %v9355_v61 }
 0x25b   :  { %v5195_v37 = vpop.f32.mrb[20].mxu1  ;;  %8164 = vmatprep.mubr.f32.mxu0 %v38316_v3 }
 0x25c   :  { %v8888_v28 = vmax.f32 %v5188_v31, %v5195_v37  ;;  %v5197_v39 = vpop.f32.mrb[21].mxu1  ;;  %8368 = vmatmul.mubr.f32.gmra.mrb[46].mxu1 %v35551_v9  ;;  %v34840_v9 = vld [vmem:[%s38305_s0 + $0x80] sm:$0xff]  ;;  %v9357_v58 = vand.u32 4294901760, %v9356_v52 }
 0x25d   :  { %v8889_v18 = vmax.f32 %v5190_v36, %v5197_v39  ;;  %8373 = vmatprep.mubr.f32.mxu1 %v38316_v3  ;;  %v9254_v51 = vmul.f32 %v34840_v9, %v9238_v12 }
 0x25e   :  { %8166 = vmatmul.mubr.f32.gmra.mrb[36].mxu0 %v35498_v34 }
 0x25f   :  { %v5202_v46 = vpop.f32.mrb[22].mxu1  ;;  %8171 = vmatprep.mubr.f32.mxu0 %v38316_v3  ;;  %v36212_v60 = vand.u32 4294901760, %v9254_v51 }
 0x260   :  { %v8904_v62 = vmax.f32 %v8888_v28, %v5202_v46  ;;  %v5204_v48 = vpop.f32.mrb[23].mxu1  ;;  %8379 = vmatmul.mubr.f32.gmra.mrb[48].mxu1 %v35560_v13 }
 0x261   :  { %v8905_v49 = vmax.f32 %v8889_v18, %v5204_v48  ;;  %8459 = vmatprep.mubr.f32.mxu1 %v38316_v3 }
 0x262   :  { %8173 = vmatmul.mubr.f32.gmra.mrb[38].mxu0 %v35509_v44 }
 0x263   :  { %v5209_v57 = vpop.f32.mrb[24].mxu1  ;;  %8245 = vmatprep.mubr.f32.mxu0 %v38316_v3 }
 0x264   :  { %v8920_v13 = vmax.f32 %v8904_v62, %v5209_v57  ;;  %v5211_v16 = vpop.f32.mrb[25].mxu1  ;;  %8461 = vmatmul.mubr.f32.vlgmr.msra.gmra.mrb[42].mxu1 %v35477_v20 }
 0x265   :  { %v8921_v59 = vmax.f32 %v8905_v49, %v5211_v16  ;;  %8493 = vmatpush1.msra.mxu1 %v36138_v63  ;;  %8466 = vmatprep.mubr.f32.mxu1 %v38316_v3 }
 0x266   :  { %v8936_v4 = vsub.f32 %v5188_v31, %v8920_v13  ;;  %v8984_v22 = vsub.f32 %v5195_v37, %v8920_v13  ;;  %v9032_v5 = vsub.f32 %v5202_v46, %v8920_v13  ;;  %v9080_v7 = vsub.f32 %v5209_v57, %v8920_v13  ;;  %8590 = vmatprep.subr.mxu1 %v36098_v40 }
 0x267   :  { %v8937_v11 = vsub.f32 %v5190_v36, %v8921_v59  ;;  %v8985_v0 = vsub.f32 %v5197_v39, %v8921_v59  ;;  %v9033_v12 = vsub.f32 %v5204_v48, %v8921_v59  ;;  %v9081_v8 = vsub.f32 %v5211_v16, %v8921_v59  ;;  %8247 = vmatmul.mubr.f32.vlgmr.msra.gmra.mrb[32].mxu0 %v35477_v20 }
 0x268   :  { %v8954_v15 = vmul.f32 1.442695, %v8936_v4  ;;  %v9002_v17 = vmul.f32 1.442695, %v8984_v22  ;;  %v9050_v21 = vmul.f32 1.442695, %v9032_v5  ;;  %9278 = vmatpush1.msra.mxu0 %v36212_v60  ;;  %8468 = vmatmul.mubr.f32.gmra.mrb[44].mxu1 %v35486_v25  ;;  %v36224_v31 = vsub.f32 %v9254_v51, %v36212_v60 }
 0x269   :  { %v9098_v23 = vmul.f32 1.442695, %v9080_v7  ;;  %9358 = vmatprep.subr.mxu0 %v9357_v58  ;;  %8252 = vmatprep.mubr.f32.mxu0 %v38316_v3  ;;  %v8956_v26 = vmul.f32 1.442695, %v8937_v11  ;;  %v9004_v36 = vmul.f32 1.442695, %v8985_v0 }
 0x26a   :  { %34649 = vpow2.f32 %v8954_v15  ;;  %8473 = vmatprep.mubr.f32.mxu1 %v38316_v3  ;;  %v36228_v37 = vand.u32 4294901760, %v36216_v1  ;;  %v9052_v38 = vmul.f32 1.442695, %v9033_v12  ;;  %v9361_v28 = vand.u32 4294901760, %v36224_v31 }
 0x26b   :  { %34651 = vpow2.f32 %v9002_v17  ;;  %8254 = vmatmul.mubr.f32.gmra.mrb[34].mxu0 %v35486_v25  ;;  %v9100_v39 = vmul.f32 1.442695, %v9081_v8 }
 0x26c   :  { %34653 = vpow2.f32 %v9050_v21  ;;  %8475 = vmatmul.mubr.f32.gmra.mrb[46].mxu1 %v35498_v34  ;;  %8259 = vmatprep.mubr.f32.mxu0 %v38316_v3  ;;  %v9345_v18 = vsub.f32 %v36216_v1, %v36228_v37  ;;  %v9362_v45 = vsub.f32 %v36224_v31, %v9361_v28 }
 0x26d   :  { %34655 = vpow2.f32 %v9098_v23  ;;  %8480 = vmatprep.mubr.f32.mxu1 %v38316_v3 }
 0x26e   :  { %34657 = vpow2.f32 %v8956_v26  ;;  %v36245_v46 = vand.u32 4294901760, %v9345_v18  ;;  %v9363_v51 = vand.u32 4294901760, %v9362_v45 }
 0x26f   :  { %34659 = vpow2.f32 %v9004_v36  ;;  %8261 = vmatmul.mubr.f32.gmra.mrb[36].mxu0 %v35498_v34 }
 0x270   :  { %8482 = vmatmul.mubr.f32.gmra.mrb[48].mxu1 %v35509_v44  ;;  %8266 = vmatprep.mubr.f32.mxu0 %v38316_v3  ;;  %34661 = vpow2.f32 %v9052_v38 }
 0x271   :  { %8556 = vmatprep.mubr.f32.mxu1 %v38316_v3  ;;  %34663 = vpow2.f32 %v9100_v39 }
 0x273   :  { %8268 = vmatmul.mubr.f32.gmra.mrb[38].mxu0 %v35509_v44 }
 0x274   :  { %v34650_v62 = vpop.eup %34649  ;;  %8559 = vmatmul.mubr.f32.vlgmr.msra.gmra.mrb[42].mxu1 %v35484_v24  ;;  %9341 = vmatprep.mubr.f32.mxu0 %v38316_v3 }
 0x275   :  { %v34652_v48 = vpop.eup %34651  ;;  %8592 = vmatpush1.msra.mxu1 %v36130_v6  ;;  %8564 = vmatprep.mubr.f32.mxu1 %v38316_v3 }
 0x276   :  { %v34654_v49 = vpop.eup %34653  ;;  %v9128_v9 = vadd.f32 %v34652_v48, %v34650_v62  ;;  %8695 = vmatprep.subr.mxu1 %v8387_v14 }
 0x277   :  { %v36253_v52 = vpop.eup %34655  ;;  %9347 = vmatmul.mubr.f32.vlgmr.msra.gmra.mrb[40].mxu0 %v36245_v46 }
 0x278   :  { %v36256_v57 = vpop.eup %34657  ;;  %v9144_v24 = vadd.f32 %v34654_v49, %v9128_v9  ;;  %9364 = vmatpush1.msra.mxu0 %v9363_v51  ;;  %8567 = vmatmul.mubr.f32.gmra.mrb[44].mxu1 %v35496_v30 }
 0x279   :  { %v34660_v13 = vpop.eup %34659  ;;  %9437 = vmatprep.subr.mxu0 %v36188_v54  ;;  %v5800_v16 = vpop.f32.mrb[16].mxu0  ;;  %8572 = vmatprep.mubr.f32.mxu1 %v38316_v3 }
 0x27a   :  { %v9160_v47 = vadd.f32 %v36253_v52, %v9144_v24  ;;  %v9129_v14 = vadd.f32 %v34660_v13, %v36256_v57  ;;  %v5802_v59 = vpop.f32.mrb[17].mxu0  ;;  %9427 = vmatprep.mubr.f32.mxu0 %v38316_v3  ;;  %v34662_v58 = vpop.eup %34661 }
 0x27b   :  { %v36265_v22 = vpop.eup %34663 }
 0x27c   :  { %34665 = vrcp.f32 %v9160_v47  ;;  %v9145_v4 = vadd.f32 %v34662_v58, %v9129_v14  ;;  %8575 = vmatmul.mubr.f32.gmra.mrb[46].mxu1 %v35507_v43 }
 0x27d   :  { %v5807_v30 = vpop.f32.mrb[18].mxu0  ;;  %8580 = vmatprep.mubr.f32.mxu1 %v38316_v3 }
 0x27e   :  { %v9161_v5 = vadd.f32 %v36265_v22, %v9145_v4  ;;  %v8890_v7 = vmax.f32 %v5800_v16, %v5807_v30  ;;  %v5809_v11 = vpop.f32.mrb[19].mxu0 }
 0x27f   :  { %v8891_v0 = vmax.f32 %v5802_v59, %v5809_v11  ;;  %9429 = vmatmul.mubr.f32.vlgmr.msra.gmra.mrb[40].mxu0 %v36206_v53 }
 0x280   :  { %34667 = vrcp.f32 %v9161_v5  ;;  %9440 = vmatpush1.msra.mxu0 %v36224_v31  ;;  %8583 = vmatmul.mubr.f32.gmra.mrb[48].mxu1 %v35525_v56 }
 0x281   :  { %9513 = vmatprep.subr.mxu0 %v36178_v19  ;;  %v5814_v43 = vpop.f32.mrb[20].mxu0  ;;  %8655 = vmatprep.mubr.f32.mxu1 %v38316_v3 }
 0x282   :  { %v8906_v12 = vmax.f32 %v8890_v7, %v5814_v43  ;;  %v5816_v8 = vpop.f32.mrb[21].mxu0  ;;  %9503 = vmatprep.mubr.f32.mxu0 %v38316_v3 }
 0x283   :  { %v8907_v15 = vmax.f32 %v8891_v0, %v5816_v8 }
 0x284   :  { %8659 = vmatmul.mubr.f32.vlgmr.msra.gmra.mrb[42].mxu1 %v35493_v29 }
 0x285   :  { %8699 = vmatpush1.msra.mxu1 %v8393_v50  ;;  %v5821_v17 = vpop.f32.mrb[22].mxu0  ;;  %8664 = vmatprep.mubr.f32.mxu1 %v38316_v3 }
 0x286   :  { %v34666_v21 = vpop.eup %34665  ;;  %v8922_v56 = vmax.f32 %v8906_v12, %v5821_v17  ;;  %8792 = vmatprep.subr.mxu1 %v36098_v40  ;;  %v5823_v23 = vpop.f32.mrb[23].mxu0 }
 0x287   :  { %v8923_v26 = vmax.f32 %v8907_v15, %v5823_v23  ;;  %9506 = vmatmul.mubr.f32.vlgmr.msra.gmra.mrb[40].mxu0 %v36216_v1  ;;  %v36281_v36 = vmul.f32 %v34666_v21, %v34652_v48  ;;  %v36283_v38 = vmul.f32 %v34666_v21, %v34650_v62  ;;  %v36285_v39 = vmul.f32 %v34666_v21, %v34654_v49 }
 0x288   :  { %v8938_v29 = vsub.f32 %v5800_v16, %v8922_v56  ;;  %v8986_v63 = vsub.f32 %v5807_v30, %v8922_v56  ;;  %v9034_v50 = vsub.f32 %v5814_v43, %v8922_v56  ;;  %v9082_v18 = vsub.f32 %v5821_v17, %v8922_v56  ;;  %9515 = vmatpush1.msra.mxu0 %v36212_v60  ;;  %v34842_v17 = vld [vmem:[%s38305_s0 + $0x90] sm:$0xff] }
 0x289   :  { %v8939_v45 = vsub.f32 %v5802_v59, %v8923_v26  ;;  %v8987_v9 = vsub.f32 %v5809_v11, %v8923_v26  ;;  %v9035_v51 = vsub.f32 %v5816_v8, %v8923_v26  ;;  %v9083_v40 = vsub.f32 %v5823_v23, %v8923_v26  ;;  %9591 = vmatprep.subr.mxu0 %v9355_v61 }
 0x28a   :  { %v34668_v24 = vpop.eup %34667  ;;  %v8958_v48 = vmul.f32 1.442695, %v8938_v29  ;;  %v9006_v47 = vmul.f32 1.442695, %v8986_v63  ;;  %v9054_v62 = vmul.f32 1.442695, %v9034_v50  ;;  %8668 = vmatmul.mubr.f32.gmra.mrb[44].mxu1 %v35504_v41  ;;  %9578 = vmatprep.mubr.f32.mxu0 %v38316_v3  ;;  %v36314_v31 = vmul.f32 %v34666_v21, %v36253_v52 }
 0x28b   :  { %v9102_v49 = vmul.f32 1.442695, %v9082_v18  ;;  %8673 = vmatprep.mubr.f32.mxu1 %v38316_v3  ;;  %v9241_v16 = vmul.f32 %v34668_v24, %v34660_v13  ;;  %v8960_v14 = vmul.f32 1.442695, %v8939_v45  ;;  %v9008_v59 = vmul.f32 1.442695, %v8987_v9 }
 0x28c   :  { %34669 = vpow2.f32 %v8958_v48  ;;  %v36294_v4 = vmul.f32 %v34668_v24, %v36256_v57  ;;  %v36297_v54 = vmul.f32 %v34668_v24, %v34662_v58  ;;  %v9056_v41 = vmul.f32 1.442695, %v9035_v51  ;;  %38320 = vst [vmem:[#allocation5_spill] sm:$0xff] %v36314_v31 }
 0x28d   :  { %34671 = vpow2.f32 %v9006_v47  ;;  %v9104_v61 = vmul.f32 1.442695, %v9083_v40  ;;  %v36311_v13 = vmul.f32 %v34668_v24, %v36265_v22  ;;  %v9256_v21 = vmul.f32 %v34842_v17, %v36281_v36 }
 0x28e   :  { %34673 = vpow2.f32 %v9054_v62  ;;  %8677 = vmatmul.mubr.f32.gmra.mrb[46].mxu1 %v35522_v55  ;;  %v34841_v55 = vld [vmem:[%s38305_s0 + $0x98] sm:$0xff] }
 0x28f   :  { %34675 = vpow2.f32 %v9102_v49  ;;  %9582 = vmatmul.mubr.f32.vlgmr.msra.gmra.mrb[40].mxu0 %v36228_v37  ;;  %8682 = vmatprep.mubr.f32.mxu1 %v38316_v3  ;;  %v9257_v57 = vmul.f32 %v34841_v55, %v9241_v16  ;;  %38319 = vst [vmem:[#allocation4_spill] sm:$0xff] %v36311_v13  ;;  %v36344_v23 = vand.u32 4294901760, %v9256_v21  ;;  %v34844_v49 = vld [vmem:[%s38305_s0 + $0xa8] sm:$0xff] }
 0x290   :  { %34677 = vpow2.f32 %v8960_v14  ;;  %9595 = vmatpush1.msra.mxu0 %v9361_v28  ;;  %9658 = vmatprep.mubr.f32.mxu0 %v38316_v3 }
 0x291   :  { %34679 = vpow2.f32 %v9008_v59  ;;  %9667 = vmatprep.subr.mxu0 %v36178_v19  ;;  %v36317_v19 = vand.u32 4294901760, %v9257_v57  ;;  %v36350_v29 = vsub.f32 %v9256_v21, %v36344_v23 }
 0x292   :  { %8686 = vmatmul.mubr.f32.gmra.mrb[48].mxu1 %v35538_v2  ;;  %34681 = vpow2.f32 %v9056_v41 }
 0x293   :  { %8762 = vmatprep.mubr.f32.mxu1 %v38316_v3  ;;  %34683 = vpow2.f32 %v9104_v61  ;;  %v36327_v7 = vsub.f32 %v9257_v57, %v36317_v19  ;;  %v9826_v48 = vand.u32 4294901760, %v36350_v29 }
 0x295   :  { %v9820_v12 = vand.u32 4294901760, %v36327_v7 }
 0x296   :  { %v34670_v28 = vpop.eup %34669  ;;  %8764 = vmatmul.mubr.f32.vlgmr.msra.gmra.mrb[42].mxu1 %v35477_v20 }
 0x297   :  { %v34672_v2 = vpop.eup %34671  ;;  %8794 = vmatpush1.msra.mxu1 %v36130_v6  ;;  %9660 = vmatmul.mubr.f32.vlgmr.msra.gmra.mrb[40].mxu0 %v36206_v53  ;;  %v9821_v56 = vsub.f32 %v36327_v7, %v9820_v12 }
 0x298   :  { %v34674_v58 = vpop.eup %34673  ;;  %v9130_v30 = vadd.f32 %v34672_v2, %v34670_v28  ;;  %9741 = vmatprep.subr.mxu1 %v36317_v19  ;;  %9669 = vmatpush1.msra.mxu0 %v36212_v60 }
 0x299   :  { %v34676_v22 = vpop.eup %34675  ;;  %8769 = vmatprep.mubr.f32.mxu1 %v38316_v3  ;;  %9732 = vmatprep.mubr.f32.mxu0 %v38316_v3  ;;  %v9822_v26 = vand.u32 4294901760, %v9821_v56 }
 0x29a   :  { %v34678_v52 = vpop.eup %34677  ;;  %v9146_v5 = vadd.f32 %v34674_v58, %v9130_v30  ;;  %8771 = vmatmul.mubr.f32.gmra.mrb[44].mxu1 %v35486_v25 }
 0x29b   :  { %v34680_v6 = vpop.eup %34679  ;;  %8776 = vmatprep.mubr.f32.mxu1 %v38316_v3 }
 0x29c   :  { %v9162_v11 = vadd.f32 %v34676_v22, %v9146_v5  ;;  %v9131_v0 = vadd.f32 %v34680_v6, %v34678_v52  ;;  %v34682_v43 = vpop.eup %34681 }
 0x29d   :  { %v34684_v8 = vpop.eup %34683 }
 0x29e   :  { %34685 = vrcp.f32 %v9162_v11  ;;  %v9147_v60 = vadd.f32 %v34682_v43, %v9131_v0  ;;  %8778 = vmatmul.mubr.f32.gmra.mrb[46].mxu1 %v35498_v34 }
 0x29f   :  { %8783 = vmatprep.mubr.f32.mxu1 %v38316_v3  ;;  %9734 = vmatmul.mubr.f32.vlgmr.msra.gmra.mrb[40].mxu0 %v36206_v53 }
 0x2a0   :  { %v9163_v15 = vadd.f32 %v34684_v8, %v9147_v60  ;;  %10271 = vmatprep.mubr.f32.mxu0 %v38316_v3 }
 0x2a2   :  { %34687 = vrcp.f32 %v9163_v15  ;;  %8785 = vmatmul.mubr.f32.gmra.mrb[48].mxu1 %v35509_v44 }
 0x2a3   :  { %8857 = vmatprep.mubr.f32.mxu1 %v38316_v3 }
 0x2a6   :  { %8859 = vmatmul.mubr.f32.vlgmr.msra.gmra.mrb[42].mxu1 %v35477_v20  ;;  %v34843_v20 = vld [vmem:[%s38305_s0 + $0xa0] sm:$0xff] }
 0x2a7   :  { %9743 = vmatpush1.msra.mxu1 %v36344_v23  ;;  %8864 = vmatprep.mubr.f32.mxu1 %v38316_v3 }
 0x2a8   :  { %v34686_v36 = vpop.eup %34685  ;;  %9823 = vmatprep.subr.mxu1 %v9822_v26 }
 0x2a9   :  { %v9242_v63 = vmul.f32 %v34686_v36, %v34672_v2  ;;  %v36352_v50 = vmul.f32 %v34686_v36, %v34670_v28  ;;  %v36354_v18 = vmul.f32 %v34686_v36, %v34674_v58  ;;  %v36356_v45 = vmul.f32 %v34686_v36, %v34676_v22 }
 0x2aa   :  { %8866 = vmatmul.mubr.f32.gmra.mrb[44].mxu1 %v35486_v25 }
 0x2ab   :  { %38321 = vst [vmem:[#allocation6_spill] sm:$0xff] %v36356_v45  ;;  %8871 = vmatprep.mubr.f32.mxu1 %v38316_v3  ;;  %v9258_v9 = vmul.f32 %v34843_v20, %v9242_v63 }
 0x2ac   :  { %v34688_v51 = vpop.eup %34687 }
 0x2ad   :  { %v9243_v40 = vmul.f32 %v34688_v51, %v34680_v6  ;;  %v36363_v24 = vand.u32 4294901760, %v9258_v9  ;;  %v36366_v47 = vmul.f32 %v34688_v51, %v34678_v52  ;;  %v36369_v62 = vmul.f32 %v34688_v51, %v34682_v43 }
 0x2ae   :  { %8873 = vmatmul.mubr.f32.gmra.mrb[46].mxu1 %v35498_v34  ;;  %v36371_v25 = vmul.f32 %v34688_v51, %v34684_v8  ;;  %v9827_v34 = vsub.f32 %v36350_v29, %v9826_v48 }
 0x2af   :  { %8878 = vmatprep.mubr.f32.mxu1 %v38316_v3  ;;  %v9259_v16 = vmul.f32 %v34844_v49, %v9243_v40  ;;  %v36378_v14 = vsub.f32 %v9258_v9, %v36363_v24 }
 0x2b0   :  { %v9828_v55 = vand.u32 4294901760, %v9827_v34 }
 0x2b1   :  { %v36380_v59 = vand.u32 4294901760, %v9259_v16  ;;  %v10291_v41 = vand.u32 4294901760, %v36378_v14 }
 0x2b2   :  { %8880 = vmatmul.mubr.f32.gmra.mrb[48].mxu1 %v35509_v44 }
 0x2b3   :  { %10206 = vmatprep.subr.mxu0 %v36380_v59  ;;  %9806 = vmatprep.mubr.f32.mxu1 %v38316_v3  ;;  %v10284_v61 = vsub.f32 %v9259_v16, %v36380_v59  ;;  %v10292_v44 = vsub.f32 %v36378_v14, %v10291_v41 }
 0x2b4   :  { %10208 = vmatpush1.msra.mxu0 %v36363_v24 }
 0x2b5   :  { %10277 = vmatmul.mubr.f32.vlgmr.msra.gmra.mrb[42].mxu0 %v36245_v46  ;;  %v10285_v57 = vand.u32 4294901760, %v10284_v61  ;;  %v10293_v22 = vand.u32 4294901760, %v10292_v44 }
 0x2b6   :  { %9812 = vmatmul.mubr.f32.vlgmr.msra.gmra.mrb[50].mxu1 %v36245_v46  ;;  %10357 = vmatprep.mubr.f32.mxu0 %v38316_v3 }
 0x2b7   :  { %9829 = vmatpush1.msra.mxu1 %v9828_v55  ;;  %v6412_v28 = vpop.f32.mrb[26].mxu1  ;;  %v10286_v2 = vsub.f32 %v10284_v61, %v10285_v57  ;;  %9892 = vmatprep.mubr.f32.mxu1 %v38316_v3 }
 0x2b8   :  { %9902 = vmatprep.subr.mxu1 %v36327_v7  ;;  %v6414_v58 = vpop.f32.mrb[27].mxu1 }
 0x2b9   :  { %v10287_v30 = vand.u32 4294901760, %v10286_v2 }
 0x2bb   :  { %10288 = vmatprep.subr.mxu0 %v10287_v30  ;;  %v6419_v52 = vpop.f32.mrb[28].mxu1 }
 0x2bc   :  { %10294 = vmatpush1.msra.mxu0 %v10293_v22  ;;  %v8892_v5 = vmax.f32 %v6412_v28, %v6419_v52  ;;  %v6421_v6 = vpop.f32.mrb[29].mxu1 }
 0x2bd   :  { %10359 = vmatmul.mubr.f32.vlgmr.msra.gmra.mrb[42].mxu0 %v36206_v53  ;;  %10367 = vmatprep.subr.mxu0 %v10284_v61  ;;  %v8893_v11 = vmax.f32 %v6414_v58, %v6421_v6 }
 0x2be   :  { %10370 = vmatpush1.msra.mxu0 %v36378_v14  ;;  %9894 = vmatmul.mubr.f32.vlgmr.msra.gmra.mrb[50].mxu1 %v36206_v53 }
 0x2bf   :  { %10443 = vmatprep.subr.mxu0 %v36380_v59  ;;  %9905 = vmatpush1.msra.mxu1 %v36350_v29  ;;  %v6426_v0 = vpop.f32.mrb[30].mxu1 }
 0x2c0   :  { %9978 = vmatprep.subr.mxu1 %v36317_v19  ;;  %v8908_v43 = vmax.f32 %v8892_v5, %v6426_v0  ;;  %v6428_v60 = vpop.f32.mrb[31].mxu1  ;;  %10433 = vmatprep.mubr.f32.mxu0 %v38316_v3 }
 0x2c1   :  { %v8909_v8 = vmax.f32 %v8893_v11, %v6428_v60  ;;  %9968 = vmatprep.mubr.f32.mxu1 %v38316_v3 }
 0x2c3   :  { %v6433_v15 = vpop.f32.mrb[32].mxu1 }
 0x2c4   :  { %v8924_v17 = vmax.f32 %v8908_v43, %v6433_v15  ;;  %v6435_v21 = vpop.f32.mrb[33].mxu1 }
 0x2c5   :  { %10436 = vmatmul.mubr.f32.vlgmr.msra.gmra.mrb[42].mxu0 %v36216_v1  ;;  %v8925_v56 = vmax.f32 %v8909_v8, %v6435_v21 }
 0x2c6   :  { %10445 = vmatpush1.msra.mxu0 %v36363_v24  ;;  %v8940_v26 = vsub.f32 %v6412_v28, %v8924_v17  ;;  %v8988_v36 = vsub.f32 %v6419_v52, %v8924_v17  ;;  %v9036_v63 = vsub.f32 %v6426_v0, %v8924_v17  ;;  %v9084_v20 = vsub.f32 %v6433_v15, %v8924_v17 }
 0x2c7   :  { %10521 = vmatprep.subr.mxu0 %v10285_v57  ;;  %v8941_v9 = vsub.f32 %v6414_v58, %v8925_v56  ;;  %v8989_v51 = vsub.f32 %v6421_v6, %v8925_v56  ;;  %v9037_v40 = vsub.f32 %v6428_v60, %v8925_v56  ;;  %v9085_v49 = vsub.f32 %v6435_v21, %v8925_v56 }
 0x2c8   :  { %v8962_v16 = vmul.f32 1.442695, %v8940_v26  ;;  %v9010_v34 = vmul.f32 1.442695, %v8988_v36  ;;  %v9058_v61 = vmul.f32 1.442695, %v9036_v63  ;;  %9971 = vmatmul.mubr.f32.vlgmr.msra.gmra.mrb[50].mxu1 %v36216_v1  ;;  %10508 = vmatprep.mubr.f32.mxu0 %v38316_v3 }
 0x2c9   :  { %v9106_v55 = vmul.f32 1.442695, %v9084_v20  ;;  %9980 = vmatpush1.msra.mxu1 %v36344_v23  ;;  %10043 = vmatprep.mubr.f32.mxu1 %v38316_v3  ;;  %v8964_v44 = vmul.f32 1.442695, %v8941_v9  ;;  %v9012_v57 = vmul.f32 1.442695, %v8989_v51 }
 0x2ca   :  { %34689 = vpow2.f32 %v8962_v16  ;;  %10056 = vmatprep.subr.mxu1 %v9820_v12  ;;  %v9060_v28 = vmul.f32 1.442695, %v9037_v40  ;;  %v9108_v2 = vmul.f32 1.442695, %v9085_v49 }
 0x2cb   :  { %34691 = vpow2.f32 %v9010_v34 }
 0x2cc   :  { %34693 = vpow2.f32 %v9058_v61 }
 0x2cd   :  { %34695 = vpow2.f32 %v9106_v55  ;;  %10512 = vmatmul.mubr.f32.vlgmr.msra.gmra.mrb[42].mxu0 %v36228_v37 }
 0x2ce   :  { %34697 = vpow2.f32 %v8964_v44  ;;  %10525 = vmatpush1.msra.mxu0 %v10291_v41  ;;  %10588 = vmatprep.mubr.f32.mxu0 %v38316_v3 }
 0x2cf   :  { %34699 = vpow2.f32 %v9012_v57  ;;  %10597 = vmatprep.subr.mxu0 %v36380_v59 }
 0x2d0   :  { %10047 = vmatmul.mubr.f32.vlgmr.msra.gmra.mrb[50].mxu1 %v36228_v37  ;;  %34701 = vpow2.f32 %v9060_v28 }
 0x2d1   :  { %10060 = vmatpush1.msra.mxu1 %v9826_v48  ;;  %10123 = vmatprep.mubr.f32.mxu1 %v38316_v3  ;;  %34703 = vpow2.f32 %v9108_v2 }
 0x2d2   :  { %10132 = vmatprep.subr.mxu1 %v36317_v19 }
 0x2d4   :  { %v34690_v7 = vpop.eup %34689 }
 0x2d5   :  { %v34692_v12 = vpop.eup %34691  ;;  %10590 = vmatmul.mubr.f32.vlgmr.msra.gmra.mrb[42].mxu0 %v36206_v53 }
 0x2d6   :  { %v34694_v14 = vpop.eup %34693  ;;  %v9132_v41 = vadd.f32 %v34692_v12, %v34690_v7  ;;  %10599 = vmatpush1.msra.mxu0 %v36363_v24  ;;  %10662 = vmatprep.mubr.f32.mxu0 %v38316_v3 }
 0x2d7   :  { %v36428_v59 = vpop.eup %34695 }
 0x2d8   :  { %v34698_v58 = vpop.eup %34697  ;;  %v9148_v29 = vadd.f32 %v34694_v14, %v9132_v41  ;;  %10125 = vmatmul.mubr.f32.vlgmr.msra.gmra.mrb[50].mxu1 %v36206_v53 }
 0x2d9   :  { %v34700_v48 = vpop.eup %34699  ;;  %10134 = vmatpush1.msra.mxu1 %v36344_v23  ;;  %v7024_v19 = vpop.f32.mrb[24].mxu0  ;;  %10197 = vmatprep.mubr.f32.mxu1 %v38316_v3 }
 0x2da   :  { %v9164_v30 = vadd.f32 %v36428_v59, %v9148_v29  ;;  %v9133_v22 = vadd.f32 %v34700_v48, %v34698_v58  ;;  %v7026_v52 = vpop.f32.mrb[25].mxu0  ;;  %v34702_v5 = vpop.eup %34701 }
 0x2db   :  { %v36434_v6 = vpop.eup %34703 }
 0x2dc   :  { %34705 = vrcp.f32 %v9164_v30  ;;  %v9149_v24 = vadd.f32 %v34702_v5, %v9133_v22 }
 0x2dd   :  { %v7031_v11 = vpop.f32.mrb[26].mxu0  ;;  %10664 = vmatmul.mubr.f32.vlgmr.msra.gmra.mrb[42].mxu0 %v36206_v53 }
 0x2de   :  { %v9165_v0 = vadd.f32 %v36434_v6, %v9149_v24  ;;  %v8894_v43 = vmax.f32 %v7024_v19, %v7031_v11  ;;  %v7033_v60 = vpop.f32.mrb[27].mxu0  ;;  %11201 = vmatprep.mubr.f32.mxu0 %v38316_v3 }
 0x2df   :  { %v8895_v23 = vmax.f32 %v7026_v52, %v7033_v60 }
 0x2e0   :  { %34707 = vrcp.f32 %v9165_v0  ;;  %10199 = vmatmul.mubr.f32.vlgmr.msra.gmra.mrb[50].mxu1 %v36206_v53 }
 0x2e1   :  { %v7038_v8 = vpop.f32.mrb[28].mxu0  ;;  %10736 = vmatprep.mubr.f32.mxu1 %v38316_v3 }
 0x2e2   :  { %v8910_v15 = vmax.f32 %v8894_v43, %v7038_v8  ;;  %v7040_v17 = vpop.f32.mrb[29].mxu0 }
 0x2e3   :  { %v8911_v21 = vmax.f32 %v8895_v23, %v7040_v17 }
 0x2e5   :  { %v7045_v56 = vpop.f32.mrb[30].mxu0 }
 0x2e6   :  { %v34706_v26 = vpop.eup %34705  ;;  %v8926_v36 = vmax.f32 %v8910_v15, %v7045_v56  ;;  %v7047_v63 = vpop.f32.mrb[31].mxu0 }
 0x2e7   :  { %v8927_v20 = vmax.f32 %v8911_v21, %v7047_v63  ;;  %v9244_v9 = vmul.f32 %v34706_v26, %v34692_v12  ;;  %v36441_v51 = vmul.f32 %v34706_v26, %v34690_v7  ;;  %v36443_v40 = vmul.f32 %v34706_v26, %v34694_v14  ;;  %v34845_v12 = vld [vmem:[%s38305_s0 + $0xb0] sm:$0xff] }
 0x2e8   :  { %v8942_v49 = vsub.f32 %v7024_v19, %v8926_v36  ;;  %v8990_v16 = vsub.f32 %v7031_v11, %v8926_v36  ;;  %v9038_v34 = vsub.f32 %v7038_v8, %v8926_v36  ;;  %v9086_v61 = vsub.f32 %v7045_v56, %v8926_v36  ;;  %v34846_v11 = vld [vmem:[%s38305_s0 + $0xb8] sm:$0xff] }
 0x2e9   :  { %v8943_v55 = vsub.f32 %v7026_v52, %v8927_v20  ;;  %v8991_v44 = vsub.f32 %v7033_v60, %v8927_v20  ;;  %v9039_v57 = vsub.f32 %v7040_v17, %v8927_v20  ;;  %v9087_v28 = vsub.f32 %v7047_v63, %v8927_v20 }
 0x2ea   :  { %v34708_v2 = vpop.eup %34707  ;;  %v8966_v41 = vmul.f32 1.442695, %v8942_v49  ;;  %v9014_v29 = vmul.f32 1.442695, %v8990_v16  ;;  %v9062_v30 = vmul.f32 1.442695, %v9038_v34  ;;  %v9260_v7 = vmul.f32 %v34845_v12, %v9244_v9 }
 0x2eb   :  { %v9110_v22 = vmul.f32 1.442695, %v9086_v61  ;;  %v9245_v14 = vmul.f32 %v34708_v2, %v34700_v48  ;;  %v8968_v19 = vmul.f32 1.442695, %v8943_v55  ;;  %v9016_v52 = vmul.f32 1.442695, %v8991_v44 }
 0x2ec   :  { %34709 = vpow2.f32 %v8966_v41  ;;  %v36448_v24 = vand.u32 4294901760, %v9260_v7  ;;  %v36453_v43 = vmul.f32 %v34708_v2, %v34698_v58  ;;  %v36456_v23 = vmul.f32 %v34708_v2, %v34702_v5 }
 0x2ed   :  { %34711 = vpow2.f32 %v9014_v29  ;;  %v9261_v0 = vmul.f32 %v34846_v11, %v9245_v14  ;;  %v9064_v48 = vmul.f32 1.442695, %v9039_v57  ;;  %v9112_v17 = vmul.f32 1.442695, %v9087_v28 }
 0x2ee   :  { %34713 = vpow2.f32 %v9062_v30  ;;  %v10755_v60 = vsub.f32 %v9260_v7, %v36448_v24  ;;  %v36462_v5 = vmul.f32 %v34708_v2, %v36434_v6  ;;  %v36465_v63 = vmul.f32 %v34706_v26, %v36428_v59 }
 0x2ef   :  { %34715 = vpow2.f32 %v9110_v22  ;;  %v10670_v8 = vand.u32 4294901760, %v9261_v0 }
 0x2f0   :  { %34717 = vpow2.f32 %v8968_v19  ;;  %v10756_v15 = vand.u32 4294901760, %v10755_v60  ;;  %38322 = vst [vmem:[#allocation7_spill] sm:$0xff] %v36462_v5  ;;  %38323 = vst [vmem:[#allocation8_spill] sm:$0xff] %v36465_v63  ;;  %v34847_v19 = vld [vmem:[%s38305_s0 + $0xc0] sm:$0xff] }
 0x2f1   :  { %34719 = vpow2.f32 %v9016_v52  ;;  %10671 = vmatprep.subr.mxu1 %v10670_v8  ;;  %v10749_v21 = vsub.f32 %v9261_v0, %v10670_v8 }
 0x2f2   :  { %10673 = vmatpush1.msra.mxu1 %v36448_v24  ;;  %34721 = vpow2.f32 %v9064_v48  ;;  %v10757_v56 = vsub.f32 %v10755_v60, %v10756_v15 }
 0x2f3   :  { %10742 = vmatmul.mubr.f32.vlgmr.msra.gmra.mrb[52].mxu1 %v36245_v46  ;;  %v10750_v58 = vand.u32 4294901760, %v10749_v21  ;;  %34723 = vpow2.f32 %v9112_v17 }
 0x2f4   :  { %10822 = vmatprep.mubr.f32.mxu1 %v38316_v3  ;;  %v10758_v61 = vand.u32 4294901760, %v10757_v56 }
 0x2f5   :  { %v10751_v36 = vsub.f32 %v10749_v21, %v10750_v58 }
 0x2f6   :  { %v34710_v20 = vpop.eup %34709 }
 0x2f7   :  { %v34712_v9 = vpop.eup %34711  ;;  %v10752_v49 = vand.u32 4294901760, %v10751_v36 }
 0x2f8   :  { %v34714_v16 = vpop.eup %34713  ;;  %v9134_v34 = vadd.f32 %v34712_v9, %v34710_v20 }
 0x2f9   :  { %v34716_v55 = vpop.eup %34715  ;;  %10753 = vmatprep.subr.mxu1 %v10752_v49 }
 0x2fa   :  { %v34718_v44 = vpop.eup %34717  ;;  %v9150_v57 = vadd.f32 %v34714_v16, %v9134_v34  ;;  %10759 = vmatpush1.msra.mxu1 %v10758_v61 }
 0x2fb   :  { %v34720_v28 = vpop.eup %34719  ;;  %10824 = vmatmul.mubr.f32.vlgmr.msra.gmra.mrb[52].mxu1 %v36206_v53  ;;  %10832 = vmatprep.subr.mxu1 %v10749_v21 }
 0x2fc   :  { %v9166_v6 = vadd.f32 %v34716_v55, %v9150_v57  ;;  %v9135_v2 = vadd.f32 %v34720_v28, %v34718_v44  ;;  %10835 = vmatpush1.msra.mxu1 %v10755_v60  ;;  %10898 = vmatprep.mubr.f32.mxu1 %v38316_v3  ;;  %v34722_v59 = vpop.eup %34721 }
 0x2fd   :  { %10908 = vmatprep.subr.mxu1 %v10670_v8  ;;  %v34724_v41 = vpop.eup %34723 }
 0x2fe   :  { %34725 = vrcp.f32 %v9166_v6  ;;  %v9151_v26 = vadd.f32 %v34722_v59, %v9135_v2 }
 0x300   :  { %v9167_v29 = vadd.f32 %v34724_v41, %v9151_v26 }
 0x302   :  { %34727 = vrcp.f32 %v9167_v29 }
 0x303   :  { %10901 = vmatmul.mubr.f32.vlgmr.msra.gmra.mrb[52].mxu1 %v36216_v1 }
 0x304   :  { %10910 = vmatpush1.msra.mxu1 %v36448_v24  ;;  %10973 = vmatprep.mubr.f32.mxu1 %v38316_v3 }
 0x305   :  { %10986 = vmatprep.subr.mxu1 %v10750_v58  ;;  %v34848_v58 = vld [vmem:[%s38305_s0 + $0xc8] sm:$0xff] }
 0x308   :  { %v34726_v30 = vpop.eup %34725 }
 0x309   :  { %v9246_v12 = vmul.f32 %v34726_v30, %v34712_v9  ;;  %v36472_v7 = vmul.f32 %v34726_v30, %v34710_v20  ;;  %v36474_v22 = vmul.f32 %v34726_v30, %v34714_v16  ;;  %v36476_v14 = vmul.f32 %v34726_v30, %v34716_v55 }
 0x30b   :  { %38324 = vst [vmem:[#allocation9_spill] sm:$0xff] %v36476_v14  ;;  %10977 = vmatmul.mubr.f32.vlgmr.msra.gmra.mrb[52].mxu1 %v36228_v37  ;;  %v9262_v52 = vmul.f32 %v34847_v19, %v9246_v12 }
 0x30c   :  { %v34728_v11 = vpop.eup %34727  ;;  %10990 = vmatpush1.msra.mxu1 %v10756_v15  ;;  %11053 = vmatprep.mubr.f32.mxu1 %v38316_v3 }
 0x30d   :  { %11062 = vmatprep.subr.mxu1 %v10670_v8  ;;  %v9247_v0 = vmul.f32 %v34728_v11, %v34720_v28  ;;  %v36483_v60 = vand.u32 4294901760, %v9262_v52  ;;  %v36485_v48 = vmul.f32 %v34728_v11, %v34718_v44  ;;  %v36487_v17 = vmul.f32 %v34728_v11, %v34722_v59 }
 0x30e   :  { %v36489_v21 = vmul.f32 %v34728_v11, %v34724_v41 }
 0x30f   :  { %v9263_v56 = vmul.f32 %v34848_v58, %v9247_v0  ;;  %v36495_v36 = vsub.f32 %v9262_v52, %v36483_v60 }
 0x310   :  { %38325 = vst [vmem:[#allocation10_spill] sm:$0xff] %v36489_v21 }
 0x311   :  { %v36497_v15 = vand.u32 4294901760, %v9263_v56  ;;  %v11221_v8 = vand.u32 4294901760, %v36495_v36 }
 0x313   :  { %11055 = vmatmul.mubr.f32.vlgmr.msra.gmra.mrb[52].mxu1 %v36206_v53  ;;  %11136 = vmatprep.subr.mxu0 %v36497_v15  ;;  %v11214_v20 = vsub.f32 %v9263_v56, %v36497_v15  ;;  %v11222_v49 = vsub.f32 %v36495_v36, %v11221_v8 }
 0x314   :  { %11064 = vmatpush1.msra.mxu1 %v36448_v24  ;;  %11138 = vmatpush1.msra.mxu0 %v36483_v60 }
 0x315   :  { %11207 = vmatmul.mubr.f32.vlgmr.msra.gmra.mrb[44].mxu0 %v36245_v46  ;;  %v11215_v9 = vand.u32 4294901760, %v11214_v20  ;;  %11127 = vmatprep.mubr.f32.mxu1 %v38316_v3  ;;  %v11223_v44 = vand.u32 4294901760, %v11222_v49 }
 0x316   :  { %11287 = vmatprep.mubr.f32.mxu0 %v38316_v3 }
 0x317   :  { %v7636_v16 = vpop.f32.mrb[34].mxu1  ;;  %v11216_v34 = vsub.f32 %v11214_v20, %v11215_v9 }
 0x318   :  { %v7638_v61 = vpop.f32.mrb[35].mxu1 }
 0x319   :  { %v11217_v55 = vand.u32 4294901760, %v11216_v34 }
 0x31b   :  { %11218 = vmatprep.subr.mxu0 %v11217_v55  ;;  %v7643_v57 = vpop.f32.mrb[36].mxu1  ;;  %11129 = vmatmul.mubr.f32.vlgmr.msra.gmra.mrb[52].mxu1 %v36206_v53 }
 0x31c   :  { %11224 = vmatpush1.msra.mxu0 %v11223_v44  ;;  %v8896_v24 = vmax.f32 %v7636_v16, %v7643_v57  ;;  %v7645_v28 = vpop.f32.mrb[37].mxu1  ;;  %11666 = vmatprep.mubr.f32.mxu1 %v38316_v3 }
 0x31d   :  { %11289 = vmatmul.mubr.f32.vlgmr.msra.gmra.mrb[44].mxu0 %v36206_v53  ;;  %11297 = vmatprep.subr.mxu0 %v11214_v20  ;;  %v8897_v6 = vmax.f32 %v7638_v61, %v7645_v28 }
 0x31e   :  { %11300 = vmatpush1.msra.mxu0 %v36495_v36  ;;  %11363 = vmatprep.mubr.f32.mxu0 %v38316_v3 }
 0x31f   :  { %11373 = vmatprep.subr.mxu0 %v36497_v15  ;;  %v7650_v2 = vpop.f32.mrb[38].mxu1 }
 0x320   :  { %v8912_v59 = vmax.f32 %v8896_v24, %v7650_v2  ;;  %v7652_v26 = vpop.f32.mrb[39].mxu1 }
 0x321   :  { %v8913_v41 = vmax.f32 %v8897_v6, %v7652_v26 }
 0x323   :  { %v7657_v29 = vpop.f32.mrb[40].mxu1 }
 0x324   :  { %v8928_v30 = vmax.f32 %v8912_v59, %v7657_v29  ;;  %v7659_v12 = vpop.f32.mrb[41].mxu1 }
 0x325   :  { %11366 = vmatmul.mubr.f32.vlgmr.msra.gmra.mrb[44].mxu0 %v36216_v1  ;;  %v8929_v19 = vmax.f32 %v8913_v41, %v7659_v12 }
 0x326   :  { %11375 = vmatpush1.msra.mxu0 %v36483_v60  ;;  %v8944_v52 = vsub.f32 %v7636_v16, %v8928_v30  ;;  %v8992_v11 = vsub.f32 %v7643_v57, %v8928_v30  ;;  %v9040_v0 = vsub.f32 %v7650_v2, %v8928_v30  ;;  %v9088_v58 = vsub.f32 %v7657_v29, %v8928_v30 }
 0x327   :  { %11451 = vmatprep.subr.mxu0 %v11215_v9  ;;  %v8945_v56 = vsub.f32 %v7638_v61, %v8929_v19  ;;  %v8993_v36 = vsub.f32 %v7645_v28, %v8929_v19  ;;  %v9041_v20 = vsub.f32 %v7652_v26, %v8929_v19  ;;  %v9089_v49 = vsub.f32 %v7659_v12, %v8929_v19 }
 0x328   :  { %v8970_v34 = vmul.f32 1.442695, %v8944_v52  ;;  %v9018_v55 = vmul.f32 1.442695, %v8992_v11  ;;  %v9066_v44 = vmul.f32 1.442695, %v9040_v0  ;;  %11438 = vmatprep.mubr.f32.mxu0 %v38316_v3 }
 0x329   :  { %v9114_v24 = vmul.f32 1.442695, %v9088_v58  ;;  %v8972_v6 = vmul.f32 1.442695, %v8945_v56  ;;  %v9020_v59 = vmul.f32 1.442695, %v8993_v36 }
 0x32a   :  { %34729 = vpow2.f32 %v8970_v34  ;;  %v9068_v16 = vmul.f32 1.442695, %v9041_v20  ;;  %v9116_v9 = vmul.f32 1.442695, %v9089_v49 }
 0x32b   :  { %34731 = vpow2.f32 %v9018_v55 }
 0x32c   :  { %34733 = vpow2.f32 %v9066_v44 }
 0x32d   :  { %34735 = vpow2.f32 %v9114_v24  ;;  %11442 = vmatmul.mubr.f32.vlgmr.msra.gmra.mrb[44].mxu0 %v36228_v37 }
 0x32e   :  { %34737 = vpow2.f32 %v8972_v6  ;;  %11455 = vmatpush1.msra.mxu0 %v11221_v8  ;;  %11518 = vmatprep.mubr.f32.mxu0 %v38316_v3 }
 0x32f   :  { %34739 = vpow2.f32 %v9020_v59  ;;  %11527 = vmatprep.subr.mxu0 %v36497_v15 }
 0x330   :  { %34741 = vpow2.f32 %v9068_v16 }
 0x331   :  { %34743 = vpow2.f32 %v9116_v9 }
 0x334   :  { %v34730_v61 = vpop.eup %34729 }
 0x335   :  { %v34732_v57 = vpop.eup %34731  ;;  %11520 = vmatmul.mubr.f32.vlgmr.msra.gmra.mrb[44].mxu0 %v36206_v53 }
 0x336   :  { %v34734_v28 = vpop.eup %34733  ;;  %v9136_v2 = vadd.f32 %v34732_v57, %v34730_v61  ;;  %11529 = vmatpush1.msra.mxu0 %v36483_v60  ;;  %11592 = vmatprep.mubr.f32.mxu0 %v38316_v3 }
 0x337   :  { %v34736_v26 = vpop.eup %34735 }
 0x338   :  { %v34738_v8 = vpop.eup %34737  ;;  %v9152_v41 = vadd.f32 %v34734_v28, %v9136_v2 }
 0x339   :  { %v34740_v29 = vpop.eup %34739 }
 0x33a   :  { %v9168_v30 = vadd.f32 %v34736_v26, %v9152_v41  ;;  %v9137_v12 = vadd.f32 %v34740_v29, %v34738_v8  ;;  %v8248_v19 = vpop.f32.mrb[32].mxu0  ;;  %v34742_v15 = vpop.eup %34741 }
 0x33b   :  { %v8250_v52 = vpop.f32.mrb[33].mxu0  ;;  %v36524_v0 = vpop.eup %34743 }
 0x33c   :  { %34745 = vrcp.f32 %v9168_v30  ;;  %v9153_v11 = vadd.f32 %v34742_v15, %v9137_v12 }
 0x33d   :  { %11594 = vmatmul.mubr.f32.vlgmr.msra.gmra.mrb[44].mxu0 %v36206_v53 }
 0x33e   :  { %v9169_v58 = vadd.f32 %v36524_v0, %v9153_v11  ;;  %v8255_v60 = vpop.f32.mrb[34].mxu0  ;;  %12131 = vmatprep.mubr.f32.mxu0 %v38316_v3 }
 0x33f   :  { %v8898_v56 = vmax.f32 %v8248_v19, %v8255_v60  ;;  %v8257_v36 = vpop.f32.mrb[35].mxu0 }
 0x340   :  { %34747 = vrcp.f32 %v9169_v58  ;;  %v8899_v20 = vmax.f32 %v8250_v52, %v8257_v36 }
 0x342   :  { %v8262_v49 = vpop.f32.mrb[36].mxu0 }
 0x343   :  { %v8914_v34 = vmax.f32 %v8898_v56, %v8262_v49  ;;  %v8264_v55 = vpop.f32.mrb[37].mxu0 }
 0x344   :  { %v8915_v44 = vmax.f32 %v8899_v20, %v8264_v55 }
 0x346   :  { %v34746_v24 = vpop.eup %34745  ;;  %v8269_v6 = vpop.f32.mrb[38].mxu0 }
 0x347   :  { %v8930_v59 = vmax.f32 %v8914_v34, %v8269_v6  ;;  %v8271_v16 = vpop.f32.mrb[39].mxu0  ;;  %v9248_v9 = vmul.f32 %v34746_v24, %v34732_v57  ;;  %v36529_v2 = vmul.f32 %v34746_v24, %v34730_v61  ;;  %v36531_v41 = vmul.f32 %v34746_v24, %v34734_v28  ;;  %v34849_v28 = vld [vmem:[%s38305_s0 + $0xd0] sm:$0xff] }
 0x348   :  { %v8931_v30 = vmax.f32 %v8915_v44, %v8271_v16  ;;  %v36533_v12 = vmul.f32 %v34746_v24, %v34736_v26  ;;  %v36551_v24 = vld [vmem:[%s38308_s3] sm:$0xff] }
 0x349   :  { %v8946_v11 = vsub.f32 %v8248_v19, %v8930_v59  ;;  %v8994_v3 = vsub.f32 %v8255_v60, %v8930_v59  ;;  %v9042_v58 = vsub.f32 %v8262_v49, %v8930_v59  ;;  %v9090_v63 = vsub.f32 %v8269_v6, %v8930_v59  ;;  %v34850_v60 = vld [vmem:[%s38305_s0 + $0xd8] sm:$0xff]  ;;  %16749 = vrot.lane.b32.xlu0 %v36551_v24, %s34906_s12 }
 0x34a   :  { %38326 = vst [vmem:[#allocation11_spill] sm:$0xff] %v36533_v12  ;;  %v34748_v5 = vpop.eup %34747  ;;  %v8947_v56 = vsub.f32 %v8250_v52, %v8931_v30  ;;  %v8995_v14 = vsub.f32 %v8257_v36, %v8931_v30  ;;  %v9043_v20 = vsub.f32 %v8264_v55, %v8931_v30  ;;  %v9091_v21 = vsub.f32 %v8271_v16, %v8931_v30 }
 0x34b   :  { %v8974_v31 = vmul.f32 1.442695, %v8946_v11  ;;  %v9022_v34 = vmul.f32 1.442695, %v8994_v3  ;;  %v9070_v13 = vmul.f32 1.442695, %v9042_v58  ;;  %v9249_v57 = vmul.f32 %v34748_v5, %v34740_v29  ;;  %20521 = vrot.lane.b32.xlu1 %v36551_v24, %s34907_s18 }
 0x34c   :  { %v9118_v61 = vmul.f32 1.442695, %v9090_v63  ;;  %v9264_v26 = vmul.f32 %v34849_v28, %v9248_v9  ;;  %v8976_v19 = vmul.f32 1.442695, %v8947_v56  ;;  %v9024_v36 = vmul.f32 1.442695, %v8995_v14 }
 0x34d   :  { %34749 = vpow2.f32 %v8974_v31  ;;  %v9265_v52 = vmul.f32 %v34850_v60, %v9249_v57  ;;  %v36543_v3 = vmul.f32 %v34748_v5, %v34738_v8  ;;  %v36545_v29 = vmul.f32 %v34748_v5, %v34742_v15 }
 0x34e   :  { %34751 = vpow2.f32 %v9022_v34  ;;  %v36541_v49 = vand.u32 4294901760, %v9264_v26  ;;  %v9072_v55 = vmul.f32 1.442695, %v9043_v20  ;;  %v38327_v6 = vmov 0.0  }
 0x34f   :  { %34753 = vpow2.f32 %v9070_v13  ;;  %v11600_v63 = vand.u32 4294901760, %v9265_v52  ;;  %v9120_v13 = vmul.f32 1.442695, %v9091_v21  ;;  %v36559_v16 = vmul.f32 %v34748_v5, %v36524_v0 }
 0x350   :  { %34755 = vpow2.f32 %v9118_v61  ;;  %v11685_v31 = vsub.f32 %v9264_v26, %v36541_v49 }
 0x351   :  { %34757 = vpow2.f32 %v8976_v19  ;;  %11601 = vmatprep.subr.mxu1 %v11600_v63  ;;  %v11679_v44 = vsub.f32 %v9265_v52, %v11600_v63  ;;  %38328 = vst [vmem:[#allocation12_spill] sm:$0xff] %v36559_v16 }
 0x352   :  { %34759 = vpow2.f32 %v9024_v36  ;;  %11603 = vmatpush1.msra.mxu1 %v36541_v49  ;;  %v11686_v14 = vand.u32 4294901760, %v11685_v31 }
 0x353   :  { %11672 = vmatmul.mubr.f32.vlgmr.msra.gmra.mrb[54].mxu1 %v36245_v46  ;;  %v11680_v8 = vand.u32 4294901760, %v11679_v44  ;;  %34761 = vpow2.f32 %v9072_v55 }
 0x354   :  { %v11687_v15 = vsub.f32 %v11685_v31, %v11686_v14  ;;  %11752 = vmatprep.mubr.f32.mxu1 %v38327_v6  ;;  %34763 = vpow2.f32 %v9120_v13  ;;  %v34852_v13 = vld [vmem:[%s38305_s0 + $0xe0] sm:$0xff] }
 0x355   :  { %v11681_v59 = vsub.f32 %v11679_v44, %v11680_v8 }
 0x356   :  { %v11688_v58 = vand.u32 4294901760, %v11687_v15 }
 0x357   :  { %v34750_v9 = vpop.eup %34749  ;;  %v11682_v30 = vand.u32 4294901760, %v11681_v59 }
 0x358   :  { %v34752_v11 = vpop.eup %34751 }
 0x359   :  { %v34754_v21 = vpop.eup %34753  ;;  %v9138_v56 = vadd.f32 %v34752_v11, %v34750_v9  ;;  %11683 = vmatprep.subr.mxu1 %v11682_v30 }
 0x35a   :  { %v34756_v20 = vpop.eup %34755  ;;  %11689 = vmatpush1.msra.mxu1 %v11688_v58 }
 0x35b   :  { %v34758_v34 = vpop.eup %34757  ;;  %v9154_v57 = vadd.f32 %v34754_v21, %v9138_v56  ;;  %11754 = vmatmul.mubr.f32.vlgmr.msra.gmra.mrb[54].mxu1 %v36206_v53  ;;  %11762 = vmatprep.subr.mxu1 %v11679_v44 }
 0x35c   :  { %v34760_v61 = vpop.eup %34759  ;;  %11765 = vmatpush1.msra.mxu1 %v11685_v31  ;;  %11828 = vmatprep.mubr.f32.mxu1 %v38327_v6 }
 0x35d   :  { %v9170_v5 = vadd.f32 %v34756_v20, %v9154_v57  ;;  %v9139_v0 = vadd.f32 %v34760_v61, %v34758_v34  ;;  %11838 = vmatprep.subr.mxu1 %v11600_v63  ;;  %v34762_v28 = vpop.eup %34761 }
 0x35e   :  { %v34764_v19 = vpop.eup %34763 }
 0x35f   :  { %34765 = vrcp.f32 %v9170_v5  ;;  %v9155_v26 = vadd.f32 %v34762_v28, %v9139_v0 }
 0x361   :  { %v9171_v60 = vadd.f32 %v34764_v19, %v9155_v26 }
 0x363   :  { %34767 = vrcp.f32 %v9171_v60  ;;  %11831 = vmatmul.mubr.f32.vlgmr.msra.gmra.mrb[54].mxu1 %v36216_v1 }
 0x364   :  { %11840 = vmatpush1.msra.mxu1 %v36541_v49  ;;  %11903 = vmatprep.mubr.f32.mxu1 %v38327_v6 }
 0x365   :  { %11916 = vmatprep.subr.mxu1 %v11680_v8 }
 0x369   :  { %v34766_v52 = vpop.eup %34765 }
 0x36a   :  { %v9250_v36 = vmul.f32 %v34766_v52, %v34752_v11  ;;  %v36566_v55 = vmul.f32 %v34766_v52, %v34750_v9  ;;  %v36568_v31 = vmul.f32 %v34766_v52, %v34754_v21  ;;  %v36570_v44 = vmul.f32 %v34766_v52, %v34756_v20 }
 0x36b   :  { %11907 = vmatmul.mubr.f32.vlgmr.msra.gmra.mrb[54].mxu1 %v36228_v37 }
 0x36c   :  { %38329 = vst [vmem:[#allocation13_spill] sm:$0xff] %v36570_v44  ;;  %11920 = vmatpush1.msra.mxu1 %v11686_v14  ;;  %11983 = vmatprep.mubr.f32.mxu1 %v38327_v6  ;;  %v9266_v15 = vmul.f32 %v34852_v13, %v9250_v36  ;;  %v34853_v14 = vld [vmem:[%s38305_s0 + $0xe8] sm:$0xff] }
 0x36d   :  { %v34768_v59 = vpop.eup %34767  ;;  %11992 = vmatprep.subr.mxu1 %v11600_v63 }
 0x36e   :  { %v9251_v8 = vmul.f32 %v34768_v59, %v34760_v61  ;;  %v36577_v30 = vand.u32 4294901760, %v9266_v15  ;;  %v36579_v9 = vmul.f32 %v34768_v59, %v34758_v34  ;;  %v36581_v11 = vmul.f32 %v34768_v59, %v34762_v28 }
 0x36f   :  { %v36583_v58 = vmul.f32 %v34768_v59, %v34764_v19 }
 0x370   :  { %v9267_v21 = vmul.f32 %v34853_v14, %v9251_v8  ;;  %v36589_v56 = vsub.f32 %v9266_v15, %v36577_v30 }
 0x371   :  { %38330 = vst [vmem:[#allocation14_spill] sm:$0xff] %v36583_v58 }
 0x372   :  { %v36591_v20 = vand.u32 4294901760, %v9267_v21  ;;  %v38318_v63 = vand.u32 4294901760, %v36589_v56 }
 0x373   :  { %11985 = vmatmul.mubr.f32.vlgmr.msra.gmra.mrb[54].mxu1 %v36206_v53 }
 0x374   :  { %11994 = vmatpush1.msra.mxu1 %v36541_v49  ;;  %12066 = vmatprep.subr.mxu0 %v36591_v20  ;;  %v12144_v34 = vsub.f32 %v9267_v21, %v36591_v20  ;;  %v12152_v61 = vsub.f32 %v36589_v56, %v38318_v63 }
 0x375   :  { %12068 = vmatpush1.msra.mxu0 %v36577_v30  ;;  %12057 = vmatprep.mubr.f32.mxu1 %v38327_v6 }
 0x376   :  { %12137 = vmatmul.mubr.f32.vlgmr.msra.gmra.mrb[46].mxu0 %v36245_v46  ;;  %v12145_v57 = vand.u32 4294901760, %v12144_v34  ;;  %v12153_v26 = vand.u32 4294901760, %v12152_v61 }
 0x377   :  { %12217 = vmatprep.mubr.f32.mxu0 %v38327_v6 }
 0x378   :  { %v12146_v5 = vsub.f32 %v12144_v34, %v12145_v57 }
 0x379   :  { %v8860_v0 = vpop.f32.mrb[42].mxu1 }
 0x37a   :  { %v12147_v49 = vand.u32 4294901760, %v12146_v5  ;;  %v8862_v28 = vpop.f32.mrb[43].mxu1 }
 0x37b   :  { %12059 = vmatmul.mubr.f32.vlgmr.msra.gmra.mrb[54].mxu1 %v36206_v53 }
 0x37c   :  { %12148 = vmatprep.subr.mxu0 %v12147_v49  ;;  %12596 = vmatprep.mubr.f32.mxu1 %v38327_v6 }
 0x37d   :  { %12154 = vmatpush1.msra.mxu0 %v12153_v26  ;;  %v8867_v19 = vpop.f32.mrb[44].mxu1 }
 0x37e   :  { %12219 = vmatmul.mubr.f32.vlgmr.msra.gmra.mrb[46].mxu0 %v36206_v53  ;;  %12227 = vmatprep.subr.mxu0 %v12144_v34  ;;  %v8900_v60 = vmax.f32 %v8860_v0, %v8867_v19  ;;  %v8869_v52 = vpop.f32.mrb[45].mxu1 }
 0x37f   :  { %12230 = vmatpush1.msra.mxu0 %v36589_v56  ;;  %v8901_v36 = vmax.f32 %v8862_v28, %v8869_v52  ;;  %12293 = vmatprep.mubr.f32.mxu0 %v38327_v6 }
 0x380   :  { %12303 = vmatprep.subr.mxu0 %v36591_v20 }
 0x381   :  { %v8874_v13 = vpop.f32.mrb[46].mxu1 }
 0x382   :  { %v8916_v15 = vmax.f32 %v8900_v60, %v8874_v13  ;;  %v8876_v59 = vpop.f32.mrb[47].mxu1 }
 0x383   :  { %v8917_v8 = vmax.f32 %v8901_v36, %v8876_v59 }
 0x385   :  { %v8881_v14 = vpop.f32.mrb[48].mxu1 }
 0x386   :  { %12296 = vmatmul.mubr.f32.vlgmr.msra.gmra.mrb[46].mxu0 %v36216_v1  ;;  %v8932_v21 = vmax.f32 %v8916_v15, %v8881_v14  ;;  %v8883_v61 = vpop.f32.mrb[49].mxu1  ;;  %v34854_v15 = vld [vmem:[%s38305_s0 + $0x8] sm:$0xff] }
 0x387   :  { %12305 = vmatpush1.msra.mxu0 %v36577_v30  ;;  %v8933_v34 = vmax.f32 %v8917_v8, %v8883_v61  ;;  %12368 = vmatprep.mubr.f32.mxu0 %v38327_v6  ;;  %v9223_v8 = vmul.f32 %v34854_v15, %v36163_v27 }
 0x388   :  { %12381 = vmatprep.subr.mxu0 %v12145_v57  ;;  %v8948_v5 = vsub.f32 %v8860_v0, %v8932_v21  ;;  %v8996_v49 = vsub.f32 %v8867_v19, %v8932_v21  ;;  %v9044_v26 = vsub.f32 %v8874_v13, %v8932_v21  ;;  %v9092_v63 = vsub.f32 %v8881_v14, %v8932_v21 }
 0x389   :  { %v8949_v12 = vsub.f32 %v8862_v28, %v8933_v34  ;;  %v8997_v16 = vsub.f32 %v8869_v52, %v8933_v34  ;;  %v9045_v60 = vsub.f32 %v8876_v59, %v8933_v34  ;;  %v9093_v44 = vsub.f32 %v8883_v61, %v8933_v34  ;;  %v34855_v52 = vld [vmem:[%s38305_s0] sm:$0xff] }
 0x38a   :  { %v8978_v36 = vmul.f32 1.442695, %v8948_v5  ;;  %v9026_v58 = vmul.f32 1.442695, %v8996_v49  ;;  %v9074_v45 = vmul.f32 1.442695, %v9044_v26  ;;  %v9222_v13 = vmul.f32 %v34855_v52, %v36150_v10 }
 0x38b   :  { %v12995_v57 = vsel %vm156_vm0, %v36551_v24, 0  ;;  %v9122_v0 = vmul.f32 1.442695, %v9092_v63  ;;  %v8980_v19 = vmul.f32 1.442695, %v8949_v12  ;;  %v36627_v27 = vand.u32 4294901760, %v9223_v8 }
 0x38c   :  { %34769 = vpow2.f32 %v8978_v36  ;;  %v9028_v28 = vmul.f32 1.442695, %v8997_v16  ;;  %v36624_v59 = vand.u32 4294901760, %v12995_v57  ;;  %v9076_v14 = vmul.f32 1.442695, %v9045_v60 }
 0x38d   :  { %34771 = vpow2.f32 %v9026_v58  ;;  %v38331_v63 = vand.u32 4294901760, %v36589_v56  ;;  %v9124_v12 = vmul.f32 1.442695, %v9093_v44  ;;  %v36633_v10 = vand.u32 4294901760, %v9222_v13 }
 0x38e   :  { %34773 = vpow2.f32 %v9074_v45  ;;  %12372 = vmatmul.mubr.f32.vlgmr.msra.gmra.mrb[46].mxu0 %v36228_v37  ;;  %v36636_v45 = vsub.f32 %v12995_v57, %v36624_v59  ;;  %v36639_v16 = vsub.f32 %v9223_v8, %v36627_v27 }
 0x38f   :  { %34775 = vpow2.f32 %v9122_v0  ;;  %12385 = vmatpush1.msra.mxu0 %v38331_v63  ;;  %12448 = vmatprep.mubr.f32.mxu0 %v38327_v6  ;;  %v36642_v58 = vsub.f32 %v9222_v13, %v36633_v10 }
 0x390   :  { %34777 = vpow2.f32 %v8980_v19  ;;  %12457 = vmatprep.subr.mxu0 %v36591_v20  ;;  %v36645_v21 = vand.u32 4294901760, %v36636_v45  ;;  %v13077_v44 = vand.u32 4294901760, %v36639_v16 }
 0x391   :  { %34779 = vpow2.f32 %v9028_v28  ;;  %v13083_v49 = vand.u32 4294901760, %v36642_v58 }
 0x392   :  { %34781 = vpow2.f32 %v9076_v14  ;;  %v13078_v36 = vsub.f32 %v36639_v16, %v13077_v44  ;;  %v13067_v15 = vsub.f32 %v36636_v45, %v36645_v21 }
 0x393   :  { %34783 = vpow2.f32 %v9124_v12  ;;  %v13084_v19 = vsub.f32 %v36642_v58, %v13083_v49 }
 0x394   :  { %v13079_v52 = vand.u32 4294901760, %v13078_v36  ;;  %v36660_v13 = vand.u32 4294901760, %v13067_v15 }
 0x395   :  { %v13085_v12 = vand.u32 4294901760, %v13084_v19 }
 0x396   :  { %v34770_v56 = vpop.eup %34769  ;;  %12450 = vmatmul.mubr.f32.vlgmr.msra.gmra.mrb[46].mxu0 %v36206_v53 }
 0x397   :  { %v34772_v20 = vpop.eup %34771  ;;  %12459 = vmatpush1.msra.mxu0 %v36577_v30  ;;  %12522 = vmatprep.mubr.f32.mxu0 %v38327_v6 }
 0x398   :  { %v34774_v61 = vpop.eup %34773  ;;  %v9140_v34 = vadd.f32 %v34772_v20, %v34770_v56  ;;  %12998 = vmatprep.subr.mxu0 %v36627_v27 }
 0x399   :  { %v34776_v5 = vpop.eup %34775 }
 0x39a   :  { %v34778_v26 = vpop.eup %34777  ;;  %v9156_v60 = vadd.f32 %v34774_v61, %v9140_v34 }
 0x39b   :  { %v34780_v8 = vpop.eup %34779 }
 0x39c   :  { %v9172_v57 = vadd.f32 %v34776_v5, %v9156_v60  ;;  %v9141_v0 = vadd.f32 %v34780_v8, %v34778_v26  ;;  %v34782_v30 = vpop.eup %34781 }
 0x39d   :  { %v34784_v14 = vpop.eup %34783 }
 0x39e   :  { %34785 = vrcp.f32 %v9172_v57  ;;  %v9157_v28 = vadd.f32 %v34782_v30, %v9141_v0  ;;  %12524 = vmatmul.mubr.f32.vlgmr.msra.gmra.mrb[46].mxu0 %v36206_v53  ;;  %v34856_v0 = vld [vmem:[%s38305_s0 + $0xf0] sm:$0xff] }
 0x39f   :  { %13000 = vmatpush1.msra.mxu0 %v36633_v10  ;;  %13063 = vmatprep.mubr.f32.mxu0 %v38327_v6 }
 0x3a0   :  { %v9173_v63 = vadd.f32 %v34784_v14, %v9157_v28  ;;  %13080 = vmatprep.subr.mxu0 %v13079_v52  ;;  %v34857_v52 = vld [vmem:[%s38305_s0 + $0xf8] sm:$0xff] }
 0x3a2   :  { %34787 = vrcp.f32 %v9173_v63  ;;  %13069 = vmatmul.mubr.f32.vlgmr.msra.gmra.mrb[40].mxu0 %v36660_v13 }
 0x3a3   :  { %13086 = vmatpush1.msra.mxu0 %v13085_v12  ;;  %13149 = vmatprep.mubr.f32.mxu0 %v38327_v6 }
 0x3a4   :  { %13159 = vmatprep.subr.mxu0 %v36639_v16 }
 0x3a8   :  { %v34786_v34 = vpop.eup %34785 }
 0x3a9   :  { %v9252_v60 = vmul.f32 %v34786_v34, %v34772_v20  ;;  %v36667_v36 = vmul.f32 %v34786_v34, %v34770_v56  ;;  %v36669_v15 = vmul.f32 %v34786_v34, %v34774_v61  ;;  %v36671_v57 = vmul.f32 %v34786_v34, %v34776_v5 }
 0x3aa   :  { %13151 = vmatmul.mubr.f32.vlgmr.msra.gmra.mrb[40].mxu0 %v36624_v59 }
 0x3ab   :  { %13162 = vmatpush1.msra.mxu0 %v36642_v58  ;;  %13225 = vmatprep.mubr.f32.mxu0 %v38327_v6  ;;  %v9268_v19 = vmul.f32 %v34856_v0, %v9252_v60 }
 0x3ac   :  { %v34788_v16 = vpop.eup %34787  ;;  %13235 = vmatprep.subr.mxu0 %v36627_v27 }
 0x3ad   :  { %v9253_v56 = vmul.f32 %v34788_v16, %v34780_v8  ;;  %v36680_v20 = vand.u32 4294901760, %v9268_v19  ;;  %v36682_v61 = vmul.f32 %v34788_v16, %v34778_v26  ;;  %v36684_v5 = vmul.f32 %v34788_v16, %v34782_v30 }
 0x3ae   :  { %v36686_v28 = vmul.f32 %v34788_v16, %v34784_v14  ;;  %v34858_v14 = vld [vmem:[%s38305_s0 + $0x28] sm:$0xff] }
 0x3af   :  { %v9269_v63 = vmul.f32 %v34857_v52, %v9253_v56  ;;  %v12615_v12 = vsub.f32 %v9268_v19, %v36680_v20  ;;  %v9227_v0 = vmul.f32 %v34858_v14, %v36366_v47 }
 0x3b1   :  { %v12530_v34 = vand.u32 4294901760, %v9269_v63  ;;  %v12616_v60 = vand.u32 4294901760, %v12615_v12  ;;  %v36707_v52 = vand.u32 4294901760, %v9227_v0 }
 0x3b2   :  { %13228 = vmatmul.mubr.f32.vlgmr.msra.gmra.mrb[40].mxu0 %v36636_v45 }
 0x3b3   :  { %12531 = vmatprep.subr.mxu1 %v12530_v34  ;;  %13237 = vmatpush1.msra.mxu0 %v36633_v10  ;;  %v12609_v26 = vsub.f32 %v9269_v63, %v12530_v34  ;;  %v12617_v30 = vsub.f32 %v12615_v12, %v12616_v60 }
 0x3b4   :  { %12533 = vmatpush1.msra.mxu1 %v36680_v20  ;;  %13313 = vmatprep.subr.mxu0 %v13077_v44  ;;  %v34859_v44 = vld [vmem:[%s38305_s0 + $0x20] sm:$0xff] }
 0x3b5   :  { %12602 = vmatmul.mubr.f32.vlgmr.msra.gmra.mrb[56].mxu1 %v36245_v46  ;;  %13300 = vmatprep.mubr.f32.mxu0 %v38327_v6  ;;  %v12610_v8 = vand.u32 4294901760, %v12609_v26  ;;  %v9226_v46 = vmul.f32 %v34859_v44, %v36352_v50  ;;  %v12618_v56 = vand.u32 4294901760, %v12617_v30  ;;  %v14006_v50 = vsub.f32 %v9227_v0, %v36707_v52 }
 0x3b6   :  { %12682 = vmatprep.mubr.f32.mxu1 %v38327_v6 }
 0x3b7   :  { %v12611_v19 = vsub.f32 %v12609_v26, %v12610_v8  ;;  %v36713_v47 = vand.u32 4294901760, %v9226_v46  ;;  %v14007_v58 = vand.u32 4294901760, %v14006_v50 }
 0x3b9   :  { %v12612_v16 = vand.u32 4294901760, %v12611_v19  ;;  %v36719_v63 = vsub.f32 %v9226_v46, %v36713_v47 }
 0x3ba   :  { %13304 = vmatmul.mubr.f32.vlgmr.msra.gmra.mrb[40].mxu0 %v36645_v21 }
 0x3bb   :  { %12613 = vmatprep.subr.mxu1 %v12612_v16  ;;  %13317 = vmatpush1.msra.mxu0 %v13083_v49  ;;  %v14008_v49 = vsub.f32 %v14006_v50, %v14007_v58 }
 0x3bc   :  { %12619 = vmatpush1.msra.mxu1 %v12618_v56  ;;  %13389 = vmatprep.subr.mxu0 %v36627_v27  ;;  %v14013_v27 = vand.u32 4294901760, %v36719_v63  ;;  %v34863_v56 = vld [vmem:[%s38305_s0 + $0x40] sm:$0xff] }
 0x3bd   :  { %12684 = vmatmul.mubr.f32.vlgmr.msra.gmra.mrb[56].mxu1 %v36206_v53  ;;  %12692 = vmatprep.subr.mxu1 %v12609_v26  ;;  %v14009_v30 = vand.u32 4294901760, %v14008_v49 }
 0x3be   :  { %12695 = vmatpush1.msra.mxu1 %v12615_v12  ;;  %13380 = vmatprep.mubr.f32.mxu0 %v38327_v6  ;;  %v14014_v12 = vsub.f32 %v36719_v63, %v14013_v27 }
 0x3bf   :  { %12768 = vmatprep.subr.mxu1 %v12530_v34  ;;  %12758 = vmatprep.mubr.f32.mxu1 %v38327_v6 }
 0x3c0   :  { %v14015_v14 = vand.u32 4294901760, %v14014_v12 }
 0x3c2   :  { %13382 = vmatmul.mubr.f32.vlgmr.msra.gmra.mrb[40].mxu0 %v36624_v59 }
 0x3c3   :  { %13391 = vmatpush1.msra.mxu0 %v36633_v10  ;;  %13454 = vmatprep.mubr.f32.mxu0 %v38327_v6  ;;  %v34860_v10 = vld [vmem:[%s38305_s0 + $0x18] sm:$0xff] }
 0x3c4   :  { %13928 = vmatprep.subr.mxu0 %v36707_v52  ;;  %v9225_v26 = vmul.f32 %v34860_v10, %v36294_v4 }
 0x3c5   :  { %12761 = vmatmul.mubr.f32.vlgmr.msra.gmra.mrb[56].mxu1 %v36216_v1  ;;  %v34861_v1 = vld [vmem:[%s38305_s0 + $0x10] sm:$0xff] }
 0x3c6   :  { %12770 = vmatpush1.msra.mxu1 %v36680_v20  ;;  %12833 = vmatprep.mubr.f32.mxu1 %v38327_v6  ;;  %v36742_v0 = vand.u32 4294901760, %v9225_v26 }
 0x3c7   :  { %12846 = vmatprep.subr.mxu1 %v12610_v8  ;;  %v9224_v8 = vmul.f32 %v34861_v1, %v36283_v38 }
 0x3c8   :  { %v13541_v19 = vsub.f32 %v9225_v26, %v36742_v0 }
 0x3c9   :  { %v36746_v4 = vand.u32 4294901760, %v9224_v8 }
 0x3ca   :  { %13456 = vmatmul.mubr.f32.vlgmr.msra.gmra.mrb[40].mxu0 %v36624_v59 }
 0x3cb   :  { %13930 = vmatpush1.msra.mxu0 %v36713_v47  ;;  %13993 = vmatprep.mubr.f32.mxu0 %v38327_v6  ;;  %v36751_v38 = vsub.f32 %v9224_v8, %v36746_v4 }
 0x3cc   :  { %14010 = vmatprep.subr.mxu0 %v14009_v30  ;;  %v34865_v30 = vld [vmem:[%s38305_s0 + $0x30] sm:$0xff] }
 0x3cd   :  { %12837 = vmatmul.mubr.f32.vlgmr.msra.gmra.mrb[56].mxu1 %v36228_v37  ;;  %v13542_v37 = vand.u32 4294901760, %v13541_v19  ;;  %v9228_v1 = vmul.f32 %v34865_v30, %v36441_v51 }
 0x3ce   :  { %12850 = vmatpush1.msra.mxu1 %v12616_v60  ;;  %13999 = vmatmul.mubr.f32.vlgmr.msra.gmra.mrb[42].mxu0 %v36660_v13 }
 0x3cf   :  { %12922 = vmatprep.subr.mxu1 %v12530_v34  ;;  %14016 = vmatpush1.msra.mxu0 %v14015_v14  ;;  %v13548_v34 = vand.u32 4294901760, %v36751_v38  ;;  %v13543_v60 = vsub.f32 %v13541_v19, %v13542_v37 }
 0x3d0   :  { %14089 = vmatprep.subr.mxu0 %v14006_v50  ;;  %12913 = vmatprep.mubr.f32.mxu1 %v38327_v6  ;;  %v9230_v50 = vmul.f32 %v34863_v56, %v36472_v7 }
 0x3d1   :  { %14079 = vmatprep.mubr.f32.mxu0 %v38327_v6  ;;  %v13549_v16 = vsub.f32 %v36751_v38, %v13548_v34 }
 0x3d3   :  { %v13550_v44 = vand.u32 4294901760, %v13549_v16 }
 0x3d5   :  { %12915 = vmatmul.mubr.f32.vlgmr.msra.gmra.mrb[56].mxu1 %v36206_v53 }
 0x3d6   :  { %12924 = vmatpush1.msra.mxu1 %v36680_v20  ;;  %14081 = vmatmul.mubr.f32.vlgmr.msra.gmra.mrb[42].mxu0 %v36624_v59  ;;  %v13544_v20 = vand.u32 4294901760, %v13543_v60  ;;  %v34866_v60 = vld [vmem:[%s38305_s0 + $0x68] sm:$0xff] }
 0x3d7   :  { %13463 = vmatprep.subr.mxu1 %v36742_v0  ;;  %14092 = vmatpush1.msra.mxu0 %v36719_v63  ;;  %v9235_v16 = vmul.f32 %v34866_v60, %v36579_v9 }
 0x3d8   :  { %14165 = vmatprep.subr.mxu0 %v36707_v52  ;;  %12987 = vmatprep.mubr.f32.mxu1 %v38327_v6 }
 0x3d9   :  { %14155 = vmatprep.mubr.f32.mxu0 %v38327_v6 }
 0x3dd   :  { %12989 = vmatmul.mubr.f32.vlgmr.msra.gmra.mrb[56].mxu1 %v36206_v53  ;;  %v34862_v53 = vld [vmem:[%s38305_s0 + $0x48] sm:$0xff] }
 0x3de   :  { %13465 = vmatpush1.msra.mxu1 %v36746_v4  ;;  %14158 = vmatmul.mubr.f32.vlgmr.msra.gmra.mrb[42].mxu0 %v36636_v45  ;;  %v9231_v46 = vmul.f32 %v34862_v53, %v36485_v48  ;;  %v36856_v53 = vand.u32 4294901760, %v9235_v16 }
 0x3df   :  { %13545 = vmatprep.subr.mxu1 %v13544_v20  ;;  %14167 = vmatpush1.msra.mxu0 %v36713_v47  ;;  %v34867_v20 = vld [vmem:[%s38305_s0 + $0x60] sm:$0xff] }
 0x3e0   :  { %13528 = vmatprep.mubr.f32.mxu1 %v38327_v6  ;;  %14243 = vmatprep.subr.mxu0 %v14007_v58  ;;  %v36780_v63 = vand.u32 4294901760, %v9231_v46  ;;  %v36785_v58 = vand.u32 4294901760, %v9230_v50  ;;  %v15866_v9 = vsub.f32 %v9235_v16, %v36856_v53 }
 0x3e1   :  { %13534 = vmatmul.mubr.f32.vlgmr.msra.gmra.mrb[50].mxu1 %v36660_v13  ;;  %14230 = vmatprep.mubr.f32.mxu0 %v38327_v6 }
 0x3e2   :  { %13551 = vmatpush1.msra.mxu1 %v13550_v44  ;;  %13614 = vmatprep.mubr.f32.mxu1 %v38327_v6  ;;  %v14936_v48 = vsub.f32 %v9231_v46, %v36780_v63  ;;  %v36792_v7 = vsub.f32 %v9230_v50, %v36785_v58  ;;  %v9234_v44 = vmul.f32 %v34867_v20, %v36566_v55  ;;  %v15867_v56 = vand.u32 4294901760, %v15866_v9 }
 0x3e3   :  { %13624 = vmatprep.subr.mxu1 %v13541_v19 }
 0x3e4   :  { %v36861_v46 = vand.u32 4294901760, %v9234_v44 }
 0x3e6   :  { %14234 = vmatmul.mubr.f32.vlgmr.msra.gmra.mrb[42].mxu0 %v36645_v21  ;;  %v36868_v55 = vsub.f32 %v9234_v44, %v36861_v46 }
 0x3e7   :  { %14247 = vmatpush1.msra.mxu0 %v14013_v27  ;;  %14310 = vmatprep.mubr.f32.mxu0 %v38327_v6  ;;  %v14937_v27 = vand.u32 4294901760, %v14936_v48 }
 0x3e8   :  { %14319 = vmatprep.subr.mxu0 %v36707_v52  ;;  %v14943_v52 = vand.u32 4294901760, %v36792_v7  ;;  %v15873_v50 = vand.u32 4294901760, %v36868_v55 }
 0x3e9   :  { %13616 = vmatmul.mubr.f32.vlgmr.msra.gmra.mrb[50].mxu1 %v36624_v59  ;;  %v14938_v49 = vsub.f32 %v14936_v48, %v14937_v27 }
 0x3ea   :  { %13627 = vmatpush1.msra.mxu1 %v36751_v38  ;;  %13690 = vmatprep.mubr.f32.mxu1 %v38327_v6  ;;  %v14944_v12 = vsub.f32 %v36792_v7, %v14943_v52 }
 0x3eb   :  { %13700 = vmatprep.subr.mxu1 %v36742_v0  ;;  %v14939_v26 = vand.u32 4294901760, %v14938_v49 }
 0x3ec   :  { %v14945_v8 = vand.u32 4294901760, %v14944_v12 }
 0x3ee   :  { %14312 = vmatmul.mubr.f32.vlgmr.msra.gmra.mrb[42].mxu0 %v36624_v59 }
 0x3ef   :  { %14321 = vmatpush1.msra.mxu0 %v36713_v47  ;;  %14384 = vmatprep.mubr.f32.mxu0 %v38327_v6  ;;  %v34864_v47 = vld [vmem:[%s38305_s0 + $0x38] sm:$0xff] }
 0x3f0   :  { %14858 = vmatprep.subr.mxu0 %v36780_v63  ;;  %v9229_v10 = vmul.f32 %v34864_v47, %v36453_v43  ;;  %v36820_v43 = vand.u32 4294901760, %v9228_v1 }
 0x3f1   :  { %13693 = vmatmul.mubr.f32.vlgmr.msra.gmra.mrb[50].mxu1 %v36636_v45 }
 0x3f2   :  { %13702 = vmatpush1.msra.mxu1 %v36746_v4  ;;  %13765 = vmatprep.mubr.f32.mxu1 %v38327_v6  ;;  %v36815_v14 = vand.u32 4294901760, %v9229_v10  ;;  %v36825_v19 = vsub.f32 %v9228_v1, %v36820_v43 }
 0x3f3   :  { %13778 = vmatprep.subr.mxu1 %v13542_v37 }
 0x3f4   :  { %v14471_v51 = vsub.f32 %v9229_v10, %v36815_v14 }
 0x3f6   :  { %14386 = vmatmul.mubr.f32.vlgmr.msra.gmra.mrb[42].mxu0 %v36624_v59  ;;  %v14472_v38 = vand.u32 4294901760, %v14471_v51 }
 0x3f7   :  { %14860 = vmatpush1.msra.mxu0 %v36785_v58  ;;  %14923 = vmatprep.mubr.f32.mxu0 %v38327_v6 }
 0x3f8   :  { %14940 = vmatprep.subr.mxu0 %v14939_v26  ;;  %v14473_v37 = vsub.f32 %v14471_v51, %v14472_v38 }
 0x3f9   :  { %13769 = vmatmul.mubr.f32.vlgmr.msra.gmra.mrb[50].mxu1 %v36645_v21 }
 0x3fa   :  { %13782 = vmatpush1.msra.mxu1 %v13548_v34  ;;  %14929 = vmatmul.mubr.f32.vlgmr.msra.gmra.mrb[44].mxu0 %v36660_v13  ;;  %v14474_v24 = vand.u32 4294901760, %v14473_v37  ;;  %v34871_v37 = vld [vmem:[%s38305_s0 + $0x100] sm:$0xff] }
 0x3fb   :  { %13854 = vmatprep.subr.mxu1 %v36742_v0  ;;  %14946 = vmatpush1.msra.mxu0 %v14945_v8  ;;  %v14478_v0 = vand.u32 4294901760, %v36825_v19 }
 0x3fc   :  { %15019 = vmatprep.subr.mxu0 %v14936_v48  ;;  %13845 = vmatprep.mubr.f32.mxu1 %v38327_v6  ;;  %v15874_v48 = vsub.f32 %v36868_v55, %v15873_v50 }
 0x3fd   :  { %15009 = vmatprep.mubr.f32.mxu0 %v38327_v6  ;;  %v14479_v34 = vsub.f32 %v36825_v19, %v14478_v0 }
 0x3fe   :  { %v15875_v12 = vand.u32 4294901760, %v15874_v48 }
 0x401   :  { %13847 = vmatmul.mubr.f32.vlgmr.msra.gmra.mrb[50].mxu1 %v36624_v59 }
 0x402   :  { %13856 = vmatpush1.msra.mxu1 %v36746_v4  ;;  %15011 = vmatmul.mubr.f32.vlgmr.msra.gmra.mrb[44].mxu0 %v36624_v59  ;;  %v14480_v4 = vand.u32 4294901760, %v14479_v34  ;;  %v16733_v34 = vmul.f32 %v34871_v37, %v36152_v35  ;;  %v34876_v37 = vld [vmem:[%s38305_s0 + $0x118] sm:$0xff] }
 0x403   :  { %14393 = vmatprep.subr.mxu1 %v36815_v14  ;;  %15022 = vmatpush1.msra.mxu0 %v36792_v7 }
 0x404   :  { %15095 = vmatprep.subr.mxu0 %v36780_v63  ;;  %13919 = vmatprep.mubr.f32.mxu1 %v38327_v6 }
 0x405   :  { %15085 = vmatprep.mubr.f32.mxu0 %v38327_v6 }
 0x409   :  { %13921 = vmatmul.mubr.f32.vlgmr.msra.gmra.mrb[50].mxu1 %v36624_v59 }
 0x40a   :  { %14395 = vmatpush1.msra.mxu1 %v36820_v43  ;;  %15088 = vmatmul.mubr.f32.vlgmr.msra.gmra.mrb[44].mxu0 %v36636_v45 }
 0x40b   :  { %14475 = vmatprep.subr.mxu1 %v14474_v24  ;;  %15097 = vmatpush1.msra.mxu0 %v36785_v58 }
 0x40c   :  { %14458 = vmatprep.mubr.f32.mxu1 %v38327_v6  ;;  %15173 = vmatprep.subr.mxu0 %v14937_v27 }
 0x40d   :  { %14464 = vmatmul.mubr.f32.vlgmr.msra.gmra.mrb[52].mxu1 %v36660_v13  ;;  %15160 = vmatprep.mubr.f32.mxu0 %v38327_v6 }
 0x40e   :  { %14481 = vmatpush1.msra.mxu1 %v14480_v4  ;;  %14544 = vmatprep.mubr.f32.mxu1 %v38327_v6 }
 0x40f   :  { %14554 = vmatprep.subr.mxu1 %v14471_v51  ;;  %v16750_v51 = vpop.permute.xlu0 %16749 }
 0x412   :  { %15164 = vmatmul.mubr.f32.vlgmr.msra.gmra.mrb[44].mxu0 %v36645_v21 }
 0x413   :  { %15177 = vmatpush1.msra.mxu0 %v14943_v52  ;;  %15240 = vmatprep.mubr.f32.mxu0 %v38327_v6  ;;  %v34869_v52 = vld [vmem:[%s38305_s0 + $0x50] sm:$0xff] }
 0x414   :  { %15249 = vmatprep.subr.mxu0 %v36780_v63  ;;  %v15868_v63 = vsub.f32 %v15866_v9, %v15867_v56  ;;  %v9232_v49 = vmul.f32 %v34869_v52, %v36529_v2 }
 0x415   :  { %14546 = vmatmul.mubr.f32.vlgmr.msra.gmra.mrb[52].mxu1 %v36624_v59 }
 0x416   :  { %14557 = vmatpush1.msra.mxu1 %v36825_v19  ;;  %14620 = vmatprep.mubr.f32.mxu1 %v38327_v6  ;;  %v15869_v27 = vand.u32 4294901760, %v15868_v63  ;;  %v34870_v19 = vld [vmem:[%s38305_s0 + $0x108] sm:$0xff] }
 0x417   :  { %14630 = vmatprep.subr.mxu1 %v36815_v14 }
 0x41a   :  { %15242 = vmatmul.mubr.f32.vlgmr.msra.gmra.mrb[44].mxu0 %v36624_v59 }
 0x41b   :  { %15251 = vmatpush1.msra.mxu0 %v36785_v58  ;;  %15314 = vmatprep.mubr.f32.mxu0 %v38327_v6  ;;  %v34868_v58 = vld [vmem:[%s38305_s0 + $0x58] sm:$0xff] }
 0x41c   :  { %15788 = vmatprep.subr.mxu0 %v36856_v53  ;;  %v9233_v7 = vmul.f32 %v34868_v58, %v36543_v3  ;;  %v36896_v3 = vand.u32 4294901760, %v9232_v49  ;;  %v34873_v58 = vld [vmem:[%s38305_s0 + $0x70] sm:$0xff] }
 0x41d   :  { %14623 = vmatmul.mubr.f32.vlgmr.msra.gmra.mrb[52].mxu1 %v36636_v45 }
 0x41e   :  { %14632 = vmatpush1.msra.mxu1 %v36820_v43  ;;  %14695 = vmatprep.mubr.f32.mxu1 %v38327_v6  ;;  %v36891_v47 = vand.u32 4294901760, %v9233_v7  ;;  %v36901_v10 = vsub.f32 %v9232_v49, %v36896_v3 }
 0x41f   :  { %14708 = vmatprep.subr.mxu1 %v14472_v38  ;;  %v16734_v38 = vmul.f32 %v34870_v19, %v36166_v33  ;;  %v36940_v33 = vand.u32 4294901760, %v16733_v34 }
 0x420   :  { %v15401_v2 = vsub.f32 %v9233_v7, %v36891_v47  ;;  %v15408_v30 = vand.u32 4294901760, %v36901_v10  ;;  %v9236_v7 = vmul.f32 %v34873_v58, %v36667_v36 }
 0x421   :  { %v36935_v4 = vand.u32 4294901760, %v16734_v38  ;;  %v36950_v16 = vsub.f32 %v16733_v34, %v36940_v33  ;;  %v16736_v34 = vmul.f32 %v34876_v37, %v36297_v54 }
 0x422   :  { %15316 = vmatmul.mubr.f32.vlgmr.msra.gmra.mrb[44].mxu0 %v36624_v59  ;;  %v15402_v26 = vand.u32 4294901760, %v15401_v2  ;;  %v15409_v8 = vsub.f32 %v36901_v10, %v15408_v30  ;;  %v36987_v52 = vand.u32 4294901760, %v9236_v7 }
 0x423   :  { %15790 = vmatpush1.msra.mxu0 %v36861_v46  ;;  %15853 = vmatprep.mubr.f32.mxu0 %v38327_v6  ;;  %v16832_v35 = vsub.f32 %v16734_v38, %v36935_v4 }
 0x424   :  { %15870 = vmatprep.subr.mxu0 %v15869_v27  ;;  %v15403_v1 = vsub.f32 %v15401_v2, %v15402_v26  ;;  %v36992_v49 = vsub.f32 %v9236_v7, %v36987_v52 }
 0x425   :  { %14699 = vmatmul.mubr.f32.vlgmr.msra.gmra.mrb[52].mxu1 %v36645_v21  ;;  %v16833_v44 = vand.u32 4294901760, %v16832_v35 }
 0x426   :  { %14712 = vmatpush1.msra.mxu1 %v14478_v0  ;;  %15859 = vmatmul.mubr.f32.vlgmr.msra.gmra.mrb[46].mxu0 %v36660_v13  ;;  %v16751_v0 = vsel %vm156_vm0, %v16750_v51, 0 }
 0x427   :  { %14784 = vmatprep.subr.mxu1 %v36815_v14  ;;  %15876 = vmatpush1.msra.mxu0 %v15875_v12  ;;  %v15404_v14 = vand.u32 4294901760, %v15403_v1  ;;  %v36933_v24 = vand.u32 4294901760, %v16751_v0 }
 0x428   :  { %15949 = vmatprep.subr.mxu0 %v15866_v9  ;;  %14775 = vmatprep.mubr.f32.mxu1 %v38327_v6  ;;  %v16834_v9 = vsub.f32 %v16832_v35, %v16833_v44 }
 0x429   :  { %15939 = vmatprep.mubr.f32.mxu0 %v38327_v6  ;;  %v36944_v60 = vsub.f32 %v16751_v0, %v36933_v24 }
 0x42a   :  { %v16835_v63 = vand.u32 4294901760, %v16834_v9 }
 0x42b   :  { %v36953_v20 = vand.u32 4294901760, %v36944_v60 }
 0x42d   :  { %14777 = vmatmul.mubr.f32.vlgmr.msra.gmra.mrb[52].mxu1 %v36624_v59 }
 0x42e   :  { %14786 = vmatpush1.msra.mxu1 %v36820_v43  ;;  %15941 = vmatmul.mubr.f32.vlgmr.msra.gmra.mrb[46].mxu0 %v36624_v59  ;;  %v15410_v43 = vand.u32 4294901760, %v15409_v8  ;;  %v34875_v8 = vld [vmem:[%s38305_s0 + $0x120] sm:$0xff] }
 0x42f   :  { %15323 = vmatprep.subr.mxu1 %v36891_v47  ;;  %15952 = vmatpush1.msra.mxu0 %v36868_v55  ;;  %v16823_v55 = vsub.f32 %v36944_v60, %v36953_v20 }
 0x430   :  { %16025 = vmatprep.subr.mxu0 %v36856_v53  ;;  %14849 = vmatprep.mubr.f32.mxu1 %v38327_v6 }
 0x431   :  { %16015 = vmatprep.mubr.f32.mxu0 %v38327_v6  ;;  %v36971_v48 = vand.u32 4294901760, %v16823_v55 }
 0x435   :  { %14851 = vmatmul.mubr.f32.vlgmr.msra.gmra.mrb[52].mxu1 %v36624_v59 }
 0x436   :  { %15325 = vmatpush1.msra.mxu1 %v36896_v3  ;;  %16018 = vmatmul.mubr.f32.vlgmr.msra.gmra.mrb[46].mxu0 %v36636_v45 }
 0x437   :  { %15405 = vmatprep.subr.mxu1 %v15404_v14  ;;  %16027 = vmatpush1.msra.mxu0 %v36861_v46  ;;  %v16737_v14 = vmul.f32 %v34875_v8, %v36354_v18 }
 0x438   :  { %15388 = vmatprep.mubr.f32.mxu1 %v38327_v6  ;;  %16103 = vmatprep.subr.mxu0 %v15867_v56 }
 0x439   :  { %15394 = vmatmul.mubr.f32.vlgmr.msra.gmra.mrb[54].mxu1 %v36660_v13  ;;  %16090 = vmatprep.mubr.f32.mxu0 %v38327_v6 }
 0x43a   :  { %15411 = vmatpush1.msra.mxu1 %v15410_v43  ;;  %15474 = vmatprep.mubr.f32.mxu1 %v38327_v6  ;;  %v37026_v43 = vand.u32 4294901760, %v16737_v14 }
 0x43b   :  { %15484 = vmatprep.subr.mxu1 %v15401_v2 }
 0x43c   :  { %v37033_v18 = vsub.f32 %v16737_v14, %v37026_v43 }
 0x43e   :  { %16094 = vmatmul.mubr.f32.vlgmr.msra.gmra.mrb[46].mxu0 %v36645_v21  ;;  %v17769_v19 = vand.u32 4294901760, %v37033_v18 }
 0x43f   :  { %16107 = vmatpush1.msra.mxu0 %v15873_v50  ;;  %16170 = vmatprep.mubr.f32.mxu0 %v38327_v6 }
 0x440   :  { %16179 = vmatprep.subr.mxu0 %v36856_v53  ;;  %v16839_v53 = vand.u32 4294901760, %v36950_v16  ;;  %v17770_v0 = vsub.f32 %v37033_v18, %v17769_v19 }
 0x441   :  { %15476 = vmatmul.mubr.f32.vlgmr.msra.gmra.mrb[54].mxu1 %v36624_v59 }
 0x442   :  { %15487 = vmatpush1.msra.mxu1 %v36901_v10  ;;  %15550 = vmatprep.mubr.f32.mxu1 %v38327_v6  ;;  %v16840_v56 = vsub.f32 %v36950_v16, %v16839_v53 }
 0x443   :  { %15560 = vmatprep.subr.mxu1 %v36891_v47 }
 0x444   :  { %v16841_v27 = vand.u32 4294901760, %v16840_v56 }
 0x446   :  { %16172 = vmatmul.mubr.f32.vlgmr.msra.gmra.mrb[46].mxu0 %v36624_v59 }
 0x447   :  { %16181 = vmatpush1.msra.mxu0 %v36861_v46  ;;  %16244 = vmatprep.mubr.f32.mxu0 %v38327_v6  ;;  %v34872_v46 = vld [vmem:[%s38305_s0 + $0x78] sm:$0xff] }
 0x448   :  { %16754 = vmatprep.subr.mxu0 %v36935_v4  ;;  %v9237_v50 = vmul.f32 %v34872_v46, %v36682_v61 }
 0x449   :  { %15553 = vmatmul.mubr.f32.vlgmr.msra.gmra.mrb[54].mxu1 %v36636_v45 }
 0x44a   :  { %15562 = vmatpush1.msra.mxu1 %v36896_v3  ;;  %15625 = vmatprep.mubr.f32.mxu1 %v38327_v6  ;;  %v36980_v61 = vand.u32 4294901760, %v9237_v50 }
 0x44b   :  { %15638 = vmatprep.subr.mxu1 %v15402_v26 }
 0x44c   :  { %v16331_v36 = vsub.f32 %v9237_v50, %v36980_v61 }
 0x44e   :  { %16246 = vmatmul.mubr.f32.vlgmr.msra.gmra.mrb[46].mxu0 %v36624_v59  ;;  %v16332_v12 = vand.u32 4294901760, %v16331_v36 }
 0x44f   :  { %16756 = vmatpush1.msra.mxu0 %v36940_v33  ;;  %16819 = vmatprep.mubr.f32.mxu0 %v38327_v6 }
 0x450   :  { %16836 = vmatprep.subr.mxu0 %v16835_v63  ;;  %v16333_v2 = vsub.f32 %v16331_v36, %v16332_v12  ;;  %v34879_v63 = vld [vmem:[%s38305_s0 + $0x140] sm:$0xff] }
 0x451   :  { %15629 = vmatmul.mubr.f32.vlgmr.msra.gmra.mrb[54].mxu1 %v36645_v21  ;;  %v16741_v58 = vmul.f32 %v34879_v63, %v36474_v22 }
 0x452   :  { %15642 = vmatpush1.msra.mxu1 %v15408_v30  ;;  %16825 = vmatmul.mubr.f32.vlgmr.msra.gmra.mrb[40].mxu0 %v36971_v48  ;;  %v34874_v30 = vld [vmem:[%s38305_s0 + $0x128] sm:$0xff] }
 0x453   :  { %15714 = vmatprep.subr.mxu1 %v36891_v47  ;;  %16842 = vmatpush1.msra.mxu0 %v16841_v27  ;;  %v16338_v47 = vand.u32 4294901760, %v36992_v49  ;;  %v16738_v1 = vmul.f32 %v34874_v30, %v36369_v62  ;;  %v37100_v27 = vand.u32 4294901760, %v16741_v58 }
 0x454   :  { %16915 = vmatprep.subr.mxu0 %v16832_v35  ;;  %15705 = vmatprep.mubr.f32.mxu1 %v38327_v6  ;;  %v17771_v35 = vand.u32 4294901760, %v17770_v0 }
 0x455   :  { %16905 = vmatprep.mubr.f32.mxu0 %v38327_v6  ;;  %v16339_v10 = vsub.f32 %v36992_v49, %v16338_v47  ;;  %v37107_v22 = vsub.f32 %v16741_v58, %v37100_v27 }
 0x457   :  { %v16340_v26 = vand.u32 4294901760, %v16339_v10  ;;  %v34881_v10 = vld [vmem:[%s38305_s0 + $0x130] sm:$0xff] }
 0x459   :  { %15707 = vmatmul.mubr.f32.vlgmr.msra.gmra.mrb[54].mxu1 %v36624_v59 }
 0x45a   :  { %15716 = vmatpush1.msra.mxu1 %v36896_v3  ;;  %16907 = vmatmul.mubr.f32.vlgmr.msra.gmra.mrb[40].mxu0 %v36933_v24  ;;  %v16334_v3 = vand.u32 4294901760, %v16333_v2 }
 0x45b   :  { %16253 = vmatprep.subr.mxu1 %v36980_v61  ;;  %16918 = vmatpush1.msra.mxu0 %v36950_v16  ;;  %v37056_v16 = vand.u32 4294901760, %v16736_v34 }
 0x45c   :  { %16991 = vmatprep.subr.mxu0 %v36935_v4  ;;  %15779 = vmatprep.mubr.f32.mxu1 %v38327_v6 }
 0x45d   :  { %16981 = vmatprep.mubr.f32.mxu0 %v38327_v6 }
 0x461   :  { %15781 = vmatmul.mubr.f32.vlgmr.msra.gmra.mrb[54].mxu1 %v36624_v59 }
 0x462   :  { %16255 = vmatpush1.msra.mxu1 %v36987_v52  ;;  %16984 = vmatmul.mubr.f32.vlgmr.msra.gmra.mrb[40].mxu0 %v36944_v60 }
 0x463   :  { %16335 = vmatprep.subr.mxu1 %v16334_v3  ;;  %16993 = vmatpush1.msra.mxu0 %v36940_v33  ;;  %v16739_v3 = vmul.f32 %v34881_v10, %v36443_v40 }
 0x464   :  { %16318 = vmatprep.mubr.f32.mxu1 %v38327_v6  ;;  %17069 = vmatprep.subr.mxu0 %v16833_v44 }
 0x465   :  { %16324 = vmatmul.mubr.f32.vlgmr.msra.gmra.mrb[56].mxu1 %v36660_v13  ;;  %17056 = vmatprep.mubr.f32.mxu0 %v38327_v6  ;;  %v37021_v13 = vand.u32 4294901760, %v16738_v1 }
 0x466   :  { %16341 = vmatpush1.msra.mxu1 %v16340_v26  ;;  %16404 = vmatprep.mubr.f32.mxu1 %v38327_v6 }
 0x467   :  { %16414 = vmatprep.subr.mxu1 %v16331_v36  ;;  %v17762_v62 = vsub.f32 %v16738_v1, %v37021_v13 }
 0x469   :  { %v17763_v51 = vand.u32 4294901760, %v17762_v62 }
 0x46a   :  { %17060 = vmatmul.mubr.f32.vlgmr.msra.gmra.mrb[40].mxu0 %v36953_v20 }
 0x46b   :  { %17073 = vmatpush1.msra.mxu0 %v16839_v53  ;;  %17136 = vmatprep.mubr.f32.mxu0 %v38327_v6  ;;  %v17764_v38 = vsub.f32 %v17762_v62, %v17763_v51 }
 0x46c   :  { %17145 = vmatprep.subr.mxu0 %v36935_v4 }
 0x46d   :  { %16406 = vmatmul.mubr.f32.vlgmr.msra.gmra.mrb[56].mxu1 %v36624_v59  ;;  %v17765_v4 = vand.u32 4294901760, %v17764_v38  ;;  %v34883_v38 = vld [vmem:[%s38305_s0 + $0x160] sm:$0xff] }
 0x46e   :  { %16417 = vmatpush1.msra.mxu1 %v36992_v49  ;;  %16480 = vmatprep.mubr.f32.mxu1 %v38327_v6  ;;  %v16745_v0 = vmul.f32 %v34883_v38, %v36568_v31 }
 0x46f   :  { %16490 = vmatprep.subr.mxu1 %v36980_v61 }
 0x472   :  { %17138 = vmatmul.mubr.f32.vlgmr.msra.gmra.mrb[40].mxu0 %v36933_v24 }
 0x473   :  { %17147 = vmatpush1.msra.mxu0 %v36940_v33  ;;  %17210 = vmatprep.mubr.f32.mxu0 %v38327_v6 }
 0x474   :  { %17684 = vmatprep.subr.mxu0 %v37021_v13 }
 0x475   :  { %16483 = vmatmul.mubr.f32.vlgmr.msra.gmra.mrb[56].mxu1 %v36636_v45  ;;  %v34877_v45 = vld [vmem:[%s38305_s0 + $0x110] sm:$0xff] }
 0x476   :  { %16492 = vmatpush1.msra.mxu1 %v36987_v52  ;;  %16555 = vmatprep.mubr.f32.mxu1 %v38327_v6  ;;  %v16735_v33 = vmul.f32 %v34877_v45, %v36285_v39  ;;  %v17297_v39 = vsub.f32 %v16736_v34, %v37056_v16  ;;  %v37174_v34 = vand.u32 4294901760, %v16745_v0 }
 0x477   :  { %16568 = vmatprep.subr.mxu1 %v16332_v12  ;;  %v34880_v12 = vld [vmem:[%s38305_s0 + $0x138] sm:$0xff] }
 0x478   :  { %v37061_v54 = vand.u32 4294901760, %v16735_v33  ;;  %v17298_v44 = vand.u32 4294901760, %v17297_v39  ;;  %v37181_v31 = vsub.f32 %v16745_v0, %v37174_v34 }
 0x47a   :  { %17212 = vmatmul.mubr.f32.vlgmr.msra.gmra.mrb[40].mxu0 %v36933_v24  ;;  %v17299_v9 = vsub.f32 %v17297_v39, %v17298_v44  ;;  %v19629_v45 = vand.u32 4294901760, %v37181_v31 }
 0x47b   :  { %17686 = vmatpush1.msra.mxu0 %v37026_v43  ;;  %17749 = vmatprep.mubr.f32.mxu0 %v38327_v6 }
 0x47c   :  { %17766 = vmatprep.subr.mxu0 %v17765_v4  ;;  %v17300_v56 = vand.u32 4294901760, %v17299_v9 }
 0x47d   :  { %16559 = vmatmul.mubr.f32.vlgmr.msra.gmra.mrb[56].mxu1 %v36645_v21  ;;  %v37066_v21 = vsub.f32 %v16735_v33, %v37061_v54 }
 0x47e   :  { %16572 = vmatpush1.msra.mxu1 %v16338_v47  ;;  %17755 = vmatmul.mubr.f32.vlgmr.msra.gmra.mrb[42].mxu0 %v36971_v48  ;;  %v16740_v47 = vmul.f32 %v34880_v12, %v36456_v23  ;;  %v37135_v23 = vand.u32 4294901760, %v16739_v3 }
 0x47f   :  { %16644 = vmatprep.subr.mxu1 %v36980_v61  ;;  %17772 = vmatpush1.msra.mxu0 %v17771_v35  ;;  %v17304_v53 = vand.u32 4294901760, %v37066_v21  ;;  %v19630_v35 = vsub.f32 %v37181_v31, %v19629_v45 }
 0x480   :  { %17845 = vmatprep.subr.mxu0 %v17762_v62  ;;  %16635 = vmatprep.mubr.f32.mxu1 %v38327_v6  ;;  %v37130_v30 = vand.u32 4294901760, %v16740_v47  ;;  %v37140_v1 = vsub.f32 %v16739_v3, %v37135_v23 }
 0x481   :  { %17835 = vmatprep.mubr.f32.mxu0 %v38327_v6  ;;  %v17305_v55 = vsub.f32 %v37066_v21, %v17304_v53 }
 0x482   :  { %v18227_v40 = vsub.f32 %v16740_v47, %v37130_v30  ;;  %v18234_v14 = vand.u32 4294901760, %v37140_v1 }
 0x483   :  { %v17306_v46 = vand.u32 4294901760, %v17305_v55 }
 0x484   :  { %v18228_v8 = vand.u32 4294901760, %v18227_v40 }
 0x485   :  { %16637 = vmatmul.mubr.f32.vlgmr.msra.gmra.mrb[56].mxu1 %v36624_v59 }
 0x486   :  { %16646 = vmatpush1.msra.mxu1 %v36987_v52  ;;  %17837 = vmatmul.mubr.f32.vlgmr.msra.gmra.mrb[42].mxu0 %v36933_v24  ;;  %v18699_v52 = vand.u32 4294901760, %v37107_v22 }
 0x487   :  { %17219 = vmatprep.subr.mxu1 %v37056_v16  ;;  %17848 = vmatpush1.msra.mxu0 %v37033_v18 }
 0x488   :  { %17921 = vmatprep.subr.mxu0 %v37021_v13  ;;  %16709 = vmatprep.mubr.f32.mxu1 %v38327_v6  ;;  %v18700_v49 = vsub.f32 %v37107_v22, %v18699_v52 }
 0x489   :  { %17911 = vmatprep.mubr.f32.mxu0 %v38327_v6 }
 0x48a   :  { %v18701_v26 = vand.u32 4294901760, %v18700_v49 }
 0x48d   :  { %16711 = vmatmul.mubr.f32.vlgmr.msra.gmra.mrb[56].mxu1 %v36624_v59  ;;  %v34878_v59 = vld [vmem:[%s38305_s0 + $0x148] sm:$0xff] }
 0x48e   :  { %17221 = vmatpush1.msra.mxu1 %v37061_v54  ;;  %17914 = vmatmul.mubr.f32.vlgmr.msra.gmra.mrb[42].mxu0 %v36944_v60  ;;  %v16742_v50 = vmul.f32 %v34878_v59, %v36487_v17 }
 0x48f   :  { %17301 = vmatprep.subr.mxu1 %v17300_v56  ;;  %17923 = vmatpush1.msra.mxu0 %v37026_v43 }
 0x490   :  { %17284 = vmatprep.mubr.f32.mxu1 %v38327_v6  ;;  %17999 = vmatprep.subr.mxu0 %v17763_v51  ;;  %v37095_v7 = vand.u32 4294901760, %v16742_v50  ;;  %v34882_v51 = vld [vmem:[%s38305_s0 + $0x168] sm:$0xff] }
 0x491   :  { %17290 = vmatmul.mubr.f32.vlgmr.msra.gmra.mrb[50].mxu1 %v36971_v48  ;;  %17986 = vmatprep.mubr.f32.mxu0 %v38327_v6 }
 0x492   :  { %17307 = vmatpush1.msra.mxu1 %v17306_v46  ;;  %17370 = vmatprep.mubr.f32.mxu1 %v38327_v6  ;;  %v18692_v17 = vsub.f32 %v16742_v50, %v37095_v7 }
 0x493   :  { %17380 = vmatprep.subr.mxu1 %v17297_v39 }
 0x494   :  { %v18693_v61 = vand.u32 4294901760, %v18692_v17 }
 0x496   :  { %17990 = vmatmul.mubr.f32.vlgmr.msra.gmra.mrb[42].mxu0 %v36953_v20  ;;  %v18694_v36 = vsub.f32 %v18692_v17, %v18693_v61 }
 0x497   :  { %18003 = vmatpush1.msra.mxu0 %v17769_v19  ;;  %18066 = vmatprep.mubr.f32.mxu0 %v38327_v6  ;;  %v16746_v19 = vmul.f32 %v34882_v51, %v36581_v11 }
 0x498   :  { %18075 = vmatprep.subr.mxu0 %v37021_v13  ;;  %v18695_v2 = vand.u32 4294901760, %v18694_v36  ;;  %v18229_v13 = vsub.f32 %v18227_v40, %v18228_v8 }
 0x499   :  { %17372 = vmatmul.mubr.f32.vlgmr.msra.gmra.mrb[50].mxu1 %v36933_v24  ;;  %v37169_v37 = vand.u32 4294901760, %v16746_v19 }
 0x49a   :  { %17383 = vmatpush1.msra.mxu1 %v37066_v21  ;;  %17446 = vmatprep.mubr.f32.mxu1 %v38327_v6  ;;  %v18230_v62 = vand.u32 4294901760, %v18229_v13  ;;  %v34885_v21 = vld [vmem:[%s38305_s0 + $0x150] sm:$0xff] }
 0x49b   :  { %17456 = vmatprep.subr.mxu1 %v37056_v16  ;;  %v19622_v11 = vsub.f32 %v16746_v19, %v37169_v37  ;;  %v34889_v13 = vld [vmem:[%s38305_s0 + $0x170] sm:$0xff] }
 0x49d   :  { %v19623_v4 = vand.u32 4294901760, %v19622_v11 }
 0x49e   :  { %18068 = vmatmul.mubr.f32.vlgmr.msra.gmra.mrb[42].mxu0 %v36933_v24 }
 0x49f   :  { %18077 = vmatpush1.msra.mxu0 %v37026_v43  ;;  %18140 = vmatprep.mubr.f32.mxu0 %v38327_v6  ;;  %v18235_v43 = vsub.f32 %v37140_v1, %v18234_v14  ;;  %v19624_v33 = vsub.f32 %v19622_v11, %v19623_v4 }
 0x4a0   :  { %18614 = vmatprep.subr.mxu0 %v37095_v7 }
 0x4a1   :  { %17449 = vmatmul.mubr.f32.vlgmr.msra.gmra.mrb[50].mxu1 %v36944_v60  ;;  %v18236_v18 = vand.u32 4294901760, %v18235_v43  ;;  %v19625_v39 = vand.u32 4294901760, %v19624_v33  ;;  %v16747_v43 = vmul.f32 %v34889_v13, %v36669_v15  ;;  %v38332_v33 = vld [vmem:[#allocation6_spill] sm:$0xff] }
 0x4a2   :  { %17458 = vmatpush1.msra.mxu1 %v37061_v54  ;;  %17521 = vmatprep.mubr.f32.mxu1 %v38327_v6 }
 0x4a3   :  { %17534 = vmatprep.subr.mxu1 %v17298_v44  ;;  %v16743_v44 = vmul.f32 %v34885_v21, %v36531_v41 }
 0x4a6   :  { %18142 = vmatmul.mubr.f32.vlgmr.msra.gmra.mrb[42].mxu0 %v36933_v24 }
 0x4a7   :  { %18616 = vmatpush1.msra.mxu0 %v37100_v27  ;;  %18679 = vmatprep.mubr.f32.mxu0 %v38327_v6 }
 0x4a8   :  { %18696 = vmatprep.subr.mxu0 %v18695_v2 }
 0x4a9   :  { %17525 = vmatmul.mubr.f32.vlgmr.msra.gmra.mrb[50].mxu1 %v36953_v20 }
 0x4aa   :  { %17538 = vmatpush1.msra.mxu1 %v17304_v53  ;;  %18685 = vmatmul.mubr.f32.vlgmr.msra.gmra.mrb[44].mxu0 %v36971_v48  ;;  %v19631_v53 = vand.u32 4294901760, %v19630_v35 }
 0x4ab   :  { %17610 = vmatprep.subr.mxu1 %v37056_v16  ;;  %18702 = vmatpush1.msra.mxu0 %v18701_v26  ;;  %v34884_v16 = vld [vmem:[%s38305_s0 + $0x158] sm:$0xff] }
 0x4ac   :  { %18775 = vmatprep.subr.mxu0 %v18692_v17  ;;  %17601 = vmatprep.mubr.f32.mxu1 %v38327_v6 }
 0x4ad   :  { %18765 = vmatprep.mubr.f32.mxu0 %v38327_v6 }
 0x4b1   :  { %17603 = vmatmul.mubr.f32.vlgmr.msra.gmra.mrb[50].mxu1 %v36933_v24 }
 0x4b2   :  { %17612 = vmatpush1.msra.mxu1 %v37061_v54  ;;  %18767 = vmatmul.mubr.f32.vlgmr.msra.gmra.mrb[44].mxu0 %v36933_v24  ;;  %v16744_v54 = vmul.f32 %v34884_v16, %v36545_v29  ;;  %v37209_v29 = vand.u32 4294901760, %v16743_v44 }
 0x4b3   :  { %18149 = vmatprep.subr.mxu1 %v37130_v30  ;;  %18778 = vmatpush1.msra.mxu0 %v37107_v22 }
 0x4b4   :  { %18851 = vmatprep.subr.mxu0 %v37095_v7  ;;  %17675 = vmatprep.mubr.f32.mxu1 %v38327_v6  ;;  %v37204_v9 = vand.u32 4294901760, %v16744_v54  ;;  %v37214_v55 = vsub.f32 %v16743_v44, %v37209_v29 }
 0x4b5   :  { %18841 = vmatprep.mubr.f32.mxu0 %v38327_v6 }
 0x4b6   :  { %v19157_v41 = vsub.f32 %v16744_v54, %v37204_v9  ;;  %v19164_v46 = vand.u32 4294901760, %v37214_v55 }
 0x4b8   :  { %v19158_v56 = vand.u32 4294901760, %v19157_v41  ;;  %v19165_v50 = vsub.f32 %v37214_v55, %v19164_v46 }
 0x4b9   :  { %17677 = vmatmul.mubr.f32.vlgmr.msra.gmra.mrb[50].mxu1 %v36933_v24 }
 0x4ba   :  { %18151 = vmatpush1.msra.mxu1 %v37135_v23  ;;  %18844 = vmatmul.mubr.f32.vlgmr.msra.gmra.mrb[44].mxu0 %v36944_v60  ;;  %v19159_v59 = vsub.f32 %v19157_v41, %v19158_v56  ;;  %v19166_v58 = vand.u32 4294901760, %v19165_v50 }
 0x4bb   :  { %18231 = vmatprep.subr.mxu1 %v18230_v62  ;;  %18853 = vmatpush1.msra.mxu0 %v37100_v27 }
 0x4bc   :  { %18214 = vmatprep.mubr.f32.mxu1 %v38327_v6  ;;  %18929 = vmatprep.subr.mxu0 %v18693_v61  ;;  %v19160_v63 = vand.u32 4294901760, %v19159_v59  ;;  %v34887_v61 = vld [vmem:[%s38305_s0 + $0x180] sm:$0xff] }
 0x4bd   :  { %18220 = vmatmul.mubr.f32.vlgmr.msra.gmra.mrb[52].mxu1 %v36971_v48  ;;  %18916 = vmatprep.mubr.f32.mxu0 %v38327_v6 }
 0x4be   :  { %18237 = vmatpush1.msra.mxu1 %v18236_v18  ;;  %18300 = vmatprep.mubr.f32.mxu1 %v38327_v6  ;;  %v37300_v18 = vand.u32 4294901760, %v16747_v43 }
 0x4bf   :  { %18310 = vmatprep.subr.mxu1 %v18227_v40  ;;  %v34888_v40 = vld [vmem:[%s38305_s0 + $0x178] sm:$0xff] }
 0x4c0   :  { %v37305_v51 = vsub.f32 %v16747_v43, %v37300_v18  ;;  %v34896_v43 = vld [vmem:[%s38305_s0 + $0x1b8] sm:$0xff] }
 0x4c2   :  { %18920 = vmatmul.mubr.f32.vlgmr.msra.gmra.mrb[44].mxu0 %v36953_v20  ;;  %v20094_v38 = vand.u32 4294901760, %v37305_v51 }
 0x4c3   :  { %18933 = vmatpush1.msra.mxu0 %v18699_v52  ;;  %18996 = vmatprep.mubr.f32.mxu0 %v38327_v6  ;;  %v20505_v52 = vmul.f32 %v34887_v61, %v36154_v32 }
 0x4c4   :  { %19005 = vmatprep.subr.mxu0 %v37095_v7  ;;  %v20522_v7 = vpop.permute.xlu1 %20521 }
 0x4c5   :  { %18302 = vmatmul.mubr.f32.vlgmr.msra.gmra.mrb[52].mxu1 %v36933_v24  ;;  %v20523_v22 = vsel %vm156_vm0, %v20522_v7, 0 }
 0x4c6   :  { %18313 = vmatpush1.msra.mxu1 %v37140_v1  ;;  %18376 = vmatprep.mubr.f32.mxu1 %v38327_v6  ;;  %v37246_v36 = vand.u32 4294901760, %v20523_v22  ;;  %v16748_v1 = vmul.f32 %v34888_v40, %v36684_v5 }
 0x4c7   :  { %18386 = vmatprep.subr.mxu1 %v37130_v30 }
 0x4c8   :  { %v37257_v12 = vsub.f32 %v20523_v22, %v37246_v36  ;;  %v37293_v5 = vand.u32 4294901760, %v16748_v1 }
 0x4ca   :  { %18998 = vmatmul.mubr.f32.vlgmr.msra.gmra.mrb[44].mxu0 %v36933_v24  ;;  %v37266_v2 = vand.u32 4294901760, %v37257_v12  ;;  %v20087_v15 = vsub.f32 %v16748_v1, %v37293_v5 }
 0x4cb   :  { %19007 = vmatpush1.msra.mxu0 %v37100_v27  ;;  %19070 = vmatprep.mubr.f32.mxu0 %v38327_v6  ;;  %v34886_v27 = vld [vmem:[%s38305_s0 + $0x188] sm:$0xff] }
 0x4cc   :  { %19544 = vmatprep.subr.mxu0 %v37169_v37  ;;  %v20506_v17 = vmul.f32 %v34886_v27, %v36168_v42  ;;  %v37253_v42 = vand.u32 4294901760, %v20505_v52  ;;  %v20088_v19 = vand.u32 4294901760, %v20087_v15 }
 0x4cd   :  { %18379 = vmatmul.mubr.f32.vlgmr.msra.gmra.mrb[52].mxu1 %v36944_v60 }
 0x4ce   :  { %18388 = vmatpush1.msra.mxu1 %v37135_v23  ;;  %18451 = vmatprep.mubr.f32.mxu1 %v38327_v6  ;;  %v37248_v49 = vand.u32 4294901760, %v20506_v17  ;;  %v37263_v47 = vsub.f32 %v20505_v52, %v37253_v42  ;;  %v20089_v0 = vsub.f32 %v20087_v15, %v20088_v19 }
 0x4cf   :  { %18464 = vmatprep.subr.mxu1 %v18228_v8 }
 0x4d0   :  { %v20604_v32 = vsub.f32 %v20506_v17, %v37248_v49  ;;  %v20611_v3 = vand.u32 4294901760, %v37263_v47 }
 0x4d2   :  { %19072 = vmatmul.mubr.f32.vlgmr.msra.gmra.mrb[44].mxu0 %v36933_v24  ;;  %v20605_v10 = vand.u32 4294901760, %v20604_v32 }
 0x4d3   :  { %19546 = vmatpush1.msra.mxu0 %v37174_v34  ;;  %19609 = vmatprep.mubr.f32.mxu0 %v38327_v6 }
 0x4d4   :  { %19626 = vmatprep.subr.mxu0 %v19625_v39  ;;  %v20606_v26 = vsub.f32 %v20604_v32, %v20605_v10 }
 0x4d5   :  { %18455 = vmatmul.mubr.f32.vlgmr.msra.gmra.mrb[52].mxu1 %v36953_v20 }
 0x4d6   :  { %18468 = vmatpush1.msra.mxu1 %v18234_v14  ;;  %19615 = vmatmul.mubr.f32.vlgmr.msra.gmra.mrb[46].mxu0 %v36971_v48  ;;  %v20607_v8 = vand.u32 4294901760, %v20606_v26 }
 0x4d7   :  { %18540 = vmatprep.subr.mxu1 %v37130_v30  ;;  %19632 = vmatpush1.msra.mxu0 %v19631_v53  ;;  %v20595_v30 = vsub.f32 %v37257_v12, %v37266_v2 }
 0x4d8   :  { %19705 = vmatprep.subr.mxu0 %v19622_v11  ;;  %18531 = vmatprep.mubr.f32.mxu1 %v38327_v6 }
 0x4d9   :  { %19695 = vmatprep.mubr.f32.mxu0 %v38327_v6  ;;  %v37284_v14 = vand.u32 4294901760, %v20595_v30 }
 0x4dd   :  { %18533 = vmatmul.mubr.f32.vlgmr.msra.gmra.mrb[52].mxu1 %v36933_v24 }
 0x4de   :  { %18542 = vmatpush1.msra.mxu1 %v37135_v23  ;;  %19697 = vmatmul.mubr.f32.vlgmr.msra.gmra.mrb[46].mxu0 %v36933_v24  ;;  %v20612_v23 = vsub.f32 %v37263_v47, %v20611_v3 }
 0x4df   :  { %19079 = vmatprep.subr.mxu1 %v37204_v9  ;;  %19708 = vmatpush1.msra.mxu0 %v37181_v31  ;;  %v34890_v31 = vld [vmem:[%s38305_s0 + $0x1a8] sm:$0xff] }
 0x4e0   :  { %19781 = vmatprep.subr.mxu0 %v37169_v37  ;;  %18605 = vmatprep.mubr.f32.mxu1 %v38327_v6  ;;  %v20613_v62 = vand.u32 4294901760, %v20612_v23 }
 0x4e1   :  { %19771 = vmatprep.mubr.f32.mxu0 %v38327_v6 }
 0x4e5   :  { %18607 = vmatmul.mubr.f32.vlgmr.msra.gmra.mrb[52].mxu1 %v36933_v24 }
 0x4e6   :  { %19081 = vmatpush1.msra.mxu1 %v37209_v29  ;;  %19774 = vmatmul.mubr.f32.vlgmr.msra.gmra.mrb[46].mxu0 %v36944_v60 }
 0x4e7   :  { %19161 = vmatprep.subr.mxu1 %v19160_v63  ;;  %19783 = vmatpush1.msra.mxu0 %v37174_v34 }
 0x4e8   :  { %19144 = vmatprep.mubr.f32.mxu1 %v38327_v6  ;;  %19859 = vmatprep.subr.mxu0 %v19623_v4  ;;  %v20510_v4 = vmul.f32 %v34890_v31, %v36371_v25 }
 0x4e9   :  { %19150 = vmatmul.mubr.f32.vlgmr.msra.gmra.mrb[54].mxu1 %v36971_v48  ;;  %19846 = vmatprep.mubr.f32.mxu0 %v38327_v6 }
 0x4ea   :  { %19167 = vmatpush1.msra.mxu1 %v19166_v58  ;;  %19230 = vmatprep.mubr.f32.mxu1 %v38327_v6 }
 0x4eb   :  { %19240 = vmatprep.subr.mxu1 %v19157_v41 }
 0x4ee   :  { %19850 = vmatmul.mubr.f32.vlgmr.msra.gmra.mrb[46].mxu0 %v36953_v20 }
 0x4ef   :  { %19863 = vmatpush1.msra.mxu0 %v19629_v45  ;;  %19926 = vmatprep.mubr.f32.mxu0 %v38327_v6  ;;  %v34891_v45 = vld [vmem:[%s38305_s0 + $0x1a0] sm:$0xff] }
 0x4f0   :  { %19935 = vmatprep.subr.mxu0 %v37169_v37  ;;  %v20095_v37 = vsub.f32 %v37305_v51, %v20094_v38  ;;  %v20509_v35 = vmul.f32 %v34891_v45, %v38332_v33 }
 0x4f1   :  { %19232 = vmatmul.mubr.f32.vlgmr.msra.gmra.mrb[54].mxu1 %v36933_v24 }
 0x4f2   :  { %19243 = vmatpush1.msra.mxu1 %v37214_v55  ;;  %19306 = vmatprep.mubr.f32.mxu1 %v38327_v6  ;;  %v20096_v11 = vand.u32 4294901760, %v20095_v37  ;;  %v37339_v16 = vand.u32 4294901760, %v20509_v35 }
 0x4f3   :  { %19316 = vmatprep.subr.mxu1 %v37204_v9 }
 0x4f4   :  { %v37346_v54 = vsub.f32 %v20509_v35, %v37339_v16 }
 0x4f6   :  { %19928 = vmatmul.mubr.f32.vlgmr.msra.gmra.mrb[46].mxu0 %v36933_v24  ;;  %v21541_v21 = vand.u32 4294901760, %v37346_v54 }
 0x4f7   :  { %19937 = vmatpush1.msra.mxu0 %v37174_v34  ;;  %20000 = vmatprep.mubr.f32.mxu0 %v38327_v6  ;;  %v20090_v34 = vand.u32 4294901760, %v20089_v0 }
 0x4f8   :  { %20526 = vmatprep.subr.mxu0 %v37248_v49  ;;  %v21542_v53 = vsub.f32 %v37346_v54, %v21541_v21 }
 0x4f9   :  { %19309 = vmatmul.mubr.f32.vlgmr.msra.gmra.mrb[54].mxu1 %v36944_v60 }
 0x4fa   :  { %19318 = vmatpush1.msra.mxu1 %v37209_v29  ;;  %19381 = vmatprep.mubr.f32.mxu1 %v38327_v6  ;;  %v21543_v59 = vand.u32 4294901760, %v21542_v53 }
 0x4fb   :  { %19394 = vmatprep.subr.mxu1 %v19158_v56  ;;  %v38334_v56 = vld [vmem:[#allocation5_spill] sm:$0xff] }
 0x4fe   :  { %20002 = vmatmul.mubr.f32.vlgmr.msra.gmra.mrb[46].mxu0 %v36933_v24 }
 0x4ff   :  { %20528 = vmatpush1.msra.mxu0 %v37253_v42  ;;  %20591 = vmatprep.mubr.f32.mxu0 %v38327_v6 }
 0x500   :  { %20608 = vmatprep.subr.mxu0 %v20607_v8 }
 0x501   :  { %19385 = vmatmul.mubr.f32.vlgmr.msra.gmra.mrb[54].mxu1 %v36953_v20 }
 0x502   :  { %19398 = vmatpush1.msra.mxu1 %v19164_v46  ;;  %20597 = vmatmul.mubr.f32.vlgmr.msra.gmra.mrb[40].mxu0 %v37284_v14 }
 0x503   :  { %19470 = vmatprep.subr.mxu1 %v37204_v9  ;;  %20614 = vmatpush1.msra.mxu0 %v20613_v62  ;;  %v34892_v9 = vld [vmem:[%s38305_s0 + $0x198] sm:$0xff] }
 0x504   :  { %20687 = vmatprep.subr.mxu0 %v20604_v32  ;;  %19461 = vmatprep.mubr.f32.mxu1 %v38327_v6  ;;  %v34895_v32 = vld [vmem:[%s38305_s0 + $0x1c0] sm:$0xff]  ;;  %v38337_v62 = vld [vmem:[#allocation7_spill] sm:$0xff] }
 0x505   :  { %20677 = vmatprep.mubr.f32.mxu0 %v38327_v6 }
 0x509   :  { %19463 = vmatmul.mubr.f32.vlgmr.msra.gmra.mrb[54].mxu1 %v36933_v24 }
 0x50a   :  { %19472 = vmatpush1.msra.mxu1 %v37209_v29  ;;  %20679 = vmatmul.mubr.f32.vlgmr.msra.gmra.mrb[40].mxu0 %v37246_v36  ;;  %v38333_v29 = vld [vmem:[#allocation4_spill] sm:$0xff] }
 0x50b   :  { %20009 = vmatprep.subr.mxu1 %v37293_v5  ;;  %20690 = vmatpush1.msra.mxu0 %v37263_v47  ;;  %v20508_v41 = vmul.f32 %v34892_v9, %v38333_v29  ;;  %v38336_v47 = vld [vmem:[#allocation9_spill] sm:$0xff] }
 0x50c   :  { %20763 = vmatprep.subr.mxu0 %v37248_v49  ;;  %19535 = vmatprep.mubr.f32.mxu1 %v38327_v6 }
 0x50d   :  { %20753 = vmatprep.mubr.f32.mxu0 %v38327_v6  ;;  %v37369_v50 = vand.u32 4294901760, %v20508_v41 }
 0x50f   :  { %v21069_v58 = vsub.f32 %v20508_v41, %v37369_v50 }
 0x511   :  { %19537 = vmatmul.mubr.f32.vlgmr.msra.gmra.mrb[54].mxu1 %v36933_v24  ;;  %v21070_v7 = vand.u32 4294901760, %v21069_v58 }
 0x512   :  { %20011 = vmatpush1.msra.mxu1 %v37300_v18  ;;  %20756 = vmatmul.mubr.f32.vlgmr.msra.gmra.mrb[40].mxu0 %v37257_v12 }
 0x513   :  { %20091 = vmatprep.subr.mxu1 %v20090_v34  ;;  %20765 = vmatpush1.msra.mxu0 %v37253_v42  ;;  %v21071_v17 = vsub.f32 %v21069_v58, %v21070_v7 }
 0x514   :  { %20074 = vmatprep.mubr.f32.mxu1 %v38327_v6  ;;  %20841 = vmatprep.subr.mxu0 %v20605_v10  ;;  %v20513_v10 = vmul.f32 %v34895_v32, %v38336_v47 }
 0x515   :  { %20080 = vmatmul.mubr.f32.vlgmr.msra.gmra.mrb[56].mxu1 %v36971_v48  ;;  %20828 = vmatprep.mubr.f32.mxu0 %v38327_v6  ;;  %v37334_v48 = vand.u32 4294901760, %v20510_v4  ;;  %v21072_v61 = vand.u32 4294901760, %v21071_v17 }
 0x516   :  { %20097 = vmatpush1.msra.mxu1 %v20096_v11  ;;  %20160 = vmatprep.mubr.f32.mxu1 %v38327_v6  ;;  %v37413_v26 = vand.u32 4294901760, %v20513_v10 }
 0x517   :  { %20170 = vmatprep.subr.mxu1 %v20087_v15  ;;  %v21534_v25 = vsub.f32 %v20510_v4, %v37334_v48  ;;  %v34897_v15 = vld [vmem:[%s38305_s0 + $0x1b0] sm:$0xff] }
 0x518   :  { %v37420_v23 = vsub.f32 %v20513_v10, %v37413_v26 }
 0x519   :  { %v21535_v39 = vand.u32 4294901760, %v21534_v25 }
 0x51a   :  { %20832 = vmatmul.mubr.f32.vlgmr.msra.gmra.mrb[40].mxu0 %v37266_v2  ;;  %v22471_v1 = vand.u32 4294901760, %v37420_v23 }
 0x51b   :  { %20845 = vmatpush1.msra.mxu0 %v20611_v3  ;;  %20908 = vmatprep.mubr.f32.mxu0 %v38327_v6  ;;  %v21536_v44 = vsub.f32 %v21534_v25, %v21535_v39 }
 0x51c   :  { %20917 = vmatprep.subr.mxu0 %v37248_v49  ;;  %v38335_v49 = vld [vmem:[#allocation10_spill] sm:$0xff]  ;;  %v22472_v13 = vsub.f32 %v37420_v23, %v22471_v1 }
 0x51d   :  { %20162 = vmatmul.mubr.f32.vlgmr.msra.gmra.mrb[56].mxu1 %v36933_v24  ;;  %v21537_v55 = vand.u32 4294901760, %v21536_v44 }
 0x51e   :  { %20173 = vmatpush1.msra.mxu1 %v37305_v51  ;;  %20236 = vmatprep.mubr.f32.mxu1 %v38327_v6  ;;  %v38338_v51 = vld [vmem:[#allocation8_spill] sm:$0xff] }
 0x51f   :  { %20246 = vmatprep.subr.mxu1 %v37293_v5 }
 0x522   :  { %20910 = vmatmul.mubr.f32.vlgmr.msra.gmra.mrb[40].mxu0 %v37246_v36 }
 0x523   :  { %20919 = vmatpush1.msra.mxu0 %v37253_v42  ;;  %20982 = vmatprep.mubr.f32.mxu0 %v38327_v6 }
 0x524   :  { %21456 = vmatprep.subr.mxu0 %v37334_v48 }
 0x525   :  { %20239 = vmatmul.mubr.f32.vlgmr.msra.gmra.mrb[56].mxu1 %v36944_v60  ;;  %v34893_v60 = vld [vmem:[%s38305_s0 + $0x190] sm:$0xff] }
 0x526   :  { %20248 = vmatpush1.msra.mxu1 %v37300_v18  ;;  %20311 = vmatprep.mubr.f32.mxu1 %v38327_v6  ;;  %v20507_v46 = vmul.f32 %v34893_v60, %v38334_v56 }
 0x527   :  { %20324 = vmatprep.subr.mxu1 %v20088_v19  ;;  %v20511_v19 = vmul.f32 %v34897_v15, %v38338_v51 }
 0x528   :  { %v37374_v63 = vand.u32 4294901760, %v20507_v46 }
 0x529   :  { %v37448_v37 = vand.u32 4294901760, %v20511_v19 }
 0x52a   :  { %20984 = vmatmul.mubr.f32.vlgmr.msra.gmra.mrb[40].mxu0 %v37246_v36 }
 0x52b   :  { %21458 = vmatpush1.msra.mxu0 %v37339_v16  ;;  %21521 = vmatprep.mubr.f32.mxu0 %v38327_v6  ;;  %v37453_v11 = vsub.f32 %v20511_v19, %v37448_v37 }
 0x52c   :  { %21538 = vmatprep.subr.mxu0 %v21537_v55 }
 0x52d   :  { %20315 = vmatmul.mubr.f32.vlgmr.msra.gmra.mrb[56].mxu1 %v36953_v20  ;;  %v37379_v20 = vsub.f32 %v20507_v46, %v37374_v63  ;;  %v22006_v4 = vand.u32 4294901760, %v37453_v11 }
 0x52e   :  { %20328 = vmatpush1.msra.mxu1 %v20094_v38  ;;  %21527 = vmatmul.mubr.f32.vlgmr.msra.gmra.mrb[42].mxu0 %v37284_v14  ;;  %v22473_v38 = vand.u32 4294901760, %v22472_v13 }
 0x52f   :  { %20400 = vmatprep.subr.mxu1 %v37293_v5  ;;  %21544 = vmatpush1.msra.mxu0 %v21543_v59  ;;  %v21076_v27 = vand.u32 4294901760, %v37379_v20  ;;  %v20512_v5 = vmul.f32 %v34896_v43, %v38337_v62  ;;  %v22007_v33 = vsub.f32 %v37453_v11, %v22006_v4  ;;  %v34900_v59 = vld [vmem:[%s38305_s0 + $0x1d8] sm:$0xff] }
 0x530   :  { %21617 = vmatprep.subr.mxu0 %v21534_v25  ;;  %20391 = vmatprep.mubr.f32.mxu1 %v38327_v6  ;;  %v38339_v25 = vld [vmem:[#allocation14_spill] sm:$0xff] }
 0x531   :  { %21607 = vmatprep.mubr.f32.mxu0 %v38327_v6  ;;  %v21077_v22 = vsub.f32 %v37379_v20, %v21076_v27  ;;  %v37443_v0 = vand.u32 4294901760, %v20512_v5 }
 0x533   :  { %v21078_v52 = vand.u32 4294901760, %v21077_v22  ;;  %v21999_v34 = vsub.f32 %v20512_v5, %v37443_v0 }
 0x535   :  { %20393 = vmatmul.mubr.f32.vlgmr.msra.gmra.mrb[56].mxu1 %v36933_v24  ;;  %v22000_v31 = vand.u32 4294901760, %v21999_v34 }
 0x536   :  { %20402 = vmatpush1.msra.mxu1 %v37300_v18  ;;  %21609 = vmatmul.mubr.f32.vlgmr.msra.gmra.mrb[42].mxu0 %v37246_v36 }
 0x537   :  { %20991 = vmatprep.subr.mxu1 %v37369_v50  ;;  %21620 = vmatpush1.msra.mxu0 %v37346_v54  ;;  %v22001_v45 = vsub.f32 %v21999_v34, %v22000_v31 }
 0x538   :  { %21693 = vmatprep.subr.mxu0 %v37334_v48  ;;  %20465 = vmatprep.mubr.f32.mxu1 %v38327_v6 }
 0x539   :  { %21683 = vmatprep.mubr.f32.mxu0 %v38327_v6  ;;  %v22002_v35 = vand.u32 4294901760, %v22001_v45 }
 0x53d   :  { %20467 = vmatmul.mubr.f32.vlgmr.msra.gmra.mrb[56].mxu1 %v36933_v24  ;;  %v34894_v24 = vld [vmem:[%s38305_s0 + $0x1c8] sm:$0xff] }
 0x53e   :  { %20993 = vmatpush1.msra.mxu1 %v37374_v63  ;;  %21686 = vmatmul.mubr.f32.vlgmr.msra.gmra.mrb[42].mxu0 %v37257_v12  ;;  %v20514_v42 = vmul.f32 %v34894_v24, %v38335_v49 }
 0x53f   :  { %21073 = vmatprep.subr.mxu1 %v21072_v61  ;;  %21695 = vmatpush1.msra.mxu0 %v37339_v16 }
 0x540   :  { %21056 = vmatprep.mubr.f32.mxu1 %v38327_v6  ;;  %21771 = vmatprep.subr.mxu0 %v21535_v39  ;;  %v37408_v3 = vand.u32 4294901760, %v20514_v42  ;;  %v34899_v39 = vld [vmem:[%s38305_s0 + $0x1e0] sm:$0xff] }
 0x541   :  { %21062 = vmatmul.mubr.f32.vlgmr.msra.gmra.mrb[50].mxu1 %v37284_v14  ;;  %21758 = vmatprep.mubr.f32.mxu0 %v38327_v6 }
 0x542   :  { %21079 = vmatpush1.msra.mxu1 %v21078_v52  ;;  %21142 = vmatprep.mubr.f32.mxu1 %v38327_v6  ;;  %v22464_v30 = vsub.f32 %v20514_v42, %v37408_v3 }
 0x543   :  { %21152 = vmatprep.subr.mxu1 %v21069_v58 }
 0x544   :  { %v22465_v40 = vand.u32 4294901760, %v22464_v30 }
 0x546   :  { %21762 = vmatmul.mubr.f32.vlgmr.msra.gmra.mrb[42].mxu0 %v37266_v2  ;;  %v22466_v8 = vsub.f32 %v22464_v30, %v22465_v40 }
 0x547   :  { %21775 = vmatpush1.msra.mxu0 %v21541_v21  ;;  %21838 = vmatprep.mubr.f32.mxu0 %v38327_v6  ;;  %v38340_v21 = vld [vmem:[#allocation13_spill] sm:$0xff] }
 0x548   :  { %21847 = vmatprep.subr.mxu0 %v37334_v48  ;;  %v22467_v18 = vand.u32 4294901760, %v22466_v8  ;;  %v22008_v48 = vand.u32 4294901760, %v22007_v33  ;;  %v20517_v44 = vmul.f32 %v34899_v39, %v38340_v21 }
 0x549   :  { %21144 = vmatmul.mubr.f32.vlgmr.msra.gmra.mrb[50].mxu1 %v37246_v36 }
 0x54a   :  { %21155 = vmatpush1.msra.mxu1 %v37379_v20  ;;  %21218 = vmatprep.mubr.f32.mxu1 %v38327_v6  ;;  %v37487_v9 = vand.u32 4294901760, %v20517_v44  ;;  %v34901_v20 = vld [vmem:[%s38305_s0 + $0x1d0] sm:$0xff] }
 0x54b   :  { %21228 = vmatprep.subr.mxu1 %v37369_v50 }
 0x54c   :  { %v23400_v41 = vsub.f32 %v20517_v44, %v37487_v9 }
 0x54e   :  { %21840 = vmatmul.mubr.f32.vlgmr.msra.gmra.mrb[42].mxu0 %v37246_v36  ;;  %v23401_v60 = vand.u32 4294901760, %v23400_v41 }
 0x54f   :  { %21849 = vmatpush1.msra.mxu0 %v37339_v16  ;;  %21912 = vmatprep.mubr.f32.mxu0 %v38327_v6  ;;  %v34898_v16 = vld [vmem:[%s38305_s0 + $0x1e8] sm:$0xff] }
 0x550   :  { %22386 = vmatprep.subr.mxu0 %v37408_v3  ;;  %v20518_v54 = vmul.f32 %v34898_v16, %v38339_v25  ;;  %v23402_v46 = vsub.f32 %v23400_v41, %v23401_v60 }
 0x551   :  { %21221 = vmatmul.mubr.f32.vlgmr.msra.gmra.mrb[50].mxu1 %v37257_v12 }
 0x552   :  { %21230 = vmatpush1.msra.mxu1 %v37374_v63  ;;  %21293 = vmatprep.mubr.f32.mxu1 %v38327_v6  ;;  %v37482_v53 = vand.u32 4294901760, %v20518_v54  ;;  %v23403_v17 = vand.u32 4294901760, %v23402_v46 }
 0x553   :  { %21306 = vmatprep.subr.mxu1 %v21070_v7  ;;  %v38342_v7 = vld [vmem:[#allocation11_spill] sm:$0xff] }
 0x554   :  { %v23394_v29 = vsub.f32 %v20518_v54, %v37482_v53 }
 0x556   :  { %21914 = vmatmul.mubr.f32.vlgmr.msra.gmra.mrb[42].mxu0 %v37246_v36  ;;  %v23395_v55 = vand.u32 4294901760, %v23394_v29 }
 0x557   :  { %22388 = vmatpush1.msra.mxu0 %v37413_v26  ;;  %22451 = vmatprep.mubr.f32.mxu0 %v38327_v6 }
 0x558   :  { %22468 = vmatprep.subr.mxu0 %v22467_v18  ;;  %v23396_v56 = vsub.f32 %v23394_v29, %v23395_v55 }
 0x559   :  { %21297 = vmatmul.mubr.f32.vlgmr.msra.gmra.mrb[50].mxu1 %v37266_v2 }
 0x55a   :  { %21310 = vmatpush1.msra.mxu1 %v21076_v27  ;;  %22457 = vmatmul.mubr.f32.vlgmr.msra.gmra.mrb[44].mxu0 %v37284_v14  ;;  %v23397_v58 = vand.u32 4294901760, %v23396_v56  ;;  %v20515_v27 = vmul.f32 %v34901_v20, %v38342_v7 }
 0x55b   :  { %21382 = vmatprep.subr.mxu1 %v37369_v50  ;;  %22474 = vmatpush1.msra.mxu0 %v22473_v38  ;;  %v38341_v50 = vld [vmem:[#allocation12_spill] sm:$0xff] }
 0x55c   :  { %22547 = vmatprep.subr.mxu0 %v22464_v30  ;;  %21373 = vmatprep.mubr.f32.mxu1 %v38327_v6  ;;  %v22852_v61 = vand.u32 4294901760, %v20515_v27 }
 0x55d   :  { %22537 = vmatprep.mubr.f32.mxu0 %v38327_v6 }
 0x55e   :  { %v22935_v24 = vsub.f32 %v20515_v27, %v22852_v61 }
 0x560   :  { %v22936_v42 = vand.u32 4294901760, %v22935_v24 }
 0x561   :  { %21375 = vmatmul.mubr.f32.vlgmr.msra.gmra.mrb[50].mxu1 %v37246_v36 }
 0x562   :  { %21384 = vmatpush1.msra.mxu1 %v37374_v63  ;;  %22539 = vmatmul.mubr.f32.vlgmr.msra.gmra.mrb[44].mxu0 %v37246_v36  ;;  %v20516_v63 = vmul.f32 %v34900_v59, %v38341_v50  ;;  %v22937_v47 = vsub.f32 %v22935_v24, %v22936_v42 }
 0x563   :  { %21921 = vmatprep.subr.mxu1 %v37443_v0  ;;  %22550 = vmatpush1.msra.mxu0 %v37420_v23  ;;  %v34903_v23 = vld [vmem:[%s38305_s0 + $0x1f0] sm:$0xff] }
 0x564   :  { %22623 = vmatprep.subr.mxu0 %v37408_v3  ;;  %21447 = vmatprep.mubr.f32.mxu1 %v38327_v6  ;;  %v22850_v22 = vand.u32 4294901760, %v20516_v63 }
 0x565   :  { %22613 = vmatprep.mubr.f32.mxu0 %v38327_v6 }
 0x566   :  { %v22929_v52 = vsub.f32 %v20516_v63, %v22850_v22 }
 0x568   :  { %v22930_v49 = vand.u32 4294901760, %v22929_v52 }
 0x569   :  { %21449 = vmatmul.mubr.f32.vlgmr.msra.gmra.mrb[50].mxu1 %v37246_v36 }
 0x56a   :  { %21923 = vmatpush1.msra.mxu1 %v37448_v37  ;;  %22616 = vmatmul.mubr.f32.vlgmr.msra.gmra.mrb[44].mxu0 %v37257_v12  ;;  %v22931_v32 = vsub.f32 %v22929_v52, %v22930_v49 }
 0x56b   :  { %22003 = vmatprep.subr.mxu1 %v22002_v35  ;;  %22625 = vmatpush1.msra.mxu0 %v37413_v26 }
 0x56c   :  { %21986 = vmatprep.mubr.f32.mxu1 %v38327_v6  ;;  %22701 = vmatprep.subr.mxu0 %v22465_v40  ;;  %v22932_v10 = vand.u32 4294901760, %v22931_v32  ;;  %v20519_v40 = vmul.f32 %v34903_v23, %v36671_v57 }
 0x56d   :  { %21992 = vmatmul.mubr.f32.vlgmr.msra.gmra.mrb[52].mxu1 %v37284_v14  ;;  %22688 = vmatprep.mubr.f32.mxu0 %v38327_v6 }
 0x56e   :  { %22009 = vmatpush1.msra.mxu1 %v22008_v48  ;;  %22072 = vmatprep.mubr.f32.mxu1 %v38327_v6  ;;  %v23782_v8 = vand.u32 4294901760, %v20519_v40  ;;  %v24293_v48 = vld [vmem:[%s38309_s4] sm:$0xf] }
 0x56f   :  { %22082 = vmatprep.subr.mxu1 %v21999_v34  ;;  %v24312_v16 = vsel %vm156_vm0, %v24293_v48, 0 }
 0x570   :  { %v37602_v25 = vand.u32 4294901760, %v24312_v16 }
 0x572   :  { %22692 = vmatmul.mubr.f32.vlgmr.msra.gmra.mrb[44].mxu0 %v37266_v2  ;;  %v37605_v54 = vsub.f32 %v24312_v16, %v37602_v25 }
 0x573   :  { %22705 = vmatpush1.msra.mxu0 %v22471_v1  ;;  %22768 = vmatprep.mubr.f32.mxu0 %v38327_v6 }
 0x574   :  { %22777 = vmatprep.subr.mxu0 %v37408_v3  ;;  %v22938_v3 = vand.u32 4294901760, %v22937_v47  ;;  %v37608_v39 = vand.u32 4294901760, %v37605_v54 }
 0x575   :  { %22074 = vmatmul.mubr.f32.vlgmr.msra.gmra.mrb[52].mxu1 %v37246_v36 }
 0x576   :  { %22085 = vmatpush1.msra.mxu1 %v37453_v11  ;;  %22148 = vmatprep.mubr.f32.mxu1 %v38327_v6  ;;  %v24384_v44 = vsub.f32 %v37605_v54, %v37608_v39 }
 0x577   :  { %22158 = vmatprep.subr.mxu1 %v37443_v0 }
 0x57a   :  { %22770 = vmatmul.mubr.f32.vlgmr.msra.gmra.mrb[44].mxu0 %v37246_v36 }
 0x57b   :  { %22779 = vmatpush1.msra.mxu0 %v37413_v26  ;;  %22842 = vmatprep.mubr.f32.mxu0 %v38327_v6  ;;  %v34902_v26 = vld [vmem:[%s38305_s0 + $0x1f8] sm:$0xff] }
 0x57c   :  { %23316 = vmatprep.subr.mxu0 %v37482_v53  ;;  %v20520_v30 = vmul.f32 %v34902_v26, %v36686_v28  ;;  %v23865_v28 = vsub.f32 %v20519_v40, %v23782_v8 }
 0x57d   :  { %22151 = vmatmul.mubr.f32.vlgmr.msra.gmra.mrb[52].mxu1 %v37257_v12 }
 0x57e   :  { %22160 = vmatpush1.msra.mxu1 %v37448_v37  ;;  %22223 = vmatprep.mubr.f32.mxu1 %v38327_v6  ;;  %v23780_v1 = vand.u32 4294901760, %v20520_v30  ;;  %v23866_v62 = vand.u32 4294901760, %v23865_v28 }
 0x57f   :  { %22236 = vmatprep.subr.mxu1 %v22000_v31 }
 0x580   :  { %v23859_v13 = vsub.f32 %v20520_v30, %v23780_v1  ;;  %v23867_v57 = vsub.f32 %v23865_v28, %v23866_v62 }
 0x582   :  { %22844 = vmatmul.mubr.f32.vlgmr.msra.gmra.mrb[44].mxu0 %v37246_v36  ;;  %v23860_v43 = vand.u32 4294901760, %v23859_v13  ;;  %v23868_v15 = vand.u32 4294901760, %v23867_v57  ;;  %v24296_v57 = vld [vmem:[%s38310_s5 + $0x10] sm:$0xff] }
 0x583   :  { %23318 = vmatpush1.msra.mxu0 %v37487_v9  ;;  %23381 = vmatprep.mubr.f32.mxu0 %v38327_v6 }
 0x584   :  { %23398 = vmatprep.subr.mxu0 %v23397_v58  ;;  %v23861_v5 = vsub.f32 %v23859_v13, %v23860_v43 }
 0x585   :  { %22227 = vmatmul.mubr.f32.vlgmr.msra.gmra.mrb[52].mxu1 %v37266_v2 }
 0x586   :  { %22240 = vmatpush1.msra.mxu1 %v22006_v4  ;;  %23387 = vmatmul.mubr.f32.vlgmr.msra.gmra.mrb[46].mxu0 %v37284_v14  ;;  %v23862_v18 = vand.u32 4294901760, %v23861_v5 }
 0x587   :  { %22312 = vmatprep.subr.mxu1 %v37443_v0  ;;  %23404 = vmatpush1.msra.mxu0 %v23403_v17 }
 0x588   :  { %23477 = vmatprep.subr.mxu0 %v23394_v29  ;;  %22303 = vmatprep.mubr.f32.mxu1 %v38327_v6 }
 0x589   :  { %23467 = vmatprep.mubr.f32.mxu0 %v38327_v6 }
 0x58d   :  { %22305 = vmatmul.mubr.f32.vlgmr.msra.gmra.mrb[52].mxu1 %v37246_v36 }
 0x58e   :  { %22314 = vmatpush1.msra.mxu1 %v37448_v37  ;;  %23469 = vmatmul.mubr.f32.vlgmr.msra.gmra.mrb[46].mxu0 %v37246_v36 }
 0x58f   :  { %22851 = vmatprep.subr.mxu1 %v22850_v22  ;;  %23480 = vmatpush1.msra.mxu0 %v23400_v41 }
 0x590   :  { %23553 = vmatprep.subr.mxu0 %v37482_v53  ;;  %22377 = vmatprep.mubr.f32.mxu1 %v38327_v6 }
 0x591   :  { %23543 = vmatprep.mubr.f32.mxu0 %v38327_v6 }
 0x595   :  { %22379 = vmatmul.mubr.f32.vlgmr.msra.gmra.mrb[52].mxu1 %v37246_v36 }
 0x596   :  { %22853 = vmatpush1.msra.mxu1 %v22852_v61  ;;  %23546 = vmatmul.mubr.f32.vlgmr.msra.gmra.mrb[46].mxu0 %v37257_v12 }
 0x597   :  { %22933 = vmatprep.subr.mxu1 %v22932_v10  ;;  %23555 = vmatpush1.msra.mxu0 %v37487_v9 }
 0x598   :  { %22916 = vmatprep.mubr.f32.mxu1 %v38327_v6  ;;  %23631 = vmatprep.subr.mxu0 %v23395_v55 }
 0x599   :  { %22922 = vmatmul.mubr.f32.vlgmr.msra.gmra.mrb[54].mxu1 %v37284_v14  ;;  %23618 = vmatprep.mubr.f32.mxu0 %v38327_v6 }
 0x59a   :  { %22939 = vmatpush1.msra.mxu1 %v22938_v3  ;;  %23002 = vmatprep.mubr.f32.mxu1 %v38327_v6 }
 0x59b   :  { %23012 = vmatprep.subr.mxu1 %v22929_v52 }
 0x59e   :  { %23622 = vmatmul.mubr.f32.vlgmr.msra.gmra.mrb[46].mxu0 %v37266_v2 }
 0x59f   :  { %23635 = vmatpush1.msra.mxu0 %v23401_v60  ;;  %23698 = vmatprep.mubr.f32.mxu0 %v38327_v6  ;;  %v24385_v60 = vand.u32 4294901760, %v24384_v44 }
 0x5a0   :  { %23707 = vmatprep.subr.mxu0 %v37482_v53 }
 0x5a1   :  { %23004 = vmatmul.mubr.f32.vlgmr.msra.gmra.mrb[54].mxu1 %v37246_v36 }
 0x5a2   :  { %23015 = vmatpush1.msra.mxu1 %v22935_v24  ;;  %23078 = vmatprep.mubr.f32.mxu1 %v38327_v6 }
 0x5a3   :  { %23088 = vmatprep.subr.mxu1 %v22850_v22 }
 0x5a6   :  { %23700 = vmatmul.mubr.f32.vlgmr.msra.gmra.mrb[46].mxu0 %v37246_v36 }
 0x5a7   :  { %23709 = vmatpush1.msra.mxu0 %v37487_v9  ;;  %23772 = vmatprep.mubr.f32.mxu0 %v38327_v6 }
 0x5a9   :  { %23081 = vmatmul.mubr.f32.vlgmr.msra.gmra.mrb[54].mxu1 %v37257_v12 }
 0x5aa   :  { %23090 = vmatpush1.msra.mxu1 %v22852_v61  ;;  %23153 = vmatprep.mubr.f32.mxu1 %v38327_v6 }
 0x5ab   :  { %23166 = vmatprep.subr.mxu1 %v22930_v49 }
 0x5ae   :  { %23774 = vmatmul.mubr.f32.vlgmr.msra.gmra.mrb[46].mxu0 %v37246_v36 }
 0x5af   :  { %24380 = vmatprep.mubr.f32.mxu0 %v38327_v6 }
 0x5b1   :  { %23157 = vmatmul.mubr.f32.vlgmr.msra.gmra.mrb[54].mxu1 %v37266_v2 }
 0x5b2   :  { %23170 = vmatpush1.msra.mxu1 %v22936_v42  ;;  %23233 = vmatprep.mubr.f32.mxu1 %v38327_v6 }
 0x5b3   :  { %23242 = vmatprep.subr.mxu1 %v22850_v22 }
 0x5b9   :  { %23235 = vmatmul.mubr.f32.vlgmr.msra.gmra.mrb[54].mxu1 %v37246_v36 }
 0x5ba   :  { %23244 = vmatpush1.msra.mxu1 %v22852_v61  ;;  %23307 = vmatprep.mubr.f32.mxu1 %v38327_v6 }
 0x5bb   :  { %23781 = vmatprep.subr.mxu1 %v23780_v1 }
 0x5c1   :  { %23309 = vmatmul.mubr.f32.vlgmr.msra.gmra.mrb[54].mxu1 %v37246_v36 }
 0x5c2   :  { %23783 = vmatpush1.msra.mxu1 %v23782_v8  ;;  %23846 = vmatprep.mubr.f32.mxu1 %v38327_v6 }
 0x5c3   :  { %23863 = vmatprep.subr.mxu1 %v23862_v18 }
 0x5c5   :  { %23852 = vmatmul.mubr.f32.vlgmr.msra.gmra.mrb[56].mxu1 %v37284_v14 }
 0x5c6   :  { %23869 = vmatpush1.msra.mxu1 %v23868_v15  ;;  %23932 = vmatprep.mubr.f32.mxu1 %v38327_v6 }
 0x5c7   :  { %23942 = vmatprep.subr.mxu1 %v23859_v13  ;;  %v24294_v13 = vld [vmem:[%s38310_s5] sm:$0xff] }
 0x5cd   :  { %23934 = vmatmul.mubr.f32.vlgmr.msra.gmra.mrb[56].mxu1 %v37246_v36 }
 0x5ce   :  { %23945 = vmatpush1.msra.mxu1 %v23865_v28  ;;  %24008 = vmatprep.mubr.f32.mxu1 %v38327_v6  ;;  %v25257_v28 = vsel %vm3928_vm1, %v24294_v13, 0 }
 0x5cf   :  { %24018 = vmatprep.subr.mxu1 %v23780_v1 }
 0x5d5   :  { %24011 = vmatmul.mubr.f32.vlgmr.msra.gmra.mrb[56].mxu1 %v37257_v12 }
 0x5d6   :  { %24020 = vmatpush1.msra.mxu1 %v23782_v8  ;;  %24083 = vmatprep.mubr.f32.mxu1 %v38327_v6 }
 0x5d7   :  { %24096 = vmatprep.subr.mxu1 %v23860_v43  ;;  %v24295_v43 = vld [vmem:[%s38310_s5 + $0x8] sm:$0xff] }
 0x5d8   :  { %v25260_v5 = vsel %vm3928_vm1, %v24295_v43, 0 }
 0x5d9   :  { %v37668_v15 = vand.u32 4294901760, %v25260_v5 }
 0x5dd   :  { %24087 = vmatmul.mubr.f32.vlgmr.msra.gmra.mrb[56].mxu1 %v37266_v2 }
 0x5de   :  { %24100 = vmatpush1.msra.mxu1 %v23866_v62  ;;  %24163 = vmatprep.mubr.f32.mxu1 %v38327_v6  ;;  %v37659_v62 = vand.u32 4294901760, %v25257_v28 }
 0x5df   :  { %24172 = vmatprep.subr.mxu1 %v23780_v1 }
 0x5e0   :  { %v37666_v18 = vsub.f32 %v25257_v28, %v37659_v62 }
 0x5e5   :  { %24165 = vmatmul.mubr.f32.vlgmr.msra.gmra.mrb[56].mxu1 %v37246_v36 }
 0x5e6   :  { %24174 = vmatpush1.msra.mxu1 %v23782_v8  ;;  %24237 = vmatprep.mubr.f32.mxu1 %v38327_v6 }
 0x5ed   :  { %24239 = vmatmul.mubr.f32.vlgmr.msra.gmra.mrb[56].mxu1 %v37246_v36 }
 0x5ee   :  { %24845 = vmatprep.mubr.f32.mxu1 %v38327_v6 }
 0x5fd   :  { %v37568_v12 = vpop.f32.mrb[40].mxu0 }
 0x5fe   :  { %v37570_v14 = vpop.f32.mrb[41].mxu0 }
 0x629   :  { %v37572_v51 = vpop.f32.mrb[42].mxu0 }
 0x62a   :  { %v24299_v2 = vadd.f32 %v37572_v51, %v37568_v12  ;;  %v37576_v19 = vpop.f32.mrb[43].mxu0 }
 0x62b   :  { %v24300_v38 = vadd.f32 %v37576_v19, %v37570_v14 }
 0x63c   :  { %v37580_v0 = vpop.f32.mrb[50].mxu1 }
 0x63d   :  { %v37582_v37 = vpop.f32.mrb[51].mxu1 }
 0x655   :  { %v37584_v36 = vpop.f32.mrb[44].mxu0 }
 0x656   :  { %v24303_v34 = vadd.f32 %v24299_v2, %v37584_v36  ;;  %v37587_v11 = vpop.f32.mrb[45].mxu0  ;;  %v25263_v2 = vsel %vm3928_vm1, %v24296_v57, 0 }
 0x657   :  { %v24304_v31 = vadd.f32 %v24300_v38, %v37587_v11  ;;  %v24297_v38 = vld [vmem:[%s38310_s5 + $0x18] sm:$0xff] }
 0x668   :  { %v37590_v4 = vpop.f32.mrb[52].mxu1 }
 0x669   :  { %v24301_v45 = vadd.f32 %v37590_v4, %v37580_v0  ;;  %v37594_v33 = vpop.f32.mrb[53].mxu1 }
 0x66a   :  { %v24302_v35 = vadd.f32 %v37594_v33, %v37582_v37 }
 0x681   :  { %v37610_v21 = vpop.f32.mrb[46].mxu0 }
 0x682   :  { %v24307_v53 = vadd.f32 %v24303_v34, %v37610_v21  ;;  %v37615_v9 = vpop.f32.mrb[47].mxu0  ;;  %v37675_v34 = vand.u32 4294901760, %v37666_v18 }
 0x683   :  { %v24308_v29 = vadd.f32 %v24304_v31, %v37615_v9  ;;  %v37678_v31 = vsub.f32 %v25260_v5, %v37668_v15 }
 0x684   :  { %v24316_v41 = vand.u32 4294901760, %v24307_v53 }
 0x685   :  { %v24314_v55 = vand.u32 4294901760, %v24308_v29 }
 0x686   :  { %v24399_v56 = vsub.f32 %v24307_v53, %v24316_v41 }
 0x687   :  { %v24393_v46 = vsub.f32 %v24308_v29, %v24314_v55  ;;  %24315 = vmatprep.subr.mxu0 %v24314_v55 }
 0x688   :  { %v24400_v59 = vand.u32 4294901760, %v24399_v56  ;;  %24317 = vmatpush1.msra.mxu0 %v24316_v41 }
 0x689   :  { %24386 = vmatmul.mubr.f32.vlgmr.msra.gmra.mrb[48].mxu0 %v24385_v60  ;;  %v24394_v50 = vand.u32 4294901760, %v24393_v46 }
 0x68a   :  { %v24401_v63 = vsub.f32 %v24399_v56, %v24400_v59  ;;  %24466 = vmatprep.mubr.f32.mxu0 %v38327_v6 }
 0x68b   :  { %v24395_v58 = vsub.f32 %v24393_v46, %v24394_v50 }
 0x68c   :  { %v24402_v7 = vand.u32 4294901760, %v24401_v63 }
 0x68d   :  { %v24396_v20 = vand.u32 4294901760, %v24395_v58 }
 0x68f   :  { %24397 = vmatprep.subr.mxu0 %v24396_v20 }
 0x690   :  { %24403 = vmatpush1.msra.mxu0 %v24402_v7 }
 0x691   :  { %24468 = vmatmul.mubr.f32.vlgmr.msra.gmra.mrb[48].mxu0 %v37602_v25  ;;  %24476 = vmatprep.subr.mxu0 %v24393_v46 }
 0x692   :  { %24479 = vmatpush1.msra.mxu0 %v24399_v56  ;;  %24542 = vmatprep.mubr.f32.mxu0 %v38327_v6 }
 0x693   :  { %24552 = vmatprep.subr.mxu0 %v24314_v55 }
 0x694   :  { %v37621_v27 = vpop.f32.mrb[54].mxu1 }
 0x695   :  { %v24305_v17 = vadd.f32 %v24301_v45, %v37621_v27  ;;  %v37624_v22 = vpop.f32.mrb[55].mxu1  ;;  %v37680_v45 = vand.u32 4294901760, %v25263_v2 }
 0x696   :  { %v24306_v61 = vadd.f32 %v24302_v35, %v37624_v22  ;;  %v25266_v35 = vsel %vm3928_vm1, %v24297_v38, 0 }
 0x697   :  { %v37689_v53 = vsub.f32 %v25263_v2, %v37680_v45  ;;  %v37691_v29 = vand.u32 4294901760, %v25266_v35 }
 0x699   :  { %24545 = vmatmul.mubr.f32.vlgmr.msra.gmra.mrb[48].mxu0 %v37605_v54  ;;  %v37702_v58 = vand.u32 4294901760, %v37689_v53  ;;  %v37705_v20 = vsub.f32 %v25266_v35, %v37691_v29 }
 0x69a   :  { %24554 = vmatpush1.msra.mxu0 %v24316_v41  ;;  %24617 = vmatprep.mubr.f32.mxu0 %v38327_v6 }
 0x69b   :  { %24630 = vmatprep.subr.mxu0 %v24394_v50 }
 0x6a1   :  { %24621 = vmatmul.mubr.f32.vlgmr.msra.gmra.mrb[48].mxu0 %v37608_v39 }
 0x6a2   :  { %24634 = vmatpush1.msra.mxu0 %v24400_v59  ;;  %24697 = vmatprep.mubr.f32.mxu0 %v38327_v6 }
 0x6a3   :  { %24706 = vmatprep.subr.mxu0 %v24314_v55 }
 0x6a9   :  { %24699 = vmatmul.mubr.f32.vlgmr.msra.gmra.mrb[48].mxu0 %v37602_v25 }
 0x6aa   :  { %24708 = vmatpush1.msra.mxu0 %v24316_v41  ;;  %24771 = vmatprep.mubr.f32.mxu0 %v38327_v6 }
 0x6b1   :  { %24773 = vmatmul.mubr.f32.vlgmr.msra.gmra.mrb[48].mxu0 %v37602_v25 }
 0x6b2   :  { %25346 = vmatprep.mubr.f32.mxu0 %v38327_v6 }
 0x6c0   :  { %v37635_v52 = vpop.f32.mrb[56].mxu1 }
 0x6c1   :  { %v24309_v24 = vadd.f32 %v24305_v17, %v37635_v52  ;;  %v37638_v49 = vpop.f32.mrb[57].mxu1 }
 0x6c2   :  { %v24310_v42 = vadd.f32 %v24306_v61, %v37638_v49 }
 0x6c3   :  { %v24781_v32 = vand.u32 4294901760, %v24309_v24 }
 0x6c4   :  { %v24779_v47 = vand.u32 4294901760, %v24310_v42 }
 0x6c5   :  { %v24864_v10 = vsub.f32 %v24309_v24, %v24781_v32 }
 0x6c6   :  { %v24858_v3 = vsub.f32 %v24310_v42, %v24779_v47  ;;  %24780 = vmatprep.subr.mxu1 %v24779_v47  ;;  %v25372_v42 = vsub.f32 %v37689_v53, %v37702_v58 }
 0x6c7   :  { %v24865_v26 = vand.u32 4294901760, %v24864_v10  ;;  %24782 = vmatpush1.msra.mxu1 %v24781_v32 }
 0x6c8   :  { %24851 = vmatmul.mubr.f32.vlgmr.msra.gmra.mrb[58].mxu1 %v24385_v60  ;;  %v24859_v30 = vand.u32 4294901760, %v24858_v3 }
 0x6c9   :  { %v24866_v23 = vsub.f32 %v24864_v10, %v24865_v26  ;;  %24931 = vmatprep.mubr.f32.mxu1 %v38327_v6 }
 0x6ca   :  { %v24860_v40 = vsub.f32 %v24858_v3, %v24859_v30 }
 0x6cb   :  { %v24867_v8 = vand.u32 4294901760, %v24866_v23 }
 0x6cc   :  { %v24861_v1 = vand.u32 4294901760, %v24860_v40 }
 0x6ce   :  { %24862 = vmatprep.subr.mxu1 %v24861_v1 }
 0x6cf   :  { %24868 = vmatpush1.msra.mxu1 %v24867_v8  ;;  %v37740_v8 = vld [vmem:[%s38311_s6] sm:$0xff] }
 0x6d0   :  { %24933 = vmatmul.mubr.f32.vlgmr.msra.gmra.mrb[58].mxu1 %v37602_v25  ;;  %24941 = vmatprep.subr.mxu1 %v24858_v3 }
 0x6d1   :  { %24944 = vmatpush1.msra.mxu1 %v24864_v10  ;;  %25007 = vmatprep.mubr.f32.mxu1 %v38327_v6 }
 0x6d2   :  { %25017 = vmatprep.subr.mxu1 %v24779_v47  ;;  %26601 = vrot.lane.b32.xlu1 %v37740_v8, %s34905_s26 }
 0x6d3   :  { %28475 = vrot.lane.b32.xlu0 %v37740_v8, %s34906_s12 }
 0x6d6   :  { %29421 = vrot.lane.b32.xlu1 %v37740_v8, %s34907_s18 }
 0x6d8   :  { %25010 = vmatmul.mubr.f32.vlgmr.msra.gmra.mrb[58].mxu1 %v37605_v54  ;;  %v25350_v54 = vsub.f32 %v37666_v18, %v37675_v34 }
 0x6d9   :  { %25019 = vmatpush1.msra.mxu1 %v24781_v32  ;;  %25082 = vmatprep.mubr.f32.mxu1 %v38327_v6 }
 0x6da   :  { %25095 = vmatprep.subr.mxu1 %v24859_v30  ;;  %v37697_v59 = vand.u32 4294901760, %v25350_v54  ;;  %v37719_v30 = vand.u32 4294901760, %v25372_v42 }
 0x6e0   :  { %25086 = vmatmul.mubr.f32.vlgmr.msra.gmra.mrb[58].mxu1 %v37608_v39  ;;  %v37686_v39 = vand.u32 4294901760, %v37678_v31 }
 0x6e1   :  { %25099 = vmatpush1.msra.mxu1 %v24865_v26  ;;  %25162 = vmatprep.mubr.f32.mxu1 %v38327_v6 }
 0x6e2   :  { %25171 = vmatprep.subr.mxu1 %v24779_v47  ;;  %v25361_v63 = vsub.f32 %v37678_v31, %v37686_v39 }
 0x6e4   :  { %v37710_v24 = vand.u32 4294901760, %v25361_v63 }
 0x6e8   :  { %25164 = vmatmul.mubr.f32.vlgmr.msra.gmra.mrb[58].mxu1 %v37602_v25 }
 0x6e9   :  { %25173 = vmatpush1.msra.mxu1 %v24781_v32  ;;  %25236 = vmatprep.mubr.f32.mxu1 %v38327_v6  ;;  %v37715_v32 = vand.u32 4294901760, %v37705_v20 }
 0x6eb   :  { %v25383_v23 = vsub.f32 %v37705_v20, %v37715_v32 }
 0x6ed   :  { %v37725_v1 = vand.u32 4294901760, %v25383_v23 }
 0x6f0   :  { %25238 = vmatmul.mubr.f32.vlgmr.msra.gmra.mrb[58].mxu1 %v37602_v25 }
 0x6f1   :  { %25958 = vmatprep.mubr.f32.mxu1 %v38327_v6 }
 0x784   :  { %v24774_v48 = vpop.f32.mrb[48].mxu0 }
 0x785   :  { %vm25244_vm6 = vcmp.ge.f32.partialorder %v24774_v48, 0.0  ;;  %v25248_v16 = vmul.f32 0.2, %v24774_v48  ;;  %v24776_v25 = vpop.f32.mrb[49].mxu0 }
 0x786   :  { %vm25245_vm7 = vcmp.ge.f32.partialorder %v24776_v25, 0.0  ;;  %v25249_v44 = vmul.f32 0.2, %v24776_v25 }
 0x787   :  { %v25252_v41 = vsel %vm25244_vm6, %v24774_v48, %v25248_v16 }
 0x788   :  { %v25269_v55 = vsel %vm3941_vm2, %v25252_v41, 0  ;;  %v25253_v60 = vsel %vm25245_vm7, %v24776_v25, %v25249_v44 }
 0x789   :  { %v37694_v56 = vand.u32 4294901760, %v25269_v55  ;;  %v25272_v46 = vsel %vm3941_vm2, %v25253_v60, 0 }
 0x78a   :  { %v25280_v50 = vand.u32 4294901760, %v25272_v46 }
 0x78b   :  { %v25398_v7 = vsub.f32 %v25269_v55, %v37694_v56 }
 0x78c   :  { %v25392_v17 = vsub.f32 %v25272_v46, %v25280_v50  ;;  %25281 = vmatprep.subr.mxu0 %v25280_v50 }
 0x78d   :  { %25283 = vmatpush1.msra.mxu0 %v37694_v56  ;;  %v25399_v61 = vand.u32 4294901760, %v25398_v7 }
 0x78e   :  { %25352 = vmatmul.mubr.f32.vlgmr.msra.gmra.mrb[50].mxu0 %v37697_v59  ;;  %v25393_v47 = vand.u32 4294901760, %v25392_v17 }
 0x78f   :  { %25357 = vmatprep.mubr.f32.mxu0 %v38327_v6  ;;  %v25400_v10 = vsub.f32 %v25398_v7, %v25399_v61 }
 0x790   :  { %v25394_v3 = vsub.f32 %v25392_v17, %v25393_v47 }
 0x791   :  { %v25401_v26 = vand.u32 4294901760, %v25400_v10 }
 0x792   :  { %25363 = vmatmul.mubr.f32.gmra.mrb[52].mxu0 %v37710_v24  ;;  %v25395_v40 = vand.u32 4294901760, %v25394_v3 }
 0x793   :  { %25368 = vmatprep.mubr.f32.mxu0 %v38327_v6 }
 0x794   :  { %25396 = vmatprep.subr.mxu0 %v25395_v40 }
 0x795   :  { %25402 = vmatpush1.msra.mxu0 %v25401_v26 }
 0x796   :  { %25374 = vmatmul.mubr.f32.gmra.mrb[54].mxu0 %v37719_v30  ;;  %25496 = vmatprep.subr.mxu0 %v25392_v17 }
 0x797   :  { %25379 = vmatprep.mubr.f32.mxu0 %v38327_v6 }
 0x79a   :  { %25385 = vmatmul.mubr.f32.gmra.mrb[56].mxu0 %v37725_v1 }
 0x79b   :  { %25465 = vmatprep.mubr.f32.mxu0 %v38327_v6 }
 0x79e   :  { %25467 = vmatmul.mubr.f32.vlgmr.msra.gmra.mrb[50].mxu0 %v37659_v62 }
 0x79f   :  { %25499 = vmatpush1.msra.mxu0 %v25398_v7  ;;  %25472 = vmatprep.mubr.f32.mxu0 %v38327_v6 }
 0x7a0   :  { %25596 = vmatprep.subr.mxu0 %v25280_v50 }
 0x7a2   :  { %25474 = vmatmul.mubr.f32.gmra.mrb[52].mxu0 %v37668_v15 }
 0x7a3   :  { %25479 = vmatprep.mubr.f32.mxu0 %v38327_v6 }
 0x7a6   :  { %25481 = vmatmul.mubr.f32.gmra.mrb[54].mxu0 %v37680_v45 }
 0x7a7   :  { %25486 = vmatprep.mubr.f32.mxu0 %v38327_v6 }
 0x7aa   :  { %25488 = vmatmul.mubr.f32.gmra.mrb[56].mxu0 %v37691_v29 }
 0x7ab   :  { %25562 = vmatprep.mubr.f32.mxu0 %v38327_v6 }
 0x7ae   :  { %25565 = vmatmul.mubr.f32.vlgmr.msra.gmra.mrb[50].mxu0 %v37666_v18 }
 0x7af   :  { %25598 = vmatpush1.msra.mxu0 %v37694_v56  ;;  %25570 = vmatprep.mubr.f32.mxu0 %v38327_v6 }
 0x7b0   :  { %25701 = vmatprep.subr.mxu0 %v25393_v47 }
 0x7b2   :  { %25573 = vmatmul.mubr.f32.gmra.mrb[52].mxu0 %v37678_v31 }
 0x7b3   :  { %25578 = vmatprep.mubr.f32.mxu0 %v38327_v6 }
 0x7b6   :  { %25581 = vmatmul.mubr.f32.gmra.mrb[54].mxu0 %v37689_v53 }
 0x7b7   :  { %25586 = vmatprep.mubr.f32.mxu0 %v38327_v6 }
 0x7ba   :  { %25589 = vmatmul.mubr.f32.gmra.mrb[56].mxu0 %v37705_v20 }
 0x7bb   :  { %25661 = vmatprep.mubr.f32.mxu0 %v38327_v6 }
 0x7be   :  { %25665 = vmatmul.mubr.f32.vlgmr.msra.gmra.mrb[50].mxu0 %v37675_v34 }
 0x7bf   :  { %25705 = vmatpush1.msra.mxu0 %v25399_v61  ;;  %25670 = vmatprep.mubr.f32.mxu0 %v38327_v6 }
 0x7c0   :  { %25798 = vmatprep.subr.mxu0 %v25280_v50 }
 0x7c2   :  { %25674 = vmatmul.mubr.f32.gmra.mrb[52].mxu0 %v37686_v39 }
 0x7c3   :  { %v25239_v13 = vpop.f32.mrb[58].mxu1  ;;  %25679 = vmatprep.mubr.f32.mxu0 %v38327_v6 }
 0x7c4   :  { %vm25246_vm8 = vcmp.ge.f32.partialorder %v25239_v13, 0.0  ;;  %v25250_v28 = vmul.f32 0.2, %v25239_v13  ;;  %v25241_v43 = vpop.f32.mrb[59].mxu1 }
 0x7c5   :  { %vm25247_vm9 = vcmp.ge.f32.partialorder %v25241_v43, 0.0  ;;  %v25251_v5 = vmul.f32 0.2, %v25241_v43 }
 0x7c6   :  { %v25254_v57 = vsel %vm25246_vm8, %v25239_v13, %v25250_v28  ;;  %25683 = vmatmul.mubr.f32.gmra.mrb[54].mxu0 %v37702_v58 }
 0x7c7   :  { %v25275_v2 = vsel %vm3941_vm2, %v25254_v57, 0  ;;  %v25255_v38 = vsel %vm25247_vm9, %v25241_v43, %v25251_v5  ;;  %25688 = vmatprep.mubr.f32.mxu0 %v38327_v6 }
 0x7c8   :  { %v37765_v35 = vand.u32 4294901760, %v25275_v2  ;;  %v25278_v48 = vsel %vm3941_vm2, %v25255_v38, 0 }
 0x7c9   :  { %v37768_v16 = vand.u32 4294901760, %v25278_v48 }
 0x7ca   :  { %v26010_v25 = vsub.f32 %v25275_v2, %v37765_v35  ;;  %25692 = vmatmul.mubr.f32.gmra.mrb[56].mxu0 %v37715_v32 }
 0x7cb   :  { %v26004_v54 = vsub.f32 %v25278_v48, %v37768_v16  ;;  %25893 = vmatprep.subr.mxu1 %v37768_v16  ;;  %25768 = vmatprep.mubr.f32.mxu0 %v38327_v6 }
 0x7cc   :  { %25895 = vmatpush1.msra.mxu1 %v37765_v35  ;;  %v26011_v44 = vand.u32 4294901760, %v26010_v25 }
 0x7cd   :  { %25964 = vmatmul.mubr.f32.vlgmr.msra.gmra.mrb[60].mxu1 %v37697_v59  ;;  %v26005_v41 = vand.u32 4294901760, %v26004_v54 }
 0x7ce   :  { %25770 = vmatmul.mubr.f32.vlgmr.msra.gmra.mrb[50].mxu0 %v37659_v62  ;;  %25969 = vmatprep.mubr.f32.mxu1 %v38327_v6  ;;  %v26012_v55 = vsub.f32 %v26010_v25, %v26011_v44 }
 0x7cf   :  { %25800 = vmatpush1.msra.mxu0 %v37694_v56  ;;  %25775 = vmatprep.mubr.f32.mxu0 %v38327_v6  ;;  %v26006_v60 = vsub.f32 %v26004_v54, %v26005_v41 }
 0x7d0   :  { %v26013_v50 = vand.u32 4294901760, %v26012_v55 }
 0x7d1   :  { %25975 = vmatmul.mubr.f32.gmra.mrb[62].mxu1 %v37710_v24  ;;  %v26007_v46 = vand.u32 4294901760, %v26006_v60 }
 0x7d2   :  { %25777 = vmatmul.mubr.f32.gmra.mrb[52].mxu0 %v37668_v15  ;;  %25980 = vmatprep.mubr.f32.mxu1 %v38327_v6 }
 0x7d3   :  { %26008 = vmatprep.subr.mxu1 %v26007_v46  ;;  %25782 = vmatprep.mubr.f32.mxu0 %v38327_v6 }
 0x7d4   :  { %26014 = vmatpush1.msra.mxu1 %v26013_v50 }
 0x7d5   :  { %25986 = vmatmul.mubr.f32.gmra.mrb[64].mxu1 %v37719_v30  ;;  %26108 = vmatprep.subr.mxu1 %v26004_v54 }
 0x7d6   :  { %25784 = vmatmul.mubr.f32.gmra.mrb[54].mxu0 %v37680_v45  ;;  %25991 = vmatprep.mubr.f32.mxu1 %v38327_v6 }
 0x7d7   :  { %25789 = vmatprep.mubr.f32.mxu0 %v38327_v6 }
 0x7d9   :  { %25997 = vmatmul.mubr.f32.gmra.mrb[66].mxu1 %v37725_v1 }
 0x7da   :  { %25791 = vmatmul.mubr.f32.gmra.mrb[56].mxu0 %v37691_v29  ;;  %26077 = vmatprep.mubr.f32.mxu1 %v38327_v6 }
 0x7db   :  { %25863 = vmatprep.mubr.f32.mxu0 %v38327_v6 }
 0x7dd   :  { %26079 = vmatmul.mubr.f32.vlgmr.msra.gmra.mrb[60].mxu1 %v37659_v62 }
 0x7de   :  { %26111 = vmatpush1.msra.mxu1 %v26010_v25  ;;  %25865 = vmatmul.mubr.f32.vlgmr.msra.gmra.mrb[50].mxu0 %v37659_v62 }
 0x7df   :  { %26208 = vmatprep.subr.mxu1 %v37768_v16  ;;  %26084 = vmatprep.mubr.f32.mxu1 %v38327_v6 }
 0x7e0   :  { %25870 = vmatprep.mubr.f32.mxu0 %v38327_v6 }
 0x7e1   :  { %26086 = vmatmul.mubr.f32.gmra.mrb[62].mxu1 %v37668_v15 }
 0x7e2   :  { %25872 = vmatmul.mubr.f32.gmra.mrb[52].mxu0 %v37668_v15  ;;  %26091 = vmatprep.mubr.f32.mxu1 %v38327_v6 }
 0x7e3   :  { %25877 = vmatprep.mubr.f32.mxu0 %v38327_v6 }
 0x7e5   :  { %26093 = vmatmul.mubr.f32.gmra.mrb[64].mxu1 %v37680_v45 }
 0x7e6   :  { %25879 = vmatmul.mubr.f32.gmra.mrb[54].mxu0 %v37680_v45  ;;  %26098 = vmatprep.mubr.f32.mxu1 %v38327_v6 }
 0x7e7   :  { %25884 = vmatprep.mubr.f32.mxu0 %v38327_v6 }
 0x7e9   :  { %26100 = vmatmul.mubr.f32.gmra.mrb[66].mxu1 %v37691_v29 }
 0x7ea   :  { %25886 = vmatmul.mubr.f32.gmra.mrb[56].mxu0 %v37691_v29  ;;  %26174 = vmatprep.mubr.f32.mxu1 %v38327_v6 }
 0x7eb   :  { %26671 = vmatprep.mubr.f32.mxu0 %v38327_v6 }
 0x7ed   :  { %26177 = vmatmul.mubr.f32.vlgmr.msra.gmra.mrb[60].mxu1 %v37666_v18 }
 0x7ee   :  { %26210 = vmatpush1.msra.mxu1 %v37765_v35  ;;  %26182 = vmatprep.mubr.f32.mxu1 %v38327_v6 }
 0x7ef   :  { %26313 = vmatprep.subr.mxu1 %v26005_v41 }
 0x7f1   :  { %26185 = vmatmul.mubr.f32.gmra.mrb[62].mxu1 %v37678_v31 }
 0x7f2   :  { %26190 = vmatprep.mubr.f32.mxu1 %v38327_v6 }
 0x7f5   :  { %26193 = vmatmul.mubr.f32.gmra.mrb[64].mxu1 %v37689_v53 }
 0x7f6   :  { %26198 = vmatprep.mubr.f32.mxu1 %v38327_v6 }
 0x7f9   :  { %26201 = vmatmul.mubr.f32.gmra.mrb[66].mxu1 %v37705_v20 }
 0x7fa   :  { %26273 = vmatprep.mubr.f32.mxu1 %v38327_v6 }
 0x7fd   :  { %26277 = vmatmul.mubr.f32.vlgmr.msra.gmra.mrb[60].mxu1 %v37675_v34 }
 0x7fe   :  { %26317 = vmatpush1.msra.mxu1 %v26011_v44  ;;  %26282 = vmatprep.mubr.f32.mxu1 %v38327_v6 }
 0x7ff   :  { %26410 = vmatprep.subr.mxu1 %v37768_v16  ;;  %v26602_v16 = vpop.permute.xlu1 %26601 }
 0x800   :  { %v26603_v55 = vsel %vm156_vm0, %v26602_v16, 0 }
 0x801   :  { %26286 = vmatmul.mubr.f32.gmra.mrb[62].mxu1 %v37686_v39 }
 0x802   :  { %26291 = vmatprep.mubr.f32.mxu1 %v38327_v6 }
 0x805   :  { %26295 = vmatmul.mubr.f32.gmra.mrb[64].mxu1 %v37702_v58 }
 0x806   :  { %26300 = vmatprep.mubr.f32.mxu1 %v38327_v6 }
 0x809   :  { %26304 = vmatmul.mubr.f32.gmra.mrb[66].mxu1 %v37715_v32 }
 0x80a   :  { %26380 = vmatprep.mubr.f32.mxu1 %v38327_v6 }
 0x80d   :  { %26382 = vmatmul.mubr.f32.vlgmr.msra.gmra.mrb[60].mxu1 %v37659_v62 }
 0x80e   :  { %26412 = vmatpush1.msra.mxu1 %v37765_v35  ;;  %26387 = vmatprep.mubr.f32.mxu1 %v38327_v6 }
 0x811   :  { %26389 = vmatmul.mubr.f32.gmra.mrb[62].mxu1 %v37668_v15 }
 0x812   :  { %26394 = vmatprep.mubr.f32.mxu1 %v38327_v6 }
 0x815   :  { %26396 = vmatmul.mubr.f32.gmra.mrb[64].mxu1 %v37680_v45 }
 0x816   :  { %26401 = vmatprep.mubr.f32.mxu1 %v38327_v6 }
 0x819   :  { %26403 = vmatmul.mubr.f32.gmra.mrb[66].mxu1 %v37691_v29 }
 0x81a   :  { %26475 = vmatprep.mubr.f32.mxu1 %v38327_v6 }
 0x81d   :  { %26477 = vmatmul.mubr.f32.vlgmr.msra.gmra.mrb[60].mxu1 %v37659_v62 }
 0x81e   :  { %26482 = vmatprep.mubr.f32.mxu1 %v38327_v6 }
 0x821   :  { %26484 = vmatmul.mubr.f32.gmra.mrb[62].mxu1 %v37668_v15 }
 0x822   :  { %26489 = vmatprep.mubr.f32.mxu1 %v38327_v6 }
 0x825   :  { %26491 = vmatmul.mubr.f32.gmra.mrb[64].mxu1 %v37680_v45 }
 0x826   :  { %26496 = vmatprep.mubr.f32.mxu1 %v38327_v6 }
 0x829   :  { %26498 = vmatmul.mubr.f32.gmra.mrb[66].mxu1 %v37691_v29 }
 0x82a   :  { %27136 = vmatprep.mubr.f32.mxu1 %v38327_v6 }
 0x8b1   :  { %v25866_v18 = vpop.f32.mrb[50].mxu0 }
 0x8b2   :  { %v25868_v34 = vpop.f32.mrb[51].mxu0 }
 0x8b5   :  { %v25873_v31 = vpop.f32.mrb[52].mxu0 }
 0x8b6   :  { %v26504_v39 = vmax.f32 %v25866_v18, %v25873_v31  ;;  %v25875_v53 = vpop.f32.mrb[53].mxu0 }
 0x8b7   :  { %v26505_v62 = vmax.f32 %v25868_v34, %v25875_v53 }
 0x8b9   :  { %v25880_v56 = vpop.f32.mrb[54].mxu0 }
 0x8ba   :  { %v26508_v59 = vmax.f32 %v26504_v39, %v25880_v56  ;;  %v25882_v63 = vpop.f32.mrb[55].mxu0 }
 0x8bb   :  { %v26509_v15 = vmax.f32 %v26505_v62, %v25882_v63 }
 0x8bd   :  { %v25887_v58 = vpop.f32.mrb[56].mxu0 }
 0x8be   :  { %v26512_v20 = vmax.f32 %v26508_v59, %v25887_v58  ;;  %v25889_v7 = vpop.f32.mrb[57].mxu0 }
 0x8bf   :  { %v26513_v45 = vmax.f32 %v26509_v15, %v25889_v7 }
 0x8c0   :  { %v26516_v17 = vsub.f32 %v25866_v18, %v26512_v20  ;;  %v26528_v61 = vsub.f32 %v25873_v31, %v26512_v20  ;;  %v26540_v24 = vsub.f32 %v25880_v56, %v26512_v20  ;;  %v26552_v29 = vsub.f32 %v25887_v58, %v26512_v20 }
 0x8c1   :  { %v26517_v42 = vsub.f32 %v25868_v34, %v26513_v45  ;;  %v26529_v32 = vsub.f32 %v25875_v53, %v26513_v45  ;;  %v26541_v47 = vsub.f32 %v25882_v63, %v26513_v45  ;;  %v26553_v10 = vsub.f32 %v25889_v7, %v26513_v45 }
 0x8c2   :  { %v26520_v3 = vmul.f32 1.442695, %v26516_v17  ;;  %v26532_v26 = vmul.f32 1.442695, %v26528_v61  ;;  %v26544_v30 = vmul.f32 1.442695, %v26540_v24 }
 0x8c3   :  { %v26556_v23 = vmul.f32 1.442695, %v26552_v29  ;;  %v26522_v40 = vmul.f32 1.442695, %v26517_v42  ;;  %v26534_v1 = vmul.f32 1.442695, %v26529_v32 }
 0x8c4   :  { %34789 = vpow2.f32 %v26520_v3  ;;  %v26546_v13 = vmul.f32 1.442695, %v26541_v47  ;;  %v26558_v28 = vmul.f32 1.442695, %v26553_v10  ;;  %v37846_v18 = vand.u32 4294901760, %v26603_v55 }
 0x8c5   :  { %34791 = vpow2.f32 %v26532_v26 }
 0x8c6   :  { %34793 = vpow2.f32 %v26544_v30  ;;  %v37849_v34 = vsub.f32 %v26603_v55, %v37846_v18 }
 0x8c7   :  { %34795 = vpow2.f32 %v26556_v23 }
 0x8c8   :  { %34797 = vpow2.f32 %v26522_v40  ;;  %v37852_v39 = vand.u32 4294901760, %v37849_v34 }
 0x8c9   :  { %34799 = vpow2.f32 %v26534_v1 }
 0x8ca   :  { %34801 = vpow2.f32 %v26546_v13  ;;  %v26675_v45 = vsub.f32 %v37849_v34, %v37852_v39 }
 0x8cb   :  { %34803 = vpow2.f32 %v26558_v28 }
 0x8cc   :  { %v37881_v47 = vand.u32 4294901760, %v26675_v45 }
 0x8ce   :  { %v34790_v43 = vpop.eup %34789 }
 0x8cf   :  { %v34792_v5 = vpop.eup %34791 }
 0x8d0   :  { %v34794_v57 = vpop.eup %34793  ;;  %v26564_v2 = vadd.f32 %v34792_v5, %v34790_v43 }
 0x8d1   :  { %v34796_v38 = vpop.eup %34795 }
 0x8d2   :  { %v34798_v35 = vpop.eup %34797  ;;  %v26568_v48 = vadd.f32 %v34794_v57, %v26564_v2 }
 0x8d3   :  { %v34800_v25 = vpop.eup %34799 }
 0x8d4   :  { %v26572_v54 = vadd.f32 %v34796_v38, %v26568_v48  ;;  %v26565_v44 = vadd.f32 %v34800_v25, %v34798_v35  ;;  %v34802_v41 = vpop.eup %34801 }
 0x8d5   :  { %v34804_v46 = vpop.eup %34803 }
 0x8d6   :  { %34805 = vrcp.f32 %v26572_v54  ;;  %v26569_v60 = vadd.f32 %v34802_v41, %v26565_v44 }
 0x8d8   :  { %v26573_v50 = vadd.f32 %v34804_v46, %v26569_v60 }
 0x8da   :  { %34807 = vrcp.f32 %v26573_v50 }
 0x8e0   :  { %v34806_v31 = vpop.eup %34805 }
 0x8e1   :  { %v26592_v53 = vmul.f32 %v34806_v31, %v34792_v5  ;;  %v26584_v62 = vmul.f32 %v34806_v31, %v34790_v43  ;;  %v28467_v56 = vmul.f32 %v34806_v31, %v34794_v57  ;;  %v29413_v59 = vmul.f32 %v34806_v31, %v34796_v38 }
 0x8e3   :  { %v26596_v63 = vmul.f32 %v26592_v53, %v37572_v51  ;;  %v37856_v15 = vmul.f32 %v26584_v62, %v37568_v12  ;;  %v37859_v58 = vmul.f32 %v28467_v56, %v37584_v36  ;;  %v37862_v20 = vmul.f32 %v29413_v59, %v37610_v21 }
 0x8e4   :  { %v34808_v7 = vpop.eup %34807 }
 0x8e5   :  { %v26593_v17 = vmul.f32 %v34808_v7, %v34800_v25  ;;  %v37866_v61 = vand.u32 4294901760, %v26596_v63  ;;  %v26585_v24 = vmul.f32 %v34808_v7, %v34798_v35  ;;  %v28468_v29 = vmul.f32 %v34808_v7, %v34802_v41 }
 0x8e6   :  { %v29414_v42 = vmul.f32 %v34808_v7, %v34804_v46 }
 0x8e7   :  { %v26597_v51 = vmul.f32 %v26593_v17, %v37576_v19  ;;  %v37870_v12 = vsub.f32 %v26596_v63, %v37866_v61  ;;  %v37873_v36 = vmul.f32 %v26585_v24, %v37570_v14  ;;  %v37876_v21 = vmul.f32 %v28468_v29, %v37587_v11 }
 0x8e8   :  { %v37879_v32 = vmul.f32 %v29414_v42, %v37615_v9  ;;  %v27535_v17 = vsel %vm156_vm0, %v37740_v8, 0 }
 0x8e9   :  { %v26605_v10 = vand.u32 4294901760, %v26597_v51  ;;  %v26691_v3 = vand.u32 4294901760, %v37870_v12  ;;  %v37896_v45 = vand.u32 4294901760, %v37873_v36  ;;  %v37901_v42 = vand.u32 4294901760, %v27535_v17 }
 0x8eb   :  { %26606 = vmatprep.subr.mxu0 %v26605_v10  ;;  %v26684_v26 = vsub.f32 %v26597_v51, %v26605_v10  ;;  %v26692_v14 = vsub.f32 %v37870_v12, %v26691_v3  ;;  %v37905_v51 = vsub.f32 %v37873_v36, %v37896_v45 }
 0x8ec   :  { %26608 = vmatpush1.msra.mxu0 %v37866_v61 }
 0x8ed   :  { %26677 = vmatmul.mubr.f32.vlgmr.msra.gmra.mrb[58].mxu0 %v37881_v47  ;;  %v26685_v19 = vand.u32 4294901760, %v26684_v26  ;;  %v26693_v40 = vand.u32 4294901760, %v26692_v14 }
 0x8ee   :  { %26757 = vmatprep.mubr.f32.mxu0 %v38327_v6 }
 0x8ef   :  { %v26686_v11 = vsub.f32 %v26684_v26, %v26685_v19 }
 0x8f0   :  { %v26478_v30 = vpop.f32.mrb[60].mxu1 }
 0x8f1   :  { %v26687_v9 = vand.u32 4294901760, %v26686_v11  ;;  %v26480_v23 = vpop.f32.mrb[61].mxu1 }
 0x8f3   :  { %26688 = vmatprep.subr.mxu0 %v26687_v9 }
 0x8f4   :  { %26694 = vmatpush1.msra.mxu0 %v26693_v40  ;;  %v26485_v1 = vpop.f32.mrb[62].mxu1 }
 0x8f5   :  { %26759 = vmatmul.mubr.f32.vlgmr.msra.gmra.mrb[58].mxu0 %v37846_v18  ;;  %26767 = vmatprep.subr.mxu0 %v26684_v26  ;;  %v26506_v13 = vmax.f32 %v26478_v30, %v26485_v1  ;;  %v26487_v28 = vpop.f32.mrb[63].mxu1 }
 0x8f6   :  { %26770 = vmatpush1.msra.mxu0 %v37870_v12  ;;  %v26507_v43 = vmax.f32 %v26480_v23, %v26487_v28  ;;  %26833 = vmatprep.mubr.f32.mxu0 %v38327_v6  ;;  %v37908_v12 = vand.u32 4294901760, %v37856_v15 }
 0x8f7   :  { %26843 = vmatprep.subr.mxu0 %v26605_v10 }
 0x8f8   :  { %v26492_v5 = vpop.f32.mrb[64].mxu1  ;;  %v37920_v11 = vsub.f32 %v37856_v15, %v37908_v12 }
 0x8f9   :  { %v26510_v57 = vmax.f32 %v26506_v13, %v26492_v5  ;;  %v26494_v2 = vpop.f32.mrb[65].mxu1 }
 0x8fa   :  { %v26511_v38 = vmax.f32 %v26507_v43, %v26494_v2  ;;  %v27623_v43 = vand.u32 4294901760, %v37920_v11 }
 0x8fc   :  { %v26499_v35 = vpop.f32.mrb[66].mxu1 }
 0x8fd   :  { %26836 = vmatmul.mubr.f32.vlgmr.msra.gmra.mrb[58].mxu0 %v37849_v34  ;;  %v26514_v48 = vmax.f32 %v26510_v57, %v26499_v35  ;;  %v26501_v16 = vpop.f32.mrb[67].mxu1 }
 0x8fe   :  { %26845 = vmatpush1.msra.mxu0 %v37866_v61  ;;  %v26515_v25 = vmax.f32 %v26511_v38, %v26501_v16  ;;  %26908 = vmatprep.mubr.f32.mxu0 %v38327_v6 }
 0x8ff   :  { %26921 = vmatprep.subr.mxu0 %v26685_v19  ;;  %v26518_v54 = vsub.f32 %v26478_v30, %v26514_v48  ;;  %v26530_v44 = vsub.f32 %v26485_v1, %v26514_v48  ;;  %v26542_v41 = vsub.f32 %v26492_v5, %v26514_v48  ;;  %v26554_v55 = vsub.f32 %v26499_v35, %v26514_v48 }
 0x900   :  { %v26519_v60 = vsub.f32 %v26480_v23, %v26515_v25  ;;  %v26531_v46 = vsub.f32 %v26487_v28, %v26515_v25  ;;  %v26543_v50 = vsub.f32 %v26494_v2, %v26515_v25  ;;  %v26555_v31 = vsub.f32 %v26501_v16, %v26515_v25 }
 0x901   :  { %v26524_v53 = vmul.f32 1.442695, %v26518_v54  ;;  %v26536_v62 = vmul.f32 1.442695, %v26530_v44  ;;  %v26548_v56 = vmul.f32 1.442695, %v26542_v41  ;;  %v27624_v35 = vsub.f32 %v37920_v11, %v27623_v43 }
 0x902   :  { %v26560_v59 = vmul.f32 1.442695, %v26554_v55  ;;  %v26526_v63 = vmul.f32 1.442695, %v26519_v60  ;;  %v26538_v7 = vmul.f32 1.442695, %v26531_v46 }
 0x903   :  { %34809 = vpow2.f32 %v26524_v53  ;;  %v26550_v24 = vmul.f32 1.442695, %v26543_v50  ;;  %v26562_v29 = vmul.f32 1.442695, %v26555_v31  ;;  %v27625_v16 = vand.u32 4294901760, %v27624_v35 }
 0x904   :  { %34811 = vpow2.f32 %v26536_v62 }
 0x905   :  { %34813 = vpow2.f32 %v26548_v56  ;;  %26912 = vmatmul.mubr.f32.vlgmr.msra.gmra.mrb[58].mxu0 %v37852_v39 }
 0x906   :  { %34815 = vpow2.f32 %v26560_v59  ;;  %26925 = vmatpush1.msra.mxu0 %v26691_v3  ;;  %26988 = vmatprep.mubr.f32.mxu0 %v38327_v6  ;;  %v37911_v3 = vsub.f32 %v27535_v17, %v37901_v42 }
 0x907   :  { %34817 = vpow2.f32 %v26526_v63  ;;  %26997 = vmatprep.subr.mxu0 %v26605_v10  ;;  %v27617_v10 = vand.u32 4294901760, %v37905_v51 }
 0x908   :  { %34819 = vpow2.f32 %v26538_v7  ;;  %v37926_v40 = vand.u32 4294901760, %v37911_v3 }
 0x909   :  { %34821 = vpow2.f32 %v26550_v24  ;;  %v27618_v23 = vsub.f32 %v37905_v51, %v27617_v10 }
 0x90a   :  { %34823 = vpow2.f32 %v26562_v29  ;;  %v27607_v57 = vsub.f32 %v37911_v3, %v37926_v40 }
 0x90b   :  { %v27619_v15 = vand.u32 4294901760, %v27618_v23 }
 0x90c   :  { %v37937_v48 = vand.u32 4294901760, %v27607_v57 }
 0x90d   :  { %v34810_v8 = vpop.eup %34809  ;;  %26990 = vmatmul.mubr.f32.vlgmr.msra.gmra.mrb[58].mxu0 %v37846_v18 }
 0x90e   :  { %v34812_v26 = vpop.eup %34811  ;;  %26999 = vmatpush1.msra.mxu0 %v37866_v61  ;;  %27062 = vmatprep.mubr.f32.mxu0 %v38327_v6 }
 0x90f   :  { %v34814_v36 = vpop.eup %34813  ;;  %v26566_v19 = vadd.f32 %v34812_v26, %v34810_v8  ;;  %27538 = vmatprep.subr.mxu0 %v37896_v45 }
 0x910   :  { %v34816_v14 = vpop.eup %34815 }
 0x911   :  { %v34818_v30 = vpop.eup %34817  ;;  %v26570_v9 = vadd.f32 %v34814_v36, %v26566_v19 }
 0x912   :  { %v34820_v61 = vpop.eup %34819 }
 0x913   :  { %v26574_v1 = vadd.f32 %v34816_v14, %v26570_v9  ;;  %v26567_v13 = vadd.f32 %v34820_v61, %v34818_v30  ;;  %v34822_v28 = vpop.eup %34821 }
 0x914   :  { %v34824_v2 = vpop.eup %34823 }
 0x915   :  { %34825 = vrcp.f32 %v26574_v1  ;;  %v26571_v5 = vadd.f32 %v34822_v28, %v26567_v13  ;;  %27064 = vmatmul.mubr.f32.vlgmr.msra.gmra.mrb[58].mxu0 %v37846_v18 }
 0x916   :  { %27540 = vmatpush1.msra.mxu0 %v37908_v12  ;;  %27603 = vmatprep.mubr.f32.mxu0 %v38327_v6 }
 0x917   :  { %v26575_v38 = vadd.f32 %v34824_v2, %v26571_v5  ;;  %27620 = vmatprep.subr.mxu0 %v27619_v15 }
 0x919   :  { %34827 = vrcp.f32 %v26575_v38 }
 0x91d   :  { %27609 = vmatmul.mubr.f32.vlgmr.msra.gmra.mrb[58].mxu0 %v37937_v48 }
 0x91e   :  { %27626 = vmatpush1.msra.mxu0 %v27625_v16  ;;  %27689 = vmatprep.mubr.f32.mxu0 %v38327_v6  ;;  %v38049_v16 = vand.u32 4294901760, %v37879_v32 }
 0x91f   :  { %v34826_v25 = vpop.eup %34825  ;;  %27699 = vmatprep.subr.mxu0 %v37905_v51 }
 0x920   :  { %v26594_v54 = vmul.f32 %v34826_v25, %v34812_v26  ;;  %v26586_v44 = vmul.f32 %v34826_v25, %v34810_v8  ;;  %v28469_v41 = vmul.f32 %v34826_v25, %v34814_v36  ;;  %v29415_v55 = vmul.f32 %v34826_v25, %v34816_v14  ;;  %v28476_v36 = vpop.permute.xlu0 %28475 }
 0x921   :  { %v28477_v51 = vsel %vm156_vm0, %v28476_v36, 0  ;;  %v37994_v14 = vand.u32 4294901760, %v37859_v58 }
 0x922   :  { %v26598_v60 = vmul.f32 %v26594_v54, %v37590_v4  ;;  %v37944_v46 = vmul.f32 %v26586_v44, %v37580_v0  ;;  %v37947_v50 = vmul.f32 %v28469_v41, %v37621_v27  ;;  %v37950_v31 = vmul.f32 %v29415_v55, %v37635_v52 }
 0x923   :  { %v34828_v53 = vpop.eup %34827  ;;  %v29504_v54 = vsub.f32 %v37879_v32, %v38049_v16  ;;  %v38062_v44 = vand.u32 4294901760, %v37862_v20 }
 0x924   :  { %v26595_v62 = vmul.f32 %v34828_v53, %v34820_v61  ;;  %v37952_v56 = vand.u32 4294901760, %v26598_v60  ;;  %v26587_v59 = vmul.f32 %v34828_v53, %v34818_v30  ;;  %v28470_v63 = vmul.f32 %v34828_v53, %v34822_v28 }
 0x925   :  { %27691 = vmatmul.mubr.f32.vlgmr.msra.gmra.mrb[58].mxu0 %v37901_v42  ;;  %v29416_v7 = vmul.f32 %v34828_v53, %v34824_v2  ;;  %v38025_v13 = vand.u32 4294901760, %v37944_v46  ;;  %v29505_v55 = vand.u32 4294901760, %v29504_v54  ;;  %v29510_v32 = vsub.f32 %v37862_v20, %v38062_v44 }
 0x926   :  { %27702 = vmatpush1.msra.mxu0 %v37920_v11  ;;  %v26599_v0 = vmul.f32 %v26595_v62, %v37594_v33  ;;  %v27155_v4 = vsub.f32 %v26598_v60, %v37952_v56  ;;  %27765 = vmatprep.mubr.f32.mxu0 %v38327_v6  ;;  %v37960_v27 = vmul.f32 %v26587_v59, %v37582_v37 }
 0x927   :  { %27775 = vmatprep.subr.mxu0 %v37896_v45  ;;  %v37964_v52 = vmul.f32 %v28470_v63, %v37624_v22  ;;  %v37967_v17 = vmul.f32 %v29416_v7, %v37638_v49  ;;  %v28087_v5 = vsub.f32 %v37944_v46, %v38025_v13  ;;  %v29506_v60 = vsub.f32 %v29504_v54, %v29505_v55 }
 0x928   :  { %v27070_v24 = vand.u32 4294901760, %v26599_v0  ;;  %v27156_v29 = vand.u32 4294901760, %v27155_v4  ;;  %v38012_v9 = vand.u32 4294901760, %v37960_v27  ;;  %v29511_v53 = vand.u32 4294901760, %v29510_v32 }
 0x929   :  { %v28088_v57 = vand.u32 4294901760, %v28087_v5  ;;  %v38080_v46 = vand.u32 4294901760, %v37964_v52  ;;  %v29507_v62 = vand.u32 4294901760, %v29506_v60  ;;  %v28946_v63 = vand.u32 4294901760, %v37947_v50 }
 0x92a   :  { %27071 = vmatprep.subr.mxu1 %v27070_v24  ;;  %v27149_v8 = vsub.f32 %v26599_v0, %v27070_v24  ;;  %v27157_v37 = vsub.f32 %v27155_v4, %v27156_v29  ;;  %v29512_v20 = vsub.f32 %v29510_v32, %v29511_v53 }
 0x92b   :  { %27073 = vmatpush1.msra.mxu1 %v37952_v56  ;;  %v28089_v38 = vsub.f32 %v28087_v5, %v28088_v57 }
 0x92c   :  { %27142 = vmatmul.mubr.f32.vlgmr.msra.gmra.mrb[68].mxu1 %v37881_v47  ;;  %v27150_v33 = vand.u32 4294901760, %v27149_v8  ;;  %v27158_v26 = vand.u32 4294901760, %v27157_v37  ;;  %v37980_v47 = vand.u32 4294901760, %v37876_v21  ;;  %v29513_v7 = vand.u32 4294901760, %v29512_v20 }
 0x92d   :  { %27768 = vmatmul.mubr.f32.vlgmr.msra.gmra.mrb[58].mxu0 %v37911_v3  ;;  %27222 = vmatprep.mubr.f32.mxu1 %v38327_v6  ;;  %v28090_v35 = vand.u32 4294901760, %v28089_v38 }
 0x92e   :  { %27777 = vmatpush1.msra.mxu0 %v37908_v12  ;;  %v27151_v22 = vsub.f32 %v27149_v8, %v27150_v33  ;;  %27840 = vmatprep.mubr.f32.mxu0 %v38327_v6  ;;  %v28558_v19 = vsub.f32 %v37876_v21, %v37980_v47 }
 0x92f   :  { %27853 = vmatprep.subr.mxu0 %v27617_v10  ;;  %v37988_v10 = vand.u32 4294901760, %v28477_v51 }
 0x930   :  { %v27152_v49 = vand.u32 4294901760, %v27151_v22  ;;  %v28559_v11 = vand.u32 4294901760, %v28558_v19 }
 0x932   :  { %27153 = vmatprep.subr.mxu1 %v27152_v49  ;;  %v28560_v30 = vsub.f32 %v28558_v19, %v28559_v11 }
 0x933   :  { %27159 = vmatpush1.msra.mxu1 %v27158_v26 }
 0x934   :  { %27224 = vmatmul.mubr.f32.vlgmr.msra.gmra.mrb[68].mxu1 %v37846_v18  ;;  %27232 = vmatprep.subr.mxu1 %v27149_v8 }
 0x935   :  { %27235 = vmatpush1.msra.mxu1 %v27155_v4  ;;  %27844 = vmatmul.mubr.f32.vlgmr.msra.gmra.mrb[58].mxu0 %v37926_v40  ;;  %v29029_v4 = vsub.f32 %v37947_v50, %v28946_v63 }
 0x936   :  { %27308 = vmatprep.subr.mxu1 %v27070_v24  ;;  %27857 = vmatpush1.msra.mxu0 %v27623_v43 }
 0x937   :  { %27929 = vmatprep.subr.mxu0 %v37896_v45  ;;  %27298 = vmatprep.mubr.f32.mxu1 %v38327_v6  ;;  %v37999_v45 = vsub.f32 %v28477_v51, %v37988_v10 }
 0x938   :  { %27920 = vmatprep.mubr.f32.mxu0 %v38327_v6 }
 0x939   :  { %v38008_v21 = vand.u32 4294901760, %v37999_v45 }
 0x93b   :  { %v28549_v61 = vsub.f32 %v37999_v45, %v38008_v21 }
 0x93c   :  { %27301 = vmatmul.mubr.f32.vlgmr.msra.gmra.mrb[68].mxu1 %v37849_v34  ;;  %v28564_v34 = vsub.f32 %v37859_v58, %v37994_v14  ;;  %v28081_v58 = vsub.f32 %v37960_v27, %v38012_v9 }
 0x93d   :  { %27310 = vmatpush1.msra.mxu1 %v37952_v56  ;;  %27922 = vmatmul.mubr.f32.vlgmr.msra.gmra.mrb[58].mxu0 %v37901_v42  ;;  %v38022_v1 = vand.u32 4294901760, %v28549_v61 }
 0x93e   :  { %27386 = vmatprep.subr.mxu1 %v27150_v33  ;;  %27931 = vmatpush1.msra.mxu0 %v37908_v12  ;;  %v28565_v23 = vand.u32 4294901760, %v28564_v34  ;;  %v28561_v12 = vand.u32 4294901760, %v28560_v30  ;;  %v28082_v43 = vand.u32 4294901760, %v28081_v58  ;;  %v29892_v33 = vand.u32 4294901760, %v37950_v31 }
 0x93f   :  { %28480 = vmatprep.subr.mxu0 %v37980_v47  ;;  %27373 = vmatprep.mubr.f32.mxu1 %v38327_v6 }
 0x940   :  { %27994 = vmatprep.mubr.f32.mxu0 %v38327_v6  ;;  %v28083_v15 = vsub.f32 %v28081_v58, %v28082_v43  ;;  %v29975_v22 = vsub.f32 %v37950_v31, %v29892_v33 }
 0x942   :  { %v28084_v2 = vand.u32 4294901760, %v28083_v15  ;;  %v29976_v26 = vand.u32 4294901760, %v29975_v22 }
 0x944   :  { %27377 = vmatmul.mubr.f32.vlgmr.msra.gmra.mrb[68].mxu1 %v37852_v39  ;;  %v28566_v39 = vsub.f32 %v28564_v34, %v28565_v23 }
 0x945   :  { %27390 = vmatpush1.msra.mxu1 %v27156_v29  ;;  %27996 = vmatmul.mubr.f32.vlgmr.msra.gmra.mrb[58].mxu0 %v37901_v42 }
 0x946   :  { %27462 = vmatprep.subr.mxu1 %v27070_v24  ;;  %28482 = vmatpush1.msra.mxu0 %v37994_v14  ;;  %v28567_v28 = vand.u32 4294901760, %v28566_v39 }
 0x947   :  { %28562 = vmatprep.subr.mxu0 %v28561_v12  ;;  %27453 = vmatprep.mubr.f32.mxu1 %v38327_v6 }
 0x948   :  { %28545 = vmatprep.mubr.f32.mxu0 %v38327_v6 }
 0x94c   :  { %27455 = vmatmul.mubr.f32.vlgmr.msra.gmra.mrb[68].mxu1 %v37846_v18 }
 0x94d   :  { %27464 = vmatpush1.msra.mxu1 %v37952_v56  ;;  %28551 = vmatmul.mubr.f32.vlgmr.msra.gmra.mrb[58].mxu0 %v38022_v1 }
 0x94e   :  { %28003 = vmatprep.subr.mxu1 %v38012_v9  ;;  %28568 = vmatpush1.msra.mxu0 %v28567_v28 }
 0x94f   :  { %28641 = vmatprep.subr.mxu0 %v28558_v19  ;;  %27527 = vmatprep.mubr.f32.mxu1 %v38327_v6  ;;  %v30367_v19 = vld [vmem:[%s38312_s7] sm:$0xf] }
 0x950   :  { %28631 = vmatprep.mubr.f32.mxu0 %v38327_v6 }
 0x954   :  { %27529 = vmatmul.mubr.f32.vlgmr.msra.gmra.mrb[68].mxu1 %v37846_v18  ;;  %v29422_v18 = vpop.permute.xlu1 %29421 }
 0x955   :  { %28005 = vmatpush1.msra.mxu1 %v38025_v13  ;;  %28633 = vmatmul.mubr.f32.vlgmr.msra.gmra.mrb[58].mxu0 %v37988_v10 }
 0x956   :  { %28085 = vmatprep.subr.mxu1 %v28084_v2  ;;  %28644 = vmatpush1.msra.mxu0 %v28564_v34 }
 0x957   :  { %28717 = vmatprep.subr.mxu0 %v37980_v47  ;;  %28068 = vmatprep.mubr.f32.mxu1 %v38327_v6 }
 0x958   :  { %28707 = vmatprep.mubr.f32.mxu0 %v38327_v6 }
 0x95c   :  { %28074 = vmatmul.mubr.f32.vlgmr.msra.gmra.mrb[68].mxu1 %v37937_v48  ;;  %v29423_v48 = vsel %vm156_vm0, %v29422_v18, 0  ;;  %v38192_v18 = vld [vmem:[%s38314_s9] sm:$0xff] }
 0x95d   :  { %28091 = vmatpush1.msra.mxu1 %v28090_v35  ;;  %28710 = vmatmul.mubr.f32.vlgmr.msra.gmra.mrb[58].mxu0 %v37999_v45  ;;  %v38056_v25 = vand.u32 4294901760, %v29423_v48 }
 0x95e   :  { %28164 = vmatprep.subr.mxu1 %v28081_v58  ;;  %28719 = vmatpush1.msra.mxu0 %v37994_v14 }
 0x95f   :  { %28795 = vmatprep.subr.mxu0 %v28559_v11  ;;  %28154 = vmatprep.mubr.f32.mxu1 %v38327_v6  ;;  %v38067_v41 = vsub.f32 %v29423_v48, %v38056_v25  ;;  %v30370_v48 = vld [vmem:[%s38313_s8 + $0x10] sm:$0xff] }
 0x960   :  { %28782 = vmatprep.mubr.f32.mxu0 %v38327_v6  ;;  %31443 = vrot.lane.b32.xlu0 %v38192_v18, %s34905_s26 }
 0x961   :  { %32343 = vrot.lane.b32.xlu1 %v38192_v18, %s34906_s12 }
 0x964   :  { %28156 = vmatmul.mubr.f32.vlgmr.msra.gmra.mrb[68].mxu1 %v37901_v42  ;;  %32796 = vrot.lane.b32.xlu0 %v38192_v18, %s34907_s18 }
 0x965   :  { %28167 = vmatpush1.msra.mxu1 %v28087_v5  ;;  %28786 = vmatmul.mubr.f32.vlgmr.msra.gmra.mrb[58].mxu0 %v38008_v21 }
 0x966   :  { %28240 = vmatprep.subr.mxu1 %v38012_v9  ;;  %28799 = vmatpush1.msra.mxu0 %v28565_v23 }
 0x967   :  { %28871 = vmatprep.subr.mxu0 %v37980_v47  ;;  %28230 = vmatprep.mubr.f32.mxu1 %v38327_v6 }
 0x968   :  { %28862 = vmatprep.mubr.f32.mxu0 %v38327_v6 }
 0x96c   :  { %28233 = vmatmul.mubr.f32.vlgmr.msra.gmra.mrb[68].mxu1 %v37911_v3  ;;  %v38076_v3 = vand.u32 4294901760, %v38067_v41 }
 0x96d   :  { %28242 = vmatpush1.msra.mxu1 %v38025_v13  ;;  %28864 = vmatmul.mubr.f32.vlgmr.msra.gmra.mrb[58].mxu0 %v37988_v10 }
 0x96e   :  { %28318 = vmatprep.subr.mxu1 %v28082_v43  ;;  %28873 = vmatpush1.msra.mxu0 %v37994_v14  ;;  %v29495_v56 = vsub.f32 %v38067_v41, %v38076_v3  ;;  %v30377_v14 = vsel %vm156_vm0, %v30367_v19, 0  ;;  %v30368_v43 = vld [vmem:[%s38313_s8] sm:$0xff] }
 0x96f   :  { %29426 = vmatprep.subr.mxu0 %v38049_v16  ;;  %28305 = vmatprep.mubr.f32.mxu1 %v38327_v6  ;;  %v30829_v5 = vsel %vm3928_vm1, %v30368_v43, 0 }
 0x970   :  { %28936 = vmatprep.mubr.f32.mxu0 %v38327_v6  ;;  %v38091_v59 = vand.u32 4294901760, %v29495_v56  ;;  %v38186_v15 = vand.u32 4294901760, %v30829_v5 }
 0x974   :  { %28309 = vmatmul.mubr.f32.vlgmr.msra.gmra.mrb[68].mxu1 %v37926_v40  ;;  %v29023_v40 = vsub.f32 %v37964_v52, %v38080_v46  ;;  %v29030_v52 = vand.u32 4294901760, %v29029_v4 }
 0x975   :  { %28322 = vmatpush1.msra.mxu1 %v28088_v57  ;;  %28938 = vmatmul.mubr.f32.vlgmr.msra.gmra.mrb[58].mxu0 %v37988_v10  ;;  %v30910_v57 = vsub.f32 %v30829_v5, %v38186_v15 }
 0x976   :  { %28394 = vmatprep.subr.mxu1 %v38012_v9  ;;  %29428 = vmatpush1.msra.mxu0 %v38062_v44  ;;  %v29024_v0 = vand.u32 4294901760, %v29023_v40  ;;  %v29031_v29 = vsub.f32 %v29029_v4, %v29030_v52 }
 0x977   :  { %29508 = vmatprep.subr.mxu0 %v29507_v62  ;;  %28385 = vmatprep.mubr.f32.mxu1 %v38327_v6  ;;  %v30911_v2 = vand.u32 4294901760, %v30910_v57 }
 0x978   :  { %29491 = vmatprep.mubr.f32.mxu0 %v38327_v6  ;;  %v29025_v27 = vsub.f32 %v29023_v40, %v29024_v0  ;;  %v29032_v50 = vand.u32 4294901760, %v29031_v29 }
 0x979   :  { %v30912_v38 = vsub.f32 %v30910_v57, %v30911_v2 }
 0x97a   :  { %v29026_v24 = vand.u32 4294901760, %v29025_v27 }
 0x97b   :  { %v30913_v35 = vand.u32 4294901760, %v30912_v38 }
 0x97c   :  { %28387 = vmatmul.mubr.f32.vlgmr.msra.gmra.mrb[68].mxu1 %v37901_v42 }
 0x97d   :  { %28396 = vmatpush1.msra.mxu1 %v38025_v13  ;;  %29497 = vmatmul.mubr.f32.vlgmr.msra.gmra.mrb[58].mxu0 %v38091_v59 }
 0x97e   :  { %28945 = vmatprep.subr.mxu1 %v38080_v46  ;;  %29514 = vmatpush1.msra.mxu0 %v29513_v7 }
 0x97f   :  { %29587 = vmatprep.subr.mxu0 %v29504_v54  ;;  %28459 = vmatprep.mubr.f32.mxu1 %v38327_v6  ;;  %v30835_v54 = vsel %vm3928_vm1, %v30370_v48, 0 }
 0x980   :  { %29577 = vmatprep.mubr.f32.mxu0 %v38327_v6 }
 0x984   :  { %28461 = vmatmul.mubr.f32.vlgmr.msra.gmra.mrb[68].mxu1 %v37901_v42  ;;  %v29890_v42 = vand.u32 4294901760, %v37967_v17 }
 0x985   :  { %28947 = vmatpush1.msra.mxu1 %v28946_v63  ;;  %29579 = vmatmul.mubr.f32.vlgmr.msra.gmra.mrb[58].mxu0 %v38056_v25 }
 0x986   :  { %29027 = vmatprep.subr.mxu1 %v29026_v24  ;;  %29590 = vmatpush1.msra.mxu0 %v29510_v32  ;;  %v29969_v8 = vsub.f32 %v37967_v17, %v29890_v42  ;;  %v29977_v17 = vsub.f32 %v29975_v22, %v29976_v26 }
 0x987   :  { %29663 = vmatprep.subr.mxu0 %v38049_v16  ;;  %29010 = vmatprep.mubr.f32.mxu1 %v38327_v6 }
 0x988   :  { %29653 = vmatprep.mubr.f32.mxu0 %v38327_v6  ;;  %v29970_v37 = vand.u32 4294901760, %v29969_v8  ;;  %v29978_v47 = vand.u32 4294901760, %v29977_v17 }
 0x98a   :  { %v29971_v49 = vsub.f32 %v29969_v8, %v29970_v37 }
 0x98c   :  { %29016 = vmatmul.mubr.f32.vlgmr.msra.gmra.mrb[68].mxu1 %v38022_v1  ;;  %v29972_v36 = vand.u32 4294901760, %v29971_v49 }
 0x98d   :  { %29033 = vmatpush1.msra.mxu1 %v29032_v50  ;;  %29656 = vmatmul.mubr.f32.vlgmr.msra.gmra.mrb[58].mxu0 %v38067_v41 }
 0x98e   :  { %29106 = vmatprep.subr.mxu1 %v29023_v40  ;;  %29665 = vmatpush1.msra.mxu0 %v38062_v44 }
 0x98f   :  { %29741 = vmatprep.subr.mxu0 %v29505_v55  ;;  %29096 = vmatprep.mubr.f32.mxu1 %v38327_v6  ;;  %v30929_v55 = vand.u32 4294901760, %v30835_v54 }
 0x990   :  { %29728 = vmatprep.mubr.f32.mxu0 %v38327_v6 }
 0x994   :  { %29098 = vmatmul.mubr.f32.vlgmr.msra.gmra.mrb[68].mxu1 %v37988_v10 }
 0x995   :  { %29109 = vmatpush1.msra.mxu1 %v29029_v4  ;;  %29732 = vmatmul.mubr.f32.vlgmr.msra.gmra.mrb[58].mxu0 %v38076_v3 }
 0x996   :  { %29182 = vmatprep.subr.mxu1 %v38080_v46  ;;  %29745 = vmatpush1.msra.mxu0 %v29511_v53 }
 0x997   :  { %29817 = vmatprep.subr.mxu0 %v38049_v16  ;;  %29172 = vmatprep.mubr.f32.mxu1 %v38327_v6  ;;  %v30369_v16 = vld [vmem:[%s38313_s8 + $0x8] sm:$0xff] }
 0x998   :  { %29808 = vmatprep.mubr.f32.mxu0 %v38327_v6 }
 0x99c   :  { %29175 = vmatmul.mubr.f32.vlgmr.msra.gmra.mrb[68].mxu1 %v37999_v45  ;;  %v30445_v45 = vand.u32 4294901760, %v30377_v14 }
 0x99d   :  { %29184 = vmatpush1.msra.mxu1 %v28946_v63  ;;  %29810 = vmatmul.mubr.f32.vlgmr.msra.gmra.mrb[58].mxu0 %v38056_v25 }
 0x99e   :  { %29260 = vmatprep.subr.mxu1 %v29024_v0  ;;  %29819 = vmatpush1.msra.mxu0 %v38062_v44  ;;  %v30446_v11 = vsub.f32 %v30377_v14, %v30445_v45  ;;  %v30371_v44 = vld [vmem:[%s38313_s8 + $0x18] sm:$0xff] }
 0x99f   :  { %29247 = vmatprep.mubr.f32.mxu1 %v38327_v6  ;;  %29882 = vmatprep.mubr.f32.mxu0 %v38327_v6  ;;  %v30838_v32 = vsel %vm3928_vm1, %v30371_v44, 0 }
 0x9a0   :  { %33390 = vmatprep.subr.mxu0 %v38327_v6  ;;  %v30447_v34 = vand.u32 4294901760, %v30446_v11  ;;  %v30939_v60 = vand.u32 4294901760, %v30838_v32 }
 0x9a2   :  { %v30448_v30 = vsub.f32 %v30446_v11, %v30447_v34  ;;  %v30940_v62 = vsub.f32 %v30838_v32, %v30939_v60 }
 0x9a4   :  { %29251 = vmatmul.mubr.f32.vlgmr.msra.gmra.mrb[68].mxu1 %v38008_v21  ;;  %v30449_v61 = vand.u32 4294901760, %v30448_v30  ;;  %v30941_v7 = vand.u32 4294901760, %v30940_v62 }
 0x9a5   :  { %29264 = vmatpush1.msra.mxu1 %v29030_v52  ;;  %29884 = vmatmul.mubr.f32.vlgmr.msra.gmra.mrb[58].mxu0 %v38056_v25 }
 0x9a6   :  { %29336 = vmatprep.subr.mxu1 %v38080_v46  ;;  %29327 = vmatprep.mubr.f32.mxu1 %v38327_v6  ;;  %v30930_v46 = vsub.f32 %v30835_v54, %v30929_v55  ;;  %v30942_v29 = vsub.f32 %v30940_v62, %v30941_v7 }
 0x9a7   :  { %33392 = vmatprep.mubr.msk.f32.mxu0 %vm34908_vm10, %v38327_v6 }
 0x9a8   :  { %v30931_v56 = vand.u32 4294901760, %v30930_v46 }
 0x9aa   :  { %v30932_v0 = vsub.f32 %v30930_v46, %v30931_v56 }
 0x9ac   :  { %29329 = vmatmul.mubr.f32.vlgmr.msra.gmra.mrb[68].mxu1 %v37988_v10  ;;  %v30933_v50 = vand.u32 4294901760, %v30932_v0 }
 0x9ad   :  { %29338 = vmatpush1.msra.mxu1 %v28946_v63  ;;  %29401 = vmatprep.mubr.f32.mxu1 %v38327_v6 }
 0x9ae   :  { %29891 = vmatprep.subr.mxu1 %v29890_v42 }
 0x9b4   :  { %29403 = vmatmul.mubr.f32.vlgmr.msra.gmra.mrb[68].mxu1 %v37988_v10 }
 0x9b5   :  { %29893 = vmatpush1.msra.mxu1 %v29892_v33  ;;  %29956 = vmatprep.mubr.f32.mxu1 %v38327_v6 }
 0x9b6   :  { %29973 = vmatprep.subr.mxu1 %v29972_v36 }
 0x9bc   :  { %29962 = vmatmul.mubr.f32.vlgmr.msra.gmra.mrb[68].mxu1 %v38091_v59 }
 0x9bd   :  { %29979 = vmatpush1.msra.mxu1 %v29978_v47  ;;  %30042 = vmatprep.mubr.f32.mxu1 %v38327_v6 }
 0x9be   :  { %30052 = vmatprep.subr.mxu1 %v29969_v8  ;;  %v30943_v8 = vand.u32 4294901760, %v30942_v29 }
 0x9c4   :  { %30044 = vmatmul.mubr.f32.vlgmr.msra.gmra.mrb[68].mxu1 %v38056_v25 }
 0x9c5   :  { %30055 = vmatpush1.msra.mxu1 %v29975_v22  ;;  %30118 = vmatprep.mubr.f32.mxu1 %v38327_v6 }
 0x9c6   :  { %30128 = vmatprep.subr.mxu1 %v29890_v42 }
 0x9cc   :  { %30121 = vmatmul.mubr.f32.vlgmr.msra.gmra.mrb[68].mxu1 %v38067_v41 }
 0x9cd   :  { %30130 = vmatpush1.msra.mxu1 %v29892_v33  ;;  %30193 = vmatprep.mubr.f32.mxu1 %v38327_v6 }
 0x9ce   :  { %30206 = vmatprep.subr.mxu1 %v29970_v37 }
 0x9d4   :  { %30197 = vmatmul.mubr.f32.vlgmr.msra.gmra.mrb[68].mxu1 %v38076_v3 }
 0x9d5   :  { %30210 = vmatpush1.msra.mxu1 %v29976_v26  ;;  %30273 = vmatprep.mubr.f32.mxu1 %v38327_v6 }
 0x9d6   :  { %30282 = vmatprep.subr.mxu1 %v29890_v42 }
 0x9dc   :  { %30275 = vmatmul.mubr.f32.vlgmr.msra.gmra.mrb[68].mxu1 %v38056_v25 }
 0x9dd   :  { %30284 = vmatpush1.msra.mxu1 %v29892_v33  ;;  %30347 = vmatprep.mubr.f32.mxu1 %v38327_v6 }
 0x9e4   :  { %30349 = vmatmul.mubr.f32.vlgmr.msra.gmra.mrb[68].mxu1 %v38056_v25  ;;  %v30832_v25 = vsel %vm3928_vm1, %v30369_v16, 0 }
 0x9e5   :  { %33422 = vmatprep.mubr.f32.mxu1 %v30913_v35  ;;  %v30919_v41 = vand.u32 4294901760, %v30832_v25 }
 0x9e7   :  { %v30920_v3 = vsub.f32 %v30832_v25, %v30919_v41 }
 0x9e9   :  { %v30921_v53 = vand.u32 4294901760, %v30920_v3 }
 0x9eb   :  { %v30922_v63 = vsub.f32 %v30920_v3, %v30921_v53 }
 0x9ed   :  { %v30923_v24 = vand.u32 4294901760, %v30922_v63 }
 0xa78   :  { %v38148_v31 = vpop.f32.mrb[58].mxu0 }
 0xa79   :  { %v38150_v51 = vpop.f32.mrb[59].mxu0 }
 0xa7a   :  { %v30373_v10 = vadd.f32 %v38150_v51, %v38148_v31 }
 0xab7   :  { %v38158_v21 = vpop.f32.mrb[68].mxu1 }
 0xab8   :  { %v30374_v9 = vadd.f32 %v30373_v10, %v38158_v21  ;;  %v38161_v23 = vpop.f32.mrb[69].mxu1 }
 0xaba   :  { %v30375_v12 = vadd.f32 %v30374_v9, %v38161_v23 }
 0xabc   :  { %v30380_v39 = vand.u32 4294901760, %v30375_v12 }
 0xabe   :  { %v30457_v58 = vsub.f32 %v30375_v12, %v30380_v39  ;;  %33391 = vmatpush3.msra.mxu0 %v30380_v39 }
 0xabf   :  { %33393 = vmatmul.mubr.f32.vlgmr.msra.gmra.mrb[60].mxu0 %v30449_v61  ;;  %33395 = vmatprep.subr.mxu0 %v38327_v6 }
 0xac0   :  { %v30458_v1 = vand.u32 4294901760, %v30457_v58  ;;  %33397 = vmatprep.mubr.msk.f32.mxu0 %vm34908_vm10, %v38327_v6 }
 0xac2   :  { %v30459_v13 = vsub.f32 %v30457_v58, %v30458_v1 }
 0xac4   :  { %v30460_v28 = vand.u32 4294901760, %v30459_v13  ;;  %v31444_v13 = vpop.permute.xlu0 %31443 }
 0xac6   :  { %33396 = vmatpush3.msra.mxu0 %v30460_v28 }
 0xac7   :  { %33398 = vmatmul.mubr.f32.vlgmr.msra.gmra.mrb[60].mxu0 %v30445_v45  ;;  %33400 = vmatprep.subr.mxu0 %v38327_v6 }
 0xac8   :  { %33401 = vmatpush3.msra.mxu0 %v30457_v58  ;;  %33402 = vmatprep.mubr.msk.f32.mxu0 %vm34908_vm10, %v38327_v6 }
 0xac9   :  { %33405 = vmatprep.subr.mxu0 %v38327_v6 }
 0xacf   :  { %33403 = vmatmul.mubr.f32.vlgmr.msra.gmra.mrb[60].mxu0 %v30446_v11 }
 0xad0   :  { %33406 = vmatpush3.msra.mxu0 %v30380_v39  ;;  %33407 = vmatprep.mubr.msk.f32.mxu0 %vm34908_vm10, %v38327_v6 }
 0xad1   :  { %33410 = vmatprep.subr.mxu0 %v38327_v6 }
 0xad7   :  { %33408 = vmatmul.mubr.f32.vlgmr.msra.gmra.mrb[60].mxu0 %v30447_v34 }
 0xad8   :  { %33411 = vmatpush3.msra.mxu0 %v30458_v1  ;;  %33412 = vmatprep.mubr.msk.f32.mxu0 %vm34908_vm10, %v38327_v6 }
 0xad9   :  { %33415 = vmatprep.subr.mxu0 %v38327_v6 }
 0xadf   :  { %33413 = vmatmul.mubr.f32.vlgmr.msra.gmra.mrb[60].mxu0 %v30445_v45 }
 0xae0   :  { %33416 = vmatpush3.msra.mxu0 %v30380_v39  ;;  %33417 = vmatprep.mubr.msk.f32.mxu0 %vm34908_vm10, %v38327_v6 }
 0xae1   :  { %33468 = vmatprep.subr.mxu0 %v38327_v6 }
 0xae7   :  { %33418 = vmatmul.mubr.f32.vlgmr.msra.gmra.mrb[60].mxu0 %v30445_v45 }
 0xae8   :  { %33470 = vmatprep.mubr.msk.f32.mxu0 %vm34908_vm10, %v38327_v6 }
 0xbba   :  { %v30821_v20 = vpop.f32.mrb[60].mxu0 }
 0xbbb   :  { %vm30825_vm11 = vcmp.ge.f32.partialorder %v30821_v20, 0.0  ;;  %v30826_v40 = vmul.f32 0.2, %v30821_v20  ;;  %v33419_v59 = vpop.f32.mrb[61].mxu0 }
 0xbbd   :  { %v30827_v4 = vsel %vm30825_vm11, %v30821_v20, %v30826_v40 }
 0xbbe   :  { %v30841_v27 = vsel %vm3941_vm2, %v30827_v4, 0 }
 0xbbf   :  { %v30844_v52 = vand.u32 4294901760, %v30841_v27 }
 0xbc1   :  { %v30951_v42 = vsub.f32 %v30841_v27, %v30844_v52  ;;  %33420 = vmatprep.subr.mxu1 %v30844_v52 }
 0xbc2   :  { %33421 = vmatpush3.msra.mxu1 %v30844_v52 }
 0xbc3   :  { %33423 = vmatmul.mubr.f32.vlgmr.msra.gmra.mrb[70].mxu1 %v30923_v24  ;;  %v30952_v33 = vand.u32 4294901760, %v30951_v42 }
 0xbc4   :  { %33425 = vmatprep.mubr.f32.mxu1 %v30933_v50 }
 0xbc5   :  { %v30953_v37 = vsub.f32 %v30951_v42, %v30952_v33 }
 0xbc7   :  { %33426 = vmatmul.mubr.f32.gmra.mrb[72].mxu1 %v30943_v8  ;;  %v30954_v22 = vand.u32 4294901760, %v30953_v37 }
 0xbc8   :  { %33430 = vmatprep.mubr.f32.mxu1 %v38186_v15 }
 0xbc9   :  { %33428 = vmatprep.subr.mxu1 %v30954_v22 }
 0xbca   :  { %33429 = vmatpush3.msra.mxu1 %v30954_v22 }
 0xbcb   :  { %33431 = vmatmul.mubr.f32.vlgmr.msra.gmra.mrb[70].mxu1 %v30919_v41  ;;  %33436 = vmatprep.subr.mxu1 %v30951_v42 }
 0xbcc   :  { %33437 = vmatpush3.msra.mxu1 %v30951_v42  ;;  %33433 = vmatprep.mubr.f32.mxu1 %v30929_v55 }
 0xbcd   :  { %33444 = vmatprep.subr.mxu1 %v30844_v52 }
 0xbcf   :  { %33434 = vmatmul.mubr.f32.gmra.mrb[72].mxu1 %v30939_v60 }
 0xbd0   :  { %33438 = vmatprep.mubr.f32.mxu1 %v30910_v57 }
 0xbd3   :  { %33439 = vmatmul.mubr.f32.vlgmr.msra.gmra.mrb[70].mxu1 %v30920_v3 }
 0xbd4   :  { %33445 = vmatpush3.msra.mxu1 %v30844_v52  ;;  %33441 = vmatprep.mubr.f32.mxu1 %v30930_v46 }
 0xbd5   :  { %33452 = vmatprep.subr.mxu1 %v30952_v33 }
 0xbd7   :  { %33442 = vmatmul.mubr.f32.gmra.mrb[72].mxu1 %v30940_v62 }
 0xbd8   :  { %33446 = vmatprep.mubr.f32.mxu1 %v30911_v2 }
 0xbdb   :  { %33447 = vmatmul.mubr.f32.vlgmr.msra.gmra.mrb[70].mxu1 %v30921_v53 }
 0xbdc   :  { %33453 = vmatpush3.msra.mxu1 %v30952_v33  ;;  %33449 = vmatprep.mubr.f32.mxu1 %v30931_v56 }
 0xbdd   :  { %33460 = vmatprep.subr.mxu1 %v30844_v52 }
 0xbdf   :  { %33450 = vmatmul.mubr.f32.gmra.mrb[72].mxu1 %v30941_v7 }
 0xbe0   :  { %33454 = vmatprep.mubr.f32.mxu1 %v38186_v15 }
 0xbe3   :  { %33455 = vmatmul.mubr.f32.vlgmr.msra.gmra.mrb[70].mxu1 %v30919_v41 }
 0xbe4   :  { %33461 = vmatpush3.msra.mxu1 %v30844_v52  ;;  %33457 = vmatprep.mubr.f32.mxu1 %v30929_v55  ;;  %v32344_v52 = vpop.permute.xlu1 %32343 }
 0xbe5   :  { %v32345_v24 = vsel %vm156_vm0, %v32344_v52, 0 }
 0xbe6   :  { %v32413_v29 = vand.u32 4294901760, %v32345_v24 }
 0xbe7   :  { %33458 = vmatmul.mubr.f32.gmra.mrb[72].mxu1 %v30939_v60 }
 0xbe8   :  { %33462 = vmatprep.mubr.f32.mxu1 %v38186_v15  ;;  %v31445_v15 = vsel %vm156_vm0, %v31444_v13, 0  ;;  %v32414_v42 = vsub.f32 %v32345_v24, %v32413_v29 }
 0xbe9   :  { %v31513_v2 = vand.u32 4294901760, %v31445_v15 }
 0xbea   :  { %v32415_v33 = vand.u32 4294901760, %v32414_v42 }
 0xbeb   :  { %33463 = vmatmul.mubr.f32.vlgmr.msra.gmra.mrb[70].mxu1 %v30919_v41  ;;  %v31514_v38 = vsub.f32 %v31445_v15, %v31513_v2 }
 0xbec   :  { %33465 = vmatprep.mubr.f32.mxu1 %v30929_v55  ;;  %v32416_v22 = vsub.f32 %v32414_v42, %v32415_v33 }
 0xbed   :  { %v31515_v35 = vand.u32 4294901760, %v31514_v38 }
 0xbef   :  { %33466 = vmatmul.mubr.f32.gmra.mrb[72].mxu1 %v30939_v60  ;;  %v31516_v41 = vsub.f32 %v31514_v38, %v31515_v35 }
 0xbf1   :  { %v31517_v53 = vand.u32 4294901760, %v31516_v41 }
 0xcbe   :  { %v33464_v49 = vpop.f32.mrb[70].mxu1 }
 0xcbf   :  { %v31396_v26 = vpop.f32.mrb[71].mxu1 }
 0xcc0   :  { %v31418_v36 = vmax.f32 %v31396_v26, %v33464_v49 }
 0xcc2   :  { %v33467_v17 = vpop.f32.mrb[72].mxu1 }
 0xcc3   :  { %v31408_v47 = vpop.f32.mrb[73].mxu1 }
 0xcc4   :  { %v31419_v10 = vmax.f32 %v31418_v36, %v31408_v47 }
 0xcc6   :  { %v31420_v19 = vmax.f32 %v31419_v10, %v33467_v17 }
 0xcc8   :  { %v31421_v14 = vsub.f32 %v31396_v26, %v31420_v19  ;;  %v31424_v45 = vsub.f32 %v33464_v49, %v31420_v19  ;;  %v31427_v11 = vsub.f32 %v31408_v47, %v31420_v19  ;;  %v31430_v34 = vsub.f32 %v33467_v17, %v31420_v19  ;;  %v32797_v17 = vpop.permute.xlu0 %32796 }
 0xcc9   :  { %v32417_v26 = vand.u32 4294901760, %v32416_v22  ;;  %v32798_v47 = vsel %vm156_vm0, %v32797_v17, 0 }
 0xcca   :  { %v31422_v30 = vmul.f32 1.442695, %v31421_v14  ;;  %v31425_v9 = vmul.f32 1.442695, %v31424_v45  ;;  %v31428_v12 = vmul.f32 1.442695, %v31427_v11 }
 0xccb   :  { %v31431_v61 = vmul.f32 1.442695, %v31430_v34  ;;  %v32866_v10 = vand.u32 4294901760, %v32798_v47 }
 0xccc   :  { %34829 = vpow2.f32 %v31422_v30 }
 0xccd   :  { %34831 = vpow2.f32 %v31425_v9  ;;  %v32867_v14 = vsub.f32 %v32798_v47, %v32866_v10 }
 0xcce   :  { %34833 = vpow2.f32 %v31428_v12 }
 0xccf   :  { %34835 = vpow2.f32 %v31431_v61  ;;  %v32868_v11 = vand.u32 4294901760, %v32867_v14 }
 0xcd1   :  { %v32869_v30 = vsub.f32 %v32867_v14, %v32868_v11 }
 0xcd3   :  { %v32870_v12 = vand.u32 4294901760, %v32869_v30 }
 0xcd6   :  { %v34830_v39 = vpop.eup %34829 }
 0xcd7   :  { %v34832_v58 = vpop.eup %34831 }
 0xcd8   :  { %v31433_v1 = vadd.f32 %v34832_v58, %v34830_v39  ;;  %v34834_v28 = vpop.eup %34833 }
 0xcd9   :  { %v34836_v5 = vpop.eup %34835 }
 0xcda   :  { %v31434_v43 = vadd.f32 %v34834_v28, %v31433_v1 }
 0xcdc   :  { %v31435_v57 = vadd.f32 %v34836_v5, %v31434_v43 }
 0xcde   :  { %34837 = vrcp.f32 %v31435_v57 }
 0xce8   :  { %v34838_v16 = vpop.eup %34837 }
 0xce9   :  { %v31440_v48 = vmul.f32 %v34838_v16, %v34832_v58  ;;  %v31438_v25 = vmul.f32 %v34838_v16, %v34830_v39  ;;  %v32341_v54 = vmul.f32 %v34838_v16, %v34834_v28  ;;  %v32794_v44 = vmul.f32 %v34838_v16, %v34836_v5 }
 0xceb   :  { %v31441_v55 = vmul.f32 %v31440_v48, %v38150_v51  ;;  %v31439_v32 = vmul.f32 %v31438_v25, %v38148_v31  ;;  %v38220_v3 = vmul.f32 %v32341_v54, %v38158_v21  ;;  %v38223_v60 = vmul.f32 %v32794_v44, %v38161_v23 }
 0xcec   :  { %v31893_v31 = vsel %vm156_vm0, %v38192_v18, 0 }
 0xced   :  { %v31448_v46 = vand.u32 4294901760, %v31441_v55  ;;  %v31961_v21 = vand.u32 4294901760, %v31893_v31  ;;  %v31896_v23 = vand.u32 4294901760, %v31439_v32  ;;  %v32348_v50 = vand.u32 4294901760, %v38220_v3 }
 0xcee   :  { %v32801_v19 = vand.u32 4294901760, %v38223_v60 }
 0xcef   :  { %33469 = vmatpush3.msra.mxu0 %v31448_v46  ;;  %v31525_v62 = vsub.f32 %v31441_v55, %v31448_v46  ;;  %v31962_v40 = vsub.f32 %v31893_v31, %v31961_v21  ;;  %v31973_v59 = vsub.f32 %v31439_v32, %v31896_v23  ;;  %v32425_v8 = vsub.f32 %v38220_v3, %v32348_v50 }
 0xcf0   :  { %33471 = vmatmul.mubr.f32.vlgmr.msra.gmra.mrb[62].mxu0 %v31517_v53  ;;  %33473 = vmatprep.subr.mxu0 %v38327_v6  ;;  %v32878_v45 = vsub.f32 %v38223_v60, %v32801_v19 }
 0xcf1   :  { %v31526_v56 = vand.u32 4294901760, %v31525_v62  ;;  %33475 = vmatprep.mubr.msk.f32.mxu0 %vm34908_vm10, %v38327_v6  ;;  %v31963_v63 = vand.u32 4294901760, %v31962_v40  ;;  %v31974_v7 = vand.u32 4294901760, %v31973_v59  ;;  %v32426_v37 = vand.u32 4294901760, %v32425_v8 }
 0xcf2   :  { %v32879_v34 = vand.u32 4294901760, %v32878_v45 }
 0xcf3   :  { %v31527_v51 = vsub.f32 %v31525_v62, %v31526_v56  ;;  %v31964_v18 = vsub.f32 %v31962_v40, %v31963_v63  ;;  %v31975_v0 = vsub.f32 %v31973_v59, %v31974_v7  ;;  %v32427_v49 = vsub.f32 %v32425_v8, %v32426_v37 }
 0xcf4   :  { %v32880_v9 = vsub.f32 %v32878_v45, %v32879_v34 }
 0xcf5   :  { %v31528_v20 = vand.u32 4294901760, %v31527_v51  ;;  %v31965_v4 = vand.u32 4294901760, %v31964_v18  ;;  %v31976_v27 = vand.u32 4294901760, %v31975_v0  ;;  %v32428_v36 = vand.u32 4294901760, %v32427_v49 }
 0xcf6   :  { %v32881_v61 = vand.u32 4294901760, %v32880_v9 }
 0xcf7   :  { %33474 = vmatpush3.msra.mxu0 %v31528_v20 }
 0xcf8   :  { %33476 = vmatmul.mubr.f32.vlgmr.msra.gmra.mrb[62].mxu0 %v31513_v2  ;;  %33478 = vmatprep.subr.mxu0 %v38327_v6 }
 0xcf9   :  { %33479 = vmatpush3.msra.mxu0 %v31525_v62  ;;  %33480 = vmatprep.mubr.msk.f32.mxu0 %vm34908_vm10, %v38327_v6 }
 0xcfa   :  { %33483 = vmatprep.subr.mxu0 %v38327_v6 }
 0xd00   :  { %33481 = vmatmul.mubr.f32.vlgmr.msra.gmra.mrb[62].mxu0 %v31514_v38 }
 0xd01   :  { %33484 = vmatpush3.msra.mxu0 %v31448_v46  ;;  %33485 = vmatprep.mubr.msk.f32.mxu0 %vm34908_vm10, %v38327_v6 }
 0xd02   :  { %33488 = vmatprep.subr.mxu0 %v38327_v6 }
 0xd08   :  { %33486 = vmatmul.mubr.f32.vlgmr.msra.gmra.mrb[62].mxu0 %v31515_v35 }
 0xd09   :  { %33489 = vmatpush3.msra.mxu0 %v31526_v56  ;;  %33490 = vmatprep.mubr.msk.f32.mxu0 %vm34908_vm10, %v38327_v6 }
 0xd0a   :  { %33493 = vmatprep.subr.mxu0 %v38327_v6 }
 0xd10   :  { %33491 = vmatmul.mubr.f32.vlgmr.msra.gmra.mrb[62].mxu0 %v31513_v2 }
 0xd11   :  { %33494 = vmatpush3.msra.mxu0 %v31448_v46  ;;  %33495 = vmatprep.mubr.msk.f32.mxu0 %vm34908_vm10, %v38327_v6 }
 0xd12   :  { %33498 = vmatprep.subr.mxu0 %v38327_v6 }
 0xd18   :  { %33496 = vmatmul.mubr.f32.vlgmr.msra.gmra.mrb[62].mxu0 %v31513_v2 }
 0xd19   :  { %33499 = vmatpush3.msra.mxu0 %v31896_v23  ;;  %33500 = vmatprep.mubr.msk.f32.mxu0 %vm34908_vm10, %v38327_v6 }
 0xd1a   :  { %33503 = vmatprep.subr.mxu0 %v38327_v6 }
 0xd20   :  { %33501 = vmatmul.mubr.f32.vlgmr.msra.gmra.mrb[62].mxu0 %v31965_v4 }
 0xd21   :  { %33504 = vmatpush3.msra.mxu0 %v31976_v27  ;;  %33505 = vmatprep.mubr.msk.f32.mxu0 %vm34908_vm10, %v38327_v6 }
 0xd22   :  { %33508 = vmatprep.subr.mxu0 %v38327_v6 }
 0xd28   :  { %33506 = vmatmul.mubr.f32.vlgmr.msra.gmra.mrb[62].mxu0 %v31961_v21 }
 0xd29   :  { %33509 = vmatpush3.msra.mxu0 %v31973_v59  ;;  %33510 = vmatprep.mubr.msk.f32.mxu0 %vm34908_vm10, %v38327_v6 }
 0xd2a   :  { %33513 = vmatprep.subr.mxu0 %v38327_v6 }
 0xd30   :  { %33511 = vmatmul.mubr.f32.vlgmr.msra.gmra.mrb[62].mxu0 %v31962_v40 }
 0xd31   :  { %33514 = vmatpush3.msra.mxu0 %v31896_v23  ;;  %33515 = vmatprep.mubr.msk.f32.mxu0 %vm34908_vm10, %v38327_v6 }
 0xd32   :  { %33518 = vmatprep.subr.mxu0 %v38327_v6 }
 0xd38   :  { %33516 = vmatmul.mubr.f32.vlgmr.msra.gmra.mrb[62].mxu0 %v31963_v63 }
 0xd39   :  { %33519 = vmatpush3.msra.mxu0 %v31974_v7  ;;  %33520 = vmatprep.mubr.msk.f32.mxu0 %vm34908_vm10, %v38327_v6 }
 0xd3a   :  { %33523 = vmatprep.subr.mxu0 %v38327_v6 }
 0xd40   :  { %33521 = vmatmul.mubr.f32.vlgmr.msra.gmra.mrb[62].mxu0 %v31961_v21 }
 0xd41   :  { %33524 = vmatpush3.msra.mxu0 %v31896_v23  ;;  %33525 = vmatprep.mubr.msk.f32.mxu0 %vm34908_vm10, %v38327_v6 }
 0xd42   :  { %33528 = vmatprep.subr.mxu0 %v38327_v6 }
 0xd48   :  { %33526 = vmatmul.mubr.f32.vlgmr.msra.gmra.mrb[62].mxu0 %v31961_v21 }
 0xd49   :  { %33529 = vmatpush3.msra.mxu0 %v32348_v50  ;;  %33530 = vmatprep.mubr.msk.f32.mxu0 %vm34908_vm10, %v38327_v6 }
 0xd4a   :  { %33533 = vmatprep.subr.mxu0 %v38327_v6 }
 0xd50   :  { %33531 = vmatmul.mubr.f32.vlgmr.msra.gmra.mrb[62].mxu0 %v32417_v26 }
 0xd51   :  { %33534 = vmatpush3.msra.mxu0 %v32428_v36  ;;  %33535 = vmatprep.mubr.msk.f32.mxu0 %vm34908_vm10, %v38327_v6 }
 0xd52   :  { %33538 = vmatprep.subr.mxu0 %v38327_v6 }
 0xd58   :  { %33536 = vmatmul.mubr.f32.vlgmr.msra.gmra.mrb[62].mxu0 %v32413_v29 }
 0xd59   :  { %33539 = vmatpush3.msra.mxu0 %v32425_v8  ;;  %33540 = vmatprep.mubr.msk.f32.mxu0 %vm34908_vm10, %v38327_v6 }
 0xd5a   :  { %33543 = vmatprep.subr.mxu0 %v38327_v6 }
 0xd60   :  { %33541 = vmatmul.mubr.f32.vlgmr.msra.gmra.mrb[62].mxu0 %v32414_v42 }
 0xd61   :  { %33544 = vmatpush3.msra.mxu0 %v32348_v50  ;;  %33545 = vmatprep.mubr.msk.f32.mxu0 %vm34908_vm10, %v38327_v6 }
 0xd62   :  { %33548 = vmatprep.subr.mxu0 %v38327_v6 }
 0xd68   :  { %33546 = vmatmul.mubr.f32.vlgmr.msra.gmra.mrb[62].mxu0 %v32415_v33 }
 0xd69   :  { %33549 = vmatpush3.msra.mxu0 %v32426_v37  ;;  %33550 = vmatprep.mubr.msk.f32.mxu0 %vm34908_vm10, %v38327_v6 }
 0xd6a   :  { %33553 = vmatprep.subr.mxu0 %v38327_v6 }
 0xd70   :  { %33551 = vmatmul.mubr.f32.vlgmr.msra.gmra.mrb[62].mxu0 %v32413_v29 }
 0xd71   :  { %33554 = vmatpush3.msra.mxu0 %v32348_v50  ;;  %33555 = vmatprep.mubr.msk.f32.mxu0 %vm34908_vm10, %v38327_v6 }
 0xd72   :  { %33558 = vmatprep.subr.mxu0 %v38327_v6 }
 0xd78   :  { %33556 = vmatmul.mubr.f32.vlgmr.msra.gmra.mrb[62].mxu0 %v32413_v29 }
 0xd79   :  { %33559 = vmatpush3.msra.mxu0 %v32801_v19  ;;  %33560 = vmatprep.mubr.msk.f32.mxu0 %vm34908_vm10, %v38327_v6 }
 0xd7a   :  { %33563 = vmatprep.subr.mxu0 %v38327_v6 }
 0xd80   :  { %33561 = vmatmul.mubr.f32.vlgmr.msra.gmra.mrb[62].mxu0 %v32870_v12 }
 0xd81   :  { %33564 = vmatpush3.msra.mxu0 %v32881_v61  ;;  %33565 = vmatprep.mubr.msk.f32.mxu0 %vm34908_vm10, %v38327_v6 }
 0xd82   :  { %33568 = vmatprep.subr.mxu0 %v38327_v6 }
 0xd88   :  { %33566 = vmatmul.mubr.f32.vlgmr.msra.gmra.mrb[62].mxu0 %v32866_v10 }
 0xd89   :  { %33569 = vmatpush3.msra.mxu0 %v32878_v45  ;;  %33570 = vmatprep.mubr.msk.f32.mxu0 %vm34908_vm10, %v38327_v6 }
 0xd8a   :  { %33573 = vmatprep.subr.mxu0 %v38327_v6 }
 0xd90   :  { %33571 = vmatmul.mubr.f32.vlgmr.msra.gmra.mrb[62].mxu0 %v32867_v14 }
 0xd91   :  { %33574 = vmatpush3.msra.mxu0 %v32801_v19  ;;  %33575 = vmatprep.mubr.msk.f32.mxu0 %vm34908_vm10, %v38327_v6 }
 0xd92   :  { %33578 = vmatprep.subr.mxu0 %v38327_v6 }
 0xd98   :  { %33576 = vmatmul.mubr.f32.vlgmr.msra.gmra.mrb[62].mxu0 %v32868_v11 }
 0xd99   :  { %33579 = vmatpush3.msra.mxu0 %v32879_v34  ;;  %33580 = vmatprep.mubr.msk.f32.mxu0 %vm34908_vm10, %v38327_v6 }
 0xd9a   :  { %33583 = vmatprep.subr.mxu0 %v38327_v6 }
 0xda0   :  { %33581 = vmatmul.mubr.f32.vlgmr.msra.gmra.mrb[62].mxu0 %v32866_v10 }
 0xda1   :  { %33584 = vmatpush3.msra.mxu0 %v32801_v19  ;;  %33585 = vmatprep.mubr.msk.f32.mxu0 %vm34908_vm10, %v38327_v6 }
 0xda8   :  { %33586 = vmatmul.mubr.f32.vlgmr.msra.gmra.mrb[62].mxu0 %v32866_v10 }
 0xe7b   :  { %v33242_v39 = vpop.f32.mrb[62].mxu0 }
 0xe7c   :  { %33247 = vst [vmem:[%s38315_s10] sm:$0xff] %v33242_v39  ;;  %v33587_v58 = vpop.f32.mrb[63].mxu0 }

</bundles_post_ra>
